<compile_context>
chip_gen: v6e
topology: v6e:2x2x1
jax: 0.10.0
libtpu: 0.0.40
codegen_flags: <defaults>
</compile_context>

<pallas_src>
import math

import jax
import jax.numpy as jnp
import numpy as np
from jax.experimental import pallas as pl
from jax.experimental.pallas import tpu as pltpu


# ----------------------------- constant helpers ----------------------------

def _colmask_np(H, W):
    """(5, H*W) 0/1 masks, row dx+2: 1 where 0 <= w+dx < W (column validity per dx shift)."""
    ww = np.tile(np.arange(W), H)
    m = np.zeros((5, H * W), np.float32)
    for dx in range(-2, 3):
        m[dx + 2] = ((ww + dx >= 0) & (ww + dx < W)).astype(np.float32)
    return m


def _up2_mat_np(Hc, Wc):
    """(Hc*Wc, 4*Hc*Wc) 0/1 matrix E with coarse_flat @ E == nearest-2x-upsample(coarse)_flat."""
    H, W = 2 * Hc, 2 * Wc
    E = np.zeros((Hc * Wc, H * W), np.float32)
    for h in range(H):
        for w in range(W):
            E[(h // 2) * Wc + (w // 2), h * W + w] = 1.0
    return E


def _pool_gather_np(Hf, Wf):
    """(Hf*Wf, Hc*Wc) 0/1 gather: picks the top-left corner of every 2x2 window."""
    Hc, Wc = Hf // 2, Wf // 2
    G = np.zeros((Hf * Wf, Hc * Wc), np.float32)
    for hc in range(Hc):
        for wc in range(Wc):
            G[(2 * hc) * Wf + 2 * wc, hc * Wc + wc] = 1.0
    return G


def _flatten_nchw(x):
    n, c, h, w = x.shape
    return x.reshape(n, c, h * w), h, w


# ----------------------------- mega-kernel body -----------------------------

def _make_neck_kernel(H3, W3, H4, W4, H5, W5):
    HW3, HW4, HW5 = H3 * W3, H4 * W4, H5 * W5
    PAD3, PAD4, PAD5 = 2 * (W3 + 1), 2 * (W4 + 1), 2 * (W5 + 1)

    def relu6(x):
        return jnp.minimum(jnp.maximum(x, 0.0), 6.0)

    def pw_matmul(x_parts, wv):
        """1x1 conv: sum_j W[:, cols_j] @ x_j (bf16 inputs, f32 accumulate on the MXU)."""
        off, y = 0, None
        for xp in x_parts:
            r = xp.shape[0]
            t = jnp.dot(wv[:, off:off + r], xp.astype(jnp.bfloat16),
                        preferred_element_type=jnp.float32)
            y = t if y is None else y + t
            off += r
        return y

    def dwconv(x, wcol, s, b, k, geom):
        """Depthwise kxk ('same' zero pad) + folded BN + ReLU6.  Row overflow -> zero pad of
        the scratch; column overflow -> one mask multiply per dx group (no per-tap mask)."""
        H, W, HW, PAD, scratch, cm = geom
        C = x.shape[0]
        p = k // 2
        scratch[0:C, PAD:PAD + HW] = x
        acc = None
        for dx in range(-p, p + 1):
            g = None
            for dy in range(-p, p + 1):
                t = (dy + p) * k + (dx + p)
                off = dy * W + dx
                tap = scratch[0:C, PAD + off:PAD + off + HW]
                term = tap * wcol[:, t:t + 1]
                g = term if g is None else g + term
            if dx != 0:
                g = g * cm[dx + 2:dx + 3, :]
            acc = g if acc is None else acc + g
        return relu6(acc * s + b)

    def ghost(x_parts, w_ref, p_ref, geom):
        """GhostConv: 1x1 primary + depthwise 3x3 cheap branch; returns the two halves."""
        wv, pv = w_ref[...], p_ref[...]
        px = relu6(pw_matmul(x_parts, wv) * pv[:, 0:1] + pv[:, 1:2])
        cx = dwconv(px, pv[:, 4:13], pv[:, 2:3], pv[:, 3:4], 3, geom)
        return px, cx

    def maxpool4(x, geom):
        """Elementwise max of the 4 taps of every 2x2 window (read at the top-left corner)."""
        _H, W, HW, PAD, scratch, _cm = geom
        C = x.shape[0]
        scratch[0:C, PAD:PAD + HW] = x
        b = scratch[0:C, PAD + 1:PAD + 1 + HW]
        c = scratch[0:C, PAD + W:PAD + W + HW]
        d = scratch[0:C, PAD + W + 1:PAD + W + 1 + HW]
        return jnp.maximum(jnp.maximum(x, b), jnp.maximum(c, d))

    def csp(x, w12_ref, p12_ref, wm_ref, pm_ref, wc3_ref, pc3_ref, geom, o_ref):
        """CSPBlock: cv1+cv2 batched into one GhostConv; cv3 consumes cat(m(cv1), cv2) by
        splitting its 1x1 weight columns (no activation concat)."""
        px, cx = ghost([x], w12_ref, p12_ref, geom)
        ic = px.shape[0] // 2
        a_p, a_c = px[0:ic], cx[0:ic]          # cv1 output halves
        b_p, b_c = px[ic:], cx[ic:]            # cv2 output halves
        m_p, m_c = ghost([a_p, a_c], wm_ref, pm_ref, geom)
        o_p, o_c = ghost([m_p, m_c, b_p, b_c], wc3_ref, pc3_ref, geom)
        oc = o_p.shape[0]
        o_ref[0, 0:oc, :] = o_p
        o_ref[0, oc:2 * oc, :] = o_c

    def kernel(x3_ref, x4_ref, x5_ref,
               cm3_ref, cm4_ref, cm5_ref,
               e54_ref, e43_ref, g34_ref, g45_ref,
               rw3_ref, rp3_ref, rw4_ref, rp4_ref, rw5_ref, rp5_ref,
               lat3_ref, lat4_ref,
               aw12_ref, ap12_ref, awm_ref, apm_ref, aw3_ref, ap3_ref,
               bw12_ref, bp12_ref, bwm_ref, bpm_ref, bw3_ref, bp3_ref,
               cw12_ref, cp12_ref, cwm_ref, cpm_ref, cw3_ref, cp3_ref,
               o3_ref, o4_ref, o5_ref,
               s3, s4, s5):
        # Zero the scratch pads every grid step (interior stores never touch them).  Not gated
        # on program_id because the "parallel" batch axis may be split across TensorCores.
        for scr, padw, hw in ((s3, PAD3, HW3), (s4, PAD4, HW4), (s5, PAD5, HW5)):
            z = jnp.zeros((scr.shape[0], padw), jnp.float32)
            scr[:, 0:padw] = z
            scr[:, padw + hw:padw + hw + padw] = z

        g3 = (H3, W3, HW3, PAD3, s3, cm3_ref[...])
        g4 = (H4, W4, HW4, PAD4, s4, cm4_ref[...])
        g5 = (H5, W5, HW5, PAD5, s5, cm5_ref[...])
        hi = jax.lax.Precision.HIGHEST   # exact 0/1 expansion / gather matmuls

        # ---------------- top-down: reduce + nearest-2x upsample residual ----------------
        p5p, p5c = ghost([x5_ref[0]], rw5_ref, rp5_ref, g5)
        p5 = jnp.concatenate([p5p, p5c], axis=0)                               # (C, HW5)

        p4p, p4c = ghost([x4_ref[0]], rw4_ref, rp4_ref, g4)
        p4 = (jnp.concatenate([p4p, p4c], axis=0)
              + jnp.dot(p5, e54_ref[...], preferred_element_type=jnp.float32, precision=hi))

        p3p, p3c = ghost([x3_ref[0]], rw3_ref, rp3_ref, g3)
        p3 = (jnp.concatenate([p3p, p3c], axis=0)
              + jnp.dot(p4, e43_ref[...], preferred_element_type=jnp.float32, precision=hi))

        # ---------------- lateral DWConv5x5 ----------------
        l3, l4 = lat3_ref[...], lat4_ref[...]
        p3 = dwconv(p3, l3[:, 2:27], l3[:, 0:1], l3[:, 1:2], 5, g3)
        p4 = dwconv(p4, l4[:, 2:27], l4[:, 0:1], l4[:, 1:2], 5, g4)

        # ---------------- bottom-up: fused max_pool2d + add ----------------
        # TODO(synk): the literal PyTorch forward writes p4 += maxpool(p5) / p3 += maxpool(p4),
        # which is shape-inconsistent for a strided pyramid; as before we implement the evidently
        # intended bottom-up PAN aggregation (p4 += pool(p3), p5 += pool(p4)), matching the
        # in-file reference.
        p4 = p4 + jnp.dot(maxpool4(p3, g3), g34_ref[...],
                          preferred_element_type=jnp.float32, precision=hi)
        p5 = p5 + jnp.dot(maxpool4(p4, g4), g45_ref[...],
                          preferred_element_type=jnp.float32, precision=hi)

        # ---------------- output CSP blocks ----------------
        csp(p3, aw12_ref, ap12_ref, awm_ref, apm_ref, aw3_ref, ap3_ref, g3, o3_ref)
        csp(p4, bw12_ref, bp12_ref, bwm_ref, bpm_ref, bw3_ref, bp3_ref, g4, o4_ref)
        csp(p5, cw12_ref, cp12_ref, cwm_ref, cpm_ref, cw3_ref, cp3_ref, g5, o5_ref)

    return kernel


# ----------------------------- parameter packing ----------------------------

def _pack_ghost(p):
    w = p["pw_w"].astype(jnp.bfloat16)                            # pre-cast weights (MXU lhs)
    pk = jnp.concatenate([p["pw_s"][:, None], p["pw_b"][:, None],
                          p["dw_s"][:, None], p["dw_b"][:, None], p["dw_w"]], axis=1)
    return w, pk


def _pack_ghost_pair(p1, p2):
    w1, k1 = _pack_ghost(p1)
    w2, k2 = _pack_ghost(p2)
    return jnp.concatenate([w1, w2], axis=0), jnp.concatenate([k1, k2], axis=0)


def _pack_dw5(p):
    return jnp.concatenate([p["s"][:, None], p["b"][:, None], p["w"]], axis=1)


# --------------------------------- wrapper ----------------------------------

def csppan_forward(c3, c4, c5, params):
    """NCHW in / NCHW out (like the PyTorch module); internally channel-major (N, C, H*W).
    The whole neck runs as a single Pallas kernel; grid=(N,) shards the batch across cores."""
    (x3, H3, W3), (x4, H4, W4), (x5, H5, W5) = (_flatten_nchw(t) for t in (c3, c4, c5))
    N = x3.shape[0]
    C = 2 * params["reduce"][0]["pw_w"].shape[0]          # out_ch
    HW3, HW4, HW5 = H3 * W3, H4 * W4, H5 * W5
    assert (H3, W3) == (2 * H4, 2 * W4) and (H4, W4) == (2 * H5, 2 * W5)

    rws, rps = zip(*[_pack_ghost(p) for p in params["reduce"]])
    lat = [_pack_dw5(p) for p in params["lat"]]
    cspp = []
    for p in params["out"]:
        w12, p12 = _pack_ghost_pair(p["cv1"], p["cv2"])
        wm, pm = _pack_ghost(p["m0"])
        wc3, pc3 = _pack_ghost(p["cv3"])
        cspp += [w12, p12, wm, pm, wc3, pc3]

    consts = [jnp.asarray(_colmask_np(H3, W3)), jnp.asarray(_colmask_np(H4, W4)),
              jnp.asarray(_colmask_np(H5, W5)),
              jnp.asarray(_up2_mat_np(H5, W5)), jnp.asarray(_up2_mat_np(H4, W4)),
              jnp.asarray(_pool_gather_np(H3, W3)), jnp.asarray(_pool_gather_np(H4, W4))]

    inputs = ([x3, x4, x5] + consts
              + [rws[0], rps[0], rws[1], rps[1], rws[2], rps[2]]
              + lat + cspp)

    in_specs = [pl.BlockSpec((1, x3.shape[1], HW3), lambda n: (n, 0, 0)),
                pl.BlockSpec((1, x4.shape[1], HW4), lambda n: (n, 0, 0)),
                pl.BlockSpec((1, x5.shape[1], HW5), lambda n: (n, 0, 0))]
    in_specs += [pl.BlockSpec(a.shape, lambda n: (0, 0)) for a in inputs[3:]]

    out_shape = (jax.ShapeDtypeStruct((N, C, HW3), jnp.float32),
                 jax.ShapeDtypeStruct((N, C, HW4), jnp.float32),
                 jax.ShapeDtypeStruct((N, C, HW5), jnp.float32))
    out_specs = (pl.BlockSpec((1, C, HW3), lambda n: (n, 0, 0)),
                 pl.BlockSpec((1, C, HW4), lambda n: (n, 0, 0)),
                 pl.BlockSpec((1, C, HW5), lambda n: (n, 0, 0)))

    PAD3, PAD4, PAD5 = 2 * (W3 + 1), 2 * (W4 + 1), 2 * (W5 + 1)
    scratch_shapes = [pltpu.VMEM((C, HW3 + 2 * PAD3), jnp.float32),
                      pltpu.VMEM((C, HW4 + 2 * PAD4), jnp.float32),
                      pltpu.VMEM((C, HW5 + 2 * PAD5), jnp.float32)]

    o3, o4, o5 = pl.pallas_call(
        _make_neck_kernel(H3, W3, H4, W4, H5, W5),
        grid=(N,),
        out_shape=out_shape,
        in_specs=in_specs,
        out_specs=out_specs,
        scratch_shapes=scratch_shapes,
        compiler_params=pltpu.CompilerParams(dimension_semantics=("parallel",)),
    )(*inputs)
    return (o3.reshape(N, C, H3, W3),
            o4.reshape(N, C, H4, W4),
            o5.reshape(N, C, H5, W5))


# --------------------------- deterministic params ---------------------------

class KeyGen:
    def __init__(self, seed=0):
        self._key = jax.random.PRNGKey(seed)

    def __call__(self):
        self._key, sub = jax.random.split(self._key)
        return sub


def _fold_bn(kg, c):
    gamma = jax.random.uniform(kg(), (c,), jnp.float32, 0.5, 1.5)
    beta = 0.1 * jax.random.normal(kg(), (c,), jnp.float32)
    mean = 0.1 * jax.random.normal(kg(), (c,), jnp.float32)
    var = jax.random.uniform(kg(), (c,), jnp.float32, 0.5, 1.5)
    scale = gamma / jnp.sqrt(var + 1e-5)
    return scale, beta - mean * scale


def make_ghost_params(kg, c_in, c_out):
    init_ch = min(c_out, math.ceil(c_out / 2))
    cheap_ch = c_out - init_ch
    assert cheap_ch == init_ch  # even c_out -> cheap branch is exactly a depthwise 3x3
    pw_w = jax.random.normal(kg(), (init_ch, c_in), jnp.float32) / math.sqrt(c_in)
    pw_s, pw_b = _fold_bn(kg, init_ch)
    dw_w = 0.2 * jax.random.normal(kg(), (init_ch, 9), jnp.float32)   # taps row-major (dy, dx)
    dw_s, dw_b = _fold_bn(kg, cheap_ch)
    return dict(pw_w=pw_w, pw_s=pw_s, pw_b=pw_b, dw_w=dw_w, dw_s=dw_s, dw_b=dw_b)


def make_dw5_params(kg, c):
    w = 0.1 * jax.random.normal(kg(), (c, 25), jnp.float32)
    s, b = _fold_bn(kg, c)
    return dict(w=w, s=s, b=b)


def make_csp_params(kg, c):
    return dict(cv1=make_ghost_params(kg, c, c // 2),
                cv2=make_ghost_params(kg, c, c // 2),
                m0=make_ghost_params(kg, c // 2, c // 2),
                cv3=make_ghost_params(kg, c, c))


def make_csppan_params(kg, in_chs, out_ch):
    return dict(
        reduce=[make_ghost_params(kg, c, out_ch) for c in in_chs],
        lat=[make_dw5_params(kg, out_ch) for _ in in_chs[:-1]],
        out=[make_csp_params(kg, out_ch) for _ in in_chs],
    )


# ------------------------- pure-JAX reference check -------------------------

def _ref_pw(x, w, s, b):
    y = jnp.einsum("oc,nchw->nohw", w.astype(jnp.bfloat16), x.astype(jnp.bfloat16),
                   preferred_element_type=jnp.float32)
    y = y * s.reshape(1, -1, 1, 1) + b.reshape(1, -1, 1, 1)
    return jnp.minimum(jnp.maximum(y, 0.0), 6.0)


def _ref_dw(x, w, s, b, k):
    N, C, H, W = x.shape
    p = k // 2
    xp = jnp.pad(x, ((0, 0), (0, 0), (p, p), (p, p)))
    acc = jnp.zeros_like(x)
    t = 0
    for dy in range(k):
        for dx in range(k):
            acc = acc + xp[:, :, dy:dy + H, dx:dx + W] * w[:, t].reshape(1, C, 1, 1)
            t += 1
    y = acc * s.reshape(1, C, 1, 1) + b.reshape(1, C, 1, 1)
    return jnp.minimum(jnp.maximum(y, 0.0), 6.0)


def _ref_ghost(x, p):
    px = _ref_pw(x, p["pw_w"], p["pw_s"], p["pw_b"])
    cx = _ref_dw(px, p["dw_w"], p["dw_s"], p["dw_b"], 3)
    return jnp.concatenate([px, cx], axis=1)


def _ref_up2(x):
    return jnp.repeat(jnp.repeat(x, 2, axis=2), 2, axis=3)


def _ref_maxpool2(x):
    return jnp.maximum(jnp.maximum(x[:, :, 0::2, 0::2], x[:, :, 0::2, 1::2]),
                       jnp.maximum(x[:, :, 1::2, 0::2], x[:, :, 1::2, 1::2]))


def _ref_csp(x, p):
    a = _ref_ghost(_ref_ghost(x, p["cv1"]), p["m0"])
    b = _ref_ghost(x, p["cv2"])
    return _ref_ghost(jnp.concatenate([a, b], axis=1), p["cv3"])


def csppan_reference(c3, c4, c5, params):
    p5 = _ref_ghost(c5, params["reduce"][2])
    p4 = _ref_ghost(c4, params["reduce"][1]) + _ref_up2(p5)
    p3 = _ref_ghost(c3, params["reduce"][0]) + _ref_up2(p4)
    l0, l1 = params["lat"][0], params["lat"][1]
    p4 = _ref_dw(p4, l1["w"], l1["s"], l1["b"], 5)
    p3 = _ref_dw(p3, l0["w"], l0["s"], l0["b"], 5)
    p4 = p4 + _ref_maxpool2(p3)
    p5 = p5 + _ref_maxpool2(p4)
    return (_ref_csp(p3, params["out"][0]),
            _ref_csp(p4, params["out"][1]),
            _ref_csp(p5, params["out"][2]))


# ---------------------------------- main ------------------------------------

if __name__ == "__main__":
    in_chs = (8, 16, 24)
    out_ch = 16
    batch = 2

    kg = KeyGen(0)
    params = make_csppan_params(kg, in_chs, out_ch)

    k3, k4, k5 = jax.random.split(jax.random.PRNGKey(0), 3)
    # NCHW inputs, standard pyramid spatial strides (c3 finest ... c5 coarsest).
    c3 = jax.random.normal(k3, (batch, in_chs[0], 16, 16), jnp.float32)
    c4 = jax.random.normal(k4, (batch, in_chs[1], 8, 8), jnp.float32)
    c5 = jax.random.normal(k5, (batch, in_chs[2], 4, 4), jnp.float32)

    fwd = jax.jit(csppan_forward)
    outs = jax.block_until_ready(fwd(c3, c4, c5, params))
    refs = jax.block_until_ready(csppan_reference(c3, c4, c5, params))

    assert outs[0].shape == (batch, out_ch, 16, 16)
    assert outs[1].shape == (batch, out_ch, 8, 8)
    assert outs[2].shape == (batch, out_ch, 4, 4)
    for o, r in zip(outs, refs):
        np.testing.assert_allclose(np.asarray(o), np.asarray(r), rtol=1e-3, atol=1e-3)

    print("KERNEL_OK")
</pallas_src>

<mosaic_0001>
module attributes {stable_mosaic.version = 11 : i64} {
  func.func @kernel(%arg0: i32, %arg1: memref<1x8x256xf32, #tpu.memory_space<vmem>>, %arg2: memref<1x16x64xf32, #tpu.memory_space<vmem>>, %arg3: memref<1x24x16xf32, #tpu.memory_space<vmem>>, %arg4: memref<5x256xf32, #tpu.memory_space<vmem>>, %arg5: memref<5x64xf32, #tpu.memory_space<vmem>>, %arg6: memref<5x16xf32, #tpu.memory_space<vmem>>, %arg7: memref<16x64xf32, #tpu.memory_space<vmem>>, %arg8: memref<64x256xf32, #tpu.memory_space<vmem>>, %arg9: memref<256x64xf32, #tpu.memory_space<vmem>>, %arg10: memref<64x16xf32, #tpu.memory_space<vmem>>, %arg11: memref<8x8xbf16, #tpu.memory_space<vmem>>, %arg12: memref<8x13xf32, #tpu.memory_space<vmem>>, %arg13: memref<8x16xbf16, #tpu.memory_space<vmem>>, %arg14: memref<8x13xf32, #tpu.memory_space<vmem>>, %arg15: memref<8x24xbf16, #tpu.memory_space<vmem>>, %arg16: memref<8x13xf32, #tpu.memory_space<vmem>>, %arg17: memref<16x27xf32, #tpu.memory_space<vmem>>, %arg18: memref<16x27xf32, #tpu.memory_space<vmem>>, %arg19: memref<8x16xbf16, #tpu.memory_space<vmem>>, %arg20: memref<8x13xf32, #tpu.memory_space<vmem>>, %arg21: memref<4x8xbf16, #tpu.memory_space<vmem>>, %arg22: memref<4x13xf32, #tpu.memory_space<vmem>>, %arg23: memref<8x16xbf16, #tpu.memory_space<vmem>>, %arg24: memref<8x13xf32, #tpu.memory_space<vmem>>, %arg25: memref<8x16xbf16, #tpu.memory_space<vmem>>, %arg26: memref<8x13xf32, #tpu.memory_space<vmem>>, %arg27: memref<4x8xbf16, #tpu.memory_space<vmem>>, %arg28: memref<4x13xf32, #tpu.memory_space<vmem>>, %arg29: memref<8x16xbf16, #tpu.memory_space<vmem>>, %arg30: memref<8x13xf32, #tpu.memory_space<vmem>>, %arg31: memref<8x16xbf16, #tpu.memory_space<vmem>>, %arg32: memref<8x13xf32, #tpu.memory_space<vmem>>, %arg33: memref<4x8xbf16, #tpu.memory_space<vmem>>, %arg34: memref<4x13xf32, #tpu.memory_space<vmem>>, %arg35: memref<8x16xbf16, #tpu.memory_space<vmem>>, %arg36: memref<8x13xf32, #tpu.memory_space<vmem>>, %arg37: memref<1x16x256xf32, #tpu.memory_space<vmem>>, %arg38: memref<1x16x64xf32, #tpu.memory_space<vmem>>, %arg39: memref<1x16x16xf32, #tpu.memory_space<vmem>>, %arg40: memref<16x324xf32, #tpu.memory_space<vmem>>, %arg41: memref<16x100xf32, #tpu.memory_space<vmem>>, %arg42: memref<16x36xf32, #tpu.memory_space<vmem>>) attributes {dimension_semantics = [#tpu.dimension_semantics<parallel>], iteration_bounds = array<i64: 2>, scalar_prefetch = 0 : i64, scratch_operands = 3 : i64, tpu.core_type = #tpu.core_type<tc>, window_params = [{transform_indices = @transform_0, window_bounds = array<i64: 1, 8, 256>}, {transform_indices = @transform_1, window_bounds = array<i64: 1, 16, 64>}, {transform_indices = @transform_2, window_bounds = array<i64: 1, 24, 16>}, {pipeline_mode = #tpu.pipeline_mode<synchronous>, transform_indices = @transform_3, window_bounds = array<i64: 5, 256>}, {pipeline_mode = #tpu.pipeline_mode<synchronous>, transform_indices = @transform_4, window_bounds = array<i64: 5, 64>}, {pipeline_mode = #tpu.pipeline_mode<synchronous>, transform_indices = @transform_5, window_bounds = array<i64: 5, 16>}, {pipeline_mode = #tpu.pipeline_mode<synchronous>, transform_indices = @transform_6, window_bounds = array<i64: 16, 64>}, {pipeline_mode = #tpu.pipeline_mode<synchronous>, transform_indices = @transform_7, window_bounds = array<i64: 64, 256>}, {pipeline_mode = #tpu.pipeline_mode<synchronous>, transform_indices = @transform_8, window_bounds = array<i64: 256, 64>}, {pipeline_mode = #tpu.pipeline_mode<synchronous>, transform_indices = @transform_9, window_bounds = array<i64: 64, 16>}, {pipeline_mode = #tpu.pipeline_mode<synchronous>, transform_indices = @transform_10, window_bounds = array<i64: 8, 8>}, {pipeline_mode = #tpu.pipeline_mode<synchronous>, transform_indices = @transform_11, window_bounds = array<i64: 8, 13>}, {pipeline_mode = #tpu.pipeline_mode<synchronous>, transform_indices = @transform_12, window_bounds = array<i64: 8, 16>}, {pipeline_mode = #tpu.pipeline_mode<synchronous>, transform_indices = @transform_13, window_bounds = array<i64: 8, 13>}, {pipeline_mode = #tpu.pipeline_mode<synchronous>, transform_indices = @transform_14, window_bounds = array<i64: 8, 24>}, {pipeline_mode = #tpu.pipeline_mode<synchronous>, transform_indices = @transform_15, window_bounds = array<i64: 8, 13>}, {pipeline_mode = #tpu.pipeline_mode<synchronous>, transform_indices = @transform_16, window_bounds = array<i64: 16, 27>}, {pipeline_mode = #tpu.pipeline_mode<synchronous>, transform_indices = @transform_17, window_bounds = array<i64: 16, 27>}, {pipeline_mode = #tpu.pipeline_mode<synchronous>, transform_indices = @transform_18, window_bounds = array<i64: 8, 16>}, {pipeline_mode = #tpu.pipeline_mode<synchronous>, transform_indices = @transform_19, window_bounds = array<i64: 8, 13>}, {pipeline_mode = #tpu.pipeline_mode<synchronous>, transform_indices = @transform_20, window_bounds = array<i64: 4, 8>}, {pipeline_mode = #tpu.pipeline_mode<synchronous>, transform_indices = @transform_21, window_bounds = array<i64: 4, 13>}, {pipeline_mode = #tpu.pipeline_mode<synchronous>, transform_indices = @transform_22, window_bounds = array<i64: 8, 16>}, {pipeline_mode = #tpu.pipeline_mode<synchronous>, transform_indices = @transform_23, window_bounds = array<i64: 8, 13>}, {pipeline_mode = #tpu.pipeline_mode<synchronous>, transform_indices = @transform_24, window_bounds = array<i64: 8, 16>}, {pipeline_mode = #tpu.pipeline_mode<synchronous>, transform_indices = @transform_25, window_bounds = array<i64: 8, 13>}, {pipeline_mode = #tpu.pipeline_mode<synchronous>, transform_indices = @transform_26, window_bounds = array<i64: 4, 8>}, {pipeline_mode = #tpu.pipeline_mode<synchronous>, transform_indices = @transform_27, window_bounds = array<i64: 4, 13>}, {pipeline_mode = #tpu.pipeline_mode<synchronous>, transform_indices = @transform_28, window_bounds = array<i64: 8, 16>}, {pipeline_mode = #tpu.pipeline_mode<synchronous>, transform_indices = @transform_29, window_bounds = array<i64: 8, 13>}, {pipeline_mode = #tpu.pipeline_mode<synchronous>, transform_indices = @transform_30, window_bounds = array<i64: 8, 16>}, {pipeline_mode = #tpu.pipeline_mode<synchronous>, transform_indices = @transform_31, window_bounds = array<i64: 8, 13>}, {pipeline_mode = #tpu.pipeline_mode<synchronous>, transform_indices = @transform_32, window_bounds = array<i64: 4, 8>}, {pipeline_mode = #tpu.pipeline_mode<synchronous>, transform_indices = @transform_33, window_bounds = array<i64: 4, 13>}, {pipeline_mode = #tpu.pipeline_mode<synchronous>, transform_indices = @transform_34, window_bounds = array<i64: 8, 16>}, {pipeline_mode = #tpu.pipeline_mode<synchronous>, transform_indices = @transform_35, window_bounds = array<i64: 8, 13>}, {transform_indices = @transform_36, window_bounds = array<i64: 1, 16, 256>}, {transform_indices = @transform_37, window_bounds = array<i64: 1, 16, 64>}, {transform_indices = @transform_38, window_bounds = array<i64: 1, 16, 16>}]} {
    %cst = arith.constant 0.000000e+00 : f32
    %0 = vector.broadcast %cst : f32 to vector<16x34xf32>
    %c0 = arith.constant 0 : index
    %c0_0 = arith.constant 0 : index
    %1 = vector.load %arg40[%c0, %c0_0] : memref<16x324xf32, #tpu.memory_space<vmem>>, vector<16x34xf32>
    tpu.vector_store %arg40[%c0, %c0_0], %0 {strides = array<i32>} : memref<16x324xf32, #tpu.memory_space<vmem>>, vector<16x34xf32>,
    %c0_1 = arith.constant 0 : index
    %c290 = arith.constant 290 : index
    %2 = vector.load %arg40[%c0_1, %c290] : memref<16x324xf32, #tpu.memory_space<vmem>>, vector<16x34xf32>
    tpu.vector_store %arg40[%c0_1, %c290], %0 {strides = array<i32>} : memref<16x324xf32, #tpu.memory_space<vmem>>, vector<16x34xf32>,
    %cst_2 = arith.constant 0.000000e+00 : f32
    %3 = vector.broadcast %cst_2 : f32 to vector<16x18xf32>
    %c0_3 = arith.constant 0 : index
    %c0_4 = arith.constant 0 : index
    %4 = vector.load %arg41[%c0_3, %c0_4] : memref<16x100xf32, #tpu.memory_space<vmem>>, vector<16x18xf32>
    tpu.vector_store %arg41[%c0_3, %c0_4], %3 {strides = array<i32>} : memref<16x100xf32, #tpu.memory_space<vmem>>, vector<16x18xf32>,
    %c0_5 = arith.constant 0 : index
    %c82 = arith.constant 82 : index
    %5 = vector.load %arg41[%c0_5, %c82] : memref<16x100xf32, #tpu.memory_space<vmem>>, vector<16x18xf32>
    tpu.vector_store %arg41[%c0_5, %c82], %3 {strides = array<i32>} : memref<16x100xf32, #tpu.memory_space<vmem>>, vector<16x18xf32>,
    %cst_6 = arith.constant 0.000000e+00 : f32
    %6 = vector.broadcast %cst_6 : f32 to vector<16x10xf32>
    %c0_7 = arith.constant 0 : index
    %c0_8 = arith.constant 0 : index
    %7 = vector.load %arg42[%c0_7, %c0_8] : memref<16x36xf32, #tpu.memory_space<vmem>>, vector<16x10xf32>
    tpu.vector_store %arg42[%c0_7, %c0_8], %6 {strides = array<i32>} : memref<16x36xf32, #tpu.memory_space<vmem>>, vector<16x10xf32>,
    %c0_9 = arith.constant 0 : index
    %c26 = arith.constant 26 : index
    %8 = vector.load %arg42[%c0_9, %c26] : memref<16x36xf32, #tpu.memory_space<vmem>>, vector<16x10xf32>
    tpu.vector_store %arg42[%c0_9, %c26], %6 {strides = array<i32>} : memref<16x36xf32, #tpu.memory_space<vmem>>, vector<16x10xf32>,
    %c0_10 = arith.constant 0 : index
    %c0_11 = arith.constant 0 : index
    %9 = vector.load %arg4[%c0_10, %c0_11] : memref<5x256xf32, #tpu.memory_space<vmem>>, vector<5x256xf32>
    %c0_12 = arith.constant 0 : index
    %c0_13 = arith.constant 0 : index
    %10 = vector.load %arg5[%c0_12, %c0_13] : memref<5x64xf32, #tpu.memory_space<vmem>>, vector<5x64xf32>
    %c0_14 = arith.constant 0 : index
    %c0_15 = arith.constant 0 : index
    %11 = vector.load %arg6[%c0_14, %c0_15] : memref<5x16xf32, #tpu.memory_space<vmem>>, vector<5x16xf32>
    %c0_16 = arith.constant 0 : index
    %c0_17 = arith.constant 0 : index
    %c0_18 = arith.constant 0 : index
    %12 = vector.load %arg3[%c0_16, %c0_17, %c0_18] : memref<1x24x16xf32, #tpu.memory_space<vmem>>, vector<1x24x16xf32>
    %13 = vector.shape_cast %12 : vector<1x24x16xf32> to vector<24x16xf32>
    %c0_19 = arith.constant 0 : index
    %c0_20 = arith.constant 0 : index
    %14 = vector.load %arg15[%c0_19, %c0_20] : memref<8x24xbf16, #tpu.memory_space<vmem>>, vector<8x24xbf16>
    %c0_21 = arith.constant 0 : index
    %c0_22 = arith.constant 0 : index
    %15 = vector.load %arg16[%c0_21, %c0_22] : memref<8x13xf32, #tpu.memory_space<vmem>>, vector<8x13xf32>
    %16 = arith.truncf %13 : vector<24x16xf32> to vector<24x16xbf16>
    %cst_23 = arith.constant dense<0.000000e+00> : vector<8x16xf32>
    %17 = tpu.matmul %14, %16, %cst_23 {dimension_numbers = #tpu.dot_dimension_numbers<[1], [0], [0], [1], [0, 0, 1, 1], [], []>} : vector<8x24xbf16>, vector<24x16xbf16>, vector<8x16xf32> -> vector<8x16xf32>
    %18 = vector.extract_strided_slice %15 {offsets = [0, 0], sizes = [8, 1], strides = [1, 1]} : vector<8x13xf32> to vector<8x1xf32>
    %19 = vector.broadcast %18 : vector<8x1xf32> to vector<8x16xf32>
    %20 = arith.mulf %17, %19 : vector<8x16xf32>
    %21 = vector.extract_strided_slice %15 {offsets = [0, 1], sizes = [8, 1], strides = [1, 1]} : vector<8x13xf32> to vector<8x1xf32>
    %22 = vector.broadcast %21 : vector<8x1xf32> to vector<8x16xf32>
    %23 = arith.addf %20, %22 : vector<8x16xf32>
    %cst_24 = arith.constant 0.000000e+00 : f32
    %24 = vector.broadcast %cst_24 : f32 to vector<8x16xf32>
    %25 = arith.maximumf %23, %24 : vector<8x16xf32>
    %cst_25 = arith.constant 6.000000e+00 : f32
    %26 = vector.broadcast %cst_25 : f32 to vector<8x16xf32>
    %27 = arith.minimumf %25, %26 : vector<8x16xf32>
    %28 = vector.extract_strided_slice %15 {offsets = [0, 4], sizes = [8, 9], strides = [1, 1]} : vector<8x13xf32> to vector<8x9xf32>
    %29 = vector.extract_strided_slice %15 {offsets = [0, 2], sizes = [8, 1], strides = [1, 1]} : vector<8x13xf32> to vector<8x1xf32>
    %30 = vector.extract_strided_slice %15 {offsets = [0, 3], sizes = [8, 1], strides = [1, 1]} : vector<8x13xf32> to vector<8x1xf32>
    %c0_26 = arith.constant 0 : index
    %c10 = arith.constant 10 : index
    %31 = vector.load %arg42[%c0_26, %c10] : memref<16x36xf32, #tpu.memory_space<vmem>>, vector<8x16xf32>
    tpu.vector_store %arg42[%c0_26, %c10], %27 {strides = array<i32>} : memref<16x36xf32, #tpu.memory_space<vmem>>, vector<8x16xf32>,
    %c0_27 = arith.constant 0 : index
    %c5 = arith.constant 5 : index
    %32 = vector.load %arg42[%c0_27, %c5] : memref<16x36xf32, #tpu.memory_space<vmem>>, vector<8x16xf32>
    %33 = vector.extract_strided_slice %28 {offsets = [0, 0], sizes = [8, 1], strides = [1, 1]} : vector<8x9xf32> to vector<8x1xf32>
    %34 = vector.broadcast %33 : vector<8x1xf32> to vector<8x16xf32>
    %35 = arith.mulf %32, %34 : vector<8x16xf32>
    %c0_28 = arith.constant 0 : index
    %c9 = arith.constant 9 : index
    %36 = vector.load %arg42[%c0_28, %c9] : memref<16x36xf32, #tpu.memory_space<vmem>>, vector<8x16xf32>
    %37 = vector.extract_strided_slice %28 {offsets = [0, 3], sizes = [8, 1], strides = [1, 1]} : vector<8x9xf32> to vector<8x1xf32>
    %38 = vector.broadcast %37 : vector<8x1xf32> to vector<8x16xf32>
    %39 = arith.mulf %36, %38 : vector<8x16xf32>
    %40 = arith.addf %35, %39 : vector<8x16xf32>
    %c0_29 = arith.constant 0 : index
    %c13 = arith.constant 13 : index
    %41 = vector.load %arg42[%c0_29, %c13] : memref<16x36xf32, #tpu.memory_space<vmem>>, vector<8x16xf32>
    %42 = vector.extract_strided_slice %28 {offsets = [0, 6], sizes = [8, 1], strides = [1, 1]} : vector<8x9xf32> to vector<8x1xf32>
    %43 = vector.broadcast %42 : vector<8x1xf32> to vector<8x16xf32>
    %44 = arith.mulf %41, %43 : vector<8x16xf32>
    %45 = arith.addf %40, %44 : vector<8x16xf32>
    %46 = vector.extract_strided_slice %11 {offsets = [1, 0], sizes = [1, 16], strides = [1, 1]} : vector<5x16xf32> to vector<1x16xf32>
    %47 = vector.broadcast %46 : vector<1x16xf32> to vector<8x16xf32>
    %48 = arith.mulf %45, %47 : vector<8x16xf32>
    %c0_30 = arith.constant 0 : index
    %c6 = arith.constant 6 : index
    %49 = vector.load %arg42[%c0_30, %c6] : memref<16x36xf32, #tpu.memory_space<vmem>>, vector<8x16xf32>
    %50 = vector.extract_strided_slice %28 {offsets = [0, 1], sizes = [8, 1], strides = [1, 1]} : vector<8x9xf32> to vector<8x1xf32>
    %51 = vector.broadcast %50 : vector<8x1xf32> to vector<8x16xf32>
    %52 = arith.mulf %49, %51 : vector<8x16xf32>
    %c0_31 = arith.constant 0 : index
    %c10_32 = arith.constant 10 : index
    %53 = vector.load %arg42[%c0_31, %c10_32] : memref<16x36xf32, #tpu.memory_space<vmem>>, vector<8x16xf32>
    %54 = vector.extract_strided_slice %28 {offsets = [0, 4], sizes = [8, 1], strides = [1, 1]} : vector<8x9xf32> to vector<8x1xf32>
    %55 = vector.broadcast %54 : vector<8x1xf32> to vector<8x16xf32>
    %56 = arith.mulf %53, %55 : vector<8x16xf32>
    %57 = arith.addf %52, %56 : vector<8x16xf32>
    %c0_33 = arith.constant 0 : index
    %c14 = arith.constant 14 : index
    %58 = vector.load %arg42[%c0_33, %c14] : memref<16x36xf32, #tpu.memory_space<vmem>>, vector<8x16xf32>
    %59 = vector.extract_strided_slice %28 {offsets = [0, 7], sizes = [8, 1], strides = [1, 1]} : vector<8x9xf32> to vector<8x1xf32>
    %60 = vector.broadcast %59 : vector<8x1xf32> to vector<8x16xf32>
    %61 = arith.mulf %58, %60 : vector<8x16xf32>
    %62 = arith.addf %57, %61 : vector<8x16xf32>
    %63 = arith.addf %48, %62 : vector<8x16xf32>
    %c0_34 = arith.constant 0 : index
    %c7 = arith.constant 7 : index
    %64 = vector.load %arg42[%c0_34, %c7] : memref<16x36xf32, #tpu.memory_space<vmem>>, vector<8x16xf32>
    %65 = vector.extract_strided_slice %28 {offsets = [0, 2], sizes = [8, 1], strides = [1, 1]} : vector<8x9xf32> to vector<8x1xf32>
    %66 = vector.broadcast %65 : vector<8x1xf32> to vector<8x16xf32>
    %67 = arith.mulf %64, %66 : vector<8x16xf32>
    %c0_35 = arith.constant 0 : index
    %c11 = arith.constant 11 : index
    %68 = vector.load %arg42[%c0_35, %c11] : memref<16x36xf32, #tpu.memory_space<vmem>>, vector<8x16xf32>
    %69 = vector.extract_strided_slice %28 {offsets = [0, 5], sizes = [8, 1], strides = [1, 1]} : vector<8x9xf32> to vector<8x1xf32>
    %70 = vector.broadcast %69 : vector<8x1xf32> to vector<8x16xf32>
    %71 = arith.mulf %68, %70 : vector<8x16xf32>
    %72 = arith.addf %67, %71 : vector<8x16xf32>
    %c0_36 = arith.constant 0 : index
    %c15 = arith.constant 15 : index
    %73 = vector.load %arg42[%c0_36, %c15] : memref<16x36xf32, #tpu.memory_space<vmem>>, vector<8x16xf32>
    %74 = vector.extract_strided_slice %28 {offsets = [0, 8], sizes = [8, 1], strides = [1, 1]} : vector<8x9xf32> to vector<8x1xf32>
    %75 = vector.broadcast %74 : vector<8x1xf32> to vector<8x16xf32>
    %76 = arith.mulf %73, %75 : vector<8x16xf32>
    %77 = arith.addf %72, %76 : vector<8x16xf32>
    %78 = vector.extract_strided_slice %11 {offsets = [3, 0], sizes = [1, 16], strides = [1, 1]} : vector<5x16xf32> to vector<1x16xf32>
    %79 = vector.broadcast %78 : vector<1x16xf32> to vector<8x16xf32>
    %80 = arith.mulf %77, %79 : vector<8x16xf32>
    %81 = arith.addf %63, %80 : vector<8x16xf32>
    %82 = vector.broadcast %29 : vector<8x1xf32> to vector<8x16xf32>
    %83 = arith.mulf %81, %82 : vector<8x16xf32>
    %84 = vector.broadcast %30 : vector<8x1xf32> to vector<8x16xf32>
    %85 = arith.addf %83, %84 : vector<8x16xf32>
    %cst_37 = arith.constant 0.000000e+00 : f32
    %86 = vector.broadcast %cst_37 : f32 to vector<8x16xf32>
    %87 = arith.maximumf %85, %86 : vector<8x16xf32>
    %cst_38 = arith.constant 6.000000e+00 : f32
    %88 = vector.broadcast %cst_38 : f32 to vector<8x16xf32>
    %89 = arith.minimumf %87, %88 : vector<8x16xf32>
    %90 = tpu.concatenate %27, %89 in 0 : vector<8x16xf32>, vector<8x16xf32> -> vector<16x16xf32>
    %c0_39 = arith.constant 0 : index
    %c0_40 = arith.constant 0 : index
    %c0_41 = arith.constant 0 : index
    %91 = vector.load %arg2[%c0_39, %c0_40, %c0_41] : memref<1x16x64xf32, #tpu.memory_space<vmem>>, vector<1x16x64xf32>
    %92 = vector.shape_cast %91 : vector<1x16x64xf32> to vector<16x64xf32>
    %c0_42 = arith.constant 0 : index
    %c0_43 = arith.constant 0 : index
    %93 = vector.load %arg13[%c0_42, %c0_43] : memref<8x16xbf16, #tpu.memory_space<vmem>>, vector<8x16xbf16>
    %c0_44 = arith.constant 0 : index
    %c0_45 = arith.constant 0 : index
    %94 = vector.load %arg14[%c0_44, %c0_45] : memref<8x13xf32, #tpu.memory_space<vmem>>, vector<8x13xf32>
    %95 = arith.truncf %92 : vector<16x64xf32> to vector<16x64xbf16>
    %cst_46 = arith.constant dense<0.000000e+00> : vector<8x64xf32>
    %96 = tpu.matmul %93, %95, %cst_46 {dimension_numbers = #tpu.dot_dimension_numbers<[1], [0], [0], [1], [0, 0, 1, 1], [], []>} : vector<8x16xbf16>, vector<16x64xbf16>, vector<8x64xf32> -> vector<8x64xf32>
    %97 = vector.extract_strided_slice %94 {offsets = [0, 0], sizes = [8, 1], strides = [1, 1]} : vector<8x13xf32> to vector<8x1xf32>
    %98 = vector.broadcast %97 : vector<8x1xf32> to vector<8x64xf32>
    %99 = arith.mulf %96, %98 : vector<8x64xf32>
    %100 = vector.extract_strided_slice %94 {offsets = [0, 1], sizes = [8, 1], strides = [1, 1]} : vector<8x13xf32> to vector<8x1xf32>
    %101 = vector.broadcast %100 : vector<8x1xf32> to vector<8x64xf32>
    %102 = arith.addf %99, %101 : vector<8x64xf32>
    %cst_47 = arith.constant 0.000000e+00 : f32
    %103 = vector.broadcast %cst_47 : f32 to vector<8x64xf32>
    %104 = arith.maximumf %102, %103 : vector<8x64xf32>
    %cst_48 = arith.constant 6.000000e+00 : f32
    %105 = vector.broadcast %cst_48 : f32 to vector<8x64xf32>
    %106 = arith.minimumf %104, %105 : vector<8x64xf32>
    %107 = vector.extract_strided_slice %94 {offsets = [0, 4], sizes = [8, 9], strides = [1, 1]} : vector<8x13xf32> to vector<8x9xf32>
    %108 = vector.extract_strided_slice %94 {offsets = [0, 2], sizes = [8, 1], strides = [1, 1]} : vector<8x13xf32> to vector<8x1xf32>
    %109 = vector.extract_strided_slice %94 {offsets = [0, 3], sizes = [8, 1], strides = [1, 1]} : vector<8x13xf32> to vector<8x1xf32>
    %c0_49 = arith.constant 0 : index
    %c18 = arith.constant 18 : index
    %110 = vector.load %arg41[%c0_49, %c18] : memref<16x100xf32, #tpu.memory_space<vmem>>, vector<8x64xf32>
    tpu.vector_store %arg41[%c0_49, %c18], %106 {strides = array<i32>} : memref<16x100xf32, #tpu.memory_space<vmem>>, vector<8x64xf32>,
    %c0_50 = arith.constant 0 : index
    %c9_51 = arith.constant 9 : index
    %111 = vector.load %arg41[%c0_50, %c9_51] : memref<16x100xf32, #tpu.memory_space<vmem>>, vector<8x64xf32>
    %112 = vector.extract_strided_slice %107 {offsets = [0, 0], sizes = [8, 1], strides = [1, 1]} : vector<8x9xf32> to vector<8x1xf32>
    %113 = vector.broadcast %112 : vector<8x1xf32> to vector<8x64xf32>
    %114 = arith.mulf %111, %113 : vector<8x64xf32>
    %c0_52 = arith.constant 0 : index
    %c17 = arith.constant 17 : index
    %115 = vector.load %arg41[%c0_52, %c17] : memref<16x100xf32, #tpu.memory_space<vmem>>, vector<8x64xf32>
    %116 = vector.extract_strided_slice %107 {offsets = [0, 3], sizes = [8, 1], strides = [1, 1]} : vector<8x9xf32> to vector<8x1xf32>
    %117 = vector.broadcast %116 : vector<8x1xf32> to vector<8x64xf32>
    %118 = arith.mulf %115, %117 : vector<8x64xf32>
    %119 = arith.addf %114, %118 : vector<8x64xf32>
    %c0_53 = arith.constant 0 : index
    %c25 = arith.constant 25 : index
    %120 = vector.load %arg41[%c0_53, %c25] : memref<16x100xf32, #tpu.memory_space<vmem>>, vector<8x64xf32>
    %121 = vector.extract_strided_slice %107 {offsets = [0, 6], sizes = [8, 1], strides = [1, 1]} : vector<8x9xf32> to vector<8x1xf32>
    %122 = vector.broadcast %121 : vector<8x1xf32> to vector<8x64xf32>
    %123 = arith.mulf %120, %122 : vector<8x64xf32>
    %124 = arith.addf %119, %123 : vector<8x64xf32>
    %125 = vector.extract_strided_slice %10 {offsets = [1, 0], sizes = [1, 64], strides = [1, 1]} : vector<5x64xf32> to vector<1x64xf32>
    %126 = vector.broadcast %125 : vector<1x64xf32> to vector<8x64xf32>
    %127 = arith.mulf %124, %126 : vector<8x64xf32>
    %c0_54 = arith.constant 0 : index
    %c10_55 = arith.constant 10 : index
    %128 = vector.load %arg41[%c0_54, %c10_55] : memref<16x100xf32, #tpu.memory_space<vmem>>, vector<8x64xf32>
    %129 = vector.extract_strided_slice %107 {offsets = [0, 1], sizes = [8, 1], strides = [1, 1]} : vector<8x9xf32> to vector<8x1xf32>
    %130 = vector.broadcast %129 : vector<8x1xf32> to vector<8x64xf32>
    %131 = arith.mulf %128, %130 : vector<8x64xf32>
    %c0_56 = arith.constant 0 : index
    %c18_57 = arith.constant 18 : index
    %132 = vector.load %arg41[%c0_56, %c18_57] : memref<16x100xf32, #tpu.memory_space<vmem>>, vector<8x64xf32>
    %133 = vector.extract_strided_slice %107 {offsets = [0, 4], sizes = [8, 1], strides = [1, 1]} : vector<8x9xf32> to vector<8x1xf32>
    %134 = vector.broadcast %133 : vector<8x1xf32> to vector<8x64xf32>
    %135 = arith.mulf %132, %134 : vector<8x64xf32>
    %136 = arith.addf %131, %135 : vector<8x64xf32>
    %c0_58 = arith.constant 0 : index
    %c26_59 = arith.constant 26 : index
    %137 = vector.load %arg41[%c0_58, %c26_59] : memref<16x100xf32, #tpu.memory_space<vmem>>, vector<8x64xf32>
    %138 = vector.extract_strided_slice %107 {offsets = [0, 7], sizes = [8, 1], strides = [1, 1]} : vector<8x9xf32> to vector<8x1xf32>
    %139 = vector.broadcast %138 : vector<8x1xf32> to vector<8x64xf32>
    %140 = arith.mulf %137, %139 : vector<8x64xf32>
    %141 = arith.addf %136, %140 : vector<8x64xf32>
    %142 = arith.addf %127, %141 : vector<8x64xf32>
    %c0_60 = arith.constant 0 : index
    %c11_61 = arith.constant 11 : index
    %143 = vector.load %arg41[%c0_60, %c11_61] : memref<16x100xf32, #tpu.memory_space<vmem>>, vector<8x64xf32>
    %144 = vector.extract_strided_slice %107 {offsets = [0, 2], sizes = [8, 1], strides = [1, 1]} : vector<8x9xf32> to vector<8x1xf32>
    %145 = vector.broadcast %144 : vector<8x1xf32> to vector<8x64xf32>
    %146 = arith.mulf %143, %145 : vector<8x64xf32>
    %c0_62 = arith.constant 0 : index
    %c19 = arith.constant 19 : index
    %147 = vector.load %arg41[%c0_62, %c19] : memref<16x100xf32, #tpu.memory_space<vmem>>, vector<8x64xf32>
    %148 = vector.extract_strided_slice %107 {offsets = [0, 5], sizes = [8, 1], strides = [1, 1]} : vector<8x9xf32> to vector<8x1xf32>
    %149 = vector.broadcast %148 : vector<8x1xf32> to vector<8x64xf32>
    %150 = arith.mulf %147, %149 : vector<8x64xf32>
    %151 = arith.addf %146, %150 : vector<8x64xf32>
    %c0_63 = arith.constant 0 : index
    %c27 = arith.constant 27 : index
    %152 = vector.load %arg41[%c0_63, %c27] : memref<16x100xf32, #tpu.memory_space<vmem>>, vector<8x64xf32>
    %153 = vector.extract_strided_slice %107 {offsets = [0, 8], sizes = [8, 1], strides = [1, 1]} : vector<8x9xf32> to vector<8x1xf32>
    %154 = vector.broadcast %153 : vector<8x1xf32> to vector<8x64xf32>
    %155 = arith.mulf %152, %154 : vector<8x64xf32>
    %156 = arith.addf %151, %155 : vector<8x64xf32>
    %157 = vector.extract_strided_slice %10 {offsets = [3, 0], sizes = [1, 64], strides = [1, 1]} : vector<5x64xf32> to vector<1x64xf32>
    %158 = vector.broadcast %157 : vector<1x64xf32> to vector<8x64xf32>
    %159 = arith.mulf %156, %158 : vector<8x64xf32>
    %160 = arith.addf %142, %159 : vector<8x64xf32>
    %161 = vector.broadcast %108 : vector<8x1xf32> to vector<8x64xf32>
    %162 = arith.mulf %160, %161 : vector<8x64xf32>
    %163 = vector.broadcast %109 : vector<8x1xf32> to vector<8x64xf32>
    %164 = arith.addf %162, %163 : vector<8x64xf32>
    %cst_64 = arith.constant 0.000000e+00 : f32
    %165 = vector.broadcast %cst_64 : f32 to vector<8x64xf32>
    %166 = arith.maximumf %164, %165 : vector<8x64xf32>
    %cst_65 = arith.constant 6.000000e+00 : f32
    %167 = vector.broadcast %cst_65 : f32 to vector<8x64xf32>
    %168 = arith.minimumf %166, %167 : vector<8x64xf32>
    %169 = tpu.concatenate %106, %168 in 0 : vector<8x64xf32>, vector<8x64xf32> -> vector<16x64xf32>
    %c0_66 = arith.constant 0 : index
    %c0_67 = arith.constant 0 : index
    %170 = vector.load %arg7[%c0_66, %c0_67] : memref<16x64xf32, #tpu.memory_space<vmem>>, vector<16x64xf32>
    %cst_68 = arith.constant dense<0.000000e+00> : vector<16x64xf32>
    %171 = tpu.matmul %90, %170, %cst_68 {dimension_numbers = #tpu.dot_dimension_numbers<[1], [0], [0], [1], [0, 0, 1, 1], [], []>, precision = #tpu.contract_precision<fp32>} : vector<16x16xf32>, vector<16x64xf32>, vector<16x64xf32> -> vector<16x64xf32>
    %172 = arith.addf %169, %171 : vector<16x64xf32>
    %c0_69 = arith.constant 0 : index
    %c0_70 = arith.constant 0 : index
    %c0_71 = arith.constant 0 : index
    %173 = vector.load %arg1[%c0_69, %c0_70, %c0_71] : memref<1x8x256xf32, #tpu.memory_space<vmem>>, vector<1x8x256xf32>
    %174 = vector.shape_cast %173 : vector<1x8x256xf32> to vector<8x256xf32>
    %c0_72 = arith.constant 0 : index
    %c0_73 = arith.constant 0 : index
    %175 = vector.load %arg11[%c0_72, %c0_73] : memref<8x8xbf16, #tpu.memory_space<vmem>>, vector<8x8xbf16>
    %c0_74 = arith.constant 0 : index
    %c0_75 = arith.constant 0 : index
    %176 = vector.load %arg12[%c0_74, %c0_75] : memref<8x13xf32, #tpu.memory_space<vmem>>, vector<8x13xf32>
    %177 = arith.truncf %174 : vector<8x256xf32> to vector<8x256xbf16>
    %cst_76 = arith.constant dense<0.000000e+00> : vector<8x256xf32>
    %178 = tpu.matmul %175, %177, %cst_76 {dimension_numbers = #tpu.dot_dimension_numbers<[1], [0], [0], [1], [0, 0, 1, 1], [], []>} : vector<8x8xbf16>, vector<8x256xbf16>, vector<8x256xf32> -> vector<8x256xf32>
    %179 = vector.extract_strided_slice %176 {offsets = [0, 0], sizes = [8, 1], strides = [1, 1]} : vector<8x13xf32> to vector<8x1xf32>
    %180 = vector.broadcast %179 : vector<8x1xf32> to vector<8x256xf32>
    %181 = arith.mulf %178, %180 : vector<8x256xf32>
    %182 = vector.extract_strided_slice %176 {offsets = [0, 1], sizes = [8, 1], strides = [1, 1]} : vector<8x13xf32> to vector<8x1xf32>
    %183 = vector.broadcast %182 : vector<8x1xf32> to vector<8x256xf32>
    %184 = arith.addf %181, %183 : vector<8x256xf32>
    %cst_77 = arith.constant 0.000000e+00 : f32
    %185 = vector.broadcast %cst_77 : f32 to vector<8x256xf32>
    %186 = arith.maximumf %184, %185 : vector<8x256xf32>
    %cst_78 = arith.constant 6.000000e+00 : f32
    %187 = vector.broadcast %cst_78 : f32 to vector<8x256xf32>
    %188 = arith.minimumf %186, %187 : vector<8x256xf32>
    %189 = vector.extract_strided_slice %176 {offsets = [0, 4], sizes = [8, 9], strides = [1, 1]} : vector<8x13xf32> to vector<8x9xf32>
    %190 = vector.extract_strided_slice %176 {offsets = [0, 2], sizes = [8, 1], strides = [1, 1]} : vector<8x13xf32> to vector<8x1xf32>
    %191 = vector.extract_strided_slice %176 {offsets = [0, 3], sizes = [8, 1], strides = [1, 1]} : vector<8x13xf32> to vector<8x1xf32>
    %c0_79 = arith.constant 0 : index
    %c34 = arith.constant 34 : index
    %192 = vector.load %arg40[%c0_79, %c34] : memref<16x324xf32, #tpu.memory_space<vmem>>, vector<8x256xf32>
    tpu.vector_store %arg40[%c0_79, %c34], %188 {strides = array<i32>} : memref<16x324xf32, #tpu.memory_space<vmem>>, vector<8x256xf32>,
    %c0_80 = arith.constant 0 : index
    %c17_81 = arith.constant 17 : index
    %193 = vector.load %arg40[%c0_80, %c17_81] : memref<16x324xf32, #tpu.memory_space<vmem>>, vector<8x256xf32>
    %194 = vector.extract_strided_slice %189 {offsets = [0, 0], sizes = [8, 1], strides = [1, 1]} : vector<8x9xf32> to vector<8x1xf32>
    %195 = vector.broadcast %194 : vector<8x1xf32> to vector<8x256xf32>
    %196 = arith.mulf %193, %195 : vector<8x256xf32>
    %c0_82 = arith.constant 0 : index
    %c33 = arith.constant 33 : index
    %197 = vector.load %arg40[%c0_82, %c33] : memref<16x324xf32, #tpu.memory_space<vmem>>, vector<8x256xf32>
    %198 = vector.extract_strided_slice %189 {offsets = [0, 3], sizes = [8, 1], strides = [1, 1]} : vector<8x9xf32> to vector<8x1xf32>
    %199 = vector.broadcast %198 : vector<8x1xf32> to vector<8x256xf32>
    %200 = arith.mulf %197, %199 : vector<8x256xf32>
    %201 = arith.addf %196, %200 : vector<8x256xf32>
    %c0_83 = arith.constant 0 : index
    %c49 = arith.constant 49 : index
    %202 = vector.load %arg40[%c0_83, %c49] : memref<16x324xf32, #tpu.memory_space<vmem>>, vector<8x256xf32>
    %203 = vector.extract_strided_slice %189 {offsets = [0, 6], sizes = [8, 1], strides = [1, 1]} : vector<8x9xf32> to vector<8x1xf32>
    %204 = vector.broadcast %203 : vector<8x1xf32> to vector<8x256xf32>
    %205 = arith.mulf %202, %204 : vector<8x256xf32>
    %206 = arith.addf %201, %205 : vector<8x256xf32>
    %207 = vector.extract_strided_slice %9 {offsets = [1, 0], sizes = [1, 256], strides = [1, 1]} : vector<5x256xf32> to vector<1x256xf32>
    %208 = vector.broadcast %207 : vector<1x256xf32> to vector<8x256xf32>
    %209 = arith.mulf %206, %208 : vector<8x256xf32>
    %c0_84 = arith.constant 0 : index
    %c18_85 = arith.constant 18 : index
    %210 = vector.load %arg40[%c0_84, %c18_85] : memref<16x324xf32, #tpu.memory_space<vmem>>, vector<8x256xf32>
    %211 = vector.extract_strided_slice %189 {offsets = [0, 1], sizes = [8, 1], strides = [1, 1]} : vector<8x9xf32> to vector<8x1xf32>
    %212 = vector.broadcast %211 : vector<8x1xf32> to vector<8x256xf32>
    %213 = arith.mulf %210, %212 : vector<8x256xf32>
    %c0_86 = arith.constant 0 : index
    %c34_87 = arith.constant 34 : index
    %214 = vector.load %arg40[%c0_86, %c34_87] : memref<16x324xf32, #tpu.memory_space<vmem>>, vector<8x256xf32>
    %215 = vector.extract_strided_slice %189 {offsets = [0, 4], sizes = [8, 1], strides = [1, 1]} : vector<8x9xf32> to vector<8x1xf32>
    %216 = vector.broadcast %215 : vector<8x1xf32> to vector<8x256xf32>
    %217 = arith.mulf %214, %216 : vector<8x256xf32>
    %218 = arith.addf %213, %217 : vector<8x256xf32>
    %c0_88 = arith.constant 0 : index
    %c50 = arith.constant 50 : index
    %219 = vector.load %arg40[%c0_88, %c50] : memref<16x324xf32, #tpu.memory_space<vmem>>, vector<8x256xf32>
    %220 = vector.extract_strided_slice %189 {offsets = [0, 7], sizes = [8, 1], strides = [1, 1]} : vector<8x9xf32> to vector<8x1xf32>
    %221 = vector.broadcast %220 : vector<8x1xf32> to vector<8x256xf32>
    %222 = arith.mulf %219, %221 : vector<8x256xf32>
    %223 = arith.addf %218, %222 : vector<8x256xf32>
    %224 = arith.addf %209, %223 : vector<8x256xf32>
    %c0_89 = arith.constant 0 : index
    %c19_90 = arith.constant 19 : index
    %225 = vector.load %arg40[%c0_89, %c19_90] : memref<16x324xf32, #tpu.memory_space<vmem>>, vector<8x256xf32>
    %226 = vector.extract_strided_slice %189 {offsets = [0, 2], sizes = [8, 1], strides = [1, 1]} : vector<8x9xf32> to vector<8x1xf32>
    %227 = vector.broadcast %226 : vector<8x1xf32> to vector<8x256xf32>
    %228 = arith.mulf %225, %227 : vector<8x256xf32>
    %c0_91 = arith.constant 0 : index
    %c35 = arith.constant 35 : index
    %229 = vector.load %arg40[%c0_91, %c35] : memref<16x324xf32, #tpu.memory_space<vmem>>, vector<8x256xf32>
    %230 = vector.extract_strided_slice %189 {offsets = [0, 5], sizes = [8, 1], strides = [1, 1]} : vector<8x9xf32> to vector<8x1xf32>
    %231 = vector.broadcast %230 : vector<8x1xf32> to vector<8x256xf32>
    %232 = arith.mulf %229, %231 : vector<8x256xf32>
    %233 = arith.addf %228, %232 : vector<8x256xf32>
    %c0_92 = arith.constant 0 : index
    %c51 = arith.constant 51 : index
    %234 = vector.load %arg40[%c0_92, %c51] : memref<16x324xf32, #tpu.memory_space<vmem>>, vector<8x256xf32>
    %235 = vector.extract_strided_slice %189 {offsets = [0, 8], sizes = [8, 1], strides = [1, 1]} : vector<8x9xf32> to vector<8x1xf32>
    %236 = vector.broadcast %235 : vector<8x1xf32> to vector<8x256xf32>
    %237 = arith.mulf %234, %236 : vector<8x256xf32>
    %238 = arith.addf %233, %237 : vector<8x256xf32>
    %239 = vector.extract_strided_slice %9 {offsets = [3, 0], sizes = [1, 256], strides = [1, 1]} : vector<5x256xf32> to vector<1x256xf32>
    %240 = vector.broadcast %239 : vector<1x256xf32> to vector<8x256xf32>
    %241 = arith.mulf %238, %240 : vector<8x256xf32>
    %242 = arith.addf %224, %241 : vector<8x256xf32>
    %243 = vector.broadcast %190 : vector<8x1xf32> to vector<8x256xf32>
    %244 = arith.mulf %242, %243 : vector<8x256xf32>
    %245 = vector.broadcast %191 : vector<8x1xf32> to vector<8x256xf32>
    %246 = arith.addf %244, %245 : vector<8x256xf32>
    %cst_93 = arith.constant 0.000000e+00 : f32
    %247 = vector.broadcast %cst_93 : f32 to vector<8x256xf32>
    %248 = arith.maximumf %246, %247 : vector<8x256xf32>
    %cst_94 = arith.constant 6.000000e+00 : f32
    %249 = vector.broadcast %cst_94 : f32 to vector<8x256xf32>
    %250 = arith.minimumf %248, %249 : vector<8x256xf32>
    %251 = tpu.concatenate %188, %250 in 0 : vector<8x256xf32>, vector<8x256xf32> -> vector<16x256xf32>
    %c0_95 = arith.constant 0 : index
    %c0_96 = arith.constant 0 : index
    %252 = vector.load %arg8[%c0_95, %c0_96] : memref<64x256xf32, #tpu.memory_space<vmem>>, vector<64x256xf32>
    %cst_97 = arith.constant dense<0.000000e+00> : vector<16x256xf32>
    %253 = tpu.matmul %172, %252, %cst_97 {dimension_numbers = #tpu.dot_dimension_numbers<[1], [0], [0], [1], [0, 0, 1, 1], [], []>, precision = #tpu.contract_precision<fp32>} : vector<16x64xf32>, vector<64x256xf32>, vector<16x256xf32> -> vector<16x256xf32>
    %254 = arith.addf %251, %253 : vector<16x256xf32>
    %c0_98 = arith.constant 0 : index
    %c0_99 = arith.constant 0 : index
    %255 = vector.load %arg17[%c0_98, %c0_99] : memref<16x27xf32, #tpu.memory_space<vmem>>, vector<16x27xf32>
    %c0_100 = arith.constant 0 : index
    %c0_101 = arith.constant 0 : index
    %256 = vector.load %arg18[%c0_100, %c0_101] : memref<16x27xf32, #tpu.memory_space<vmem>>, vector<16x27xf32>
    %257 = vector.extract_strided_slice %255 {offsets = [0, 2], sizes = [16, 25], strides = [1, 1]} : vector<16x27xf32> to vector<16x25xf32>
    %258 = vector.extract_strided_slice %255 {offsets = [0, 0], sizes = [16, 1], strides = [1, 1]} : vector<16x27xf32> to vector<16x1xf32>
    %259 = vector.extract_strided_slice %255 {offsets = [0, 1], sizes = [16, 1], strides = [1, 1]} : vector<16x27xf32> to vector<16x1xf32>
    %c0_102 = arith.constant 0 : index
    %c34_103 = arith.constant 34 : index
    %260 = vector.load %arg40[%c0_102, %c34_103] : memref<16x324xf32, #tpu.memory_space<vmem>>, vector<16x256xf32>
    tpu.vector_store %arg40[%c0_102, %c34_103], %254 {strides = array<i32>} : memref<16x324xf32, #tpu.memory_space<vmem>>, vector<16x256xf32>,
    %c0_104 = arith.constant 0 : index
    %c0_105 = arith.constant 0 : index
    %261 = vector.load %arg40[%c0_104, %c0_105] : memref<16x324xf32, #tpu.memory_space<vmem>>, vector<16x256xf32>
    %262 = vector.extract_strided_slice %257 {offsets = [0, 0], sizes = [16, 1], strides = [1, 1]} : vector<16x25xf32> to vector<16x1xf32>
    %263 = vector.broadcast %262 : vector<16x1xf32> to vector<16x256xf32>
    %264 = arith.mulf %261, %263 : vector<16x256xf32>
    %c0_106 = arith.constant 0 : index
    %c16 = arith.constant 16 : index
    %265 = vector.load %arg40[%c0_106, %c16] : memref<16x324xf32, #tpu.memory_space<vmem>>, vector<16x256xf32>
    %266 = vector.extract_strided_slice %257 {offsets = [0, 5], sizes = [16, 1], strides = [1, 1]} : vector<16x25xf32> to vector<16x1xf32>
    %267 = vector.broadcast %266 : vector<16x1xf32> to vector<16x256xf32>
    %268 = arith.mulf %265, %267 : vector<16x256xf32>
    %269 = arith.addf %264, %268 : vector<16x256xf32>
    %c0_107 = arith.constant 0 : index
    %c32 = arith.constant 32 : index
    %270 = vector.load %arg40[%c0_107, %c32] : memref<16x324xf32, #tpu.memory_space<vmem>>, vector<16x256xf32>
    %271 = vector.extract_strided_slice %257 {offsets = [0, 10], sizes = [16, 1], strides = [1, 1]} : vector<16x25xf32> to vector<16x1xf32>
    %272 = vector.broadcast %271 : vector<16x1xf32> to vector<16x256xf32>
    %273 = arith.mulf %270, %272 : vector<16x256xf32>
    %274 = arith.addf %269, %273 : vector<16x256xf32>
    %c0_108 = arith.constant 0 : index
    %c48 = arith.constant 48 : index
    %275 = vector.load %arg40[%c0_108, %c48] : memref<16x324xf32, #tpu.memory_space<vmem>>, vector<16x256xf32>
    %276 = vector.extract_strided_slice %257 {offsets = [0, 15], sizes = [16, 1], strides = [1, 1]} : vector<16x25xf32> to vector<16x1xf32>
    %277 = vector.broadcast %276 : vector<16x1xf32> to vector<16x256xf32>
    %278 = arith.mulf %275, %277 : vector<16x256xf32>
    %279 = arith.addf %274, %278 : vector<16x256xf32>
    %c0_109 = arith.constant 0 : index
    %c64 = arith.constant 64 : index
    %280 = vector.load %arg40[%c0_109, %c64] : memref<16x324xf32, #tpu.memory_space<vmem>>, vector<16x256xf32>
    %281 = vector.extract_strided_slice %257 {offsets = [0, 20], sizes = [16, 1], strides = [1, 1]} : vector<16x25xf32> to vector<16x1xf32>
    %282 = vector.broadcast %281 : vector<16x1xf32> to vector<16x256xf32>
    %283 = arith.mulf %280, %282 : vector<16x256xf32>
    %284 = arith.addf %279, %283 : vector<16x256xf32>
    %285 = vector.extract_strided_slice %9 {offsets = [0, 0], sizes = [1, 256], strides = [1, 1]} : vector<5x256xf32> to vector<1x256xf32>
    %286 = vector.broadcast %285 : vector<1x256xf32> to vector<16x256xf32>
    %287 = arith.mulf %284, %286 : vector<16x256xf32>
    %c0_110 = arith.constant 0 : index
    %c1 = arith.constant 1 : index
    %288 = vector.load %arg40[%c0_110, %c1] : memref<16x324xf32, #tpu.memory_space<vmem>>, vector<16x256xf32>
    %289 = vector.extract_strided_slice %257 {offsets = [0, 1], sizes = [16, 1], strides = [1, 1]} : vector<16x25xf32> to vector<16x1xf32>
    %290 = vector.broadcast %289 : vector<16x1xf32> to vector<16x256xf32>
    %291 = arith.mulf %288, %290 : vector<16x256xf32>
    %c0_111 = arith.constant 0 : index
    %c17_112 = arith.constant 17 : index
    %292 = vector.load %arg40[%c0_111, %c17_112] : memref<16x324xf32, #tpu.memory_space<vmem>>, vector<16x256xf32>
    %293 = vector.extract_strided_slice %257 {offsets = [0, 6], sizes = [16, 1], strides = [1, 1]} : vector<16x25xf32> to vector<16x1xf32>
    %294 = vector.broadcast %293 : vector<16x1xf32> to vector<16x256xf32>
    %295 = arith.mulf %292, %294 : vector<16x256xf32>
    %296 = arith.addf %291, %295 : vector<16x256xf32>
    %c0_113 = arith.constant 0 : index
    %c33_114 = arith.constant 33 : index
    %297 = vector.load %arg40[%c0_113, %c33_114] : memref<16x324xf32, #tpu.memory_space<vmem>>, vector<16x256xf32>
    %298 = vector.extract_strided_slice %257 {offsets = [0, 11], sizes = [16, 1], strides = [1, 1]} : vector<16x25xf32> to vector<16x1xf32>
    %299 = vector.broadcast %298 : vector<16x1xf32> to vector<16x256xf32>
    %300 = arith.mulf %297, %299 : vector<16x256xf32>
    %301 = arith.addf %296, %300 : vector<16x256xf32>
    %c0_115 = arith.constant 0 : index
    %c49_116 = arith.constant 49 : index
    %302 = vector.load %arg40[%c0_115, %c49_116] : memref<16x324xf32, #tpu.memory_space<vmem>>, vector<16x256xf32>
    %303 = vector.extract_strided_slice %257 {offsets = [0, 16], sizes = [16, 1], strides = [1, 1]} : vector<16x25xf32> to vector<16x1xf32>
    %304 = vector.broadcast %303 : vector<16x1xf32> to vector<16x256xf32>
    %305 = arith.mulf %302, %304 : vector<16x256xf32>
    %306 = arith.addf %301, %305 : vector<16x256xf32>
    %c0_117 = arith.constant 0 : index
    %c65 = arith.constant 65 : index
    %307 = vector.load %arg40[%c0_117, %c65] : memref<16x324xf32, #tpu.memory_space<vmem>>, vector<16x256xf32>
    %308 = vector.extract_strided_slice %257 {offsets = [0, 21], sizes = [16, 1], strides = [1, 1]} : vector<16x25xf32> to vector<16x1xf32>
    %309 = vector.broadcast %308 : vector<16x1xf32> to vector<16x256xf32>
    %310 = arith.mulf %307, %309 : vector<16x256xf32>
    %311 = arith.addf %306, %310 : vector<16x256xf32>
    %312 = vector.extract_strided_slice %9 {offsets = [1, 0], sizes = [1, 256], strides = [1, 1]} : vector<5x256xf32> to vector<1x256xf32>
    %313 = vector.broadcast %312 : vector<1x256xf32> to vector<16x256xf32>
    %314 = arith.mulf %311, %313 : vector<16x256xf32>
    %315 = arith.addf %287, %314 : vector<16x256xf32>
    %c0_118 = arith.constant 0 : index
    %c2 = arith.constant 2 : index
    %316 = vector.load %arg40[%c0_118, %c2] : memref<16x324xf32, #tpu.memory_space<vmem>>, vector<16x256xf32>
    %317 = vector.extract_strided_slice %257 {offsets = [0, 2], sizes = [16, 1], strides = [1, 1]} : vector<16x25xf32> to vector<16x1xf32>
    %318 = vector.broadcast %317 : vector<16x1xf32> to vector<16x256xf32>
    %319 = arith.mulf %316, %318 : vector<16x256xf32>
    %c0_119 = arith.constant 0 : index
    %c18_120 = arith.constant 18 : index
    %320 = vector.load %arg40[%c0_119, %c18_120] : memref<16x324xf32, #tpu.memory_space<vmem>>, vector<16x256xf32>
    %321 = vector.extract_strided_slice %257 {offsets = [0, 7], sizes = [16, 1], strides = [1, 1]} : vector<16x25xf32> to vector<16x1xf32>
    %322 = vector.broadcast %321 : vector<16x1xf32> to vector<16x256xf32>
    %323 = arith.mulf %320, %322 : vector<16x256xf32>
    %324 = arith.addf %319, %323 : vector<16x256xf32>
    %c0_121 = arith.constant 0 : index
    %c34_122 = arith.constant 34 : index
    %325 = vector.load %arg40[%c0_121, %c34_122] : memref<16x324xf32, #tpu.memory_space<vmem>>, vector<16x256xf32>
    %326 = vector.extract_strided_slice %257 {offsets = [0, 12], sizes = [16, 1], strides = [1, 1]} : vector<16x25xf32> to vector<16x1xf32>
    %327 = vector.broadcast %326 : vector<16x1xf32> to vector<16x256xf32>
    %328 = arith.mulf %325, %327 : vector<16x256xf32>
    %329 = arith.addf %324, %328 : vector<16x256xf32>
    %c0_123 = arith.constant 0 : index
    %c50_124 = arith.constant 50 : index
    %330 = vector.load %arg40[%c0_123, %c50_124] : memref<16x324xf32, #tpu.memory_space<vmem>>, vector<16x256xf32>
    %331 = vector.extract_strided_slice %257 {offsets = [0, 17], sizes = [16, 1], strides = [1, 1]} : vector<16x25xf32> to vector<16x1xf32>
    %332 = vector.broadcast %331 : vector<16x1xf32> to vector<16x256xf32>
    %333 = arith.mulf %330, %332 : vector<16x256xf32>
    %334 = arith.addf %329, %333 : vector<16x256xf32>
    %c0_125 = arith.constant 0 : index
    %c66 = arith.constant 66 : index
    %335 = vector.load %arg40[%c0_125, %c66] : memref<16x324xf32, #tpu.memory_space<vmem>>, vector<16x256xf32>
    %336 = vector.extract_strided_slice %257 {offsets = [0, 22], sizes = [16, 1], strides = [1, 1]} : vector<16x25xf32> to vector<16x1xf32>
    %337 = vector.broadcast %336 : vector<16x1xf32> to vector<16x256xf32>
    %338 = arith.mulf %335, %337 : vector<16x256xf32>
    %339 = arith.addf %334, %338 : vector<16x256xf32>
    %340 = arith.addf %315, %339 : vector<16x256xf32>
    %c0_126 = arith.constant 0 : index
    %c3 = arith.constant 3 : index
    %341 = vector.load %arg40[%c0_126, %c3] : memref<16x324xf32, #tpu.memory_space<vmem>>, vector<16x256xf32>
    %342 = vector.extract_strided_slice %257 {offsets = [0, 3], sizes = [16, 1], strides = [1, 1]} : vector<16x25xf32> to vector<16x1xf32>
    %343 = vector.broadcast %342 : vector<16x1xf32> to vector<16x256xf32>
    %344 = arith.mulf %341, %343 : vector<16x256xf32>
    %c0_127 = arith.constant 0 : index
    %c19_128 = arith.constant 19 : index
    %345 = vector.load %arg40[%c0_127, %c19_128] : memref<16x324xf32, #tpu.memory_space<vmem>>, vector<16x256xf32>
    %346 = vector.extract_strided_slice %257 {offsets = [0, 8], sizes = [16, 1], strides = [1, 1]} : vector<16x25xf32> to vector<16x1xf32>
    %347 = vector.broadcast %346 : vector<16x1xf32> to vector<16x256xf32>
    %348 = arith.mulf %345, %347 : vector<16x256xf32>
    %349 = arith.addf %344, %348 : vector<16x256xf32>
    %c0_129 = arith.constant 0 : index
    %c35_130 = arith.constant 35 : index
    %350 = vector.load %arg40[%c0_129, %c35_130] : memref<16x324xf32, #tpu.memory_space<vmem>>, vector<16x256xf32>
    %351 = vector.extract_strided_slice %257 {offsets = [0, 13], sizes = [16, 1], strides = [1, 1]} : vector<16x25xf32> to vector<16x1xf32>
    %352 = vector.broadcast %351 : vector<16x1xf32> to vector<16x256xf32>
    %353 = arith.mulf %350, %352 : vector<16x256xf32>
    %354 = arith.addf %349, %353 : vector<16x256xf32>
    %c0_131 = arith.constant 0 : index
    %c51_132 = arith.constant 51 : index
    %355 = vector.load %arg40[%c0_131, %c51_132] : memref<16x324xf32, #tpu.memory_space<vmem>>, vector<16x256xf32>
    %356 = vector.extract_strided_slice %257 {offsets = [0, 18], sizes = [16, 1], strides = [1, 1]} : vector<16x25xf32> to vector<16x1xf32>
    %357 = vector.broadcast %356 : vector<16x1xf32> to vector<16x256xf32>
    %358 = arith.mulf %355, %357 : vector<16x256xf32>
    %359 = arith.addf %354, %358 : vector<16x256xf32>
    %c0_133 = arith.constant 0 : index
    %c67 = arith.constant 67 : index
    %360 = vector.load %arg40[%c0_133, %c67] : memref<16x324xf32, #tpu.memory_space<vmem>>, vector<16x256xf32>
    %361 = vector.extract_strided_slice %257 {offsets = [0, 23], sizes = [16, 1], strides = [1, 1]} : vector<16x25xf32> to vector<16x1xf32>
    %362 = vector.broadcast %361 : vector<16x1xf32> to vector<16x256xf32>
    %363 = arith.mulf %360, %362 : vector<16x256xf32>
    %364 = arith.addf %359, %363 : vector<16x256xf32>
    %365 = vector.extract_strided_slice %9 {offsets = [3, 0], sizes = [1, 256], strides = [1, 1]} : vector<5x256xf32> to vector<1x256xf32>
    %366 = vector.broadcast %365 : vector<1x256xf32> to vector<16x256xf32>
    %367 = arith.mulf %364, %366 : vector<16x256xf32>
    %368 = arith.addf %340, %367 : vector<16x256xf32>
    %c0_134 = arith.constant 0 : index
    %c4 = arith.constant 4 : index
    %369 = vector.load %arg40[%c0_134, %c4] : memref<16x324xf32, #tpu.memory_space<vmem>>, vector<16x256xf32>
    %370 = vector.extract_strided_slice %257 {offsets = [0, 4], sizes = [16, 1], strides = [1, 1]} : vector<16x25xf32> to vector<16x1xf32>
    %371 = vector.broadcast %370 : vector<16x1xf32> to vector<16x256xf32>
    %372 = arith.mulf %369, %371 : vector<16x256xf32>
    %c0_135 = arith.constant 0 : index
    %c20 = arith.constant 20 : index
    %373 = vector.load %arg40[%c0_135, %c20] : memref<16x324xf32, #tpu.memory_space<vmem>>, vector<16x256xf32>
    %374 = vector.extract_strided_slice %257 {offsets = [0, 9], sizes = [16, 1], strides = [1, 1]} : vector<16x25xf32> to vector<16x1xf32>
    %375 = vector.broadcast %374 : vector<16x1xf32> to vector<16x256xf32>
    %376 = arith.mulf %373, %375 : vector<16x256xf32>
    %377 = arith.addf %372, %376 : vector<16x256xf32>
    %c0_136 = arith.constant 0 : index
    %c36 = arith.constant 36 : index
    %378 = vector.load %arg40[%c0_136, %c36] : memref<16x324xf32, #tpu.memory_space<vmem>>, vector<16x256xf32>
    %379 = vector.extract_strided_slice %257 {offsets = [0, 14], sizes = [16, 1], strides = [1, 1]} : vector<16x25xf32> to vector<16x1xf32>
    %380 = vector.broadcast %379 : vector<16x1xf32> to vector<16x256xf32>
    %381 = arith.mulf %378, %380 : vector<16x256xf32>
    %382 = arith.addf %377, %381 : vector<16x256xf32>
    %c0_137 = arith.constant 0 : index
    %c52 = arith.constant 52 : index
    %383 = vector.load %arg40[%c0_137, %c52] : memref<16x324xf32, #tpu.memory_space<vmem>>, vector<16x256xf32>
    %384 = vector.extract_strided_slice %257 {offsets = [0, 19], sizes = [16, 1], strides = [1, 1]} : vector<16x25xf32> to vector<16x1xf32>
    %385 = vector.broadcast %384 : vector<16x1xf32> to vector<16x256xf32>
    %386 = arith.mulf %383, %385 : vector<16x256xf32>
    %387 = arith.addf %382, %386 : vector<16x256xf32>
    %c0_138 = arith.constant 0 : index
    %c68 = arith.constant 68 : index
    %388 = vector.load %arg40[%c0_138, %c68] : memref<16x324xf32, #tpu.memory_space<vmem>>, vector<16x256xf32>
    %389 = vector.extract_strided_slice %257 {offsets = [0, 24], sizes = [16, 1], strides = [1, 1]} : vector<16x25xf32> to vector<16x1xf32>
    %390 = vector.broadcast %389 : vector<16x1xf32> to vector<16x256xf32>
    %391 = arith.mulf %388, %390 : vector<16x256xf32>
    %392 = arith.addf %387, %391 : vector<16x256xf32>
    %393 = vector.extract_strided_slice %9 {offsets = [4, 0], sizes = [1, 256], strides = [1, 1]} : vector<5x256xf32> to vector<1x256xf32>
    %394 = vector.broadcast %393 : vector<1x256xf32> to vector<16x256xf32>
    %395 = arith.mulf %392, %394 : vector<16x256xf32>
    %396 = arith.addf %368, %395 : vector<16x256xf32>
    %397 = vector.broadcast %258 : vector<16x1xf32> to vector<16x256xf32>
    %398 = arith.mulf %396, %397 : vector<16x256xf32>
    %399 = vector.broadcast %259 : vector<16x1xf32> to vector<16x256xf32>
    %400 = arith.addf %398, %399 : vector<16x256xf32>
    %cst_139 = arith.constant 0.000000e+00 : f32
    %401 = vector.broadcast %cst_139 : f32 to vector<16x256xf32>
    %402 = arith.maximumf %400, %401 : vector<16x256xf32>
    %cst_140 = arith.constant 6.000000e+00 : f32
    %403 = vector.broadcast %cst_140 : f32 to vector<16x256xf32>
    %404 = arith.minimumf %402, %403 : vector<16x256xf32>
    %405 = vector.extract_strided_slice %256 {offsets = [0, 2], sizes = [16, 25], strides = [1, 1]} : vector<16x27xf32> to vector<16x25xf32>
    %406 = vector.extract_strided_slice %256 {offsets = [0, 0], sizes = [16, 1], strides = [1, 1]} : vector<16x27xf32> to vector<16x1xf32>
    %407 = vector.extract_strided_slice %256 {offsets = [0, 1], sizes = [16, 1], strides = [1, 1]} : vector<16x27xf32> to vector<16x1xf32>
    %c0_141 = arith.constant 0 : index
    %c18_142 = arith.constant 18 : index
    %408 = vector.load %arg41[%c0_141, %c18_142] : memref<16x100xf32, #tpu.memory_space<vmem>>, vector<16x64xf32>
    tpu.vector_store %arg41[%c0_141, %c18_142], %172 {strides = array<i32>} : memref<16x100xf32, #tpu.memory_space<vmem>>, vector<16x64xf32>,
    %c0_143 = arith.constant 0 : index
    %c0_144 = arith.constant 0 : index
    %409 = vector.load %arg41[%c0_143, %c0_144] : memref<16x100xf32, #tpu.memory_space<vmem>>, vector<16x64xf32>
    %410 = vector.extract_strided_slice %405 {offsets = [0, 0], sizes = [16, 1], strides = [1, 1]} : vector<16x25xf32> to vector<16x1xf32>
    %411 = vector.broadcast %410 : vector<16x1xf32> to vector<16x64xf32>
    %412 = arith.mulf %409, %411 : vector<16x64xf32>
    %c0_145 = arith.constant 0 : index
    %c8 = arith.constant 8 : index
    %413 = vector.load %arg41[%c0_145, %c8] : memref<16x100xf32, #tpu.memory_space<vmem>>, vector<16x64xf32>
    %414 = vector.extract_strided_slice %405 {offsets = [0, 5], sizes = [16, 1], strides = [1, 1]} : vector<16x25xf32> to vector<16x1xf32>
    %415 = vector.broadcast %414 : vector<16x1xf32> to vector<16x64xf32>
    %416 = arith.mulf %413, %415 : vector<16x64xf32>
    %417 = arith.addf %412, %416 : vector<16x64xf32>
    %c0_146 = arith.constant 0 : index
    %c16_147 = arith.constant 16 : index
    %418 = vector.load %arg41[%c0_146, %c16_147] : memref<16x100xf32, #tpu.memory_space<vmem>>, vector<16x64xf32>
    %419 = vector.extract_strided_slice %405 {offsets = [0, 10], sizes = [16, 1], strides = [1, 1]} : vector<16x25xf32> to vector<16x1xf32>
    %420 = vector.broadcast %419 : vector<16x1xf32> to vector<16x64xf32>
    %421 = arith.mulf %418, %420 : vector<16x64xf32>
    %422 = arith.addf %417, %421 : vector<16x64xf32>
    %c0_148 = arith.constant 0 : index
    %c24 = arith.constant 24 : index
    %423 = vector.load %arg41[%c0_148, %c24] : memref<16x100xf32, #tpu.memory_space<vmem>>, vector<16x64xf32>
    %424 = vector.extract_strided_slice %405 {offsets = [0, 15], sizes = [16, 1], strides = [1, 1]} : vector<16x25xf32> to vector<16x1xf32>
    %425 = vector.broadcast %424 : vector<16x1xf32> to vector<16x64xf32>
    %426 = arith.mulf %423, %425 : vector<16x64xf32>
    %427 = arith.addf %422, %426 : vector<16x64xf32>
    %c0_149 = arith.constant 0 : index
    %c32_150 = arith.constant 32 : index
    %428 = vector.load %arg41[%c0_149, %c32_150] : memref<16x100xf32, #tpu.memory_space<vmem>>, vector<16x64xf32>
    %429 = vector.extract_strided_slice %405 {offsets = [0, 20], sizes = [16, 1], strides = [1, 1]} : vector<16x25xf32> to vector<16x1xf32>
    %430 = vector.broadcast %429 : vector<16x1xf32> to vector<16x64xf32>
    %431 = arith.mulf %428, %430 : vector<16x64xf32>
    %432 = arith.addf %427, %431 : vector<16x64xf32>
    %433 = vector.extract_strided_slice %10 {offsets = [0, 0], sizes = [1, 64], strides = [1, 1]} : vector<5x64xf32> to vector<1x64xf32>
    %434 = vector.broadcast %433 : vector<1x64xf32> to vector<16x64xf32>
    %435 = arith.mulf %432, %434 : vector<16x64xf32>
    %c0_151 = arith.constant 0 : index
    %c1_152 = arith.constant 1 : index
    %436 = vector.load %arg41[%c0_151, %c1_152] : memref<16x100xf32, #tpu.memory_space<vmem>>, vector<16x64xf32>
    %437 = vector.extract_strided_slice %405 {offsets = [0, 1], sizes = [16, 1], strides = [1, 1]} : vector<16x25xf32> to vector<16x1xf32>
    %438 = vector.broadcast %437 : vector<16x1xf32> to vector<16x64xf32>
    %439 = arith.mulf %436, %438 : vector<16x64xf32>
    %c0_153 = arith.constant 0 : index
    %c9_154 = arith.constant 9 : index
    %440 = vector.load %arg41[%c0_153, %c9_154] : memref<16x100xf32, #tpu.memory_space<vmem>>, vector<16x64xf32>
    %441 = vector.extract_strided_slice %405 {offsets = [0, 6], sizes = [16, 1], strides = [1, 1]} : vector<16x25xf32> to vector<16x1xf32>
    %442 = vector.broadcast %441 : vector<16x1xf32> to vector<16x64xf32>
    %443 = arith.mulf %440, %442 : vector<16x64xf32>
    %444 = arith.addf %439, %443 : vector<16x64xf32>
    %c0_155 = arith.constant 0 : index
    %c17_156 = arith.constant 17 : index
    %445 = vector.load %arg41[%c0_155, %c17_156] : memref<16x100xf32, #tpu.memory_space<vmem>>, vector<16x64xf32>
    %446 = vector.extract_strided_slice %405 {offsets = [0, 11], sizes = [16, 1], strides = [1, 1]} : vector<16x25xf32> to vector<16x1xf32>
    %447 = vector.broadcast %446 : vector<16x1xf32> to vector<16x64xf32>
    %448 = arith.mulf %445, %447 : vector<16x64xf32>
    %449 = arith.addf %444, %448 : vector<16x64xf32>
    %c0_157 = arith.constant 0 : index
    %c25_158 = arith.constant 25 : index
    %450 = vector.load %arg41[%c0_157, %c25_158] : memref<16x100xf32, #tpu.memory_space<vmem>>, vector<16x64xf32>
    %451 = vector.extract_strided_slice %405 {offsets = [0, 16], sizes = [16, 1], strides = [1, 1]} : vector<16x25xf32> to vector<16x1xf32>
    %452 = vector.broadcast %451 : vector<16x1xf32> to vector<16x64xf32>
    %453 = arith.mulf %450, %452 : vector<16x64xf32>
    %454 = arith.addf %449, %453 : vector<16x64xf32>
    %c0_159 = arith.constant 0 : index
    %c33_160 = arith.constant 33 : index
    %455 = vector.load %arg41[%c0_159, %c33_160] : memref<16x100xf32, #tpu.memory_space<vmem>>, vector<16x64xf32>
    %456 = vector.extract_strided_slice %405 {offsets = [0, 21], sizes = [16, 1], strides = [1, 1]} : vector<16x25xf32> to vector<16x1xf32>
    %457 = vector.broadcast %456 : vector<16x1xf32> to vector<16x64xf32>
    %458 = arith.mulf %455, %457 : vector<16x64xf32>
    %459 = arith.addf %454, %458 : vector<16x64xf32>
    %460 = vector.extract_strided_slice %10 {offsets = [1, 0], sizes = [1, 64], strides = [1, 1]} : vector<5x64xf32> to vector<1x64xf32>
    %461 = vector.broadcast %460 : vector<1x64xf32> to vector<16x64xf32>
    %462 = arith.mulf %459, %461 : vector<16x64xf32>
    %463 = arith.addf %435, %462 : vector<16x64xf32>
    %c0_161 = arith.constant 0 : index
    %c2_162 = arith.constant 2 : index
    %464 = vector.load %arg41[%c0_161, %c2_162] : memref<16x100xf32, #tpu.memory_space<vmem>>, vector<16x64xf32>
    %465 = vector.extract_strided_slice %405 {offsets = [0, 2], sizes = [16, 1], strides = [1, 1]} : vector<16x25xf32> to vector<16x1xf32>
    %466 = vector.broadcast %465 : vector<16x1xf32> to vector<16x64xf32>
    %467 = arith.mulf %464, %466 : vector<16x64xf32>
    %c0_163 = arith.constant 0 : index
    %c10_164 = arith.constant 10 : index
    %468 = vector.load %arg41[%c0_163, %c10_164] : memref<16x100xf32, #tpu.memory_space<vmem>>, vector<16x64xf32>
    %469 = vector.extract_strided_slice %405 {offsets = [0, 7], sizes = [16, 1], strides = [1, 1]} : vector<16x25xf32> to vector<16x1xf32>
    %470 = vector.broadcast %469 : vector<16x1xf32> to vector<16x64xf32>
    %471 = arith.mulf %468, %470 : vector<16x64xf32>
    %472 = arith.addf %467, %471 : vector<16x64xf32>
    %c0_165 = arith.constant 0 : index
    %c18_166 = arith.constant 18 : index
    %473 = vector.load %arg41[%c0_165, %c18_166] : memref<16x100xf32, #tpu.memory_space<vmem>>, vector<16x64xf32>
    %474 = vector.extract_strided_slice %405 {offsets = [0, 12], sizes = [16, 1], strides = [1, 1]} : vector<16x25xf32> to vector<16x1xf32>
    %475 = vector.broadcast %474 : vector<16x1xf32> to vector<16x64xf32>
    %476 = arith.mulf %473, %475 : vector<16x64xf32>
    %477 = arith.addf %472, %476 : vector<16x64xf32>
    %c0_167 = arith.constant 0 : index
    %c26_168 = arith.constant 26 : index
    %478 = vector.load %arg41[%c0_167, %c26_168] : memref<16x100xf32, #tpu.memory_space<vmem>>, vector<16x64xf32>
    %479 = vector.extract_strided_slice %405 {offsets = [0, 17], sizes = [16, 1], strides = [1, 1]} : vector<16x25xf32> to vector<16x1xf32>
    %480 = vector.broadcast %479 : vector<16x1xf32> to vector<16x64xf32>
    %481 = arith.mulf %478, %480 : vector<16x64xf32>
    %482 = arith.addf %477, %481 : vector<16x64xf32>
    %c0_169 = arith.constant 0 : index
    %c34_170 = arith.constant 34 : index
    %483 = vector.load %arg41[%c0_169, %c34_170] : memref<16x100xf32, #tpu.memory_space<vmem>>, vector<16x64xf32>
    %484 = vector.extract_strided_slice %405 {offsets = [0, 22], sizes = [16, 1], strides = [1, 1]} : vector<16x25xf32> to vector<16x1xf32>
    %485 = vector.broadcast %484 : vector<16x1xf32> to vector<16x64xf32>
    %486 = arith.mulf %483, %485 : vector<16x64xf32>
    %487 = arith.addf %482, %486 : vector<16x64xf32>
    %488 = arith.addf %463, %487 : vector<16x64xf32>
    %c0_171 = arith.constant 0 : index
    %c3_172 = arith.constant 3 : index
    %489 = vector.load %arg41[%c0_171, %c3_172] : memref<16x100xf32, #tpu.memory_space<vmem>>, vector<16x64xf32>
    %490 = vector.extract_strided_slice %405 {offsets = [0, 3], sizes = [16, 1], strides = [1, 1]} : vector<16x25xf32> to vector<16x1xf32>
    %491 = vector.broadcast %490 : vector<16x1xf32> to vector<16x64xf32>
    %492 = arith.mulf %489, %491 : vector<16x64xf32>
    %c0_173 = arith.constant 0 : index
    %c11_174 = arith.constant 11 : index
    %493 = vector.load %arg41[%c0_173, %c11_174] : memref<16x100xf32, #tpu.memory_space<vmem>>, vector<16x64xf32>
    %494 = vector.extract_strided_slice %405 {offsets = [0, 8], sizes = [16, 1], strides = [1, 1]} : vector<16x25xf32> to vector<16x1xf32>
    %495 = vector.broadcast %494 : vector<16x1xf32> to vector<16x64xf32>
    %496 = arith.mulf %493, %495 : vector<16x64xf32>
    %497 = arith.addf %492, %496 : vector<16x64xf32>
    %c0_175 = arith.constant 0 : index
    %c19_176 = arith.constant 19 : index
    %498 = vector.load %arg41[%c0_175, %c19_176] : memref<16x100xf32, #tpu.memory_space<vmem>>, vector<16x64xf32>
    %499 = vector.extract_strided_slice %405 {offsets = [0, 13], sizes = [16, 1], strides = [1, 1]} : vector<16x25xf32> to vector<16x1xf32>
    %500 = vector.broadcast %499 : vector<16x1xf32> to vector<16x64xf32>
    %501 = arith.mulf %498, %500 : vector<16x64xf32>
    %502 = arith.addf %497, %501 : vector<16x64xf32>
    %c0_177 = arith.constant 0 : index
    %c27_178 = arith.constant 27 : index
    %503 = vector.load %arg41[%c0_177, %c27_178] : memref<16x100xf32, #tpu.memory_space<vmem>>, vector<16x64xf32>
    %504 = vector.extract_strided_slice %405 {offsets = [0, 18], sizes = [16, 1], strides = [1, 1]} : vector<16x25xf32> to vector<16x1xf32>
    %505 = vector.broadcast %504 : vector<16x1xf32> to vector<16x64xf32>
    %506 = arith.mulf %503, %505 : vector<16x64xf32>
    %507 = arith.addf %502, %506 : vector<16x64xf32>
    %c0_179 = arith.constant 0 : index
    %c35_180 = arith.constant 35 : index
    %508 = vector.load %arg41[%c0_179, %c35_180] : memref<16x100xf32, #tpu.memory_space<vmem>>, vector<16x64xf32>
    %509 = vector.extract_strided_slice %405 {offsets = [0, 23], sizes = [16, 1], strides = [1, 1]} : vector<16x25xf32> to vector<16x1xf32>
    %510 = vector.broadcast %509 : vector<16x1xf32> to vector<16x64xf32>
    %511 = arith.mulf %508, %510 : vector<16x64xf32>
    %512 = arith.addf %507, %511 : vector<16x64xf32>
    %513 = vector.extract_strided_slice %10 {offsets = [3, 0], sizes = [1, 64], strides = [1, 1]} : vector<5x64xf32> to vector<1x64xf32>
    %514 = vector.broadcast %513 : vector<1x64xf32> to vector<16x64xf32>
    %515 = arith.mulf %512, %514 : vector<16x64xf32>
    %516 = arith.addf %488, %515 : vector<16x64xf32>
    %c0_181 = arith.constant 0 : index
    %c4_182 = arith.constant 4 : index
    %517 = vector.load %arg41[%c0_181, %c4_182] : memref<16x100xf32, #tpu.memory_space<vmem>>, vector<16x64xf32>
    %518 = vector.extract_strided_slice %405 {offsets = [0, 4], sizes = [16, 1], strides = [1, 1]} : vector<16x25xf32> to vector<16x1xf32>
    %519 = vector.broadcast %518 : vector<16x1xf32> to vector<16x64xf32>
    %520 = arith.mulf %517, %519 : vector<16x64xf32>
    %c0_183 = arith.constant 0 : index
    %c12 = arith.constant 12 : index
    %521 = vector.load %arg41[%c0_183, %c12] : memref<16x100xf32, #tpu.memory_space<vmem>>, vector<16x64xf32>
    %522 = vector.extract_strided_slice %405 {offsets = [0, 9], sizes = [16, 1], strides = [1, 1]} : vector<16x25xf32> to vector<16x1xf32>
    %523 = vector.broadcast %522 : vector<16x1xf32> to vector<16x64xf32>
    %524 = arith.mulf %521, %523 : vector<16x64xf32>
    %525 = arith.addf %520, %524 : vector<16x64xf32>
    %c0_184 = arith.constant 0 : index
    %c20_185 = arith.constant 20 : index
    %526 = vector.load %arg41[%c0_184, %c20_185] : memref<16x100xf32, #tpu.memory_space<vmem>>, vector<16x64xf32>
    %527 = vector.extract_strided_slice %405 {offsets = [0, 14], sizes = [16, 1], strides = [1, 1]} : vector<16x25xf32> to vector<16x1xf32>
    %528 = vector.broadcast %527 : vector<16x1xf32> to vector<16x64xf32>
    %529 = arith.mulf %526, %528 : vector<16x64xf32>
    %530 = arith.addf %525, %529 : vector<16x64xf32>
    %c0_186 = arith.constant 0 : index
    %c28 = arith.constant 28 : index
    %531 = vector.load %arg41[%c0_186, %c28] : memref<16x100xf32, #tpu.memory_space<vmem>>, vector<16x64xf32>
    %532 = vector.extract_strided_slice %405 {offsets = [0, 19], sizes = [16, 1], strides = [1, 1]} : vector<16x25xf32> to vector<16x1xf32>
    %533 = vector.broadcast %532 : vector<16x1xf32> to vector<16x64xf32>
    %534 = arith.mulf %531, %533 : vector<16x64xf32>
    %535 = arith.addf %530, %534 : vector<16x64xf32>
    %c0_187 = arith.constant 0 : index
    %c36_188 = arith.constant 36 : index
    %536 = vector.load %arg41[%c0_187, %c36_188] : memref<16x100xf32, #tpu.memory_space<vmem>>, vector<16x64xf32>
    %537 = vector.extract_strided_slice %405 {offsets = [0, 24], sizes = [16, 1], strides = [1, 1]} : vector<16x25xf32> to vector<16x1xf32>
    %538 = vector.broadcast %537 : vector<16x1xf32> to vector<16x64xf32>
    %539 = arith.mulf %536, %538 : vector<16x64xf32>
    %540 = arith.addf %535, %539 : vector<16x64xf32>
    %541 = vector.extract_strided_slice %10 {offsets = [4, 0], sizes = [1, 64], strides = [1, 1]} : vector<5x64xf32> to vector<1x64xf32>
    %542 = vector.broadcast %541 : vector<1x64xf32> to vector<16x64xf32>
    %543 = arith.mulf %540, %542 : vector<16x64xf32>
    %544 = arith.addf %516, %543 : vector<16x64xf32>
    %545 = vector.broadcast %406 : vector<16x1xf32> to vector<16x64xf32>
    %546 = arith.mulf %544, %545 : vector<16x64xf32>
    %547 = vector.broadcast %407 : vector<16x1xf32> to vector<16x64xf32>
    %548 = arith.addf %546, %547 : vector<16x64xf32>
    %cst_189 = arith.constant 0.000000e+00 : f32
    %549 = vector.broadcast %cst_189 : f32 to vector<16x64xf32>
    %550 = arith.maximumf %548, %549 : vector<16x64xf32>
    %cst_190 = arith.constant 6.000000e+00 : f32
    %551 = vector.broadcast %cst_190 : f32 to vector<16x64xf32>
    %552 = arith.minimumf %550, %551 : vector<16x64xf32>
    %c0_191 = arith.constant 0 : index
    %c34_192 = arith.constant 34 : index
    %553 = vector.load %arg40[%c0_191, %c34_192] : memref<16x324xf32, #tpu.memory_space<vmem>>, vector<16x256xf32>
    tpu.vector_store %arg40[%c0_191, %c34_192], %404 {strides = array<i32>} : memref<16x324xf32, #tpu.memory_space<vmem>>, vector<16x256xf32>,
    %c0_193 = arith.constant 0 : index
    %c35_194 = arith.constant 35 : index
    %554 = vector.load %arg40[%c0_193, %c35_194] : memref<16x324xf32, #tpu.memory_space<vmem>>, vector<16x256xf32>
    %c0_195 = arith.constant 0 : index
    %c50_196 = arith.constant 50 : index
    %555 = vector.load %arg40[%c0_195, %c50_196] : memref<16x324xf32, #tpu.memory_space<vmem>>, vector<16x256xf32>
    %c0_197 = arith.constant 0 : index
    %c51_198 = arith.constant 51 : index
    %556 = vector.load %arg40[%c0_197, %c51_198] : memref<16x324xf32, #tpu.memory_space<vmem>>, vector<16x256xf32>
    %557 = arith.maximumf %404, %554 : vector<16x256xf32>
    %558 = arith.maximumf %555, %556 : vector<16x256xf32>
    %559 = arith.maximumf %557, %558 : vector<16x256xf32>
    %c0_199 = arith.constant 0 : index
    %c0_200 = arith.constant 0 : index
    %560 = vector.load %arg9[%c0_199, %c0_200] : memref<256x64xf32, #tpu.memory_space<vmem>>, vector<256x64xf32>
    %cst_201 = arith.constant dense<0.000000e+00> : vector<16x64xf32>
    %561 = tpu.matmul %559, %560, %cst_201 {dimension_numbers = #tpu.dot_dimension_numbers<[1], [0], [0], [1], [0, 0, 1, 1], [], []>, precision = #tpu.contract_precision<fp32>} : vector<16x256xf32>, vector<256x64xf32>, vector<16x64xf32> -> vector<16x64xf32>
    %562 = arith.addf %552, %561 : vector<16x64xf32>
    %c0_202 = arith.constant 0 : index
    %c18_203 = arith.constant 18 : index
    %563 = vector.load %arg41[%c0_202, %c18_203] : memref<16x100xf32, #tpu.memory_space<vmem>>, vector<16x64xf32>
    tpu.vector_store %arg41[%c0_202, %c18_203], %562 {strides = array<i32>} : memref<16x100xf32, #tpu.memory_space<vmem>>, vector<16x64xf32>,
    %c0_204 = arith.constant 0 : index
    %c19_205 = arith.constant 19 : index
    %564 = vector.load %arg41[%c0_204, %c19_205] : memref<16x100xf32, #tpu.memory_space<vmem>>, vector<16x64xf32>
    %c0_206 = arith.constant 0 : index
    %c26_207 = arith.constant 26 : index
    %565 = vector.load %arg41[%c0_206, %c26_207] : memref<16x100xf32, #tpu.memory_space<vmem>>, vector<16x64xf32>
    %c0_208 = arith.constant 0 : index
    %c27_209 = arith.constant 27 : index
    %566 = vector.load %arg41[%c0_208, %c27_209] : memref<16x100xf32, #tpu.memory_space<vmem>>, vector<16x64xf32>
    %567 = arith.maximumf %562, %564 : vector<16x64xf32>
    %568 = arith.maximumf %565, %566 : vector<16x64xf32>
    %569 = arith.maximumf %567, %568 : vector<16x64xf32>
    %c0_210 = arith.constant 0 : index
    %c0_211 = arith.constant 0 : index
    %570 = vector.load %arg10[%c0_210, %c0_211] : memref<64x16xf32, #tpu.memory_space<vmem>>, vector<64x16xf32>
    %cst_212 = arith.constant dense<0.000000e+00> : vector<16x16xf32>
    %571 = tpu.matmul %569, %570, %cst_212 {dimension_numbers = #tpu.dot_dimension_numbers<[1], [0], [0], [1], [0, 0, 1, 1], [], []>, precision = #tpu.contract_precision<fp32>} : vector<16x64xf32>, vector<64x16xf32>, vector<16x16xf32> -> vector<16x16xf32>
    %572 = arith.addf %90, %571 : vector<16x16xf32>
    %c0_213 = arith.constant 0 : index
    %c0_214 = arith.constant 0 : index
    %573 = vector.load %arg19[%c0_213, %c0_214] : memref<8x16xbf16, #tpu.memory_space<vmem>>, vector<8x16xbf16>
    %c0_215 = arith.constant 0 : index
    %c0_216 = arith.constant 0 : index
    %574 = vector.load %arg20[%c0_215, %c0_216] : memref<8x13xf32, #tpu.memory_space<vmem>>, vector<8x13xf32>
    %575 = arith.truncf %404 : vector<16x256xf32> to vector<16x256xbf16>
    %cst_217 = arith.constant dense<0.000000e+00> : vector<8x256xf32>
    %576 = tpu.matmul %573, %575, %cst_217 {dimension_numbers = #tpu.dot_dimension_numbers<[1], [0], [0], [1], [0, 0, 1, 1], [], []>} : vector<8x16xbf16>, vector<16x256xbf16>, vector<8x256xf32> -> vector<8x256xf32>
    %577 = vector.extract_strided_slice %574 {offsets = [0, 0], sizes = [8, 1], strides = [1, 1]} : vector<8x13xf32> to vector<8x1xf32>
    %578 = vector.broadcast %577 : vector<8x1xf32> to vector<8x256xf32>
    %579 = arith.mulf %576, %578 : vector<8x256xf32>
    %580 = vector.extract_strided_slice %574 {offsets = [0, 1], sizes = [8, 1], strides = [1, 1]} : vector<8x13xf32> to vector<8x1xf32>
    %581 = vector.broadcast %580 : vector<8x1xf32> to vector<8x256xf32>
    %582 = arith.addf %579, %581 : vector<8x256xf32>
    %cst_218 = arith.constant 0.000000e+00 : f32
    %583 = vector.broadcast %cst_218 : f32 to vector<8x256xf32>
    %584 = arith.maximumf %582, %583 : vector<8x256xf32>
    %cst_219 = arith.constant 6.000000e+00 : f32
    %585 = vector.broadcast %cst_219 : f32 to vector<8x256xf32>
    %586 = arith.minimumf %584, %585 : vector<8x256xf32>
    %587 = vector.extract_strided_slice %574 {offsets = [0, 4], sizes = [8, 9], strides = [1, 1]} : vector<8x13xf32> to vector<8x9xf32>
    %588 = vector.extract_strided_slice %574 {offsets = [0, 2], sizes = [8, 1], strides = [1, 1]} : vector<8x13xf32> to vector<8x1xf32>
    %589 = vector.extract_strided_slice %574 {offsets = [0, 3], sizes = [8, 1], strides = [1, 1]} : vector<8x13xf32> to vector<8x1xf32>
    %c0_220 = arith.constant 0 : index
    %c34_221 = arith.constant 34 : index
    %590 = vector.load %arg40[%c0_220, %c34_221] : memref<16x324xf32, #tpu.memory_space<vmem>>, vector<8x256xf32>
    tpu.vector_store %arg40[%c0_220, %c34_221], %586 {strides = array<i32>} : memref<16x324xf32, #tpu.memory_space<vmem>>, vector<8x256xf32>,
    %c0_222 = arith.constant 0 : index
    %c17_223 = arith.constant 17 : index
    %591 = vector.load %arg40[%c0_222, %c17_223] : memref<16x324xf32, #tpu.memory_space<vmem>>, vector<8x256xf32>
    %592 = vector.extract_strided_slice %587 {offsets = [0, 0], sizes = [8, 1], strides = [1, 1]} : vector<8x9xf32> to vector<8x1xf32>
    %593 = vector.broadcast %592 : vector<8x1xf32> to vector<8x256xf32>
    %594 = arith.mulf %591, %593 : vector<8x256xf32>
    %c0_224 = arith.constant 0 : index
    %c33_225 = arith.constant 33 : index
    %595 = vector.load %arg40[%c0_224, %c33_225] : memref<16x324xf32, #tpu.memory_space<vmem>>, vector<8x256xf32>
    %596 = vector.extract_strided_slice %587 {offsets = [0, 3], sizes = [8, 1], strides = [1, 1]} : vector<8x9xf32> to vector<8x1xf32>
    %597 = vector.broadcast %596 : vector<8x1xf32> to vector<8x256xf32>
    %598 = arith.mulf %595, %597 : vector<8x256xf32>
    %599 = arith.addf %594, %598 : vector<8x256xf32>
    %c0_226 = arith.constant 0 : index
    %c49_227 = arith.constant 49 : index
    %600 = vector.load %arg40[%c0_226, %c49_227] : memref<16x324xf32, #tpu.memory_space<vmem>>, vector<8x256xf32>
    %601 = vector.extract_strided_slice %587 {offsets = [0, 6], sizes = [8, 1], strides = [1, 1]} : vector<8x9xf32> to vector<8x1xf32>
    %602 = vector.broadcast %601 : vector<8x1xf32> to vector<8x256xf32>
    %603 = arith.mulf %600, %602 : vector<8x256xf32>
    %604 = arith.addf %599, %603 : vector<8x256xf32>
    %605 = vector.extract_strided_slice %9 {offsets = [1, 0], sizes = [1, 256], strides = [1, 1]} : vector<5x256xf32> to vector<1x256xf32>
    %606 = vector.broadcast %605 : vector<1x256xf32> to vector<8x256xf32>
    %607 = arith.mulf %604, %606 : vector<8x256xf32>
    %c0_228 = arith.constant 0 : index
    %c18_229 = arith.constant 18 : index
    %608 = vector.load %arg40[%c0_228, %c18_229] : memref<16x324xf32, #tpu.memory_space<vmem>>, vector<8x256xf32>
    %609 = vector.extract_strided_slice %587 {offsets = [0, 1], sizes = [8, 1], strides = [1, 1]} : vector<8x9xf32> to vector<8x1xf32>
    %610 = vector.broadcast %609 : vector<8x1xf32> to vector<8x256xf32>
    %611 = arith.mulf %608, %610 : vector<8x256xf32>
    %c0_230 = arith.constant 0 : index
    %c34_231 = arith.constant 34 : index
    %612 = vector.load %arg40[%c0_230, %c34_231] : memref<16x324xf32, #tpu.memory_space<vmem>>, vector<8x256xf32>
    %613 = vector.extract_strided_slice %587 {offsets = [0, 4], sizes = [8, 1], strides = [1, 1]} : vector<8x9xf32> to vector<8x1xf32>
    %614 = vector.broadcast %613 : vector<8x1xf32> to vector<8x256xf32>
    %615 = arith.mulf %612, %614 : vector<8x256xf32>
    %616 = arith.addf %611, %615 : vector<8x256xf32>
    %c0_232 = arith.constant 0 : index
    %c50_233 = arith.constant 50 : index
    %617 = vector.load %arg40[%c0_232, %c50_233] : memref<16x324xf32, #tpu.memory_space<vmem>>, vector<8x256xf32>
    %618 = vector.extract_strided_slice %587 {offsets = [0, 7], sizes = [8, 1], strides = [1, 1]} : vector<8x9xf32> to vector<8x1xf32>
    %619 = vector.broadcast %618 : vector<8x1xf32> to vector<8x256xf32>
    %620 = arith.mulf %617, %619 : vector<8x256xf32>
    %621 = arith.addf %616, %620 : vector<8x256xf32>
    %622 = arith.addf %607, %621 : vector<8x256xf32>
    %c0_234 = arith.constant 0 : index
    %c19_235 = arith.constant 19 : index
    %623 = vector.load %arg40[%c0_234, %c19_235] : memref<16x324xf32, #tpu.memory_space<vmem>>, vector<8x256xf32>
    %624 = vector.extract_strided_slice %587 {offsets = [0, 2], sizes = [8, 1], strides = [1, 1]} : vector<8x9xf32> to vector<8x1xf32>
    %625 = vector.broadcast %624 : vector<8x1xf32> to vector<8x256xf32>
    %626 = arith.mulf %623, %625 : vector<8x256xf32>
    %c0_236 = arith.constant 0 : index
    %c35_237 = arith.constant 35 : index
    %627 = vector.load %arg40[%c0_236, %c35_237] : memref<16x324xf32, #tpu.memory_space<vmem>>, vector<8x256xf32>
    %628 = vector.extract_strided_slice %587 {offsets = [0, 5], sizes = [8, 1], strides = [1, 1]} : vector<8x9xf32> to vector<8x1xf32>
    %629 = vector.broadcast %628 : vector<8x1xf32> to vector<8x256xf32>
    %630 = arith.mulf %627, %629 : vector<8x256xf32>
    %631 = arith.addf %626, %630 : vector<8x256xf32>
    %c0_238 = arith.constant 0 : index
    %c51_239 = arith.constant 51 : index
    %632 = vector.load %arg40[%c0_238, %c51_239] : memref<16x324xf32, #tpu.memory_space<vmem>>, vector<8x256xf32>
    %633 = vector.extract_strided_slice %587 {offsets = [0, 8], sizes = [8, 1], strides = [1, 1]} : vector<8x9xf32> to vector<8x1xf32>
    %634 = vector.broadcast %633 : vector<8x1xf32> to vector<8x256xf32>
    %635 = arith.mulf %632, %634 : vector<8x256xf32>
    %636 = arith.addf %631, %635 : vector<8x256xf32>
    %637 = vector.extract_strided_slice %9 {offsets = [3, 0], sizes = [1, 256], strides = [1, 1]} : vector<5x256xf32> to vector<1x256xf32>
    %638 = vector.broadcast %637 : vector<1x256xf32> to vector<8x256xf32>
    %639 = arith.mulf %636, %638 : vector<8x256xf32>
    %640 = arith.addf %622, %639 : vector<8x256xf32>
    %641 = vector.broadcast %588 : vector<8x1xf32> to vector<8x256xf32>
    %642 = arith.mulf %640, %641 : vector<8x256xf32>
    %643 = vector.broadcast %589 : vector<8x1xf32> to vector<8x256xf32>
    %644 = arith.addf %642, %643 : vector<8x256xf32>
    %cst_240 = arith.constant 0.000000e+00 : f32
    %645 = vector.broadcast %cst_240 : f32 to vector<8x256xf32>
    %646 = arith.maximumf %644, %645 : vector<8x256xf32>
    %cst_241 = arith.constant 6.000000e+00 : f32
    %647 = vector.broadcast %cst_241 : f32 to vector<8x256xf32>
    %648 = arith.minimumf %646, %647 : vector<8x256xf32>
    %649 = vector.extract_strided_slice %586 {offsets = [0, 0], sizes = [4, 256], strides = [1, 1]} : vector<8x256xf32> to vector<4x256xf32>
    %650 = vector.extract_strided_slice %648 {offsets = [0, 0], sizes = [4, 256], strides = [1, 1]} : vector<8x256xf32> to vector<4x256xf32>
    %651 = vector.extract_strided_slice %586 {offsets = [4, 0], sizes = [4, 256], strides = [1, 1]} : vector<8x256xf32> to vector<4x256xf32>
    %652 = vector.extract_strided_slice %648 {offsets = [4, 0], sizes = [4, 256], strides = [1, 1]} : vector<8x256xf32> to vector<4x256xf32>
    %c0_242 = arith.constant 0 : index
    %c0_243 = arith.constant 0 : index
    %653 = vector.load %arg21[%c0_242, %c0_243] : memref<4x8xbf16, #tpu.memory_space<vmem>>, vector<4x8xbf16>
    %c0_244 = arith.constant 0 : index
    %c0_245 = arith.constant 0 : index
    %654 = vector.load %arg22[%c0_244, %c0_245] : memref<4x13xf32, #tpu.memory_space<vmem>>, vector<4x13xf32>
    %655 = vector.extract_strided_slice %653 {offsets = [0, 0], sizes = [4, 4], strides = [1, 1]} : vector<4x8xbf16> to vector<4x4xbf16>
    %656 = arith.truncf %649 : vector<4x256xf32> to vector<4x256xbf16>
    %cst_246 = arith.constant dense<0.000000e+00> : vector<4x256xf32>
    %657 = tpu.matmul %655, %656, %cst_246 {dimension_numbers = #tpu.dot_dimension_numbers<[1], [0], [0], [1], [0, 0, 1, 1], [], []>} : vector<4x4xbf16>, vector<4x256xbf16>, vector<4x256xf32> -> vector<4x256xf32>
    %658 = vector.extract_strided_slice %653 {offsets = [0, 4], sizes = [4, 4], strides = [1, 1]} : vector<4x8xbf16> to vector<4x4xbf16>
    %659 = arith.truncf %650 : vector<4x256xf32> to vector<4x256xbf16>
    %cst_247 = arith.constant dense<0.000000e+00> : vector<4x256xf32>
    %660 = tpu.matmul %658, %659, %cst_247 {dimension_numbers = #tpu.dot_dimension_numbers<[1], [0], [0], [1], [0, 0, 1, 1], [], []>} : vector<4x4xbf16>, vector<4x256xbf16>, vector<4x256xf32> -> vector<4x256xf32>
    %661 = arith.addf %657, %660 : vector<4x256xf32>
    %662 = vector.extract_strided_slice %654 {offsets = [0, 0], sizes = [4, 1], strides = [1, 1]} : vector<4x13xf32> to vector<4x1xf32>
    %663 = vector.broadcast %662 : vector<4x1xf32> to vector<4x256xf32>
    %664 = arith.mulf %661, %663 : vector<4x256xf32>
    %665 = vector.extract_strided_slice %654 {offsets = [0, 1], sizes = [4, 1], strides = [1, 1]} : vector<4x13xf32> to vector<4x1xf32>
    %666 = vector.broadcast %665 : vector<4x1xf32> to vector<4x256xf32>
    %667 = arith.addf %664, %666 : vector<4x256xf32>
    %cst_248 = arith.constant 0.000000e+00 : f32
    %668 = vector.broadcast %cst_248 : f32 to vector<4x256xf32>
    %669 = arith.maximumf %667, %668 : vector<4x256xf32>
    %cst_249 = arith.constant 6.000000e+00 : f32
    %670 = vector.broadcast %cst_249 : f32 to vector<4x256xf32>
    %671 = arith.minimumf %669, %670 : vector<4x256xf32>
    %672 = vector.extract_strided_slice %654 {offsets = [0, 4], sizes = [4, 9], strides = [1, 1]} : vector<4x13xf32> to vector<4x9xf32>
    %673 = vector.extract_strided_slice %654 {offsets = [0, 2], sizes = [4, 1], strides = [1, 1]} : vector<4x13xf32> to vector<4x1xf32>
    %674 = vector.extract_strided_slice %654 {offsets = [0, 3], sizes = [4, 1], strides = [1, 1]} : vector<4x13xf32> to vector<4x1xf32>
    %c0_250 = arith.constant 0 : index
    %c34_251 = arith.constant 34 : index
    %675 = vector.load %arg40[%c0_250, %c34_251] : memref<16x324xf32, #tpu.memory_space<vmem>>, vector<4x256xf32>
    tpu.vector_store %arg40[%c0_250, %c34_251], %671 {strides = array<i32>} : memref<16x324xf32, #tpu.memory_space<vmem>>, vector<4x256xf32>,
    %c0_252 = arith.constant 0 : index
    %c17_253 = arith.constant 17 : index
    %676 = vector.load %arg40[%c0_252, %c17_253] : memref<16x324xf32, #tpu.memory_space<vmem>>, vector<4x256xf32>
    %677 = vector.extract_strided_slice %672 {offsets = [0, 0], sizes = [4, 1], strides = [1, 1]} : vector<4x9xf32> to vector<4x1xf32>
    %678 = vector.broadcast %677 : vector<4x1xf32> to vector<4x256xf32>
    %679 = arith.mulf %676, %678 : vector<4x256xf32>
    %c0_254 = arith.constant 0 : index
    %c33_255 = arith.constant 33 : index
    %680 = vector.load %arg40[%c0_254, %c33_255] : memref<16x324xf32, #tpu.memory_space<vmem>>, vector<4x256xf32>
    %681 = vector.extract_strided_slice %672 {offsets = [0, 3], sizes = [4, 1], strides = [1, 1]} : vector<4x9xf32> to vector<4x1xf32>
    %682 = vector.broadcast %681 : vector<4x1xf32> to vector<4x256xf32>
    %683 = arith.mulf %680, %682 : vector<4x256xf32>
    %684 = arith.addf %679, %683 : vector<4x256xf32>
    %c0_256 = arith.constant 0 : index
    %c49_257 = arith.constant 49 : index
    %685 = vector.load %arg40[%c0_256, %c49_257] : memref<16x324xf32, #tpu.memory_space<vmem>>, vector<4x256xf32>
    %686 = vector.extract_strided_slice %672 {offsets = [0, 6], sizes = [4, 1], strides = [1, 1]} : vector<4x9xf32> to vector<4x1xf32>
    %687 = vector.broadcast %686 : vector<4x1xf32> to vector<4x256xf32>
    %688 = arith.mulf %685, %687 : vector<4x256xf32>
    %689 = arith.addf %684, %688 : vector<4x256xf32>
    %690 = vector.extract_strided_slice %9 {offsets = [1, 0], sizes = [1, 256], strides = [1, 1]} : vector<5x256xf32> to vector<1x256xf32>
    %691 = vector.broadcast %690 : vector<1x256xf32> to vector<4x256xf32>
    %692 = arith.mulf %689, %691 : vector<4x256xf32>
    %c0_258 = arith.constant 0 : index
    %c18_259 = arith.constant 18 : index
    %693 = vector.load %arg40[%c0_258, %c18_259] : memref<16x324xf32, #tpu.memory_space<vmem>>, vector<4x256xf32>
    %694 = vector.extract_strided_slice %672 {offsets = [0, 1], sizes = [4, 1], strides = [1, 1]} : vector<4x9xf32> to vector<4x1xf32>
    %695 = vector.broadcast %694 : vector<4x1xf32> to vector<4x256xf32>
    %696 = arith.mulf %693, %695 : vector<4x256xf32>
    %c0_260 = arith.constant 0 : index
    %c34_261 = arith.constant 34 : index
    %697 = vector.load %arg40[%c0_260, %c34_261] : memref<16x324xf32, #tpu.memory_space<vmem>>, vector<4x256xf32>
    %698 = vector.extract_strided_slice %672 {offsets = [0, 4], sizes = [4, 1], strides = [1, 1]} : vector<4x9xf32> to vector<4x1xf32>
    %699 = vector.broadcast %698 : vector<4x1xf32> to vector<4x256xf32>
    %700 = arith.mulf %697, %699 : vector<4x256xf32>
    %701 = arith.addf %696, %700 : vector<4x256xf32>
    %c0_262 = arith.constant 0 : index
    %c50_263 = arith.constant 50 : index
    %702 = vector.load %arg40[%c0_262, %c50_263] : memref<16x324xf32, #tpu.memory_space<vmem>>, vector<4x256xf32>
    %703 = vector.extract_strided_slice %672 {offsets = [0, 7], sizes = [4, 1], strides = [1, 1]} : vector<4x9xf32> to vector<4x1xf32>
    %704 = vector.broadcast %703 : vector<4x1xf32> to vector<4x256xf32>
    %705 = arith.mulf %702, %704 : vector<4x256xf32>
    %706 = arith.addf %701, %705 : vector<4x256xf32>
    %707 = arith.addf %692, %706 : vector<4x256xf32>
    %c0_264 = arith.constant 0 : index
    %c19_265 = arith.constant 19 : index
    %708 = vector.load %arg40[%c0_264, %c19_265] : memref<16x324xf32, #tpu.memory_space<vmem>>, vector<4x256xf32>
    %709 = vector.extract_strided_slice %672 {offsets = [0, 2], sizes = [4, 1], strides = [1, 1]} : vector<4x9xf32> to vector<4x1xf32>
    %710 = vector.broadcast %709 : vector<4x1xf32> to vector<4x256xf32>
    %711 = arith.mulf %708, %710 : vector<4x256xf32>
    %c0_266 = arith.constant 0 : index
    %c35_267 = arith.constant 35 : index
    %712 = vector.load %arg40[%c0_266, %c35_267] : memref<16x324xf32, #tpu.memory_space<vmem>>, vector<4x256xf32>
    %713 = vector.extract_strided_slice %672 {offsets = [0, 5], sizes = [4, 1], strides = [1, 1]} : vector<4x9xf32> to vector<4x1xf32>
    %714 = vector.broadcast %713 : vector<4x1xf32> to vector<4x256xf32>
    %715 = arith.mulf %712, %714 : vector<4x256xf32>
    %716 = arith.addf %711, %715 : vector<4x256xf32>
    %c0_268 = arith.constant 0 : index
    %c51_269 = arith.constant 51 : index
    %717 = vector.load %arg40[%c0_268, %c51_269] : memref<16x324xf32, #tpu.memory_space<vmem>>, vector<4x256xf32>
    %718 = vector.extract_strided_slice %672 {offsets = [0, 8], sizes = [4, 1], strides = [1, 1]} : vector<4x9xf32> to vector<4x1xf32>
    %719 = vector.broadcast %718 : vector<4x1xf32> to vector<4x256xf32>
    %720 = arith.mulf %717, %719 : vector<4x256xf32>
    %721 = arith.addf %716, %720 : vector<4x256xf32>
    %722 = vector.extract_strided_slice %9 {offsets = [3, 0], sizes = [1, 256], strides = [1, 1]} : vector<5x256xf32> to vector<1x256xf32>
    %723 = vector.broadcast %722 : vector<1x256xf32> to vector<4x256xf32>
    %724 = arith.mulf %721, %723 : vector<4x256xf32>
    %725 = arith.addf %707, %724 : vector<4x256xf32>
    %726 = vector.broadcast %673 : vector<4x1xf32> to vector<4x256xf32>
    %727 = arith.mulf %725, %726 : vector<4x256xf32>
    %728 = vector.broadcast %674 : vector<4x1xf32> to vector<4x256xf32>
    %729 = arith.addf %727, %728 : vector<4x256xf32>
    %cst_270 = arith.constant 0.000000e+00 : f32
    %730 = vector.broadcast %cst_270 : f32 to vector<4x256xf32>
    %731 = arith.maximumf %729, %730 : vector<4x256xf32>
    %cst_271 = arith.constant 6.000000e+00 : f32
    %732 = vector.broadcast %cst_271 : f32 to vector<4x256xf32>
    %733 = arith.minimumf %731, %732 : vector<4x256xf32>
    %c0_272 = arith.constant 0 : index
    %c0_273 = arith.constant 0 : index
    %734 = vector.load %arg23[%c0_272, %c0_273] : memref<8x16xbf16, #tpu.memory_space<vmem>>, vector<8x16xbf16>
    %c0_274 = arith.constant 0 : index
    %c0_275 = arith.constant 0 : index
    %735 = vector.load %arg24[%c0_274, %c0_275] : memref<8x13xf32, #tpu.memory_space<vmem>>, vector<8x13xf32>
    %736 = vector.extract_strided_slice %734 {offsets = [0, 0], sizes = [8, 4], strides = [1, 1]} : vector<8x16xbf16> to vector<8x4xbf16>
    %737 = arith.truncf %671 : vector<4x256xf32> to vector<4x256xbf16>
    %cst_276 = arith.constant dense<0.000000e+00> : vector<8x256xf32>
    %738 = tpu.matmul %736, %737, %cst_276 {dimension_numbers = #tpu.dot_dimension_numbers<[1], [0], [0], [1], [0, 0, 1, 1], [], []>} : vector<8x4xbf16>, vector<4x256xbf16>, vector<8x256xf32> -> vector<8x256xf32>
    %739 = vector.extract_strided_slice %734 {offsets = [0, 4], sizes = [8, 4], strides = [1, 1]} : vector<8x16xbf16> to vector<8x4xbf16>
    %740 = arith.truncf %733 : vector<4x256xf32> to vector<4x256xbf16>
    %cst_277 = arith.constant dense<0.000000e+00> : vector<8x256xf32>
    %741 = tpu.matmul %739, %740, %cst_277 {dimension_numbers = #tpu.dot_dimension_numbers<[1], [0], [0], [1], [0, 0, 1, 1], [], []>} : vector<8x4xbf16>, vector<4x256xbf16>, vector<8x256xf32> -> vector<8x256xf32>
    %742 = arith.addf %738, %741 : vector<8x256xf32>
    %743 = vector.extract_strided_slice %734 {offsets = [0, 8], sizes = [8, 4], strides = [1, 1]} : vector<8x16xbf16> to vector<8x4xbf16>
    %744 = arith.truncf %651 : vector<4x256xf32> to vector<4x256xbf16>
    %cst_278 = arith.constant dense<0.000000e+00> : vector<8x256xf32>
    %745 = tpu.matmul %743, %744, %cst_278 {dimension_numbers = #tpu.dot_dimension_numbers<[1], [0], [0], [1], [0, 0, 1, 1], [], []>} : vector<8x4xbf16>, vector<4x256xbf16>, vector<8x256xf32> -> vector<8x256xf32>
    %746 = arith.addf %742, %745 : vector<8x256xf32>
    %747 = vector.extract_strided_slice %734 {offsets = [0, 12], sizes = [8, 4], strides = [1, 1]} : vector<8x16xbf16> to vector<8x4xbf16>
    %748 = arith.truncf %652 : vector<4x256xf32> to vector<4x256xbf16>
    %cst_279 = arith.constant dense<0.000000e+00> : vector<8x256xf32>
    %749 = tpu.matmul %747, %748, %cst_279 {dimension_numbers = #tpu.dot_dimension_numbers<[1], [0], [0], [1], [0, 0, 1, 1], [], []>} : vector<8x4xbf16>, vector<4x256xbf16>, vector<8x256xf32> -> vector<8x256xf32>
    %750 = arith.addf %746, %749 : vector<8x256xf32>
    %751 = vector.extract_strided_slice %735 {offsets = [0, 0], sizes = [8, 1], strides = [1, 1]} : vector<8x13xf32> to vector<8x1xf32>
    %752 = vector.broadcast %751 : vector<8x1xf32> to vector<8x256xf32>
    %753 = arith.mulf %750, %752 : vector<8x256xf32>
    %754 = vector.extract_strided_slice %735 {offsets = [0, 1], sizes = [8, 1], strides = [1, 1]} : vector<8x13xf32> to vector<8x1xf32>
    %755 = vector.broadcast %754 : vector<8x1xf32> to vector<8x256xf32>
    %756 = arith.addf %753, %755 : vector<8x256xf32>
    %cst_280 = arith.constant 0.000000e+00 : f32
    %757 = vector.broadcast %cst_280 : f32 to vector<8x256xf32>
    %758 = arith.maximumf %756, %757 : vector<8x256xf32>
    %cst_281 = arith.constant 6.000000e+00 : f32
    %759 = vector.broadcast %cst_281 : f32 to vector<8x256xf32>
    %760 = arith.minimumf %758, %759 : vector<8x256xf32>
    %761 = vector.extract_strided_slice %735 {offsets = [0, 4], sizes = [8, 9], strides = [1, 1]} : vector<8x13xf32> to vector<8x9xf32>
    %762 = vector.extract_strided_slice %735 {offsets = [0, 2], sizes = [8, 1], strides = [1, 1]} : vector<8x13xf32> to vector<8x1xf32>
    %763 = vector.extract_strided_slice %735 {offsets = [0, 3], sizes = [8, 1], strides = [1, 1]} : vector<8x13xf32> to vector<8x1xf32>
    %c0_282 = arith.constant 0 : index
    %c34_283 = arith.constant 34 : index
    %764 = vector.load %arg40[%c0_282, %c34_283] : memref<16x324xf32, #tpu.memory_space<vmem>>, vector<8x256xf32>
    tpu.vector_store %arg40[%c0_282, %c34_283], %760 {strides = array<i32>} : memref<16x324xf32, #tpu.memory_space<vmem>>, vector<8x256xf32>,
    %c0_284 = arith.constant 0 : index
    %c17_285 = arith.constant 17 : index
    %765 = vector.load %arg40[%c0_284, %c17_285] : memref<16x324xf32, #tpu.memory_space<vmem>>, vector<8x256xf32>
    %766 = vector.extract_strided_slice %761 {offsets = [0, 0], sizes = [8, 1], strides = [1, 1]} : vector<8x9xf32> to vector<8x1xf32>
    %767 = vector.broadcast %766 : vector<8x1xf32> to vector<8x256xf32>
    %768 = arith.mulf %765, %767 : vector<8x256xf32>
    %c0_286 = arith.constant 0 : index
    %c33_287 = arith.constant 33 : index
    %769 = vector.load %arg40[%c0_286, %c33_287] : memref<16x324xf32, #tpu.memory_space<vmem>>, vector<8x256xf32>
    %770 = vector.extract_strided_slice %761 {offsets = [0, 3], sizes = [8, 1], strides = [1, 1]} : vector<8x9xf32> to vector<8x1xf32>
    %771 = vector.broadcast %770 : vector<8x1xf32> to vector<8x256xf32>
    %772 = arith.mulf %769, %771 : vector<8x256xf32>
    %773 = arith.addf %768, %772 : vector<8x256xf32>
    %c0_288 = arith.constant 0 : index
    %c49_289 = arith.constant 49 : index
    %774 = vector.load %arg40[%c0_288, %c49_289] : memref<16x324xf32, #tpu.memory_space<vmem>>, vector<8x256xf32>
    %775 = vector.extract_strided_slice %761 {offsets = [0, 6], sizes = [8, 1], strides = [1, 1]} : vector<8x9xf32> to vector<8x1xf32>
    %776 = vector.broadcast %775 : vector<8x1xf32> to vector<8x256xf32>
    %777 = arith.mulf %774, %776 : vector<8x256xf32>
    %778 = arith.addf %773, %777 : vector<8x256xf32>
    %779 = vector.extract_strided_slice %9 {offsets = [1, 0], sizes = [1, 256], strides = [1, 1]} : vector<5x256xf32> to vector<1x256xf32>
    %780 = vector.broadcast %779 : vector<1x256xf32> to vector<8x256xf32>
    %781 = arith.mulf %778, %780 : vector<8x256xf32>
    %c0_290 = arith.constant 0 : index
    %c18_291 = arith.constant 18 : index
    %782 = vector.load %arg40[%c0_290, %c18_291] : memref<16x324xf32, #tpu.memory_space<vmem>>, vector<8x256xf32>
    %783 = vector.extract_strided_slice %761 {offsets = [0, 1], sizes = [8, 1], strides = [1, 1]} : vector<8x9xf32> to vector<8x1xf32>
    %784 = vector.broadcast %783 : vector<8x1xf32> to vector<8x256xf32>
    %785 = arith.mulf %782, %784 : vector<8x256xf32>
    %c0_292 = arith.constant 0 : index
    %c34_293 = arith.constant 34 : index
    %786 = vector.load %arg40[%c0_292, %c34_293] : memref<16x324xf32, #tpu.memory_space<vmem>>, vector<8x256xf32>
    %787 = vector.extract_strided_slice %761 {offsets = [0, 4], sizes = [8, 1], strides = [1, 1]} : vector<8x9xf32> to vector<8x1xf32>
    %788 = vector.broadcast %787 : vector<8x1xf32> to vector<8x256xf32>
    %789 = arith.mulf %786, %788 : vector<8x256xf32>
    %790 = arith.addf %785, %789 : vector<8x256xf32>
    %c0_294 = arith.constant 0 : index
    %c50_295 = arith.constant 50 : index
    %791 = vector.load %arg40[%c0_294, %c50_295] : memref<16x324xf32, #tpu.memory_space<vmem>>, vector<8x256xf32>
    %792 = vector.extract_strided_slice %761 {offsets = [0, 7], sizes = [8, 1], strides = [1, 1]} : vector<8x9xf32> to vector<8x1xf32>
    %793 = vector.broadcast %792 : vector<8x1xf32> to vector<8x256xf32>
    %794 = arith.mulf %791, %793 : vector<8x256xf32>
    %795 = arith.addf %790, %794 : vector<8x256xf32>
    %796 = arith.addf %781, %795 : vector<8x256xf32>
    %c0_296 = arith.constant 0 : index
    %c19_297 = arith.constant 19 : index
    %797 = vector.load %arg40[%c0_296, %c19_297] : memref<16x324xf32, #tpu.memory_space<vmem>>, vector<8x256xf32>
    %798 = vector.extract_strided_slice %761 {offsets = [0, 2], sizes = [8, 1], strides = [1, 1]} : vector<8x9xf32> to vector<8x1xf32>
    %799 = vector.broadcast %798 : vector<8x1xf32> to vector<8x256xf32>
    %800 = arith.mulf %797, %799 : vector<8x256xf32>
    %c0_298 = arith.constant 0 : index
    %c35_299 = arith.constant 35 : index
    %801 = vector.load %arg40[%c0_298, %c35_299] : memref<16x324xf32, #tpu.memory_space<vmem>>, vector<8x256xf32>
    %802 = vector.extract_strided_slice %761 {offsets = [0, 5], sizes = [8, 1], strides = [1, 1]} : vector<8x9xf32> to vector<8x1xf32>
    %803 = vector.broadcast %802 : vector<8x1xf32> to vector<8x256xf32>
    %804 = arith.mulf %801, %803 : vector<8x256xf32>
    %805 = arith.addf %800, %804 : vector<8x256xf32>
    %c0_300 = arith.constant 0 : index
    %c51_301 = arith.constant 51 : index
    %806 = vector.load %arg40[%c0_300, %c51_301] : memref<16x324xf32, #tpu.memory_space<vmem>>, vector<8x256xf32>
    %807 = vector.extract_strided_slice %761 {offsets = [0, 8], sizes = [8, 1], strides = [1, 1]} : vector<8x9xf32> to vector<8x1xf32>
    %808 = vector.broadcast %807 : vector<8x1xf32> to vector<8x256xf32>
    %809 = arith.mulf %806, %808 : vector<8x256xf32>
    %810 = arith.addf %805, %809 : vector<8x256xf32>
    %811 = vector.extract_strided_slice %9 {offsets = [3, 0], sizes = [1, 256], strides = [1, 1]} : vector<5x256xf32> to vector<1x256xf32>
    %812 = vector.broadcast %811 : vector<1x256xf32> to vector<8x256xf32>
    %813 = arith.mulf %810, %812 : vector<8x256xf32>
    %814 = arith.addf %796, %813 : vector<8x256xf32>
    %815 = vector.broadcast %762 : vector<8x1xf32> to vector<8x256xf32>
    %816 = arith.mulf %814, %815 : vector<8x256xf32>
    %817 = vector.broadcast %763 : vector<8x1xf32> to vector<8x256xf32>
    %818 = arith.addf %816, %817 : vector<8x256xf32>
    %cst_302 = arith.constant 0.000000e+00 : f32
    %819 = vector.broadcast %cst_302 : f32 to vector<8x256xf32>
    %820 = arith.maximumf %818, %819 : vector<8x256xf32>
    %cst_303 = arith.constant 6.000000e+00 : f32
    %821 = vector.broadcast %cst_303 : f32 to vector<8x256xf32>
    %822 = arith.minimumf %820, %821 : vector<8x256xf32>
    %c0_304 = arith.constant 0 : index
    %c0_305 = arith.constant 0 : index
    %c0_306 = arith.constant 0 : index
    %823 = vector.load %arg37[%c0_304, %c0_305, %c0_306] : memref<1x16x256xf32, #tpu.memory_space<vmem>>, vector<1x8x256xf32>
    %824 = vector.shape_cast %823 : vector<1x8x256xf32> to vector<8x256xf32>
    %825 = vector.shape_cast %760 : vector<8x256xf32> to vector<1x8x256xf32>
    tpu.vector_store %arg37[%c0_304, %c0_305, %c0_306], %825 {strides = array<i32>} : memref<1x16x256xf32, #tpu.memory_space<vmem>>, vector<1x8x256xf32>,
    %c0_307 = arith.constant 0 : index
    %c8_308 = arith.constant 8 : index
    %c0_309 = arith.constant 0 : index
    %826 = vector.load %arg37[%c0_307, %c8_308, %c0_309] : memref<1x16x256xf32, #tpu.memory_space<vmem>>, vector<1x8x256xf32>
    %827 = vector.shape_cast %826 : vector<1x8x256xf32> to vector<8x256xf32>
    %828 = vector.shape_cast %822 : vector<8x256xf32> to vector<1x8x256xf32>
    tpu.vector_store %arg37[%c0_307, %c8_308, %c0_309], %828 {strides = array<i32>} : memref<1x16x256xf32, #tpu.memory_space<vmem>>, vector<1x8x256xf32>,
    %c0_310 = arith.constant 0 : index
    %c0_311 = arith.constant 0 : index
    %829 = vector.load %arg25[%c0_310, %c0_311] : memref<8x16xbf16, #tpu.memory_space<vmem>>, vector<8x16xbf16>
    %c0_312 = arith.constant 0 : index
    %c0_313 = arith.constant 0 : index
    %830 = vector.load %arg26[%c0_312, %c0_313] : memref<8x13xf32, #tpu.memory_space<vmem>>, vector<8x13xf32>
    %831 = arith.truncf %562 : vector<16x64xf32> to vector<16x64xbf16>
    %cst_314 = arith.constant dense<0.000000e+00> : vector<8x64xf32>
    %832 = tpu.matmul %829, %831, %cst_314 {dimension_numbers = #tpu.dot_dimension_numbers<[1], [0], [0], [1], [0, 0, 1, 1], [], []>} : vector<8x16xbf16>, vector<16x64xbf16>, vector<8x64xf32> -> vector<8x64xf32>
    %833 = vector.extract_strided_slice %830 {offsets = [0, 0], sizes = [8, 1], strides = [1, 1]} : vector<8x13xf32> to vector<8x1xf32>
    %834 = vector.broadcast %833 : vector<8x1xf32> to vector<8x64xf32>
    %835 = arith.mulf %832, %834 : vector<8x64xf32>
    %836 = vector.extract_strided_slice %830 {offsets = [0, 1], sizes = [8, 1], strides = [1, 1]} : vector<8x13xf32> to vector<8x1xf32>
    %837 = vector.broadcast %836 : vector<8x1xf32> to vector<8x64xf32>
    %838 = arith.addf %835, %837 : vector<8x64xf32>
    %cst_315 = arith.constant 0.000000e+00 : f32
    %839 = vector.broadcast %cst_315 : f32 to vector<8x64xf32>
    %840 = arith.maximumf %838, %839 : vector<8x64xf32>
    %cst_316 = arith.constant 6.000000e+00 : f32
    %841 = vector.broadcast %cst_316 : f32 to vector<8x64xf32>
    %842 = arith.minimumf %840, %841 : vector<8x64xf32>
    %843 = vector.extract_strided_slice %830 {offsets = [0, 4], sizes = [8, 9], strides = [1, 1]} : vector<8x13xf32> to vector<8x9xf32>
    %844 = vector.extract_strided_slice %830 {offsets = [0, 2], sizes = [8, 1], strides = [1, 1]} : vector<8x13xf32> to vector<8x1xf32>
    %845 = vector.extract_strided_slice %830 {offsets = [0, 3], sizes = [8, 1], strides = [1, 1]} : vector<8x13xf32> to vector<8x1xf32>
    %c0_317 = arith.constant 0 : index
    %c18_318 = arith.constant 18 : index
    %846 = vector.load %arg41[%c0_317, %c18_318] : memref<16x100xf32, #tpu.memory_space<vmem>>, vector<8x64xf32>
    tpu.vector_store %arg41[%c0_317, %c18_318], %842 {strides = array<i32>} : memref<16x100xf32, #tpu.memory_space<vmem>>, vector<8x64xf32>,
    %c0_319 = arith.constant 0 : index
    %c9_320 = arith.constant 9 : index
    %847 = vector.load %arg41[%c0_319, %c9_320] : memref<16x100xf32, #tpu.memory_space<vmem>>, vector<8x64xf32>
    %848 = vector.extract_strided_slice %843 {offsets = [0, 0], sizes = [8, 1], strides = [1, 1]} : vector<8x9xf32> to vector<8x1xf32>
    %849 = vector.broadcast %848 : vector<8x1xf32> to vector<8x64xf32>
    %850 = arith.mulf %847, %849 : vector<8x64xf32>
    %c0_321 = arith.constant 0 : index
    %c17_322 = arith.constant 17 : index
    %851 = vector.load %arg41[%c0_321, %c17_322] : memref<16x100xf32, #tpu.memory_space<vmem>>, vector<8x64xf32>
    %852 = vector.extract_strided_slice %843 {offsets = [0, 3], sizes = [8, 1], strides = [1, 1]} : vector<8x9xf32> to vector<8x1xf32>
    %853 = vector.broadcast %852 : vector<8x1xf32> to vector<8x64xf32>
    %854 = arith.mulf %851, %853 : vector<8x64xf32>
    %855 = arith.addf %850, %854 : vector<8x64xf32>
    %c0_323 = arith.constant 0 : index
    %c25_324 = arith.constant 25 : index
    %856 = vector.load %arg41[%c0_323, %c25_324] : memref<16x100xf32, #tpu.memory_space<vmem>>, vector<8x64xf32>
    %857 = vector.extract_strided_slice %843 {offsets = [0, 6], sizes = [8, 1], strides = [1, 1]} : vector<8x9xf32> to vector<8x1xf32>
    %858 = vector.broadcast %857 : vector<8x1xf32> to vector<8x64xf32>
    %859 = arith.mulf %856, %858 : vector<8x64xf32>
    %860 = arith.addf %855, %859 : vector<8x64xf32>
    %861 = vector.extract_strided_slice %10 {offsets = [1, 0], sizes = [1, 64], strides = [1, 1]} : vector<5x64xf32> to vector<1x64xf32>
    %862 = vector.broadcast %861 : vector<1x64xf32> to vector<8x64xf32>
    %863 = arith.mulf %860, %862 : vector<8x64xf32>
    %c0_325 = arith.constant 0 : index
    %c10_326 = arith.constant 10 : index
    %864 = vector.load %arg41[%c0_325, %c10_326] : memref<16x100xf32, #tpu.memory_space<vmem>>, vector<8x64xf32>
    %865 = vector.extract_strided_slice %843 {offsets = [0, 1], sizes = [8, 1], strides = [1, 1]} : vector<8x9xf32> to vector<8x1xf32>
    %866 = vector.broadcast %865 : vector<8x1xf32> to vector<8x64xf32>
    %867 = arith.mulf %864, %866 : vector<8x64xf32>
    %c0_327 = arith.constant 0 : index
    %c18_328 = arith.constant 18 : index
    %868 = vector.load %arg41[%c0_327, %c18_328] : memref<16x100xf32, #tpu.memory_space<vmem>>, vector<8x64xf32>
    %869 = vector.extract_strided_slice %843 {offsets = [0, 4], sizes = [8, 1], strides = [1, 1]} : vector<8x9xf32> to vector<8x1xf32>
    %870 = vector.broadcast %869 : vector<8x1xf32> to vector<8x64xf32>
    %871 = arith.mulf %868, %870 : vector<8x64xf32>
    %872 = arith.addf %867, %871 : vector<8x64xf32>
    %c0_329 = arith.constant 0 : index
    %c26_330 = arith.constant 26 : index
    %873 = vector.load %arg41[%c0_329, %c26_330] : memref<16x100xf32, #tpu.memory_space<vmem>>, vector<8x64xf32>
    %874 = vector.extract_strided_slice %843 {offsets = [0, 7], sizes = [8, 1], strides = [1, 1]} : vector<8x9xf32> to vector<8x1xf32>
    %875 = vector.broadcast %874 : vector<8x1xf32> to vector<8x64xf32>
    %876 = arith.mulf %873, %875 : vector<8x64xf32>
    %877 = arith.addf %872, %876 : vector<8x64xf32>
    %878 = arith.addf %863, %877 : vector<8x64xf32>
    %c0_331 = arith.constant 0 : index
    %c11_332 = arith.constant 11 : index
    %879 = vector.load %arg41[%c0_331, %c11_332] : memref<16x100xf32, #tpu.memory_space<vmem>>, vector<8x64xf32>
    %880 = vector.extract_strided_slice %843 {offsets = [0, 2], sizes = [8, 1], strides = [1, 1]} : vector<8x9xf32> to vector<8x1xf32>
    %881 = vector.broadcast %880 : vector<8x1xf32> to vector<8x64xf32>
    %882 = arith.mulf %879, %881 : vector<8x64xf32>
    %c0_333 = arith.constant 0 : index
    %c19_334 = arith.constant 19 : index
    %883 = vector.load %arg41[%c0_333, %c19_334] : memref<16x100xf32, #tpu.memory_space<vmem>>, vector<8x64xf32>
    %884 = vector.extract_strided_slice %843 {offsets = [0, 5], sizes = [8, 1], strides = [1, 1]} : vector<8x9xf32> to vector<8x1xf32>
    %885 = vector.broadcast %884 : vector<8x1xf32> to vector<8x64xf32>
    %886 = arith.mulf %883, %885 : vector<8x64xf32>
    %887 = arith.addf %882, %886 : vector<8x64xf32>
    %c0_335 = arith.constant 0 : index
    %c27_336 = arith.constant 27 : index
    %888 = vector.load %arg41[%c0_335, %c27_336] : memref<16x100xf32, #tpu.memory_space<vmem>>, vector<8x64xf32>
    %889 = vector.extract_strided_slice %843 {offsets = [0, 8], sizes = [8, 1], strides = [1, 1]} : vector<8x9xf32> to vector<8x1xf32>
    %890 = vector.broadcast %889 : vector<8x1xf32> to vector<8x64xf32>
    %891 = arith.mulf %888, %890 : vector<8x64xf32>
    %892 = arith.addf %887, %891 : vector<8x64xf32>
    %893 = vector.extract_strided_slice %10 {offsets = [3, 0], sizes = [1, 64], strides = [1, 1]} : vector<5x64xf32> to vector<1x64xf32>
    %894 = vector.broadcast %893 : vector<1x64xf32> to vector<8x64xf32>
    %895 = arith.mulf %892, %894 : vector<8x64xf32>
    %896 = arith.addf %878, %895 : vector<8x64xf32>
    %897 = vector.broadcast %844 : vector<8x1xf32> to vector<8x64xf32>
    %898 = arith.mulf %896, %897 : vector<8x64xf32>
    %899 = vector.broadcast %845 : vector<8x1xf32> to vector<8x64xf32>
    %900 = arith.addf %898, %899 : vector<8x64xf32>
    %cst_337 = arith.constant 0.000000e+00 : f32
    %901 = vector.broadcast %cst_337 : f32 to vector<8x64xf32>
    %902 = arith.maximumf %900, %901 : vector<8x64xf32>
    %cst_338 = arith.constant 6.000000e+00 : f32
    %903 = vector.broadcast %cst_338 : f32 to vector<8x64xf32>
    %904 = arith.minimumf %902, %903 : vector<8x64xf32>
    %905 = vector.extract_strided_slice %842 {offsets = [0, 0], sizes = [4, 64], strides = [1, 1]} : vector<8x64xf32> to vector<4x64xf32>
    %906 = vector.extract_strided_slice %904 {offsets = [0, 0], sizes = [4, 64], strides = [1, 1]} : vector<8x64xf32> to vector<4x64xf32>
    %907 = vector.extract_strided_slice %842 {offsets = [4, 0], sizes = [4, 64], strides = [1, 1]} : vector<8x64xf32> to vector<4x64xf32>
    %908 = vector.extract_strided_slice %904 {offsets = [4, 0], sizes = [4, 64], strides = [1, 1]} : vector<8x64xf32> to vector<4x64xf32>
    %c0_339 = arith.constant 0 : index
    %c0_340 = arith.constant 0 : index
    %909 = vector.load %arg27[%c0_339, %c0_340] : memref<4x8xbf16, #tpu.memory_space<vmem>>, vector<4x8xbf16>
    %c0_341 = arith.constant 0 : index
    %c0_342 = arith.constant 0 : index
    %910 = vector.load %arg28[%c0_341, %c0_342] : memref<4x13xf32, #tpu.memory_space<vmem>>, vector<4x13xf32>
    %911 = vector.extract_strided_slice %909 {offsets = [0, 0], sizes = [4, 4], strides = [1, 1]} : vector<4x8xbf16> to vector<4x4xbf16>
    %912 = arith.truncf %905 : vector<4x64xf32> to vector<4x64xbf16>
    %cst_343 = arith.constant dense<0.000000e+00> : vector<4x64xf32>
    %913 = tpu.matmul %911, %912, %cst_343 {dimension_numbers = #tpu.dot_dimension_numbers<[1], [0], [0], [1], [0, 0, 1, 1], [], []>} : vector<4x4xbf16>, vector<4x64xbf16>, vector<4x64xf32> -> vector<4x64xf32>
    %914 = vector.extract_strided_slice %909 {offsets = [0, 4], sizes = [4, 4], strides = [1, 1]} : vector<4x8xbf16> to vector<4x4xbf16>
    %915 = arith.truncf %906 : vector<4x64xf32> to vector<4x64xbf16>
    %cst_344 = arith.constant dense<0.000000e+00> : vector<4x64xf32>
    %916 = tpu.matmul %914, %915, %cst_344 {dimension_numbers = #tpu.dot_dimension_numbers<[1], [0], [0], [1], [0, 0, 1, 1], [], []>} : vector<4x4xbf16>, vector<4x64xbf16>, vector<4x64xf32> -> vector<4x64xf32>
    %917 = arith.addf %913, %916 : vector<4x64xf32>
    %918 = vector.extract_strided_slice %910 {offsets = [0, 0], sizes = [4, 1], strides = [1, 1]} : vector<4x13xf32> to vector<4x1xf32>
    %919 = vector.broadcast %918 : vector<4x1xf32> to vector<4x64xf32>
    %920 = arith.mulf %917, %919 : vector<4x64xf32>
    %921 = vector.extract_strided_slice %910 {offsets = [0, 1], sizes = [4, 1], strides = [1, 1]} : vector<4x13xf32> to vector<4x1xf32>
    %922 = vector.broadcast %921 : vector<4x1xf32> to vector<4x64xf32>
    %923 = arith.addf %920, %922 : vector<4x64xf32>
    %cst_345 = arith.constant 0.000000e+00 : f32
    %924 = vector.broadcast %cst_345 : f32 to vector<4x64xf32>
    %925 = arith.maximumf %923, %924 : vector<4x64xf32>
    %cst_346 = arith.constant 6.000000e+00 : f32
    %926 = vector.broadcast %cst_346 : f32 to vector<4x64xf32>
    %927 = arith.minimumf %925, %926 : vector<4x64xf32>
    %928 = vector.extract_strided_slice %910 {offsets = [0, 4], sizes = [4, 9], strides = [1, 1]} : vector<4x13xf32> to vector<4x9xf32>
    %929 = vector.extract_strided_slice %910 {offsets = [0, 2], sizes = [4, 1], strides = [1, 1]} : vector<4x13xf32> to vector<4x1xf32>
    %930 = vector.extract_strided_slice %910 {offsets = [0, 3], sizes = [4, 1], strides = [1, 1]} : vector<4x13xf32> to vector<4x1xf32>
    %c0_347 = arith.constant 0 : index
    %c18_348 = arith.constant 18 : index
    %931 = vector.load %arg41[%c0_347, %c18_348] : memref<16x100xf32, #tpu.memory_space<vmem>>, vector<4x64xf32>
    tpu.vector_store %arg41[%c0_347, %c18_348], %927 {strides = array<i32>} : memref<16x100xf32, #tpu.memory_space<vmem>>, vector<4x64xf32>,
    %c0_349 = arith.constant 0 : index
    %c9_350 = arith.constant 9 : index
    %932 = vector.load %arg41[%c0_349, %c9_350] : memref<16x100xf32, #tpu.memory_space<vmem>>, vector<4x64xf32>
    %933 = vector.extract_strided_slice %928 {offsets = [0, 0], sizes = [4, 1], strides = [1, 1]} : vector<4x9xf32> to vector<4x1xf32>
    %934 = vector.broadcast %933 : vector<4x1xf32> to vector<4x64xf32>
    %935 = arith.mulf %932, %934 : vector<4x64xf32>
    %c0_351 = arith.constant 0 : index
    %c17_352 = arith.constant 17 : index
    %936 = vector.load %arg41[%c0_351, %c17_352] : memref<16x100xf32, #tpu.memory_space<vmem>>, vector<4x64xf32>
    %937 = vector.extract_strided_slice %928 {offsets = [0, 3], sizes = [4, 1], strides = [1, 1]} : vector<4x9xf32> to vector<4x1xf32>
    %938 = vector.broadcast %937 : vector<4x1xf32> to vector<4x64xf32>
    %939 = arith.mulf %936, %938 : vector<4x64xf32>
    %940 = arith.addf %935, %939 : vector<4x64xf32>
    %c0_353 = arith.constant 0 : index
    %c25_354 = arith.constant 25 : index
    %941 = vector.load %arg41[%c0_353, %c25_354] : memref<16x100xf32, #tpu.memory_space<vmem>>, vector<4x64xf32>
    %942 = vector.extract_strided_slice %928 {offsets = [0, 6], sizes = [4, 1], strides = [1, 1]} : vector<4x9xf32> to vector<4x1xf32>
    %943 = vector.broadcast %942 : vector<4x1xf32> to vector<4x64xf32>
    %944 = arith.mulf %941, %943 : vector<4x64xf32>
    %945 = arith.addf %940, %944 : vector<4x64xf32>
    %946 = vector.extract_strided_slice %10 {offsets = [1, 0], sizes = [1, 64], strides = [1, 1]} : vector<5x64xf32> to vector<1x64xf32>
    %947 = vector.broadcast %946 : vector<1x64xf32> to vector<4x64xf32>
    %948 = arith.mulf %945, %947 : vector<4x64xf32>
    %c0_355 = arith.constant 0 : index
    %c10_356 = arith.constant 10 : index
    %949 = vector.load %arg41[%c0_355, %c10_356] : memref<16x100xf32, #tpu.memory_space<vmem>>, vector<4x64xf32>
    %950 = vector.extract_strided_slice %928 {offsets = [0, 1], sizes = [4, 1], strides = [1, 1]} : vector<4x9xf32> to vector<4x1xf32>
    %951 = vector.broadcast %950 : vector<4x1xf32> to vector<4x64xf32>
    %952 = arith.mulf %949, %951 : vector<4x64xf32>
    %c0_357 = arith.constant 0 : index
    %c18_358 = arith.constant 18 : index
    %953 = vector.load %arg41[%c0_357, %c18_358] : memref<16x100xf32, #tpu.memory_space<vmem>>, vector<4x64xf32>
    %954 = vector.extract_strided_slice %928 {offsets = [0, 4], sizes = [4, 1], strides = [1, 1]} : vector<4x9xf32> to vector<4x1xf32>
    %955 = vector.broadcast %954 : vector<4x1xf32> to vector<4x64xf32>
    %956 = arith.mulf %953, %955 : vector<4x64xf32>
    %957 = arith.addf %952, %956 : vector<4x64xf32>
    %c0_359 = arith.constant 0 : index
    %c26_360 = arith.constant 26 : index
    %958 = vector.load %arg41[%c0_359, %c26_360] : memref<16x100xf32, #tpu.memory_space<vmem>>, vector<4x64xf32>
    %959 = vector.extract_strided_slice %928 {offsets = [0, 7], sizes = [4, 1], strides = [1, 1]} : vector<4x9xf32> to vector<4x1xf32>
    %960 = vector.broadcast %959 : vector<4x1xf32> to vector<4x64xf32>
    %961 = arith.mulf %958, %960 : vector<4x64xf32>
    %962 = arith.addf %957, %961 : vector<4x64xf32>
    %963 = arith.addf %948, %962 : vector<4x64xf32>
    %c0_361 = arith.constant 0 : index
    %c11_362 = arith.constant 11 : index
    %964 = vector.load %arg41[%c0_361, %c11_362] : memref<16x100xf32, #tpu.memory_space<vmem>>, vector<4x64xf32>
    %965 = vector.extract_strided_slice %928 {offsets = [0, 2], sizes = [4, 1], strides = [1, 1]} : vector<4x9xf32> to vector<4x1xf32>
    %966 = vector.broadcast %965 : vector<4x1xf32> to vector<4x64xf32>
    %967 = arith.mulf %964, %966 : vector<4x64xf32>
    %c0_363 = arith.constant 0 : index
    %c19_364 = arith.constant 19 : index
    %968 = vector.load %arg41[%c0_363, %c19_364] : memref<16x100xf32, #tpu.memory_space<vmem>>, vector<4x64xf32>
    %969 = vector.extract_strided_slice %928 {offsets = [0, 5], sizes = [4, 1], strides = [1, 1]} : vector<4x9xf32> to vector<4x1xf32>
    %970 = vector.broadcast %969 : vector<4x1xf32> to vector<4x64xf32>
    %971 = arith.mulf %968, %970 : vector<4x64xf32>
    %972 = arith.addf %967, %971 : vector<4x64xf32>
    %c0_365 = arith.constant 0 : index
    %c27_366 = arith.constant 27 : index
    %973 = vector.load %arg41[%c0_365, %c27_366] : memref<16x100xf32, #tpu.memory_space<vmem>>, vector<4x64xf32>
    %974 = vector.extract_strided_slice %928 {offsets = [0, 8], sizes = [4, 1], strides = [1, 1]} : vector<4x9xf32> to vector<4x1xf32>
    %975 = vector.broadcast %974 : vector<4x1xf32> to vector<4x64xf32>
    %976 = arith.mulf %973, %975 : vector<4x64xf32>
    %977 = arith.addf %972, %976 : vector<4x64xf32>
    %978 = vector.extract_strided_slice %10 {offsets = [3, 0], sizes = [1, 64], strides = [1, 1]} : vector<5x64xf32> to vector<1x64xf32>
    %979 = vector.broadcast %978 : vector<1x64xf32> to vector<4x64xf32>
    %980 = arith.mulf %977, %979 : vector<4x64xf32>
    %981 = arith.addf %963, %980 : vector<4x64xf32>
    %982 = vector.broadcast %929 : vector<4x1xf32> to vector<4x64xf32>
    %983 = arith.mulf %981, %982 : vector<4x64xf32>
    %984 = vector.broadcast %930 : vector<4x1xf32> to vector<4x64xf32>
    %985 = arith.addf %983, %984 : vector<4x64xf32>
    %cst_367 = arith.constant 0.000000e+00 : f32
    %986 = vector.broadcast %cst_367 : f32 to vector<4x64xf32>
    %987 = arith.maximumf %985, %986 : vector<4x64xf32>
    %cst_368 = arith.constant 6.000000e+00 : f32
    %988 = vector.broadcast %cst_368 : f32 to vector<4x64xf32>
    %989 = arith.minimumf %987, %988 : vector<4x64xf32>
    %c0_369 = arith.constant 0 : index
    %c0_370 = arith.constant 0 : index
    %990 = vector.load %arg29[%c0_369, %c0_370] : memref<8x16xbf16, #tpu.memory_space<vmem>>, vector<8x16xbf16>
    %c0_371 = arith.constant 0 : index
    %c0_372 = arith.constant 0 : index
    %991 = vector.load %arg30[%c0_371, %c0_372] : memref<8x13xf32, #tpu.memory_space<vmem>>, vector<8x13xf32>
    %992 = vector.extract_strided_slice %990 {offsets = [0, 0], sizes = [8, 4], strides = [1, 1]} : vector<8x16xbf16> to vector<8x4xbf16>
    %993 = arith.truncf %927 : vector<4x64xf32> to vector<4x64xbf16>
    %cst_373 = arith.constant dense<0.000000e+00> : vector<8x64xf32>
    %994 = tpu.matmul %992, %993, %cst_373 {dimension_numbers = #tpu.dot_dimension_numbers<[1], [0], [0], [1], [0, 0, 1, 1], [], []>} : vector<8x4xbf16>, vector<4x64xbf16>, vector<8x64xf32> -> vector<8x64xf32>
    %995 = vector.extract_strided_slice %990 {offsets = [0, 4], sizes = [8, 4], strides = [1, 1]} : vector<8x16xbf16> to vector<8x4xbf16>
    %996 = arith.truncf %989 : vector<4x64xf32> to vector<4x64xbf16>
    %cst_374 = arith.constant dense<0.000000e+00> : vector<8x64xf32>
    %997 = tpu.matmul %995, %996, %cst_374 {dimension_numbers = #tpu.dot_dimension_numbers<[1], [0], [0], [1], [0, 0, 1, 1], [], []>} : vector<8x4xbf16>, vector<4x64xbf16>, vector<8x64xf32> -> vector<8x64xf32>
    %998 = arith.addf %994, %997 : vector<8x64xf32>
    %999 = vector.extract_strided_slice %990 {offsets = [0, 8], sizes = [8, 4], strides = [1, 1]} : vector<8x16xbf16> to vector<8x4xbf16>
    %1000 = arith.truncf %907 : vector<4x64xf32> to vector<4x64xbf16>
    %cst_375 = arith.constant dense<0.000000e+00> : vector<8x64xf32>
    %1001 = tpu.matmul %999, %1000, %cst_375 {dimension_numbers = #tpu.dot_dimension_numbers<[1], [0], [0], [1], [0, 0, 1, 1], [], []>} : vector<8x4xbf16>, vector<4x64xbf16>, vector<8x64xf32> -> vector<8x64xf32>
    %1002 = arith.addf %998, %1001 : vector<8x64xf32>
    %1003 = vector.extract_strided_slice %990 {offsets = [0, 12], sizes = [8, 4], strides = [1, 1]} : vector<8x16xbf16> to vector<8x4xbf16>
    %1004 = arith.truncf %908 : vector<4x64xf32> to vector<4x64xbf16>
    %cst_376 = arith.constant dense<0.000000e+00> : vector<8x64xf32>
    %1005 = tpu.matmul %1003, %1004, %cst_376 {dimension_numbers = #tpu.dot_dimension_numbers<[1], [0], [0], [1], [0, 0, 1, 1], [], []>} : vector<8x4xbf16>, vector<4x64xbf16>, vector<8x64xf32> -> vector<8x64xf32>
    %1006 = arith.addf %1002, %1005 : vector<8x64xf32>
    %1007 = vector.extract_strided_slice %991 {offsets = [0, 0], sizes = [8, 1], strides = [1, 1]} : vector<8x13xf32> to vector<8x1xf32>
    %1008 = vector.broadcast %1007 : vector<8x1xf32> to vector<8x64xf32>
    %1009 = arith.mulf %1006, %1008 : vector<8x64xf32>
    %1010 = vector.extract_strided_slice %991 {offsets = [0, 1], sizes = [8, 1], strides = [1, 1]} : vector<8x13xf32> to vector<8x1xf32>
    %1011 = vector.broadcast %1010 : vector<8x1xf32> to vector<8x64xf32>
    %1012 = arith.addf %1009, %1011 : vector<8x64xf32>
    %cst_377 = arith.constant 0.000000e+00 : f32
    %1013 = vector.broadcast %cst_377 : f32 to vector<8x64xf32>
    %1014 = arith.maximumf %1012, %1013 : vector<8x64xf32>
    %cst_378 = arith.constant 6.000000e+00 : f32
    %1015 = vector.broadcast %cst_378 : f32 to vector<8x64xf32>
    %1016 = arith.minimumf %1014, %1015 : vector<8x64xf32>
    %1017 = vector.extract_strided_slice %991 {offsets = [0, 4], sizes = [8, 9], strides = [1, 1]} : vector<8x13xf32> to vector<8x9xf32>
    %1018 = vector.extract_strided_slice %991 {offsets = [0, 2], sizes = [8, 1], strides = [1, 1]} : vector<8x13xf32> to vector<8x1xf32>
    %1019 = vector.extract_strided_slice %991 {offsets = [0, 3], sizes = [8, 1], strides = [1, 1]} : vector<8x13xf32> to vector<8x1xf32>
    %c0_379 = arith.constant 0 : index
    %c18_380 = arith.constant 18 : index
    %1020 = vector.load %arg41[%c0_379, %c18_380] : memref<16x100xf32, #tpu.memory_space<vmem>>, vector<8x64xf32>
    tpu.vector_store %arg41[%c0_379, %c18_380], %1016 {strides = array<i32>} : memref<16x100xf32, #tpu.memory_space<vmem>>, vector<8x64xf32>,
    %c0_381 = arith.constant 0 : index
    %c9_382 = arith.constant 9 : index
    %1021 = vector.load %arg41[%c0_381, %c9_382] : memref<16x100xf32, #tpu.memory_space<vmem>>, vector<8x64xf32>
    %1022 = vector.extract_strided_slice %1017 {offsets = [0, 0], sizes = [8, 1], strides = [1, 1]} : vector<8x9xf32> to vector<8x1xf32>
    %1023 = vector.broadcast %1022 : vector<8x1xf32> to vector<8x64xf32>
    %1024 = arith.mulf %1021, %1023 : vector<8x64xf32>
    %c0_383 = arith.constant 0 : index
    %c17_384 = arith.constant 17 : index
    %1025 = vector.load %arg41[%c0_383, %c17_384] : memref<16x100xf32, #tpu.memory_space<vmem>>, vector<8x64xf32>
    %1026 = vector.extract_strided_slice %1017 {offsets = [0, 3], sizes = [8, 1], strides = [1, 1]} : vector<8x9xf32> to vector<8x1xf32>
    %1027 = vector.broadcast %1026 : vector<8x1xf32> to vector<8x64xf32>
    %1028 = arith.mulf %1025, %1027 : vector<8x64xf32>
    %1029 = arith.addf %1024, %1028 : vector<8x64xf32>
    %c0_385 = arith.constant 0 : index
    %c25_386 = arith.constant 25 : index
    %1030 = vector.load %arg41[%c0_385, %c25_386] : memref<16x100xf32, #tpu.memory_space<vmem>>, vector<8x64xf32>
    %1031 = vector.extract_strided_slice %1017 {offsets = [0, 6], sizes = [8, 1], strides = [1, 1]} : vector<8x9xf32> to vector<8x1xf32>
    %1032 = vector.broadcast %1031 : vector<8x1xf32> to vector<8x64xf32>
    %1033 = arith.mulf %1030, %1032 : vector<8x64xf32>
    %1034 = arith.addf %1029, %1033 : vector<8x64xf32>
    %1035 = vector.extract_strided_slice %10 {offsets = [1, 0], sizes = [1, 64], strides = [1, 1]} : vector<5x64xf32> to vector<1x64xf32>
    %1036 = vector.broadcast %1035 : vector<1x64xf32> to vector<8x64xf32>
    %1037 = arith.mulf %1034, %1036 : vector<8x64xf32>
    %c0_387 = arith.constant 0 : index
    %c10_388 = arith.constant 10 : index
    %1038 = vector.load %arg41[%c0_387, %c10_388] : memref<16x100xf32, #tpu.memory_space<vmem>>, vector<8x64xf32>
    %1039 = vector.extract_strided_slice %1017 {offsets = [0, 1], sizes = [8, 1], strides = [1, 1]} : vector<8x9xf32> to vector<8x1xf32>
    %1040 = vector.broadcast %1039 : vector<8x1xf32> to vector<8x64xf32>
    %1041 = arith.mulf %1038, %1040 : vector<8x64xf32>
    %c0_389 = arith.constant 0 : index
    %c18_390 = arith.constant 18 : index
    %1042 = vector.load %arg41[%c0_389, %c18_390] : memref<16x100xf32, #tpu.memory_space<vmem>>, vector<8x64xf32>
    %1043 = vector.extract_strided_slice %1017 {offsets = [0, 4], sizes = [8, 1], strides = [1, 1]} : vector<8x9xf32> to vector<8x1xf32>
    %1044 = vector.broadcast %1043 : vector<8x1xf32> to vector<8x64xf32>
    %1045 = arith.mulf %1042, %1044 : vector<8x64xf32>
    %1046 = arith.addf %1041, %1045 : vector<8x64xf32>
    %c0_391 = arith.constant 0 : index
    %c26_392 = arith.constant 26 : index
    %1047 = vector.load %arg41[%c0_391, %c26_392] : memref<16x100xf32, #tpu.memory_space<vmem>>, vector<8x64xf32>
    %1048 = vector.extract_strided_slice %1017 {offsets = [0, 7], sizes = [8, 1], strides = [1, 1]} : vector<8x9xf32> to vector<8x1xf32>
    %1049 = vector.broadcast %1048 : vector<8x1xf32> to vector<8x64xf32>
    %1050 = arith.mulf %1047, %1049 : vector<8x64xf32>
    %1051 = arith.addf %1046, %1050 : vector<8x64xf32>
    %1052 = arith.addf %1037, %1051 : vector<8x64xf32>
    %c0_393 = arith.constant 0 : index
    %c11_394 = arith.constant 11 : index
    %1053 = vector.load %arg41[%c0_393, %c11_394] : memref<16x100xf32, #tpu.memory_space<vmem>>, vector<8x64xf32>
    %1054 = vector.extract_strided_slice %1017 {offsets = [0, 2], sizes = [8, 1], strides = [1, 1]} : vector<8x9xf32> to vector<8x1xf32>
    %1055 = vector.broadcast %1054 : vector<8x1xf32> to vector<8x64xf32>
    %1056 = arith.mulf %1053, %1055 : vector<8x64xf32>
    %c0_395 = arith.constant 0 : index
    %c19_396 = arith.constant 19 : index
    %1057 = vector.load %arg41[%c0_395, %c19_396] : memref<16x100xf32, #tpu.memory_space<vmem>>, vector<8x64xf32>
    %1058 = vector.extract_strided_slice %1017 {offsets = [0, 5], sizes = [8, 1], strides = [1, 1]} : vector<8x9xf32> to vector<8x1xf32>
    %1059 = vector.broadcast %1058 : vector<8x1xf32> to vector<8x64xf32>
    %1060 = arith.mulf %1057, %1059 : vector<8x64xf32>
    %1061 = arith.addf %1056, %1060 : vector<8x64xf32>
    %c0_397 = arith.constant 0 : index
    %c27_398 = arith.constant 27 : index
    %1062 = vector.load %arg41[%c0_397, %c27_398] : memref<16x100xf32, #tpu.memory_space<vmem>>, vector<8x64xf32>
    %1063 = vector.extract_strided_slice %1017 {offsets = [0, 8], sizes = [8, 1], strides = [1, 1]} : vector<8x9xf32> to vector<8x1xf32>
    %1064 = vector.broadcast %1063 : vector<8x1xf32> to vector<8x64xf32>
    %1065 = arith.mulf %1062, %1064 : vector<8x64xf32>
    %1066 = arith.addf %1061, %1065 : vector<8x64xf32>
    %1067 = vector.extract_strided_slice %10 {offsets = [3, 0], sizes = [1, 64], strides = [1, 1]} : vector<5x64xf32> to vector<1x64xf32>
    %1068 = vector.broadcast %1067 : vector<1x64xf32> to vector<8x64xf32>
    %1069 = arith.mulf %1066, %1068 : vector<8x64xf32>
    %1070 = arith.addf %1052, %1069 : vector<8x64xf32>
    %1071 = vector.broadcast %1018 : vector<8x1xf32> to vector<8x64xf32>
    %1072 = arith.mulf %1070, %1071 : vector<8x64xf32>
    %1073 = vector.broadcast %1019 : vector<8x1xf32> to vector<8x64xf32>
    %1074 = arith.addf %1072, %1073 : vector<8x64xf32>
    %cst_399 = arith.constant 0.000000e+00 : f32
    %1075 = vector.broadcast %cst_399 : f32 to vector<8x64xf32>
    %1076 = arith.maximumf %1074, %1075 : vector<8x64xf32>
    %cst_400 = arith.constant 6.000000e+00 : f32
    %1077 = vector.broadcast %cst_400 : f32 to vector<8x64xf32>
    %1078 = arith.minimumf %1076, %1077 : vector<8x64xf32>
    %c0_401 = arith.constant 0 : index
    %c0_402 = arith.constant 0 : index
    %c0_403 = arith.constant 0 : index
    %1079 = vector.load %arg38[%c0_401, %c0_402, %c0_403] : memref<1x16x64xf32, #tpu.memory_space<vmem>>, vector<1x8x64xf32>
    %1080 = vector.shape_cast %1079 : vector<1x8x64xf32> to vector<8x64xf32>
    %1081 = vector.shape_cast %1016 : vector<8x64xf32> to vector<1x8x64xf32>
    tpu.vector_store %arg38[%c0_401, %c0_402, %c0_403], %1081 {strides = array<i32>} : memref<1x16x64xf32, #tpu.memory_space<vmem>>, vector<1x8x64xf32>,
    %c0_404 = arith.constant 0 : index
    %c8_405 = arith.constant 8 : index
    %c0_406 = arith.constant 0 : index
    %1082 = vector.load %arg38[%c0_404, %c8_405, %c0_406] : memref<1x16x64xf32, #tpu.memory_space<vmem>>, vector<1x8x64xf32>
    %1083 = vector.shape_cast %1082 : vector<1x8x64xf32> to vector<8x64xf32>
    %1084 = vector.shape_cast %1078 : vector<8x64xf32> to vector<1x8x64xf32>
    tpu.vector_store %arg38[%c0_404, %c8_405, %c0_406], %1084 {strides = array<i32>} : memref<1x16x64xf32, #tpu.memory_space<vmem>>, vector<1x8x64xf32>,
    %c0_407 = arith.constant 0 : index
    %c0_408 = arith.constant 0 : index
    %1085 = vector.load %arg31[%c0_407, %c0_408] : memref<8x16xbf16, #tpu.memory_space<vmem>>, vector<8x16xbf16>
    %c0_409 = arith.constant 0 : index
    %c0_410 = arith.constant 0 : index
    %1086 = vector.load %arg32[%c0_409, %c0_410] : memref<8x13xf32, #tpu.memory_space<vmem>>, vector<8x13xf32>
    %1087 = arith.truncf %572 : vector<16x16xf32> to vector<16x16xbf16>
    %cst_411 = arith.constant dense<0.000000e+00> : vector<8x16xf32>
    %1088 = tpu.matmul %1085, %1087, %cst_411 {dimension_numbers = #tpu.dot_dimension_numbers<[1], [0], [0], [1], [0, 0, 1, 1], [], []>} : vector<8x16xbf16>, vector<16x16xbf16>, vector<8x16xf32> -> vector<8x16xf32>
    %1089 = vector.extract_strided_slice %1086 {offsets = [0, 0], sizes = [8, 1], strides = [1, 1]} : vector<8x13xf32> to vector<8x1xf32>
    %1090 = vector.broadcast %1089 : vector<8x1xf32> to vector<8x16xf32>
    %1091 = arith.mulf %1088, %1090 : vector<8x16xf32>
    %1092 = vector.extract_strided_slice %1086 {offsets = [0, 1], sizes = [8, 1], strides = [1, 1]} : vector<8x13xf32> to vector<8x1xf32>
    %1093 = vector.broadcast %1092 : vector<8x1xf32> to vector<8x16xf32>
    %1094 = arith.addf %1091, %1093 : vector<8x16xf32>
    %cst_412 = arith.constant 0.000000e+00 : f32
    %1095 = vector.broadcast %cst_412 : f32 to vector<8x16xf32>
    %1096 = arith.maximumf %1094, %1095 : vector<8x16xf32>
    %cst_413 = arith.constant 6.000000e+00 : f32
    %1097 = vector.broadcast %cst_413 : f32 to vector<8x16xf32>
    %1098 = arith.minimumf %1096, %1097 : vector<8x16xf32>
    %1099 = vector.extract_strided_slice %1086 {offsets = [0, 4], sizes = [8, 9], strides = [1, 1]} : vector<8x13xf32> to vector<8x9xf32>
    %1100 = vector.extract_strided_slice %1086 {offsets = [0, 2], sizes = [8, 1], strides = [1, 1]} : vector<8x13xf32> to vector<8x1xf32>
    %1101 = vector.extract_strided_slice %1086 {offsets = [0, 3], sizes = [8, 1], strides = [1, 1]} : vector<8x13xf32> to vector<8x1xf32>
    %c0_414 = arith.constant 0 : index
    %c10_415 = arith.constant 10 : index
    %1102 = vector.load %arg42[%c0_414, %c10_415] : memref<16x36xf32, #tpu.memory_space<vmem>>, vector<8x16xf32>
    tpu.vector_store %arg42[%c0_414, %c10_415], %1098 {strides = array<i32>} : memref<16x36xf32, #tpu.memory_space<vmem>>, vector<8x16xf32>,
    %c0_416 = arith.constant 0 : index
    %c5_417 = arith.constant 5 : index
    %1103 = vector.load %arg42[%c0_416, %c5_417] : memref<16x36xf32, #tpu.memory_space<vmem>>, vector<8x16xf32>
    %1104 = vector.extract_strided_slice %1099 {offsets = [0, 0], sizes = [8, 1], strides = [1, 1]} : vector<8x9xf32> to vector<8x1xf32>
    %1105 = vector.broadcast %1104 : vector<8x1xf32> to vector<8x16xf32>
    %1106 = arith.mulf %1103, %1105 : vector<8x16xf32>
    %c0_418 = arith.constant 0 : index
    %c9_419 = arith.constant 9 : index
    %1107 = vector.load %arg42[%c0_418, %c9_419] : memref<16x36xf32, #tpu.memory_space<vmem>>, vector<8x16xf32>
    %1108 = vector.extract_strided_slice %1099 {offsets = [0, 3], sizes = [8, 1], strides = [1, 1]} : vector<8x9xf32> to vector<8x1xf32>
    %1109 = vector.broadcast %1108 : vector<8x1xf32> to vector<8x16xf32>
    %1110 = arith.mulf %1107, %1109 : vector<8x16xf32>
    %1111 = arith.addf %1106, %1110 : vector<8x16xf32>
    %c0_420 = arith.constant 0 : index
    %c13_421 = arith.constant 13 : index
    %1112 = vector.load %arg42[%c0_420, %c13_421] : memref<16x36xf32, #tpu.memory_space<vmem>>, vector<8x16xf32>
    %1113 = vector.extract_strided_slice %1099 {offsets = [0, 6], sizes = [8, 1], strides = [1, 1]} : vector<8x9xf32> to vector<8x1xf32>
    %1114 = vector.broadcast %1113 : vector<8x1xf32> to vector<8x16xf32>
    %1115 = arith.mulf %1112, %1114 : vector<8x16xf32>
    %1116 = arith.addf %1111, %1115 : vector<8x16xf32>
    %1117 = vector.extract_strided_slice %11 {offsets = [1, 0], sizes = [1, 16], strides = [1, 1]} : vector<5x16xf32> to vector<1x16xf32>
    %1118 = vector.broadcast %1117 : vector<1x16xf32> to vector<8x16xf32>
    %1119 = arith.mulf %1116, %1118 : vector<8x16xf32>
    %c0_422 = arith.constant 0 : index
    %c6_423 = arith.constant 6 : index
    %1120 = vector.load %arg42[%c0_422, %c6_423] : memref<16x36xf32, #tpu.memory_space<vmem>>, vector<8x16xf32>
    %1121 = vector.extract_strided_slice %1099 {offsets = [0, 1], sizes = [8, 1], strides = [1, 1]} : vector<8x9xf32> to vector<8x1xf32>
    %1122 = vector.broadcast %1121 : vector<8x1xf32> to vector<8x16xf32>
    %1123 = arith.mulf %1120, %1122 : vector<8x16xf32>
    %c0_424 = arith.constant 0 : index
    %c10_425 = arith.constant 10 : index
    %1124 = vector.load %arg42[%c0_424, %c10_425] : memref<16x36xf32, #tpu.memory_space<vmem>>, vector<8x16xf32>
    %1125 = vector.extract_strided_slice %1099 {offsets = [0, 4], sizes = [8, 1], strides = [1, 1]} : vector<8x9xf32> to vector<8x1xf32>
    %1126 = vector.broadcast %1125 : vector<8x1xf32> to vector<8x16xf32>
    %1127 = arith.mulf %1124, %1126 : vector<8x16xf32>
    %1128 = arith.addf %1123, %1127 : vector<8x16xf32>
    %c0_426 = arith.constant 0 : index
    %c14_427 = arith.constant 14 : index
    %1129 = vector.load %arg42[%c0_426, %c14_427] : memref<16x36xf32, #tpu.memory_space<vmem>>, vector<8x16xf32>
    %1130 = vector.extract_strided_slice %1099 {offsets = [0, 7], sizes = [8, 1], strides = [1, 1]} : vector<8x9xf32> to vector<8x1xf32>
    %1131 = vector.broadcast %1130 : vector<8x1xf32> to vector<8x16xf32>
    %1132 = arith.mulf %1129, %1131 : vector<8x16xf32>
    %1133 = arith.addf %1128, %1132 : vector<8x16xf32>
    %1134 = arith.addf %1119, %1133 : vector<8x16xf32>
    %c0_428 = arith.constant 0 : index
    %c7_429 = arith.constant 7 : index
    %1135 = vector.load %arg42[%c0_428, %c7_429] : memref<16x36xf32, #tpu.memory_space<vmem>>, vector<8x16xf32>
    %1136 = vector.extract_strided_slice %1099 {offsets = [0, 2], sizes = [8, 1], strides = [1, 1]} : vector<8x9xf32> to vector<8x1xf32>
    %1137 = vector.broadcast %1136 : vector<8x1xf32> to vector<8x16xf32>
    %1138 = arith.mulf %1135, %1137 : vector<8x16xf32>
    %c0_430 = arith.constant 0 : index
    %c11_431 = arith.constant 11 : index
    %1139 = vector.load %arg42[%c0_430, %c11_431] : memref<16x36xf32, #tpu.memory_space<vmem>>, vector<8x16xf32>
    %1140 = vector.extract_strided_slice %1099 {offsets = [0, 5], sizes = [8, 1], strides = [1, 1]} : vector<8x9xf32> to vector<8x1xf32>
    %1141 = vector.broadcast %1140 : vector<8x1xf32> to vector<8x16xf32>
    %1142 = arith.mulf %1139, %1141 : vector<8x16xf32>
    %1143 = arith.addf %1138, %1142 : vector<8x16xf32>
    %c0_432 = arith.constant 0 : index
    %c15_433 = arith.constant 15 : index
    %1144 = vector.load %arg42[%c0_432, %c15_433] : memref<16x36xf32, #tpu.memory_space<vmem>>, vector<8x16xf32>
    %1145 = vector.extract_strided_slice %1099 {offsets = [0, 8], sizes = [8, 1], strides = [1, 1]} : vector<8x9xf32> to vector<8x1xf32>
    %1146 = vector.broadcast %1145 : vector<8x1xf32> to vector<8x16xf32>
    %1147 = arith.mulf %1144, %1146 : vector<8x16xf32>
    %1148 = arith.addf %1143, %1147 : vector<8x16xf32>
    %1149 = vector.extract_strided_slice %11 {offsets = [3, 0], sizes = [1, 16], strides = [1, 1]} : vector<5x16xf32> to vector<1x16xf32>
    %1150 = vector.broadcast %1149 : vector<1x16xf32> to vector<8x16xf32>
    %1151 = arith.mulf %1148, %1150 : vector<8x16xf32>
    %1152 = arith.addf %1134, %1151 : vector<8x16xf32>
    %1153 = vector.broadcast %1100 : vector<8x1xf32> to vector<8x16xf32>
    %1154 = arith.mulf %1152, %1153 : vector<8x16xf32>
    %1155 = vector.broadcast %1101 : vector<8x1xf32> to vector<8x16xf32>
    %1156 = arith.addf %1154, %1155 : vector<8x16xf32>
    %cst_434 = arith.constant 0.000000e+00 : f32
    %1157 = vector.broadcast %cst_434 : f32 to vector<8x16xf32>
    %1158 = arith.maximumf %1156, %1157 : vector<8x16xf32>
    %cst_435 = arith.constant 6.000000e+00 : f32
    %1159 = vector.broadcast %cst_435 : f32 to vector<8x16xf32>
    %1160 = arith.minimumf %1158, %1159 : vector<8x16xf32>
    %1161 = vector.extract_strided_slice %1098 {offsets = [0, 0], sizes = [4, 16], strides = [1, 1]} : vector<8x16xf32> to vector<4x16xf32>
    %1162 = vector.extract_strided_slice %1160 {offsets = [0, 0], sizes = [4, 16], strides = [1, 1]} : vector<8x16xf32> to vector<4x16xf32>
    %1163 = vector.extract_strided_slice %1098 {offsets = [4, 0], sizes = [4, 16], strides = [1, 1]} : vector<8x16xf32> to vector<4x16xf32>
    %1164 = vector.extract_strided_slice %1160 {offsets = [4, 0], sizes = [4, 16], strides = [1, 1]} : vector<8x16xf32> to vector<4x16xf32>
    %c0_436 = arith.constant 0 : index
    %c0_437 = arith.constant 0 : index
    %1165 = vector.load %arg33[%c0_436, %c0_437] : memref<4x8xbf16, #tpu.memory_space<vmem>>, vector<4x8xbf16>
    %c0_438 = arith.constant 0 : index
    %c0_439 = arith.constant 0 : index
    %1166 = vector.load %arg34[%c0_438, %c0_439] : memref<4x13xf32, #tpu.memory_space<vmem>>, vector<4x13xf32>
    %1167 = vector.extract_strided_slice %1165 {offsets = [0, 0], sizes = [4, 4], strides = [1, 1]} : vector<4x8xbf16> to vector<4x4xbf16>
    %1168 = arith.truncf %1161 : vector<4x16xf32> to vector<4x16xbf16>
    %cst_440 = arith.constant dense<0.000000e+00> : vector<4x16xf32>
    %1169 = tpu.matmul %1167, %1168, %cst_440 {dimension_numbers = #tpu.dot_dimension_numbers<[1], [0], [0], [1], [0, 0, 1, 1], [], []>} : vector<4x4xbf16>, vector<4x16xbf16>, vector<4x16xf32> -> vector<4x16xf32>
    %1170 = vector.extract_strided_slice %1165 {offsets = [0, 4], sizes = [4, 4], strides = [1, 1]} : vector<4x8xbf16> to vector<4x4xbf16>
    %1171 = arith.truncf %1162 : vector<4x16xf32> to vector<4x16xbf16>
    %cst_441 = arith.constant dense<0.000000e+00> : vector<4x16xf32>
    %1172 = tpu.matmul %1170, %1171, %cst_441 {dimension_numbers = #tpu.dot_dimension_numbers<[1], [0], [0], [1], [0, 0, 1, 1], [], []>} : vector<4x4xbf16>, vector<4x16xbf16>, vector<4x16xf32> -> vector<4x16xf32>
    %1173 = arith.addf %1169, %1172 : vector<4x16xf32>
    %1174 = vector.extract_strided_slice %1166 {offsets = [0, 0], sizes = [4, 1], strides = [1, 1]} : vector<4x13xf32> to vector<4x1xf32>
    %1175 = vector.broadcast %1174 : vector<4x1xf32> to vector<4x16xf32>
    %1176 = arith.mulf %1173, %1175 : vector<4x16xf32>
    %1177 = vector.extract_strided_slice %1166 {offsets = [0, 1], sizes = [4, 1], strides = [1, 1]} : vector<4x13xf32> to vector<4x1xf32>
    %1178 = vector.broadcast %1177 : vector<4x1xf32> to vector<4x16xf32>
    %1179 = arith.addf %1176, %1178 : vector<4x16xf32>
    %cst_442 = arith.constant 0.000000e+00 : f32
    %1180 = vector.broadcast %cst_442 : f32 to vector<4x16xf32>
    %1181 = arith.maximumf %1179, %1180 : vector<4x16xf32>
    %cst_443 = arith.constant 6.000000e+00 : f32
    %1182 = vector.broadcast %cst_443 : f32 to vector<4x16xf32>
    %1183 = arith.minimumf %1181, %1182 : vector<4x16xf32>
    %1184 = vector.extract_strided_slice %1166 {offsets = [0, 4], sizes = [4, 9], strides = [1, 1]} : vector<4x13xf32> to vector<4x9xf32>
    %1185 = vector.extract_strided_slice %1166 {offsets = [0, 2], sizes = [4, 1], strides = [1, 1]} : vector<4x13xf32> to vector<4x1xf32>
    %1186 = vector.extract_strided_slice %1166 {offsets = [0, 3], sizes = [4, 1], strides = [1, 1]} : vector<4x13xf32> to vector<4x1xf32>
    %c0_444 = arith.constant 0 : index
    %c10_445 = arith.constant 10 : index
    %1187 = vector.load %arg42[%c0_444, %c10_445] : memref<16x36xf32, #tpu.memory_space<vmem>>, vector<4x16xf32>
    tpu.vector_store %arg42[%c0_444, %c10_445], %1183 {strides = array<i32>} : memref<16x36xf32, #tpu.memory_space<vmem>>, vector<4x16xf32>,
    %c0_446 = arith.constant 0 : index
    %c5_447 = arith.constant 5 : index
    %1188 = vector.load %arg42[%c0_446, %c5_447] : memref<16x36xf32, #tpu.memory_space<vmem>>, vector<4x16xf32>
    %1189 = vector.extract_strided_slice %1184 {offsets = [0, 0], sizes = [4, 1], strides = [1, 1]} : vector<4x9xf32> to vector<4x1xf32>
    %1190 = vector.broadcast %1189 : vector<4x1xf32> to vector<4x16xf32>
    %1191 = arith.mulf %1188, %1190 : vector<4x16xf32>
    %c0_448 = arith.constant 0 : index
    %c9_449 = arith.constant 9 : index
    %1192 = vector.load %arg42[%c0_448, %c9_449] : memref<16x36xf32, #tpu.memory_space<vmem>>, vector<4x16xf32>
    %1193 = vector.extract_strided_slice %1184 {offsets = [0, 3], sizes = [4, 1], strides = [1, 1]} : vector<4x9xf32> to vector<4x1xf32>
    %1194 = vector.broadcast %1193 : vector<4x1xf32> to vector<4x16xf32>
    %1195 = arith.mulf %1192, %1194 : vector<4x16xf32>
    %1196 = arith.addf %1191, %1195 : vector<4x16xf32>
    %c0_450 = arith.constant 0 : index
    %c13_451 = arith.constant 13 : index
    %1197 = vector.load %arg42[%c0_450, %c13_451] : memref<16x36xf32, #tpu.memory_space<vmem>>, vector<4x16xf32>
    %1198 = vector.extract_strided_slice %1184 {offsets = [0, 6], sizes = [4, 1], strides = [1, 1]} : vector<4x9xf32> to vector<4x1xf32>
    %1199 = vector.broadcast %1198 : vector<4x1xf32> to vector<4x16xf32>
    %1200 = arith.mulf %1197, %1199 : vector<4x16xf32>
    %1201 = arith.addf %1196, %1200 : vector<4x16xf32>
    %1202 = vector.extract_strided_slice %11 {offsets = [1, 0], sizes = [1, 16], strides = [1, 1]} : vector<5x16xf32> to vector<1x16xf32>
    %1203 = vector.broadcast %1202 : vector<1x16xf32> to vector<4x16xf32>
    %1204 = arith.mulf %1201, %1203 : vector<4x16xf32>
    %c0_452 = arith.constant 0 : index
    %c6_453 = arith.constant 6 : index
    %1205 = vector.load %arg42[%c0_452, %c6_453] : memref<16x36xf32, #tpu.memory_space<vmem>>, vector<4x16xf32>
    %1206 = vector.extract_strided_slice %1184 {offsets = [0, 1], sizes = [4, 1], strides = [1, 1]} : vector<4x9xf32> to vector<4x1xf32>
    %1207 = vector.broadcast %1206 : vector<4x1xf32> to vector<4x16xf32>
    %1208 = arith.mulf %1205, %1207 : vector<4x16xf32>
    %c0_454 = arith.constant 0 : index
    %c10_455 = arith.constant 10 : index
    %1209 = vector.load %arg42[%c0_454, %c10_455] : memref<16x36xf32, #tpu.memory_space<vmem>>, vector<4x16xf32>
    %1210 = vector.extract_strided_slice %1184 {offsets = [0, 4], sizes = [4, 1], strides = [1, 1]} : vector<4x9xf32> to vector<4x1xf32>
    %1211 = vector.broadcast %1210 : vector<4x1xf32> to vector<4x16xf32>
    %1212 = arith.mulf %1209, %1211 : vector<4x16xf32>
    %1213 = arith.addf %1208, %1212 : vector<4x16xf32>
    %c0_456 = arith.constant 0 : index
    %c14_457 = arith.constant 14 : index
    %1214 = vector.load %arg42[%c0_456, %c14_457] : memref<16x36xf32, #tpu.memory_space<vmem>>, vector<4x16xf32>
    %1215 = vector.extract_strided_slice %1184 {offsets = [0, 7], sizes = [4, 1], strides = [1, 1]} : vector<4x9xf32> to vector<4x1xf32>
    %1216 = vector.broadcast %1215 : vector<4x1xf32> to vector<4x16xf32>
    %1217 = arith.mulf %1214, %1216 : vector<4x16xf32>
    %1218 = arith.addf %1213, %1217 : vector<4x16xf32>
    %1219 = arith.addf %1204, %1218 : vector<4x16xf32>
    %c0_458 = arith.constant 0 : index
    %c7_459 = arith.constant 7 : index
    %1220 = vector.load %arg42[%c0_458, %c7_459] : memref<16x36xf32, #tpu.memory_space<vmem>>, vector<4x16xf32>
    %1221 = vector.extract_strided_slice %1184 {offsets = [0, 2], sizes = [4, 1], strides = [1, 1]} : vector<4x9xf32> to vector<4x1xf32>
    %1222 = vector.broadcast %1221 : vector<4x1xf32> to vector<4x16xf32>
    %1223 = arith.mulf %1220, %1222 : vector<4x16xf32>
    %c0_460 = arith.constant 0 : index
    %c11_461 = arith.constant 11 : index
    %1224 = vector.load %arg42[%c0_460, %c11_461] : memref<16x36xf32, #tpu.memory_space<vmem>>, vector<4x16xf32>
    %1225 = vector.extract_strided_slice %1184 {offsets = [0, 5], sizes = [4, 1], strides = [1, 1]} : vector<4x9xf32> to vector<4x1xf32>
    %1226 = vector.broadcast %1225 : vector<4x1xf32> to vector<4x16xf32>
    %1227 = arith.mulf %1224, %1226 : vector<4x16xf32>
    %1228 = arith.addf %1223, %1227 : vector<4x16xf32>
    %c0_462 = arith.constant 0 : index
    %c15_463 = arith.constant 15 : index
    %1229 = vector.load %arg42[%c0_462, %c15_463] : memref<16x36xf32, #tpu.memory_space<vmem>>, vector<4x16xf32>
    %1230 = vector.extract_strided_slice %1184 {offsets = [0, 8], sizes = [4, 1], strides = [1, 1]} : vector<4x9xf32> to vector<4x1xf32>
    %1231 = vector.broadcast %1230 : vector<4x1xf32> to vector<4x16xf32>
    %1232 = arith.mulf %1229, %1231 : vector<4x16xf32>
    %1233 = arith.addf %1228, %1232 : vector<4x16xf32>
    %1234 = vector.extract_strided_slice %11 {offsets = [3, 0], sizes = [1, 16], strides = [1, 1]} : vector<5x16xf32> to vector<1x16xf32>
    %1235 = vector.broadcast %1234 : vector<1x16xf32> to vector<4x16xf32>
    %1236 = arith.mulf %1233, %1235 : vector<4x16xf32>
    %1237 = arith.addf %1219, %1236 : vector<4x16xf32>
    %1238 = vector.broadcast %1185 : vector<4x1xf32> to vector<4x16xf32>
    %1239 = arith.mulf %1237, %1238 : vector<4x16xf32>
    %1240 = vector.broadcast %1186 : vector<4x1xf32> to vector<4x16xf32>
    %1241 = arith.addf %1239, %1240 : vector<4x16xf32>
    %cst_464 = arith.constant 0.000000e+00 : f32
    %1242 = vector.broadcast %cst_464 : f32 to vector<4x16xf32>
    %1243 = arith.maximumf %1241, %1242 : vector<4x16xf32>
    %cst_465 = arith.constant 6.000000e+00 : f32
    %1244 = vector.broadcast %cst_465 : f32 to vector<4x16xf32>
    %1245 = arith.minimumf %1243, %1244 : vector<4x16xf32>
    %c0_466 = arith.constant 0 : index
    %c0_467 = arith.constant 0 : index
    %1246 = vector.load %arg35[%c0_466, %c0_467] : memref<8x16xbf16, #tpu.memory_space<vmem>>, vector<8x16xbf16>
    %c0_468 = arith.constant 0 : index
    %c0_469 = arith.constant 0 : index
    %1247 = vector.load %arg36[%c0_468, %c0_469] : memref<8x13xf32, #tpu.memory_space<vmem>>, vector<8x13xf32>
    %1248 = vector.extract_strided_slice %1246 {offsets = [0, 0], sizes = [8, 4], strides = [1, 1]} : vector<8x16xbf16> to vector<8x4xbf16>
    %1249 = arith.truncf %1183 : vector<4x16xf32> to vector<4x16xbf16>
    %cst_470 = arith.constant dense<0.000000e+00> : vector<8x16xf32>
    %1250 = tpu.matmul %1248, %1249, %cst_470 {dimension_numbers = #tpu.dot_dimension_numbers<[1], [0], [0], [1], [0, 0, 1, 1], [], []>} : vector<8x4xbf16>, vector<4x16xbf16>, vector<8x16xf32> -> vector<8x16xf32>
    %1251 = vector.extract_strided_slice %1246 {offsets = [0, 4], sizes = [8, 4], strides = [1, 1]} : vector<8x16xbf16> to vector<8x4xbf16>
    %1252 = arith.truncf %1245 : vector<4x16xf32> to vector<4x16xbf16>
    %cst_471 = arith.constant dense<0.000000e+00> : vector<8x16xf32>
    %1253 = tpu.matmul %1251, %1252, %cst_471 {dimension_numbers = #tpu.dot_dimension_numbers<[1], [0], [0], [1], [0, 0, 1, 1], [], []>} : vector<8x4xbf16>, vector<4x16xbf16>, vector<8x16xf32> -> vector<8x16xf32>
    %1254 = arith.addf %1250, %1253 : vector<8x16xf32>
    %1255 = vector.extract_strided_slice %1246 {offsets = [0, 8], sizes = [8, 4], strides = [1, 1]} : vector<8x16xbf16> to vector<8x4xbf16>
    %1256 = arith.truncf %1163 : vector<4x16xf32> to vector<4x16xbf16>
    %cst_472 = arith.constant dense<0.000000e+00> : vector<8x16xf32>
    %1257 = tpu.matmul %1255, %1256, %cst_472 {dimension_numbers = #tpu.dot_dimension_numbers<[1], [0], [0], [1], [0, 0, 1, 1], [], []>} : vector<8x4xbf16>, vector<4x16xbf16>, vector<8x16xf32> -> vector<8x16xf32>
    %1258 = arith.addf %1254, %1257 : vector<8x16xf32>
    %1259 = vector.extract_strided_slice %1246 {offsets = [0, 12], sizes = [8, 4], strides = [1, 1]} : vector<8x16xbf16> to vector<8x4xbf16>
    %1260 = arith.truncf %1164 : vector<4x16xf32> to vector<4x16xbf16>
    %cst_473 = arith.constant dense<0.000000e+00> : vector<8x16xf32>
    %1261 = tpu.matmul %1259, %1260, %cst_473 {dimension_numbers = #tpu.dot_dimension_numbers<[1], [0], [0], [1], [0, 0, 1, 1], [], []>} : vector<8x4xbf16>, vector<4x16xbf16>, vector<8x16xf32> -> vector<8x16xf32>
    %1262 = arith.addf %1258, %1261 : vector<8x16xf32>
    %1263 = vector.extract_strided_slice %1247 {offsets = [0, 0], sizes = [8, 1], strides = [1, 1]} : vector<8x13xf32> to vector<8x1xf32>
    %1264 = vector.broadcast %1263 : vector<8x1xf32> to vector<8x16xf32>
    %1265 = arith.mulf %1262, %1264 : vector<8x16xf32>
    %1266 = vector.extract_strided_slice %1247 {offsets = [0, 1], sizes = [8, 1], strides = [1, 1]} : vector<8x13xf32> to vector<8x1xf32>
    %1267 = vector.broadcast %1266 : vector<8x1xf32> to vector<8x16xf32>
    %1268 = arith.addf %1265, %1267 : vector<8x16xf32>
    %cst_474 = arith.constant 0.000000e+00 : f32
    %1269 = vector.broadcast %cst_474 : f32 to vector<8x16xf32>
    %1270 = arith.maximumf %1268, %1269 : vector<8x16xf32>
    %cst_475 = arith.constant 6.000000e+00 : f32
    %1271 = vector.broadcast %cst_475 : f32 to vector<8x16xf32>
    %1272 = arith.minimumf %1270, %1271 : vector<8x16xf32>
    %1273 = vector.extract_strided_slice %1247 {offsets = [0, 4], sizes = [8, 9], strides = [1, 1]} : vector<8x13xf32> to vector<8x9xf32>
    %1274 = vector.extract_strided_slice %1247 {offsets = [0, 2], sizes = [8, 1], strides = [1, 1]} : vector<8x13xf32> to vector<8x1xf32>
    %1275 = vector.extract_strided_slice %1247 {offsets = [0, 3], sizes = [8, 1], strides = [1, 1]} : vector<8x13xf32> to vector<8x1xf32>
    %c0_476 = arith.constant 0 : index
    %c10_477 = arith.constant 10 : index
    %1276 = vector.load %arg42[%c0_476, %c10_477] : memref<16x36xf32, #tpu.memory_space<vmem>>, vector<8x16xf32>
    tpu.vector_store %arg42[%c0_476, %c10_477], %1272 {strides = array<i32>} : memref<16x36xf32, #tpu.memory_space<vmem>>, vector<8x16xf32>,
    %c0_478 = arith.constant 0 : index
    %c5_479 = arith.constant 5 : index
    %1277 = vector.load %arg42[%c0_478, %c5_479] : memref<16x36xf32, #tpu.memory_space<vmem>>, vector<8x16xf32>
    %1278 = vector.extract_strided_slice %1273 {offsets = [0, 0], sizes = [8, 1], strides = [1, 1]} : vector<8x9xf32> to vector<8x1xf32>
    %1279 = vector.broadcast %1278 : vector<8x1xf32> to vector<8x16xf32>
    %1280 = arith.mulf %1277, %1279 : vector<8x16xf32>
    %c0_480 = arith.constant 0 : index
    %c9_481 = arith.constant 9 : index
    %1281 = vector.load %arg42[%c0_480, %c9_481] : memref<16x36xf32, #tpu.memory_space<vmem>>, vector<8x16xf32>
    %1282 = vector.extract_strided_slice %1273 {offsets = [0, 3], sizes = [8, 1], strides = [1, 1]} : vector<8x9xf32> to vector<8x1xf32>
    %1283 = vector.broadcast %1282 : vector<8x1xf32> to vector<8x16xf32>
    %1284 = arith.mulf %1281, %1283 : vector<8x16xf32>
    %1285 = arith.addf %1280, %1284 : vector<8x16xf32>
    %c0_482 = arith.constant 0 : index
    %c13_483 = arith.constant 13 : index
    %1286 = vector.load %arg42[%c0_482, %c13_483] : memref<16x36xf32, #tpu.memory_space<vmem>>, vector<8x16xf32>
    %1287 = vector.extract_strided_slice %1273 {offsets = [0, 6], sizes = [8, 1], strides = [1, 1]} : vector<8x9xf32> to vector<8x1xf32>
    %1288 = vector.broadcast %1287 : vector<8x1xf32> to vector<8x16xf32>
    %1289 = arith.mulf %1286, %1288 : vector<8x16xf32>
    %1290 = arith.addf %1285, %1289 : vector<8x16xf32>
    %1291 = vector.extract_strided_slice %11 {offsets = [1, 0], sizes = [1, 16], strides = [1, 1]} : vector<5x16xf32> to vector<1x16xf32>
    %1292 = vector.broadcast %1291 : vector<1x16xf32> to vector<8x16xf32>
    %1293 = arith.mulf %1290, %1292 : vector<8x16xf32>
    %c0_484 = arith.constant 0 : index
    %c6_485 = arith.constant 6 : index
    %1294 = vector.load %arg42[%c0_484, %c6_485] : memref<16x36xf32, #tpu.memory_space<vmem>>, vector<8x16xf32>
    %1295 = vector.extract_strided_slice %1273 {offsets = [0, 1], sizes = [8, 1], strides = [1, 1]} : vector<8x9xf32> to vector<8x1xf32>
    %1296 = vector.broadcast %1295 : vector<8x1xf32> to vector<8x16xf32>
    %1297 = arith.mulf %1294, %1296 : vector<8x16xf32>
    %c0_486 = arith.constant 0 : index
    %c10_487 = arith.constant 10 : index
    %1298 = vector.load %arg42[%c0_486, %c10_487] : memref<16x36xf32, #tpu.memory_space<vmem>>, vector<8x16xf32>
    %1299 = vector.extract_strided_slice %1273 {offsets = [0, 4], sizes = [8, 1], strides = [1, 1]} : vector<8x9xf32> to vector<8x1xf32>
    %1300 = vector.broadcast %1299 : vector<8x1xf32> to vector<8x16xf32>
    %1301 = arith.mulf %1298, %1300 : vector<8x16xf32>
    %1302 = arith.addf %1297, %1301 : vector<8x16xf32>
    %c0_488 = arith.constant 0 : index
    %c14_489 = arith.constant 14 : index
    %1303 = vector.load %arg42[%c0_488, %c14_489] : memref<16x36xf32, #tpu.memory_space<vmem>>, vector<8x16xf32>
    %1304 = vector.extract_strided_slice %1273 {offsets = [0, 7], sizes = [8, 1], strides = [1, 1]} : vector<8x9xf32> to vector<8x1xf32>
    %1305 = vector.broadcast %1304 : vector<8x1xf32> to vector<8x16xf32>
    %1306 = arith.mulf %1303, %1305 : vector<8x16xf32>
    %1307 = arith.addf %1302, %1306 : vector<8x16xf32>
    %1308 = arith.addf %1293, %1307 : vector<8x16xf32>
    %c0_490 = arith.constant 0 : index
    %c7_491 = arith.constant 7 : index
    %1309 = vector.load %arg42[%c0_490, %c7_491] : memref<16x36xf32, #tpu.memory_space<vmem>>, vector<8x16xf32>
    %1310 = vector.extract_strided_slice %1273 {offsets = [0, 2], sizes = [8, 1], strides = [1, 1]} : vector<8x9xf32> to vector<8x1xf32>
    %1311 = vector.broadcast %1310 : vector<8x1xf32> to vector<8x16xf32>
    %1312 = arith.mulf %1309, %1311 : vector<8x16xf32>
    %c0_492 = arith.constant 0 : index
    %c11_493 = arith.constant 11 : index
    %1313 = vector.load %arg42[%c0_492, %c11_493] : memref<16x36xf32, #tpu.memory_space<vmem>>, vector<8x16xf32>
    %1314 = vector.extract_strided_slice %1273 {offsets = [0, 5], sizes = [8, 1], strides = [1, 1]} : vector<8x9xf32> to vector<8x1xf32>
    %1315 = vector.broadcast %1314 : vector<8x1xf32> to vector<8x16xf32>
    %1316 = arith.mulf %1313, %1315 : vector<8x16xf32>
    %1317 = arith.addf %1312, %1316 : vector<8x16xf32>
    %c0_494 = arith.constant 0 : index
    %c15_495 = arith.constant 15 : index
    %1318 = vector.load %arg42[%c0_494, %c15_495] : memref<16x36xf32, #tpu.memory_space<vmem>>, vector<8x16xf32>
    %1319 = vector.extract_strided_slice %1273 {offsets = [0, 8], sizes = [8, 1], strides = [1, 1]} : vector<8x9xf32> to vector<8x1xf32>
    %1320 = vector.broadcast %1319 : vector<8x1xf32> to vector<8x16xf32>
    %1321 = arith.mulf %1318, %1320 : vector<8x16xf32>
    %1322 = arith.addf %1317, %1321 : vector<8x16xf32>
    %1323 = vector.extract_strided_slice %11 {offsets = [3, 0], sizes = [1, 16], strides = [1, 1]} : vector<5x16xf32> to vector<1x16xf32>
    %1324 = vector.broadcast %1323 : vector<1x16xf32> to vector<8x16xf32>
    %1325 = arith.mulf %1322, %1324 : vector<8x16xf32>
    %1326 = arith.addf %1308, %1325 : vector<8x16xf32>
    %1327 = vector.broadcast %1274 : vector<8x1xf32> to vector<8x16xf32>
    %1328 = arith.mulf %1326, %1327 : vector<8x16xf32>
    %1329 = vector.broadcast %1275 : vector<8x1xf32> to vector<8x16xf32>
    %1330 = arith.addf %1328, %1329 : vector<8x16xf32>
    %cst_496 = arith.constant 0.000000e+00 : f32
    %1331 = vector.broadcast %cst_496 : f32 to vector<8x16xf32>
    %1332 = arith.maximumf %1330, %1331 : vector<8x16xf32>
    %cst_497 = arith.constant 6.000000e+00 : f32
    %1333 = vector.broadcast %cst_497 : f32 to vector<8x16xf32>
    %1334 = arith.minimumf %1332, %1333 : vector<8x16xf32>
    %c0_498 = arith.constant 0 : index
    %c0_499 = arith.constant 0 : index
    %c0_500 = arith.constant 0 : index
    %1335 = vector.load %arg39[%c0_498, %c0_499, %c0_500] : memref<1x16x16xf32, #tpu.memory_space<vmem>>, vector<1x8x16xf32>
    %1336 = vector.shape_cast %1335 : vector<1x8x16xf32> to vector<8x16xf32>
    %1337 = vector.shape_cast %1272 : vector<8x16xf32> to vector<1x8x16xf32>
    tpu.vector_store %arg39[%c0_498, %c0_499, %c0_500], %1337 {strides = array<i32>} : memref<1x16x16xf32, #tpu.memory_space<vmem>>, vector<1x8x16xf32>,
    %c0_501 = arith.constant 0 : index
    %c8_502 = arith.constant 8 : index
    %c0_503 = arith.constant 0 : index
    %1338 = vector.load %arg39[%c0_501, %c8_502, %c0_503] : memref<1x16x16xf32, #tpu.memory_space<vmem>>, vector<1x8x16xf32>
    %1339 = vector.shape_cast %1338 : vector<1x8x16xf32> to vector<8x16xf32>
    %1340 = vector.shape_cast %1334 : vector<8x16xf32> to vector<1x8x16xf32>
    tpu.vector_store %arg39[%c0_501, %c8_502, %c0_503], %1340 {strides = array<i32>} : memref<1x16x16xf32, #tpu.memory_space<vmem>>, vector<1x8x16xf32>,
    return
  }
  func.func @transform_0(%arg0: i32) -> (i32, i32, i32) {
    %c0_i32 = arith.constant 0 : i32
    %c0_i32_0 = arith.constant 0 : i32
    %c0_i32_1 = arith.constant 0 : i32
    return %arg0, %c0_i32, %c0_i32_0 : i32, i32, i32
  }
  func.func @transform_1(%arg0: i32) -> (i32, i32, i32) {
    %c0_i32 = arith.constant 0 : i32
    %c0_i32_0 = arith.constant 0 : i32
    %c0_i32_1 = arith.constant 0 : i32
    return %arg0, %c0_i32, %c0_i32_0 : i32, i32, i32
  }
  func.func @transform_2(%arg0: i32) -> (i32, i32, i32) {
    %c0_i32 = arith.constant 0 : i32
    %c0_i32_0 = arith.constant 0 : i32
    %c0_i32_1 = arith.constant 0 : i32
    return %arg0, %c0_i32, %c0_i32_0 : i32, i32, i32
  }
  func.func @transform_3(%arg0: i32) -> (i32, i32) {
    %c0_i32 = arith.constant 0 : i32
    %c0_i32_0 = arith.constant 0 : i32
    %c0_i32_1 = arith.constant 0 : i32
    return %c0_i32, %c0_i32_0 : i32, i32
  }
  func.func @transform_4(%arg0: i32) -> (i32, i32) {
    %c0_i32 = arith.constant 0 : i32
    %c0_i32_0 = arith.constant 0 : i32
    %c0_i32_1 = arith.constant 0 : i32
    return %c0_i32, %c0_i32_0 : i32, i32
  }
  func.func @transform_5(%arg0: i32) -> (i32, i32) {
    %c0_i32 = arith.constant 0 : i32
    %c0_i32_0 = arith.constant 0 : i32
    %c0_i32_1 = arith.constant 0 : i32
    return %c0_i32, %c0_i32_0 : i32, i32
  }
  func.func @transform_6(%arg0: i32) -> (i32, i32) {
    %c0_i32 = arith.constant 0 : i32
    %c0_i32_0 = arith.constant 0 : i32
    %c0_i32_1 = arith.constant 0 : i32
    return %c0_i32, %c0_i32_0 : i32, i32
  }
  func.func @transform_7(%arg0: i32) -> (i32, i32) {
    %c0_i32 = arith.constant 0 : i32
    %c0_i32_0 = arith.constant 0 : i32
    %c0_i32_1 = arith.constant 0 : i32
    return %c0_i32, %c0_i32_0 : i32, i32
  }
  func.func @transform_8(%arg0: i32) -> (i32, i32) {
    %c0_i32 = arith.constant 0 : i32
    %c0_i32_0 = arith.constant 0 : i32
    %c0_i32_1 = arith.constant 0 : i32
    return %c0_i32, %c0_i32_0 : i32, i32
  }
  func.func @transform_9(%arg0: i32) -> (i32, i32) {
    %c0_i32 = arith.constant 0 : i32
    %c0_i32_0 = arith.constant 0 : i32
    %c0_i32_1 = arith.constant 0 : i32
    return %c0_i32, %c0_i32_0 : i32, i32
  }
  func.func @transform_10(%arg0: i32) -> (i32, i32) {
    %c0_i32 = arith.constant 0 : i32
    %c0_i32_0 = arith.constant 0 : i32
    %c0_i32_1 = arith.constant 0 : i32
    return %c0_i32, %c0_i32_0 : i32, i32
  }
  func.func @transform_11(%arg0: i32) -> (i32, i32) {
    %c0_i32 = arith.constant 0 : i32
    %c0_i32_0 = arith.constant 0 : i32
    %c0_i32_1 = arith.constant 0 : i32
    return %c0_i32, %c0_i32_0 : i32, i32
  }
  func.func @transform_12(%arg0: i32) -> (i32, i32) {
    %c0_i32 = arith.constant 0 : i32
    %c0_i32_0 = arith.constant 0 : i32
    %c0_i32_1 = arith.constant 0 : i32
    return %c0_i32, %c0_i32_0 : i32, i32
  }
  func.func @transform_13(%arg0: i32) -> (i32, i32) {
    %c0_i32 = arith.constant 0 : i32
    %c0_i32_0 = arith.constant 0 : i32
    %c0_i32_1 = arith.constant 0 : i32
    return %c0_i32, %c0_i32_0 : i32, i32
  }
  func.func @transform_14(%arg0: i32) -> (i32, i32) {
    %c0_i32 = arith.constant 0 : i32
    %c0_i32_0 = arith.constant 0 : i32
    %c0_i32_1 = arith.constant 0 : i32
    return %c0_i32, %c0_i32_0 : i32, i32
  }
  func.func @transform_15(%arg0: i32) -> (i32, i32) {
    %c0_i32 = arith.constant 0 : i32
    %c0_i32_0 = arith.constant 0 : i32
    %c0_i32_1 = arith.constant 0 : i32
    return %c0_i32, %c0_i32_0 : i32, i32
  }
  func.func @transform_16(%arg0: i32) -> (i32, i32) {
    %c0_i32 = arith.constant 0 : i32
    %c0_i32_0 = arith.constant 0 : i32
    %c0_i32_1 = arith.constant 0 : i32
    return %c0_i32, %c0_i32_0 : i32, i32
  }
  func.func @transform_17(%arg0: i32) -> (i32, i32) {
    %c0_i32 = arith.constant 0 : i32
    %c0_i32_0 = arith.constant 0 : i32
    %c0_i32_1 = arith.constant 0 : i32
    return %c0_i32, %c0_i32_0 : i32, i32
  }
  func.func @transform_18(%arg0: i32) -> (i32, i32) {
    %c0_i32 = arith.constant 0 : i32
    %c0_i32_0 = arith.constant 0 : i32
    %c0_i32_1 = arith.constant 0 : i32
    return %c0_i32, %c0_i32_0 : i32, i32
  }
  func.func @transform_19(%arg0: i32) -> (i32, i32) {
    %c0_i32 = arith.constant 0 : i32
    %c0_i32_0 = arith.constant 0 : i32
    %c0_i32_1 = arith.constant 0 : i32
    return %c0_i32, %c0_i32_0 : i32, i32
  }
  func.func @transform_20(%arg0: i32) -> (i32, i32) {
    %c0_i32 = arith.constant 0 : i32
    %c0_i32_0 = arith.constant 0 : i32
    %c0_i32_1 = arith.constant 0 : i32
    return %c0_i32, %c0_i32_0 : i32, i32
  }
  func.func @transform_21(%arg0: i32) -> (i32, i32) {
    %c0_i32 = arith.constant 0 : i32
    %c0_i32_0 = arith.constant 0 : i32
    %c0_i32_1 = arith.constant 0 : i32
    return %c0_i32, %c0_i32_0 : i32, i32
  }
  func.func @transform_22(%arg0: i32) -> (i32, i32) {
    %c0_i32 = arith.constant 0 : i32
    %c0_i32_0 = arith.constant 0 : i32
    %c0_i32_1 = arith.constant 0 : i32
    return %c0_i32, %c0_i32_0 : i32, i32
  }
  func.func @transform_23(%arg0: i32) -> (i32, i32) {
    %c0_i32 = arith.constant 0 : i32
    %c0_i32_0 = arith.constant 0 : i32
    %c0_i32_1 = arith.constant 0 : i32
    return %c0_i32, %c0_i32_0 : i32, i32
  }
  func.func @transform_24(%arg0: i32) -> (i32, i32) {
    %c0_i32 = arith.constant 0 : i32
    %c0_i32_0 = arith.constant 0 : i32
    %c0_i32_1 = arith.constant 0 : i32
    return %c0_i32, %c0_i32_0 : i32, i32
  }
  func.func @transform_25(%arg0: i32) -> (i32, i32) {
    %c0_i32 = arith.constant 0 : i32
    %c0_i32_0 = arith.constant 0 : i32
    %c0_i32_1 = arith.constant 0 : i32
    return %c0_i32, %c0_i32_0 : i32, i32
  }
  func.func @transform_26(%arg0: i32) -> (i32, i32) {
    %c0_i32 = arith.constant 0 : i32
    %c0_i32_0 = arith.constant 0 : i32
    %c0_i32_1 = arith.constant 0 : i32
    return %c0_i32, %c0_i32_0 : i32, i32
  }
  func.func @transform_27(%arg0: i32) -> (i32, i32) {
    %c0_i32 = arith.constant 0 : i32
    %c0_i32_0 = arith.constant 0 : i32
    %c0_i32_1 = arith.constant 0 : i32
    return %c0_i32, %c0_i32_0 : i32, i32
  }
  func.func @transform_28(%arg0: i32) -> (i32, i32) {
    %c0_i32 = arith.constant 0 : i32
    %c0_i32_0 = arith.constant 0 : i32
    %c0_i32_1 = arith.constant 0 : i32
    return %c0_i32, %c0_i32_0 : i32, i32
  }
  func.func @transform_29(%arg0: i32) -> (i32, i32) {
    %c0_i32 = arith.constant 0 : i32
    %c0_i32_0 = arith.constant 0 : i32
    %c0_i32_1 = arith.constant 0 : i32
    return %c0_i32, %c0_i32_0 : i32, i32
  }
  func.func @transform_30(%arg0: i32) -> (i32, i32) {
    %c0_i32 = arith.constant 0 : i32
    %c0_i32_0 = arith.constant 0 : i32
    %c0_i32_1 = arith.constant 0 : i32
    return %c0_i32, %c0_i32_0 : i32, i32
  }
  func.func @transform_31(%arg0: i32) -> (i32, i32) {
    %c0_i32 = arith.constant 0 : i32
    %c0_i32_0 = arith.constant 0 : i32
    %c0_i32_1 = arith.constant 0 : i32
    return %c0_i32, %c0_i32_0 : i32, i32
  }
  func.func @transform_32(%arg0: i32) -> (i32, i32) {
    %c0_i32 = arith.constant 0 : i32
    %c0_i32_0 = arith.constant 0 : i32
    %c0_i32_1 = arith.constant 0 : i32
    return %c0_i32, %c0_i32_0 : i32, i32
  }
  func.func @transform_33(%arg0: i32) -> (i32, i32) {
    %c0_i32 = arith.constant 0 : i32
    %c0_i32_0 = arith.constant 0 : i32
    %c0_i32_1 = arith.constant 0 : i32
    return %c0_i32, %c0_i32_0 : i32, i32
  }
  func.func @transform_34(%arg0: i32) -> (i32, i32) {
    %c0_i32 = arith.constant 0 : i32
    %c0_i32_0 = arith.constant 0 : i32
    %c0_i32_1 = arith.constant 0 : i32
    return %c0_i32, %c0_i32_0 : i32, i32
  }
  func.func @transform_35(%arg0: i32) -> (i32, i32) {
    %c0_i32 = arith.constant 0 : i32
    %c0_i32_0 = arith.constant 0 : i32
    %c0_i32_1 = arith.constant 0 : i32
    return %c0_i32, %c0_i32_0 : i32, i32
  }
  func.func @transform_36(%arg0: i32) -> (i32, i32, i32) {
    %c0_i32 = arith.constant 0 : i32
    %c0_i32_0 = arith.constant 0 : i32
    %c0_i32_1 = arith.constant 0 : i32
    return %arg0, %c0_i32, %c0_i32_0 : i32, i32, i32
  }
  func.func @transform_37(%arg0: i32) -> (i32, i32, i32) {
    %c0_i32 = arith.constant 0 : i32
    %c0_i32_0 = arith.constant 0 : i32
    %c0_i32_1 = arith.constant 0 : i32
    return %arg0, %c0_i32, %c0_i32_0 : i32, i32, i32
  }
  func.func @transform_38(%arg0: i32) -> (i32, i32, i32) {
    %c0_i32 = arith.constant 0 : i32
    %c0_i32_0 = arith.constant 0 : i32
    %c0_i32_1 = arith.constant 0 : i32
    return %arg0, %c0_i32, %c0_i32_0 : i32, i32, i32
  }
}

</mosaic_0001>

<bundles_post_ra>
// kernel: csppan_forward.1
= control target key start
LH: loop header
LB: loop body
LE: loop exit
PB: predicated region body
PF: predicated region fallthrough
CT: control target
= control target key end

     0   :  { %s10639_s6 = smov 1   ;;  %s10640_s10 = smov 2   ;;  %s14871_s0 = inlined_call_operand.smem [shape: u32[39], index: -1, kind: input, shape index: {}] }
   0x1   :  { %s10745_s5 = sld [smem:[%s14871_s0]]   ;;  %s10641_s14 = smov 3  }
   0x2   :  { %s10750_s9 = sld [smem:[%s14871_s0 + %s10639_s6]]   ;;  %s10642_s18 = smov 4  }
   0x3   :  { %s10755_s13 = sld [smem:[%s14871_s0 + %s10640_s10]]   ;;  %s10643_s22 = smov 5  }
   0x4   :  { %s10760_s17 = sld [smem:[%s14871_s0 + %s10641_s14]]   ;;  %s10644_s26 = smov 6  }
   0x5   :  { %s10765_s21 = sld [smem:[%s14871_s0 + %s10642_s18]]   ;;  %s10645_s30 = smov 7  }
   0x6   :  { %s10770_s25 = sld [smem:[%s14871_s0 + %s10643_s22]]   ;;  %s10646_s4 = smov 8  }
   0x7   :  { %15169 = sst [smem:[#allocation5_spill]] %s10745_s5  ;;  %s10647_s10 = smov 9  }
   0x8   :  { %15170 = sst [smem:[#allocation6_spill]] %s10750_s9  ;;  %s10648_s15 = smov 10  }
   0x9   :  { %15171 = sst [smem:[#allocation7_spill]] %s10755_s13  ;;  %s10649_s20 = smov 11  }
   0xa   :  { %s10775_s29 = sld [smem:[%s14871_s0 + %s10644_s26]]   ;;  %s10650_s26 = smov 12  }
   0xb   :  { %s10780_s3 = sld [smem:[%s14871_s0 + %s10645_s30]]   ;;  %s10651_s1 = smov 13  }
   0xc   :  { %s10785_s8 = sld [smem:[%s14871_s0 + %s10646_s4]]   ;;  %s10652_s7 = smov 14  }
   0xd   :  { %s10790_s14 = sld [smem:[%s14871_s0 + %s10647_s10]]   ;;  %s10654_s22 = smov 16  }
   0xe   :  { %s10795_s19 = sld [smem:[%s14871_s0 + %s10648_s15]]   ;;  %s10653_s15 = smov 15  }
   0xf   :  { %s10800_s24 = sld [smem:[%s14871_s0 + %s10649_s20]]   ;;  %s10655_s28 = smov 17  }
  0x10   :  { %s10805_s30 = sld [smem:[%s14871_s0 + %s10650_s26]]  }
  0x11   :  { %15172 = sst [smem:[#allocation8_spill]] %s10780_s3 }
  0x12   :  { %15173 = sst [smem:[#allocation9_spill]] %s10785_s8 }
  0x13   :  { %15174 = sst [smem:[#allocation10_spill]] %s10790_s14 }
  0x14   :  { %s10810_s6 = sld [smem:[%s14871_s0 + %s10651_s1]]  }
  0x15   :  { %s10815_s12 = sld [smem:[%s14871_s0 + %s10652_s7]]   ;;  %s10656_s7 = smov 18  }
  0x16   :  { %s10820_s20 = sld [smem:[%s14871_s0 + %s10653_s15]]   ;;  %s10657_s15 = smov 19  }
  0x17   :  { %s10825_s27 = sld [smem:[%s14871_s0 + %s10654_s22]]   ;;  %s10658_s22 = smov 20  }
  0x18   :  { %s10830_s4 = sld [smem:[%s14871_s0 + %s10655_s28]]   ;;  %s10659_s28 = smov 21  }
  0x19   :  { %s10835_s14 = sld [smem:[%s14871_s0 + %s10656_s7]]   ;;  %s10660_s7 = smov 22  }
  0x1a   :  { %15175 = sst [smem:[#allocation11_spill]] %s10810_s6 }
  0x1b   :  { %15176 = sst [smem:[#allocation12_spill]] %s10815_s12 }
  0x1c   :  { %s10840_s8 = sld [smem:[%s14871_s0 + %s10657_s15]]   ;;  %s10661_s15 = smov 23  }
  0x1d   :  { %15177 = sst [smem:[#allocation13_spill]] %s10825_s27 }
  0x1e   :  { %15178 = sst [smem:[#allocation14_spill]] %s10830_s4 }
  0x1f   :  { %15179 = sst [smem:[#allocation15_spill]] %s10835_s14 }
  0x20   :  { %s10845_s27 = sld [smem:[%s14871_s0 + %s10658_s22]]   ;;  %s10662_s22 = smov 24  }
  0x21   :  { %s10850_s4 = sld [smem:[%s14871_s0 + %s10659_s28]]   ;;  %s10663_s28 = smov 25  }
  0x22   :  { %15180 = sst [smem:[#allocation16_spill]] %s10840_s8 }
  0x23   :  { %s10855_s14 = sld [smem:[%s14871_s0 + %s10660_s7]]   ;;  %s10664_s7 = smov 26  }
  0x24   :  { %s10860_s8 = sld [smem:[%s14871_s0 + %s10661_s15]]   ;;  %s10665_s15 = smov 27  }
  0x26   :  { %15181 = sst [smem:[#allocation17_spill]] %s10845_s27 }
  0x27   :  { %15182 = sst [smem:[#allocation18_spill]] %s10850_s4 }
  0x28   :  { %s10865_s27 = sld [smem:[%s14871_s0 + %s10662_s22]]   ;;  %s10666_s22 = smov 28  }
  0x29   :  { %15183 = sst [smem:[#allocation19_spill]] %s10855_s14 }
  0x2a   :  { %15184 = sst [smem:[#allocation20_spill]] %s10860_s8 }
  0x2b   :  { %s10870_s4 = sld [smem:[%s14871_s0 + %s10663_s28]]   ;;  %s10667_s28 = smov 29  }
  0x2c   :  { %s10875_s14 = sld [smem:[%s14871_s0 + %s10664_s7]]   ;;  %s10668_s7 = smov 30  }
  0x2d   :  { %s10880_s8 = sld [smem:[%s14871_s0 + %s10665_s15]]   ;;  %s10669_s15 = smov 31  }
  0x2e   :  { %15185 = sst [smem:[#allocation21_spill]] %s10865_s27 }
  0x2f   :  { %s10885_s27 = sld [smem:[%s14871_s0 + %s10666_s22]]   ;;  %s10670_s22 = smov 32  }
  0x31   :  { %15186 = sst [smem:[#allocation22_spill]] %s10870_s4 }
  0x32   :  { %15187 = sst [smem:[#allocation23_spill]] %s10875_s14 }
  0x33   :  { %15188 = sst [smem:[#allocation24_spill]] %s10880_s8 }
  0x34   :  { %s10890_s4 = sld [smem:[%s14871_s0 + %s10667_s28]]   ;;  %s10671_s28 = smov 33  }
  0x35   :  { %15189 = sst [smem:[#allocation25_spill]] %s10885_s27 }
  0x36   :  { %s10895_s14 = sld [smem:[%s14871_s0 + %s10668_s7]]   ;;  %s10672_s7 = smov 34  }
  0x37   :  { %s10900_s8 = sld [smem:[%s14871_s0 + %s10669_s15]]   ;;  %s10673_s15 = smov 35  }
  0x38   :  { %s10905_s27 = sld [smem:[%s14871_s0 + %s10670_s22]]   ;;  %s10674_s22 = smov 36  }
  0x3a   :  { %15190 = sst [smem:[#allocation26_spill]] %s10890_s4 }
  0x3b   :  { %s10910_s4 = sld [smem:[%s14871_s0 + %s10671_s28]]   ;;  %s10675_s28 = smov 37  }
  0x3c   :  { %15191 = sst [smem:[#allocation27_spill]] %s10895_s14 }
  0x3d   :  { %15192 = sst [smem:[#allocation28_spill]] %s10900_s8 }
  0x3e   :  { %15193 = sst [smem:[#allocation29_spill]] %s10905_s27 }
  0x3f   :  { %s10915_s14 = sld [smem:[%s14871_s0 + %s10672_s7]]   ;;  %s10676_s7 = smov 38  }
  0x40   :  { %s10920_s8 = sld [smem:[%s14871_s0 + %s10673_s15]]   ;;  %s10937_s15 = smov 0  }
  0x41   :  { %15194 = sst [smem:[#allocation30_spill]] %s10910_s4 }
  0x42   :  { %s10925_s27 = sld [smem:[%s14871_s0 + %s10674_s22]]  }
  0x43   :  { %s10930_s4 = sld [smem:[%s14871_s0 + %s10675_s28]]  }
  0x45   :  { %15195 = sst [smem:[#allocation31_spill]] %s10915_s14 }
  0x46   :  { %s10935_s14 = sld [smem:[%s14871_s0 + %s10676_s7]]  }
  0x47 LB: > { %s15196_s3 = sld [smem:[#allocation8_spill]]  ;;  %s9614_s16 = sadd.s32 4294967295, %s10637_s15   ;;  %s10637_s15 = sphi %s10937_s15, %s88_s15  }
  0x48   : > { %p9618_p0 = scmp.ge.s32.totalorder %s10637_s15, 1  ;;  %p1076_p1 = scmp.lt.s32.totalorder %s10637_s15, 3 }
  0x4a   : > { %p1077_p2 = pnand %p9618_p0, %p1076_p1 }
  0x4c   : > { %1080 = sbr.rel (%p1077_p2) target bundleno = 8422 (0x20e6), region = 164 }
  0x51   : > { %p1190_p3 = scmp.lt.s32.totalorder %s9614_s16, 1  ;;  %s15197_s13 = sld [smem:[#allocation7_spill]]  ;;  %v14928_v0 = vmov 0.0   ;;  %vm10678_vm0 = vmmov 0   ;;  %v10949_v1 = vld [vmem:[%s10820_s20] sm:$0xff]  ;;  %v14878_v2 = vmov 0   ;;  %v1343_v42 = vlaneseq }
  0x52   : > { %10016 = vmatprep.subr.bf16.mxu0 %v14928_v0  ;;  %10020 = vmatprep.mubr.msk.bf16.mxu0 %vm10678_vm0, %v14928_v0  ;;  %v14922_v3 = vmov 8   ;;  %s15198_s12 = sld [smem:[#allocation12_spill]]  ;;  %vm1254_vm1 = vcmask 1043456   ;;  %v14876_v5 = vmov 1   ;;  %vm1250_vm2 = vcmask 195584   ;;  %s14950_s26 = smov 10  }
  0x53   : > { %s15595_s16 = smov (!%p1190_p3, %s9614_s16), 1  ;;  %10377 = vset.pattern.permute.xlu0 %v14878_v2  ;;  %10379 = vset.pattern.permute.xlu1 %v14922_v3  ;;  %s15199_s9 = sld [smem:[#allocation6_spill]]  ;;  %v14899_v12 = vmov 11   ;;  %v14926_v13 = vmov 10   ;;  %v14924_v14 = vmov 9   ;;  %vm1442_vm3 = vcmask 130048  }
  0x54   : > { %1300 = vperm.xlu0 %10377, %v10949_v1   ;;  %1358 = vperm.xlu1 %10379, %v10949_v1   ;;  %s10270_s0 = smul.u32 24, %s15595_s16  ;;  %s10972_s22 = sshll.u32 %s15595_s16, 4  ;;  %v1439_v18 = vld [vmem:[%s10805_s30] sm:$0xf]  ;;  %vm1233_vm4 = vcmask 80896   ;;  %vm1236_vm5 = vcmask 294096  }
  0x55   : > { %10024 = vmatprep.subr.bf16.mxu1 %v14928_v0  ;;  %10026 = vmatprep.mubr.msk.bf16.mxu1 %vm10678_vm0, %v14928_v0  ;;  %1234 = vst.msk [vmem:[#allocation4] sm:$0xff] %vm1233_vm4, %v14928_v0  ;;  %v14907_v34 = vmov 12   ;;  %v14912_v36 = vmov 7   ;;  %v14905_v37 = vmov 5   ;;  %v14895_v38 = vmov 6   ;;  %s14958_s28 = smov 124  }
  0x56   : > { %1237 = vst.msk [vmem:[#allocation4] sm:$0xff] %vm1236_vm5, %v14928_v0  ;;  %v14887_v39 = vmov 4   ;;  %vm1315_vm6 = vcmask 212048   ;;  %v11006_v43 = vshrl.u32 %v1343_v42, 7  ;;  %v1242_v48 = vld [vmem:[%s10770_s25] sm:$0x1f] }
  0x57   : > { %s1204_s18 = scalar_lea.vmem %s15197_s13, %s10270_s0  ;;  %s14952_s1 = smov 120   ;;  %v14889_v61 = vmov 2   ;;  %v14892_v62 = vmov 3   ;;  %vm1227_vm7 = vcmask 146432   ;;  %vm1230_vm8 = vcmask 818832  }
  0x58   : > { %v1245_v4 = vld [vmem:[%s1204_s18 + $0x10] sm:$0xff]  ;;  %10378 = vset.pattern.permute.xlu0 %v14876_v5  ;;  %v1243_v7 = vld [vmem:[%s1204_s18] sm:$0xff]  ;;  %v1244_v8 = vld [vmem:[%s1204_s18 + $0x8] sm:$0xff]  ;;  %10380 = vset.pattern.permute.xlu1 %v14924_v14  ;;  %15201 = vst [vmem:[#allocation33_spill] sm:$0xff] %v11006_v43  ;;  %v11013_v46 = vsub.s32 3, %v11006_v43  ;;  %v11021_v53 = vsub.s32 1, %v11006_v43 }
  0x59   : > { %v1249_v6 = vpack.c.bf16 %v1245_v4, %v1245_v4  ;;  %1305 = vperm.xlu0 %10378, %v10949_v1   ;;  %v1248_v10 = vpack.c.bf16 %v1244_v8, %v1243_v7  ;;  %v1246_v11 = vld [vmem:[%s15198_s12] sm:$0xf]  ;;  %s1199_s23 = scalar_lea.vmem %s15199_s9, %s10972_s22  ;;  %s10693_s2 = smov 7   ;;  %1228 = vst.msk [vmem:[#allocation3] sm:$0xff] %vm1227_vm7, %v14928_v0  ;;  %1229 = vst.msk [vmem:[#allocation3 + $0x8] sm:$0xff] %vm1227_vm7, %v14928_v0  ;;  %vm1503_vm9 = vcmask 670864  }
  0x5a   : > { %v1437_v15 = vld [vmem:[%s1199_s23] sm:$0xff]  ;;  %v1438_v16 = vld [vmem:[%s1199_s23 + $0x8] sm:$0xff]  ;;  %v1410_v52 = vrot.slane %v1242_v48, %v11013_v46  ;;  %v1346_v56 = vrot.slane %v1242_v48, %v11021_v53  ;;  %s15202_s6 = sld [smem:[#allocation11_spill]]  ;;  %s10694_s7 = smov 5   ;;  %1231 = vst.msk [vmem:[#allocation3] sm:$0xff] %vm1230_vm8, %v14928_v0  ;;  %1232 = vst.msk [vmem:[#allocation3 + $0x8] sm:$0xff] %vm1230_vm8, %v14928_v0 }
  0x5b   : > { %v1256_v9 = vsel %vm1254_vm1, %v1249_v6, 0  ;;  %v1441_v17 = vpack.c.bf16 %v1438_v16, %v1437_v15  ;;  %s15158_s10 = smov 127   ;;  %s15129_s11 = smov 126   ;;  %vm2141_vm10 = vcmask 64512   ;;  %vm2523_vm11 = vcmask 523264  }
  0x5c   : > { %10017 = vmatpush3.bf16.msra.mxu0 %v1256_v9  ;;  %s14910_s0 = smov 123   ;;  %s14956_s18 = smov 18   ;;  %vm1221_vm12 = vcmask 277504   ;;  %vm1224_vm13 = vcmask 556304   ;;  %vm2219_vm14 = vcmask 1047824   ;;  %vm2249_vm15 = vcmask 916480  }
  0x5d   : > { %10018 = vmatprep.subr.bf16.mxu0 %v14928_v0  ;;  %10381 = vset.pattern.permute.xlu0 %v14899_v12  ;;  %s15206_s5 = sld [smem:[#allocation5_spill]]  ;;  %vm2297_vm4 = vcmask 138240   ;;  %vm2369_vm5 = vcmask 1039360   ;;  %vm2464_vm7 = vcmask 1031168   ;;  %vm3404_vm8 = vcmask 654336   ;;  %s15587_s12 = smov 116  }
  0x5e   : > { %1368 = vperm.xlu0 %10381, %v10949_v1   ;;  %10025 = vmatpush3.bf16.msra.mxu1 %v1441_v17  ;;  %s15578_s9 = sld [smem:[#allocation24_spill]] }
  0x5f   : > { %s15588_s13 = sld [smem:[#allocation30_spill]] }
  0x60   : > { %10019 = vmatpush3.bf16.msra.mxu0 %v1248_v10  ;;  %v11037_v63 = vld [vmem:[%s15202_s6] sm:$0xff]  ;;  %s15571_s6 = smov 111  }
  0x61   : > { %10027 = vmatmul.mubr.msk.bf16.vlgmr.msra.gmra.mxu1 %vm1442_vm3, %v1439_v18 }
  0x62   : > { %10384 = vset.pattern.permute.xlu0 %v14926_v13 }
  0x63   : > { %10021 = vmatmul.mubr.msk.bf16.vlgmr.msra.gmra.mxu0 %vm1250_vm2, %v1246_v11  ;;  %1334 = vperm.xlu0 %10384, %v10949_v1   ;;  %s1194_s23 = scalar_lea.vmem %s15206_s5, %s10972_s22  ;;  %vm2447_vm2 = vcmask 154624   ;;  %s15562_s5 = sld [smem:[#allocation17_spill]] }
  0x67   : > { %10391 = vset.pattern.permute.xlu0 %v14876_v5 }
  0xcf   : > { %v1301_v19 = vpop.permute.xlu0 %1300  ;;  %v1359_v40 = vpop.permute.xlu1 %1358 }
  0xd4   : > { %v1306_v21 = vpop.permute.xlu0 %1305 }
  0xd9   : > { %v1369_v47 = vpop.permute.xlu0 %1368 }
  0xde   : > { %v1335_v58 = vpop.permute.xlu0 %1334 }
 0x121   : > { %v11043_v16 = vpop.f32.mrf.mxu1 }
 0x123   : > { %v1292_v20 = vpop.f32.mrf.mxu0  ;;  %v10028_v17 = vpop.f32.mrf.mxu1 }
 0x124   : > { %v1303_v22 = vmul.f32 %v1301_v19, %v1292_v20 }
 0x125   : > { %v10022_v23 = vpop.f32.mrf.mxu0  ;;  %v1483_v20 = vpop.f32.mrf.mxu1 }
 0x126   : > { %v1308_v24 = vadd.f32 %v1306_v21, %v1303_v22 }
 0x127   : > { %v1295_v25 = vpop.f32.mrf.mxu0  ;;  %v10029_v23 = vpop.f32.mrf.mxu1 }
 0x128   : > { %v1309_v26 = vmax.f32 %v1308_v24, 0.0 }
 0x129   : > { %v10023_v27 = vpop.f32.mrf.mxu0 }
 0x12a   : > { %v10982_v28 = vmin.f32 %v1309_v26, 6.0 }
 0x12c   : > { %15200 = vst [vmem:[#allocation32_spill] sm:$0xff] %v10982_v28  ;;  %v1627_v29 = vsel %vm1442_vm3, %v10982_v28, 0  ;;  %1312 = vrot.lane.b32.xlu1 %v10982_v28, %s14950_s26  ;;  %s14954_s26 = smov 119  }
 0x12d   : > { %v10988_v30 = vand.u32 4294901760, %v1627_v29 }
 0x12f   : > { %v10991_v31 = vsub.f32 %v1627_v29, %v10988_v30 }
 0x130   : > { %1388 = vperm.xlu1 %10380, %v10949_v1  }
 0x131   : > { %v1700_v32 = vand.u32 4294901760, %v10991_v31 }
 0x133   : > { %10055 = vmatprep.mubr.f32.mxu0 %v1700_v32  ;;  %v1701_v33 = vsub.f32 %v10991_v31, %v1700_v32 }
 0x134   : > { %10382 = vset.pattern.permute.xlu1 %v14907_v34 }
 0x135   : > { %1398 = vperm.xlu1 %10382, %v10949_v1   ;;  %v1702_v35 = vand.u32 4294901760, %v1701_v33 }
 0x137   : > { %10034 = vmatprep.mubr.f32.mxu1 %v1702_v35 }
 0x139   : > { %10383 = vset.pattern.permute.xlu1 %v14912_v36 }
 0x13a   : > { %1324 = vperm.xlu1 %10383, %v10949_v1  }
 0x13e   : > { %10385 = vset.pattern.permute.xlu1 %v14905_v37 }
 0x13f   : > { %1353 = vperm.xlu1 %10385, %v10949_v1  }
 0x143   : > { %10386 = vset.pattern.permute.xlu1 %v14895_v38 }
 0x144   : > { %1383 = vperm.xlu1 %10386, %v10949_v1  }
 0x148   : > { %10387 = vset.pattern.permute.xlu1 %v14887_v39 }
 0x19e   : > { %v1313_v41 = vpop.permute.xlu1 %1312 }
 0x19f   : > { %1316 = vst.msk [vmem:[#allocation4] sm:$0xff] %vm1315_vm6, %v1313_v41 }
 0x1a6   : > { %v11008_v44 = vld [vmem:[#allocation4] sm:$0xff] }
 0x1a7   : > { %v1361_v45 = vmul.f32 %v1359_v40, %v11008_v44  ;;  %v1371_v49 = vmul.f32 %v1369_v47, %v11008_v44  ;;  %v1337_v60 = vmul.f32 %v1335_v58, %v11008_v44 }
 0x1a9   : > { %1363 = vrot.lane.b32.xlu0 %v1361_v45, %s14958_s28  ;;  %v1626_v45 = vld [vmem:[%s10775_s29 + $0x8] sm:$0xff] }
 0x1aa   : > { %v1660_v48 = vand.u32 4294901760, %v1626_v45 }
 0x1ab   : > { %v1389_v50 = vpop.permute.xlu1 %1388 }
 0x1ac   : > { %v1391_v51 = vmul.f32 %v1389_v50, %v11008_v44  ;;  %v1625_v50 = vld [vmem:[%s10775_s29] sm:$0xff]  ;;  %10051 = vmatprep.subr.mxu0 %v1660_v48  ;;  %10030 = vmatprep.subr.mxu1 %v1660_v48 }
 0x1ad   : > { %1373 = vrot.lane.b32.xlu0 %v1371_v49, %s14952_s1  ;;  %10052 = vmatpush3.msra.mxu0 %v1660_v48 }
 0x1ae   : > { %1393 = vrot.lane.b32.xlu1 %v1391_v51, %s14958_s28  ;;  %10031 = vmatpush3.msra.mxu1 %v1660_v48 }
 0x1b0   : > { %v1399_v54 = vpop.permute.xlu1 %1398 }
 0x1b1   : > { %v1401_v55 = vmul.f32 %v1399_v54, %v11008_v44  ;;  %1412 = vrot.lane.b32.xlu0 %v1410_v52, %s10693_s2  ;;  %v1663_v52 = vand.u32 4294901760, %v1625_v50  ;;  %v11065_v54 = vsub.f32 %v1626_v45, %v1660_v48  ;;  %s15162_s2 = smov 112  }
 0x1b3   : > { %1403 = vrot.lane.b32.xlu1 %v1401_v55, %s14952_s1  ;;  %10053 = vmatprep.subr.mxu0 %v1663_v52 }
 0x1b4   : > { %10032 = vmatprep.subr.mxu1 %v1663_v52  ;;  %10054 = vmatpush3.msra.mxu0 %v1663_v52 }
 0x1b5   : > { %1348 = vrot.lane.b32.xlu0 %v1346_v56, %s10694_s7  ;;  %v1325_v57 = vpop.permute.xlu1 %1324  ;;  %v11068_v56 = vand.u32 4294901760, %v11065_v54  ;;  %10033 = vmatpush3.msra.mxu1 %v1663_v52  ;;  %s10702_s7 = smov 11  }
 0x1b6   : > { %v1327_v59 = vmul.f32 %v1325_v57, %v11008_v44  ;;  %10065 = vmatprep.subr.mxu0 %v1660_v48 }
 0x1b7   : > { %1319 = vperm.xlu1 %10387, %v10949_v1   ;;  %v1750_v58 = vsub.f32 %v11065_v54, %v11068_v56 }
 0x1b9   : > { %1329 = vrot.lane.b32.xlu0 %v1327_v59, %s14958_s28  ;;  %s15021_s28 = smov 4  }
 0x1ba   : > { %v1354_v4 = vpop.permute.xlu1 %1353 }
 0x1bb   : > { %1339 = vrot.lane.b32.xlu1 %v1337_v60, %s14952_s1  ;;  %v1356_v7 = vmul.f32 %v1354_v4, %v11008_v44  ;;  %v1751_v4 = vand.u32 4294901760, %v1750_v58 }
 0x1bc   : > { %10388 = vset.pattern.permute.xlu1 %v14889_v61 }
 0x1bd   : > { %10037 = vmatprep.subr.mxu1 %v1751_v4 }
 0x1bf   : > { %1422 = vperm.xlu1 %10388, %v10949_v1   ;;  %v1384_v8 = vpop.permute.xlu1 %1383 }
 0x1c3   : > { %10389 = vset.pattern.permute.xlu1 %v14892_v62 }
 0x1c4   : > { %1427 = vperm.xlu1 %10389, %v10949_v1   ;;  %v1386_v1 = vmul.f32 %v1384_v8, %v11008_v44 }
 0x1c8   : > { %10390 = vset.pattern.permute.xlu1 %v14878_v2 }
 0x1c9   : > { %1488 = vperm.xlu1 %10390, %v11037_v63  }
 0x1cd   : > { %10393 = vset.pattern.permute.xlu1 %v14924_v14 }
 0x21b   : > { %v1364_v6 = vpop.permute.xlu0 %1363 }
 0x21c   : > { %v1366_v9 = vadd.f32 %v1364_v6, %v1356_v7 }
 0x21f   : > { %v1374_v10 = vpop.permute.xlu0 %1373 }
 0x220   : > { %v1376_v11 = vadd.f32 %v1374_v10, %v1366_v9  ;;  %v1394_v15 = vpop.permute.xlu1 %1393 }
 0x221   : > { %v1396_v18 = vadd.f32 %v1394_v15, %v1386_v1  ;;  %v1755_v15 = vsub.f32 %v1625_v50, %v1663_v52 }
 0x222   : > { %1378 = vrot.lane.b32.xlu0 %v1376_v11, %s15158_s10 }
 0x223   : > { %v11047_v22 = vpop.permute.xlu0 %1412 }
 0x224   : > { %15203 = vst [vmem:[#allocation34_spill] sm:$0xff] %v11047_v22 }
 0x225   : > { %v1404_v19 = vpop.permute.xlu1 %1403 }
 0x226   : > { %v1406_v21 = vadd.f32 %v1404_v19, %v1396_v18  ;;  %v1756_v18 = vand.u32 4294901760, %v1755_v15 }
 0x227   : > { %v11059_v25 = vpop.permute.xlu0 %1348 }
 0x228   : > { %v1415_v24 = vmul.f32 %v11047_v22, %v1406_v21  ;;  %15204 = vst [vmem:[#allocation35_spill] sm:$0xff] %v11059_v25  ;;  %v1757_v21 = vsub.f32 %v1755_v15, %v1756_v18 }
 0x22a   : > { %1417 = vrot.lane.b32.xlu0 %v1415_v24, %s15129_s11 }
 0x22b   : > { %v1330_v29 = vpop.permute.xlu0 %1329 }
 0x22e   : > { %1493 = vperm.xlu0 %10391, %v11037_v63  }
 0x232   : > { %10392 = vset.pattern.permute.xlu0 %v14922_v3  ;;  %v1320_v26 = vpop.permute.xlu1 %1319 }
 0x233   : > { %1546 = vperm.xlu0 %10392, %v11037_v63   ;;  %v1322_v27 = vmul.f32 %v1320_v26, %v11008_v44 }
 0x235   : > { %v1332_v32 = vadd.f32 %v1330_v29, %v1322_v27  ;;  %v1758_v27 = vand.u32 4294901760, %v1757_v21  ;;  %v2135_v29 = vld [vmem:[%s1194_s23] sm:$0xff]  ;;  %v2517_v21 = vld [vmem:[%s15196_s3 + $0x50] sm:$0xff] }
 0x236   : > { %v1340_v33 = vpop.permute.xlu1 %1339 }
 0x237   : > { %10395 = vset.pattern.permute.xlu0 %v14907_v34  ;;  %v1342_v35 = vadd.f32 %v1340_v33, %v1332_v32 }
 0x238   : > { %1586 = vperm.xlu0 %10395, %v11037_v63  }
 0x239   : > { %v1351_v42 = vmul.f32 %v11059_v25, %v1342_v35  ;;  %v2136_v35 = vld [vmem:[%s1194_s23 + $0x8] sm:$0xff]  ;;  %s10703_s23 = smov 9   ;;  %v14947_v25 = vmov 19  }
 0x23a   : > { %v1423_v41 = vpop.permute.xlu1 %1422 }
 0x23c   : > { %10398 = vset.pattern.permute.xlu0 %v14905_v37 }
 0x23d   : > { %1541 = vperm.xlu0 %10398, %v11037_v63  }
 0x23f   : > { %v1428_v44 = vpop.permute.xlu1 %1427 }
 0x241   : > { %10400 = vset.pattern.permute.xlu0 %v14887_v39 }
 0x244   : > { %v1489_v60 = vpop.permute.xlu1 %1488 }
 0x245   : > { %v1491_v7 = vmul.f32 %v1489_v60, %v11043_v16  ;;  %v2522_v60 = vld [vmem:[%s15196_s3 + $0x78] sm:$0xff] }
 0x294   : > { %v1379_v40 = vpop.permute.xlu0 %1378 }
 0x295   : > { %v1381_v47 = vadd.f32 %v1379_v40, %v1351_v42  ;;  %v2140_v42 = vpack.c.bf16 %v2136_v35, %v2136_v35 }
 0x29c   : > { %v1418_v49 = vpop.permute.xlu0 %1417 }
 0x29d   : > { %v1420_v51 = vadd.f32 %v1418_v49, %v1381_v47 }
 0x29f   : > { %v1425_v55 = vmul.f32 %v1423_v41, %v1420_v51  ;;  %v2139_v41 = vpack.c.bf16 %v2135_v29, %v2135_v29  ;;  %v1241_v51 = vld [vmem:[%s10765_s21] sm:$0x1f] }
 0x2a1   : > { %v1430_v57 = vadd.f32 %v1428_v44, %v1425_v55  ;;  %v2146_v45 = vsel %vm1254_vm1, %v2139_v41, 0  ;;  %v11129_v55 = vrot.slane %v1241_v51, %v11021_v53  ;;  %v2515_v41 = vld [vmem:[%s15196_s3 + $0x40] sm:$0xff] }
 0x2a3   : > { %v1431_v59 = vmax.f32 %v1430_v57, 0.0  ;;  %15208 = vst [vmem:[#allocation38_spill] sm:$0xff] %v11129_v55 }
 0x2a5   : > { %v1432_v6 = vmin.f32 %v1431_v59, 6.0  ;;  %v11142_v59 = vld [vmem:[%s10800_s24] sm:$0xff] }
 0x2a7   : > { %1434 = vrot.lane.b32.xlu1 %v1432_v6, %s14910_s0  ;;  %v2521_v6 = vld [vmem:[%s15196_s3 + $0x70] sm:$0xff]  ;;  %s10706_s0 = smov 17  }
 0x2a9   : > { %v1494_v8 = vpop.permute.xlu0 %1493 }
 0x2aa   : > { %v1496_v9 = vadd.f32 %v1494_v8, %v1491_v7  ;;  %v11151_v7 = vand.u32 4294901760, %v2521_v6  ;;  %v2520_v8 = vld [vmem:[%s15196_s3 + $0x68] sm:$0xff] }
 0x2ac   : > { %v1497_v10 = vmax.f32 %v1496_v9, 0.0 }
 0x2ae   : > { %v11078_v11 = vmin.f32 %v1497_v10, 6.0  ;;  %v1547_v32 = vpop.permute.xlu0 %1546  ;;  %v2519_v10 = vld [vmem:[%s15196_s3 + $0x60] sm:$0xff] }
 0x2b0   : > { %1500 = vrot.lane.b32.xlu1 %v11078_v11, %s14956_s18  ;;  %s15022_s18 = smov 3  }
 0x2b3   : > { %v1587_v49 = vpop.permute.xlu0 %1586 }
 0x2b4   : > { %1576 = vperm.xlu1 %10393, %v11037_v63  }
 0x2b8   : > { %10394 = vset.pattern.permute.xlu1 %v14899_v12 }
 0x2b9   : > { %1556 = vperm.xlu1 %10394, %v11037_v63  }
 0x2bd   : > { %10396 = vset.pattern.permute.xlu1 %v14912_v36 }
 0x2be   : > { %1512 = vperm.xlu1 %10396, %v11037_v63  }
 0x2c2   : > { %10397 = vset.pattern.permute.xlu1 %v14926_v13 }
 0x2c3   : > { %1522 = vperm.xlu1 %10397, %v11037_v63  }
 0x2c7   : > { %10399 = vset.pattern.permute.xlu1 %v14895_v38 }
 0x2c8   : > { %1571 = vperm.xlu1 %10399, %v11037_v63  }
 0x2cc   : > { %10401 = vset.pattern.permute.xlu1 %v14889_v61 }
 0x319   : > { %v11092_v16 = vpop.permute.xlu1 %1434 }
 0x31a   : > { %15205 = vst [vmem:[#allocation36_spill] sm:$0xff] %v11092_v16  ;;  %v1629_v1 = vsel %vm1442_vm3, %v11092_v16, 0 }
 0x31b   : > { %v1708_v17 = vand.u32 4294901760, %v1629_v1 }
 0x31d   : > { %v1709_v19 = vsub.f32 %v1629_v1, %v1708_v17  ;;  %v11164_v1 = vand.u32 4294901760, %v2519_v10 }
 0x31f   : > { %v1710_v20 = vand.u32 4294901760, %v1709_v19 }
 0x321   : > { %10056 = vmatmul.mubr.f32.vlgmr.msra.gmra.mxu0 %v1710_v20  ;;  %v1711_v23 = vsub.f32 %v1709_v19, %v1710_v20 }
 0x322   : > { %10066 = vmatpush3.msra.mxu0 %v1660_v48  ;;  %10069 = vmatprep.mubr.f32.mxu0 %v10988_v30  ;;  %v1501_v24 = vpop.permute.xlu1 %1500  ;;  %v2137_v48 = vld [vmem:[%s10795_s19] sm:$0xf] }
 0x323   : > { %1504 = vst.msk [vmem:[#allocation3] sm:$0xff] %vm1503_vm9, %v1501_v24  ;;  %10067 = vmatprep.subr.mxu0 %v1663_v52  ;;  %v1712_v26 = vand.u32 4294901760, %v1711_v23  ;;  %v11178_v24 = vsub.f32 %v2519_v10, %v11164_v1 }
 0x324   : > { %10068 = vmatpush3.msra.mxu0 %v1663_v52 }
 0x325   : > { %10035 = vmatmul.mubr.f32.vlgmr.msra.gmra.mxu1 %v1712_v26  ;;  %10070 = vmatmul.mubr.f32.vlgmr.msra.gmra.mxu0 %v1708_v17  ;;  %v11180_v26 = vand.u32 4294901760, %v2517_v21 }
 0x326   : > { %10038 = vmatpush3.msra.mxu1 %v1751_v4  ;;  %10041 = vmatprep.mubr.f32.mxu1 %v10988_v30  ;;  %v11148_v4 = vand.u32 4294901760, %v2522_v60 }
 0x327   : > { %10039 = vmatprep.subr.mxu1 %v1758_v27  ;;  %2610 = vmatprep.mubr.f32.mxu0 %v14928_v0 }
 0x328   : > { %10040 = vmatpush3.msra.mxu1 %v1758_v27  ;;  %v11155_v9 = vsub.f32 %v2522_v60, %v11148_v4  ;;  %2547 = vmatprep.subr.mxu0 %v11148_v4  ;;  %v2516_v27 = vld [vmem:[%s15196_s3 + $0x48] sm:$0xff] }
 0x329   : > { %10042 = vmatmul.mubr.f32.vlgmr.msra.gmra.mxu1 %v1708_v17  ;;  %10044 = vmatprep.subr.mxu1 %v11065_v54 }
 0x32a   : > { %v11103_v33 = vld [vmem:[#allocation3] sm:$0xff]  ;;  %10045 = vmatpush3.msra.mxu1 %v11065_v54  ;;  %10048 = vmatprep.mubr.f32.mxu1 %v10991_v31  ;;  %v11125_v54 = vrot.slane %v1241_v51, %v11013_v46 }
 0x32b   : > { %10046 = vmatprep.subr.mxu1 %v1755_v15  ;;  %v1549_v40 = vmul.f32 %v1547_v32, %v11103_v33  ;;  %2549 = vmatpush1.msra.mxu0 %v11151_v7  ;;  %v2513_v51 = vld [vmem:[%s15196_s3 + $0x30] sm:$0xff] }
 0x32c   : > { %10047 = vmatpush3.msra.mxu1 %v1755_v15  ;;  %15207 = vst [vmem:[#allocation37_spill] sm:$0xff] %v11125_v54  ;;  %v11162_v15 = vsub.f32 %v2521_v6, %v11151_v7 }
 0x32d   : > { %10049 = vmatmul.mubr.f32.vlgmr.msra.gmra.mxu1 %v1709_v19  ;;  %10058 = vmatprep.subr.mxu1 %v11068_v56 }
 0x32e   : > { %1551 = vrot.lane.b32.xlu1 %v1549_v40, %s14952_s1  ;;  %10059 = vmatpush3.msra.mxu1 %v11068_v56  ;;  %v14886_v23 = vand.u32 4294901760, %v11162_v15  ;;  %v11191_v40 = vand.u32 4294901760, %v2516_v27 }
 0x32f   : > { %10062 = vmatprep.mubr.f32.mxu1 %v10988_v30  ;;  %10060 = vmatprep.subr.mxu1 %v1756_v18  ;;  %v1577_v31 = vpop.permute.xlu1 %1576  ;;  %v1589_v30 = vmul.f32 %v1587_v49, %v11103_v33 }
 0x330   : > { %v1579_v47 = vmul.f32 %v1577_v31, %v11103_v33  ;;  %10061 = vmatpush3.msra.mxu1 %v1756_v18  ;;  %v14904_v18 = vand.u32 4294901760, %v11155_v9  ;;  %v14883_v31 = vand.u32 4294901760, %v11178_v24 }
 0x331   : > { %10063 = vmatmul.mubr.f32.vlgmr.msra.gmra.mxu1 %v1708_v17  ;;  %9632 = vmatprep.subr.msk.bf16.mxu1 %vm1254_vm1, %v2140_v42  ;;  %v2518_v17 = vld [vmem:[%s15196_s3 + $0x58] sm:$0xff]  ;;  %v2658_v42 = vsub.f32 %v11162_v15, %v14886_v23  ;;  %vm2274_vm1 = vcmask 785408  }
 0x332   : > { %1581 = vrot.lane.b32.xlu0 %v1579_v47, %s14952_s1  ;;  %2166 = vmatpush1.bf16.msra.mxu1 %v2146_v45  ;;  %v11172_v20 = vand.u32 4294901760, %v2518_v17  ;;  %v2652_v29 = vsub.f32 %v11155_v9, %v14904_v18  ;;  %v11200_v45 = vsub.f32 %v2517_v21, %v11180_v26  ;;  %v11202_v47 = vand.u32 4294901760, %v2515_v41 }
 0x333   : > { %2183 = vmatprep.mubr.bf16.mxu1 %v14878_v2 }
 0x334   : > { %v1557_v50 = vpop.permute.xlu1 %1556  ;;  %v11189_v35 = vsub.f32 %v2518_v17, %v11172_v20  ;;  %v2653_v49 = vand.u32 4294901760, %v2652_v29  ;;  %v2511_v17 = vld [vmem:[%s15196_s3 + $0x20] sm:$0xff] }
 0x335   : > { %v1559_v52 = vmul.f32 %v1557_v50, %v11103_v33  ;;  %9633 = vmatmul.mubr.msk.bf16.vlgmr.msra.gmra.mxu1 %vm2141_vm10, %v2137_v48  ;;  %v2514_v48 = vld [vmem:[%s15196_s3 + $0x38] sm:$0xff]  ;;  %vm3683_vm10 = vcmask 7168  }
 0x336   : > { %1591 = vrot.lane.b32.xlu0 %v1589_v30, %s15162_s2  ;;  %2777 = vmatprep.mubr.f32.mxu1 %v14928_v0  ;;  %v14881_v50 = vand.u32 4294901760, %v11189_v35  ;;  %v11227_v10 = vand.u32 4294901760, %v2514_v48 }
 0x337   : > { %1561 = vrot.lane.b32.xlu1 %v1559_v52, %s15162_s2  ;;  %v2659_v52 = vand.u32 4294901760, %v2658_v42  ;;  %2654 = vmatprep.subr.mxu1 %v2653_v49  ;;  %v11234_v42 = vand.u32 4294901760, %v2513_v51  ;;  %v2510_v49 = vld [vmem:[%s15196_s3 + $0x18] sm:$0xff] }
 0x338   : > { %v2676_v6 = vsub.f32 %v11189_v35, %v14881_v50  ;;  %v11261_v50 = vand.u32 4294901760, %v2510_v49 }
 0x339   : > { %v1513_v44 = vpop.permute.xlu1 %1512  ;;  %2660 = vmatpush1.msra.mxu1 %v2659_v52  ;;  %v2509_v52 = vld [vmem:[%s15196_s3 + $0x10] sm:$0xff] }
 0x33a   : > { %1507 = vperm.xlu0 %10400, %v11037_v63   ;;  %v1515_v56 = vmul.f32 %v1513_v44, %v11103_v33  ;;  %v2670_v44 = vsub.f32 %v11178_v24, %v14883_v31 }
 0x33b   : > { %1600 = vrot.lane.b32.xlu1 %v11125_v54, %s10702_s7  ;;  %s15209_s7 = sld [smem:[#allocation13_spill]] }
 0x33c   : > { %v2671_v21 = vand.u32 4294901760, %v2670_v44 }
 0x33e   : > { %v1523_v57 = vpop.permute.xlu1 %1522  ;;  %1536 = vrot.lane.b32.xlu0 %v11129_v55, %s10703_s23  ;;  %s10704_s23 = smov 19   ;;  %v14945_v55 = vmov 24  }
 0x33f   : > { %1517 = vrot.lane.b32.xlu1 %v1515_v56, %s14952_s1  ;;  %10404 = vset.pattern.permute.xlu0 %v14876_v5  ;;  %v1525_v58 = vmul.f32 %v1523_v57, %v11103_v33  ;;  %v14880_v56 = vand.u32 4294901760, %v11200_v45  ;;  %v11217_v57 = vsub.f32 %v2516_v27, %v11191_v40  ;;  %s15108_s1 = smov 34  }
 0x341   : > { %v2682_v27 = vsub.f32 %v11200_v45, %v14880_v56  ;;  %v14882_v29 = vand.u32 4294901760, %v11217_v57 }
 0x343   : > { %1527 = vrot.lane.b32.xlu1 %v1525_v58, %s15162_s2  ;;  %v2512_v58 = vld [vmem:[%s15196_s3 + $0x28] sm:$0xff]  ;;  %v2683_v44 = vand.u32 4294901760, %v2682_v27  ;;  %v2688_v56 = vsub.f32 %v11217_v57, %v14882_v29 }
 0x344   : > { %v2508_v29 = vld [vmem:[%s15196_s3 + $0x8] sm:$0xff] }
 0x345   : > { %v11288_v61 = vand.u32 4294901760, %v2508_v29 }
 0x347   : > { %1610 = vperm.xlu1 %10401, %v11037_v63  }
 0x34b   : > { %10402 = vset.pattern.permute.xlu1 %v14892_v62 }
 0x34c   : > { %1615 = vperm.xlu1 %10402, %v11037_v63   ;;  %v11157_v63 = vand.u32 4294901760, %v2520_v8 }
 0x34e   : > { %v11170_v19 = vsub.f32 %v2520_v8, %v11157_v63  ;;  %2551 = vmatprep.subr.mxu0 %v11157_v63  ;;  %v11225_v8 = vsub.f32 %v2515_v41, %v11202_v47  ;;  %v11239_v41 = vsub.f32 %v2514_v48, %v11227_v10 }
 0x34f   : > { %2553 = vmatpush1.msra.mxu0 %v11164_v1 }
 0x350   : > { %10403 = vset.pattern.permute.xlu1 %v14878_v2  ;;  %v14884_v32 = vand.u32 4294901760, %v11170_v19  ;;  %2555 = vmatprep.subr.mxu0 %v11172_v20  ;;  %v14885_v5 = vand.u32 4294901760, %v11225_v8  ;;  %v11241_v2 = vand.u32 4294901760, %v2512_v58 }
 0x351   : > { %2194 = vperm.xlu1 %10403, %v11142_v59   ;;  %2557 = vmatpush1.msra.mxu0 %v11180_v26 }
 0x352   : > { %v2664_v30 = vsub.f32 %v11170_v19, %v14884_v32  ;;  %2559 = vmatprep.subr.mxu0 %v11191_v40  ;;  %v2694_v48 = vsub.f32 %v11225_v8, %v14885_v5  ;;  %v11259_v27 = vsub.f32 %v2512_v58, %v11241_v2  ;;  %v11269_v32 = vand.u32 4294901760, %v2509_v52  ;;  %v2507_v5 = vld [vmem:[%s15196_s3] sm:$0xff]  ;;  %s15560_s3 = smov 96  }
 0x353   : > { %2561 = vmatpush1.msra.mxu0 %v11202_v47  ;;  %v11295_v62 = vand.u32 4294901760, %v2507_v5 }
 0x354   : > { %v2665_v60 = vand.u32 4294901760, %v2664_v30  ;;  %v2677_v30 = vand.u32 4294901760, %v2676_v6  ;;  %2563 = vmatprep.subr.mxu0 %v11227_v10  ;;  %v11251_v6 = vand.u32 4294901760, %v2511_v17  ;;  %v2695_v23 = vand.u32 4294901760, %v2694_v48 }
 0x355   : > { %10405 = vset.pattern.permute.xlu1 %v14922_v3  ;;  %2565 = vmatpush1.msra.mxu0 %v11234_v42  ;;  %v14897_v39 = vand.u32 4294901760, %v11259_v27  ;;  %v11286_v48 = vsub.f32 %v2509_v52, %v11269_v32  ;;  %v11313_v12 = vsub.f32 %v2507_v5, %v11295_v62 }
 0x356   : > { %2666 = vmatprep.subr.mxu1 %v2665_v60  ;;  %v11249_v60 = vsub.f32 %v2513_v51, %v11234_v42  ;;  %2567 = vmatprep.subr.mxu0 %v11241_v2  ;;  %v2689_v51 = vand.u32 4294901760, %v2688_v56 }
 0x357   : > { %2672 = vmatpush1.msra.mxu1 %v2671_v21  ;;  %v14891_v21 = vand.u32 4294901760, %v11239_v41  ;;  %2569 = vmatpush1.msra.mxu0 %v11251_v6  ;;  %v14902_v38 = vand.u32 4294901760, %v11286_v48 }
 0x358   : > { %2678 = vmatprep.subr.mxu1 %v2677_v30  ;;  %v14894_v31 = vand.u32 4294901760, %v11249_v60  ;;  %v11267_v30 = vsub.f32 %v2511_v17, %v11251_v6  ;;  %2571 = vmatprep.subr.mxu0 %v11261_v50 }
 0x359   : > { %2684 = vmatpush1.msra.mxu1 %v2683_v44  ;;  %v2700_v58 = vsub.f32 %v11239_v41, %v14891_v21  ;;  %v11278_v44 = vsub.f32 %v2510_v49, %v11261_v50  ;;  %2573 = vmatpush1.msra.mxu0 %v11269_v32  ;;  %v2712_v49 = vsub.f32 %v11259_v27, %v14897_v39 }
 0x35a   : > { %2690 = vmatprep.subr.mxu1 %v2689_v51  ;;  %v2706_v56 = vsub.f32 %v11249_v60, %v14894_v31  ;;  %v14898_v17 = vand.u32 4294901760, %v11267_v30  ;;  %2575 = vmatprep.subr.mxu0 %v11288_v61  ;;  %v11306_v39 = vsub.f32 %v2508_v29, %v11288_v61 }
 0x35b   : > { %2696 = vmatpush1.msra.mxu1 %v2695_v23  ;;  %v2701_v21 = vand.u32 4294901760, %v2700_v58  ;;  %v14901_v51 = vand.u32 4294901760, %v11278_v44  ;;  %v2713_v23 = vand.u32 4294901760, %v2712_v49  ;;  %2577 = vmatpush1.msra.mxu0 %v11295_v62 }
 0x35c   : > { %v2707_v31 = vand.u32 4294901760, %v2706_v56  ;;  %v2718_v52 = vsub.f32 %v11267_v30, %v14898_v17  ;;  %v2730_v17 = vsub.f32 %v11286_v48, %v14902_v38  ;;  %2810 = vmatprep.subr.mxu0 %v11155_v9  ;;  %v14903_v49 = vand.u32 4294901760, %v11306_v39 }
 0x35d   : > { %2702 = vmatprep.subr.mxu1 %v2701_v21  ;;  %v2724_v58 = vsub.f32 %v11278_v44, %v14901_v51  ;;  %v14909_v51 = vand.u32 4294901760, %v11313_v12 }
 0x35e   : > { %2708 = vmatpush1.msra.mxu1 %v2707_v31  ;;  %v2719_v56 = vand.u32 4294901760, %v2718_v52  ;;  %v2731_v29 = vand.u32 4294901760, %v2730_v17  ;;  %v2736_v31 = vsub.f32 %v11306_v39, %v14903_v49  ;;  %v1572_v17 = vpop.permute.xlu1 %1571 }
 0x35f   : > { %2714 = vmatprep.subr.mxu1 %v2713_v23  ;;  %v2725_v21 = vand.u32 4294901760, %v2724_v58  ;;  %v2742_v5 = vsub.f32 %v11313_v12, %v14909_v51  ;;  %v1542_v23 = vpop.permute.xlu0 %1541  ;;  %v1574_v49 = vmul.f32 %v1572_v17, %v11103_v33  ;;  %v14914_v17 = vmov 25  }
 0x360   : > { %2720 = vmatpush1.msra.mxu1 %v2719_v56  ;;  %v2737_v52 = vand.u32 4294901760, %v2736_v31 }
 0x361   : > { %2726 = vmatprep.subr.mxu1 %v2725_v21  ;;  %v2743_v38 = vand.u32 4294901760, %v2742_v5  ;;  %v1544_v21 = vmul.f32 %v1542_v23, %v11103_v33  ;;  %v14916_v23 = vmov 20  }
 0x362   : > { %2732 = vmatpush1.msra.mxu1 %v2731_v29 }
 0x363   : > { %2738 = vmatprep.subr.mxu1 %v2737_v52  ;;  %v11334_v52 = vld [vmem:[%s10760_s17] sm:$0x1f] }
 0x364   : > { %2744 = vmatpush1.msra.mxu1 %v2743_v38 }
 0x365   : > { %2922 = vmatprep.subr.mxu1 %v11148_v4 }
 0x3a0   : > { %v1552_v56 = vpop.permute.xlu1 %1551 }
 0x3a1   : > { %v1554_v29 = vadd.f32 %v1552_v56, %v1544_v21 }
 0x3a4   : > { %v1582_v58 = vpop.permute.xlu0 %1581 }
 0x3a5   : > { %v1584_v34 = vadd.f32 %v1582_v58, %v1574_v49  ;;  %v14918_v49 = vmov 15   ;;  %v11364_v58 = vld [vmem:[%s15209_s7 + $0x8] sm:$0xff] }
 0x3a8   : > { %v1592_v18 = vpop.permute.xlu0 %1591 }
 0x3a9   : > { %v1562_v37 = vpop.permute.xlu1 %1561  ;;  %v1594_v31 = vadd.f32 %v1592_v18, %v1584_v34  ;;  %v11340_v34 = vrot.slane %v11334_v52, %v11013_v46  ;;  %v14920_v18 = vmov 13  }
 0x3aa   : > { %v1564_v51 = vadd.f32 %v1562_v37, %v1554_v29  ;;  %v11346_v37 = vrot.slane %v11334_v52, %v11021_v53 }
 0x3ac   : > { %1566 = vrot.lane.b32.xlu0 %v1564_v51, %s15158_s10  ;;  %v11352_v51 = vld [vmem:[%s15209_s7] sm:$0xff] }
 0x3ad   : > { %v11328_v38 = vpop.permute.xlu1 %1600 }
 0x3ae   : > { %15210 = vst [vmem:[#allocation39_spill] sm:$0xff] %v11328_v38  ;;  %v1603_v5 = vmul.f32 %v11328_v38, %v1594_v31 }
 0x3b0   : > { %1605 = vrot.lane.b32.xlu0 %v1603_v5, %s15129_s11 }
 0x3b4   : > { %2200 = vperm.xlu0 %10404, %v11142_v59  }
 0x3b8   : > { %10408 = vset.pattern.permute.xlu0 %v14912_v36 }
 0x3b9   : > { %2234 = vperm.xlu0 %10408, %v11142_v59  }
 0x3bd   : > { %2443 = vrot.lane.b32.xlu0 %v11340_v34, %s10704_s23 }
 0x3be   : > { %10414 = vset.pattern.permute.xlu0 %v14920_v18 }
 0x3c1   : > { %2293 = vrot.lane.b32.xlu0 %v11346_v37, %s10706_s0 }
 0x3c5   : > { %3536 = vperm.xlu0 %10414, %v11352_v51  }
 0x3c9   : > { %10417 = vset.pattern.permute.xlu0 %v14926_v13 }
 0x3ca   : > { %3975 = vperm.xlu0 %10417, %v11352_v51  }
 0x3ce   : > { %10420 = vset.pattern.permute.xlu0 %v14918_v49 }
 0x3cf   : > { %4023 = vperm.xlu0 %10420, %v11352_v51  }
 0x3d3   : > { %10423 = vset.pattern.permute.xlu0 %v14916_v23 }
 0x3d4   : > { %4071 = vperm.xlu0 %10423, %v11352_v51  }
 0x3d8   : > { %10426 = vset.pattern.permute.xlu0 %v14914_v17  ;;  %v14937_v17 = vmov 14  }
 0x3d9   : > { %4119 = vperm.xlu0 %10426, %v11352_v51  }
 0x3dd   : > { %10429 = vset.pattern.permute.xlu0 %v14922_v3 }
 0x3de   : > { %3492 = vperm.xlu0 %10429, %v11364_v58  }
 0x3e1   : > { %v10057_v29 = vpop.f32.mrf.mxu0 }
 0x3e2   : > { %10430 = vset.pattern.permute.xlu0 %v14924_v14 }
 0x3e3   : > { %2386 = vperm.xlu0 %10430, %v11142_v59   ;;  %v1959_v23 = vpop.f32.mrf.mxu0 }
 0x3e5   : > { %v10036_v56 = vpop.f32.mrf.mxu1  ;;  %v10071_v22 = vpop.f32.mrf.mxu0 }
 0x3e7   : > { %v1704_v21 = vpop.f32.mrf.mxu1  ;;  %3743 = vperm.xlu0 %10430, %v11364_v58   ;;  %v2123_v54 = vpop.f32.mrf.mxu0 }
 0x3e9   : > { %v10043_v31 = vpop.f32.mrf.mxu1 }
 0x3ea   : > { %v1802_v5 = vadd.f32 %v10043_v31, %v10036_v56 }
 0x3eb   : > { %v1795_v36 = vpop.f32.mrf.mxu1  ;;  %10435 = vset.pattern.permute.xlu0 %v14937_v17 }
 0x3ec   : > { %3791 = vperm.xlu0 %10435, %v11364_v58   ;;  %v1796_v18 = vadd.f32 %v1795_v36, %v1704_v21 }
 0x3ed   : > { %v10050_v49 = vpop.f32.mrf.mxu1 }
 0x3ee   : > { %v1885_v3 = vadd.f32 %v10050_v49, %v1802_v5  ;;  %v15213_v49 = vmov 12   ;;  %v1508_v5 = vpop.permute.xlu0 %1507 }
 0x3ef   : > { %v1877_v14 = vpop.f32.mrf.mxu1 }
 0x3f0   : > { %v1878_v13 = vadd.f32 %v1877_v14, %v1796_v18  ;;  %v1968_v0 = vadd.f32 %v10057_v29, %v1885_v3  ;;  %10438 = vset.pattern.permute.xlu0 %v14947_v25  ;;  %v15214_v29 = vmov 5  }
 0x3f1   : > { %v10064_v38 = vpop.f32.mrf.mxu1  ;;  %3839 = vperm.xlu0 %10438, %v11364_v58  }
 0x3f2   : > { %v2051_v56 = vadd.f32 %v10064_v38, %v1968_v0  ;;  %v1960_v31 = vadd.f32 %v1959_v23, %v1878_v13 }
 0x3f3   : > { %v2044_v28 = vpop.f32.mrf.mxu1 }
 0x3f4   : > { %v11375_v17 = vadd.f32 %v10071_v22, %v2051_v56  ;;  %v2045_v16 = vadd.f32 %v2044_v28, %v1960_v31  ;;  %v14943_v28 = vmov 26   ;;  %v1510_v56 = vmul.f32 %v1508_v5, %v11103_v33  ;;  %v1518_v31 = vpop.permute.xlu1 %1517 }
 0x3f5   : > { %10441 = vset.pattern.permute.xlu0 %v14945_v55  ;;  %v11378_v36 = vpop.f32.mrf.mxu1 }
 0x3f6   : > { %v2124_v3 = vadd.f32 %v2123_v54, %v2045_v16  ;;  %3887 = vperm.xlu0 %10441, %v11364_v58  }
 0x3f7   : > { %v11381_v14 = vpop.f32.mrf.mxu1 }
 0x3f8   : > { %v11384_v18 = vadd.f32 %v2124_v3, %v11078_v11  ;;  %v15212_v11 = vmov 0.0   ;;  %v1520_v3 = vadd.f32 %v1518_v31, %v1510_v56 }
 0x3f9   : > { %v2189_v0 = vpop.f32.mrf.mxu1  ;;  %1225 = vst.msk [vmem:[#allocation2 + $0x10] sm:$0xff] %vm1224_vm13, %v15212_v11  ;;  %1226 = vst.msk [vmem:[#allocation2 + $0x28] sm:$0xff] %vm1224_vm13, %v15212_v11  ;;  %vm4170_vm13 = vcmask 23552  }
 0x3fa   : > { %15211 = vst [vmem:[#allocation40_spill] sm:$0xff] %v11384_v18  ;;  %v2525_v13 = vsel %vm2523_vm11, %v11384_v18, 0  ;;  %10444 = vset.pattern.permute.xlu0 %v14943_v28  ;;  %v1528_v0 = vpop.permute.xlu1 %1527  ;;  %1222 = vst.msk [vmem:[#allocation2] sm:$0xff] %vm1221_vm12, %v15212_v11 }
 0x3fb   : > { %v11389_v22 = vand.u32 4294901760, %v2525_v13  ;;  %4375 = vperm.xlu0 %10444, %v11364_v58   ;;  %v2190_v16 = vpop.f32.mrf.mxu1  ;;  %1223 = vst.msk [vmem:[#allocation2 + $0x18] sm:$0xff] %vm1221_vm12, %v15212_v11 }
 0x3fc   : > { %v1530_v16 = vadd.f32 %v1528_v0, %v1520_v3  ;;  %v15219_v3 = vmov 10   ;;  %v1240_v0 = vld [vmem:[%s10760_s17 + $0x8] sm:$0x1f] }
 0x3fd   : > { %v11393_v54 = vsub.f32 %v2525_v13, %v11389_v22  ;;  %2779 = vmatmul.mubr.f32.vlgmr.msra.gmra.mxu1 %v11389_v22  ;;  %v11439_v13 = vpop.permute.xlu0 %1536 }
 0x3fe   : > { %2924 = vmatpush1.msra.mxu1 %v11151_v7  ;;  %2784 = vmatprep.mubr.f32.mxu1 %v15212_v11  ;;  %15216 = vst [vmem:[#allocation41_spill] sm:$0xff] %v11439_v13 }
 0x3ff   : > { %v14942_v38 = vand.u32 4294901760, %v11393_v54  ;;  %10447 = vset.pattern.permute.xlu0 %v15213_v49  ;;  %2926 = vmatprep.subr.mxu1 %v11157_v63 }
 0x400   : > { %3329 = vperm.xlu0 %10447, %v11352_v51   ;;  %2928 = vmatpush1.msra.mxu1 %v11164_v1 }
 0x401   : > { %v2614_v23 = vsub.f32 %v11393_v54, %v14942_v38  ;;  %2930 = vmatprep.subr.mxu1 %v11172_v20  ;;  %v1539_v38 = vmul.f32 %v11439_v13, %v1530_v16  ;;  %v11475_v16 = vrot.slane %v1240_v0, %v11013_v46 }
 0x402   : > { %2932 = vmatpush1.msra.mxu1 %v11180_v26 }
 0x403   : > { %v2615_v21 = vand.u32 4294901760, %v2614_v23  ;;  %2934 = vmatprep.subr.mxu1 %v11191_v40 }
 0x404   : > { %10450 = vset.pattern.permute.xlu0 %v15214_v29  ;;  %2936 = vmatpush1.msra.mxu1 %v11202_v47 }
 0x405   : > { %2616 = vmatmul.mubr.f32.vlgmr.msra.gmra.mxu0 %v2615_v21  ;;  %2938 = vmatprep.subr.mxu1 %v11227_v10  ;;  %v1611_v21 = vpop.permute.xlu1 %1610 }
 0x406   : > { %2813 = vmatpush1.msra.mxu0 %v11162_v15  ;;  %2940 = vmatpush1.msra.mxu1 %v11234_v42 }
 0x407   : > { %2816 = vmatprep.subr.mxu0 %v11170_v19  ;;  %2942 = vmatprep.subr.mxu1 %v11241_v2 }
 0x408   : > { %2819 = vmatpush1.msra.mxu0 %v11178_v24  ;;  %2944 = vmatpush1.msra.mxu1 %v11251_v6 }
 0x409   : > { %2822 = vmatprep.subr.mxu0 %v11189_v35  ;;  %2946 = vmatprep.subr.mxu1 %v11261_v50  ;;  %v1616_v5 = vpop.permute.xlu1 %1615 }
 0x40a   : > { %2825 = vmatpush1.msra.mxu0 %v11200_v45  ;;  %2948 = vmatpush1.msra.mxu1 %v11269_v32 }
 0x40b   : > { %2828 = vmatprep.subr.mxu0 %v11217_v57  ;;  %2950 = vmatprep.subr.mxu1 %v11288_v61 }
 0x40c   : > { %2831 = vmatpush1.msra.mxu0 %v11225_v8  ;;  %2952 = vmatpush1.msra.mxu1 %v11295_v62 }
 0x40d   : > { %2834 = vmatprep.subr.mxu0 %v11239_v41  ;;  %3148 = vmatprep.subr.mxu1 %v11148_v4  ;;  %v15215_v4 = vand.u32 4294901760, %v11155_v9  ;;  %v11448_v56 = vpop.permute.xlu1 %2194 }
 0x40e   : > { %2837 = vmatpush1.msra.mxu0 %v11249_v60  ;;  %2621 = vmatprep.mubr.f32.mxu0 %v15212_v11 }
 0x40f   : > { %2840 = vmatprep.subr.mxu0 %v11259_v27 }
 0x410   : > { %2843 = vmatpush1.msra.mxu0 %v11267_v30 }
 0x411   : > { %2846 = vmatprep.subr.mxu0 %v11278_v44 }
 0x412   : > { %2849 = vmatpush1.msra.mxu0 %v11286_v48 }
 0x413   : > { %2852 = vmatprep.subr.mxu0 %v11306_v39 }
 0x414   : > { %2855 = vmatpush1.msra.mxu0 %v11313_v12 }
 0x415   : > { %3023 = vmatprep.subr.mxu0 %v15215_v4 }
 0x41e   : > { %v1567_v23 = vpop.permute.xlu0 %1566 }
 0x41f   : > { %v1569_v28 = vadd.f32 %v1567_v23, %v1539_v38  ;;  %v11480_v23 = vsub.s32 4, %v11006_v43  ;;  %v15231_v43 = vmov 14  }
 0x421   : > { %15220 = vst [vmem:[#allocation42_spill] sm:$0xff] %v11480_v23  ;;  %v4425_v46 = vrot.slane %v1240_v0, %v11480_v23 }
 0x422   : > { %v1606_v55 = vpop.permute.xlu0 %1605 }
 0x423   : > { %v1608_v33 = vadd.f32 %v1606_v55, %v1569_v28  ;;  %v2198_v55 = vmul.f32 %v11448_v56, %v11381_v14  ;;  %v15218_v14 = vmov 6  }
 0x425   : > { %v1613_v25 = vmul.f32 %v1611_v21, %v1608_v33  ;;  %v15221_v33 = vmov 3  }
 0x427   : > { %v1618_v18 = vadd.f32 %v1616_v5, %v1613_v25  ;;  %v11488_v5 = vrot.slane %v1240_v0, %v11021_v53  ;;  %v15228_v0 = vmov 9  }
 0x429   : > { %v1619_v9 = vmax.f32 %v1618_v18, 0.0  ;;  %v15217_v18 = vmov 11  }
 0x42b   : > { %v1620_v38 = vmin.f32 %v1619_v9, 6.0  ;;  %v15222_v9 = vmov 2  }
 0x42d   : > { %1622 = vrot.lane.b32.xlu1 %v1620_v38, %s14954_s26  ;;  %s15044_s26 = smov 1   ;;  %v15226_v38 = vmov 8  }
 0x42f   : > { %v11453_v25 = vpop.permute.xlu0 %2200 }
 0x430   : > { %v2204_v28 = vadd.f32 %v11453_v25, %v2198_v55 }
 0x431   : > { %2313 = vperm.xlu1 %10405, %v11142_v59  }
 0x432   : > { %v2206_v31 = vmax.f32 %v2204_v28, 0.0  ;;  %v14964_v28 = vmov 18  }
 0x434   : > { %v11457_v4 = vmin.f32 %v2206_v31, 6.0  ;;  %v11482_v21 = vpop.permute.xlu0 %2234 }
 0x435   : > { %10406 = vset.pattern.permute.xlu1 %v15217_v18 }
 0x436   : > { %2337 = vperm.xlu1 %10406, %v11142_v59   ;;  %2213 = vrot.lane.b32.xlu0 %v11457_v4, %s15108_s1 }
 0x43a   : > { %10407 = vset.pattern.permute.xlu1 %v15213_v49  ;;  %3961 = vperm.xlu0 %10450, %v11352_v51  }
 0x43b   : > { %2410 = vperm.xlu1 %10407, %v11142_v59  }
 0x43e   : > { %10451 = vset.pattern.permute.xlu0 %v15218_v14 }
 0x43f   : > { %10409 = vset.pattern.permute.xlu1 %v15219_v3  ;;  %2379 = vperm.xlu0 %10451, %v11142_v59  }
 0x440   : > { %2259 = vperm.xlu1 %10409, %v11142_v59  }
 0x443   : > { %4213 = vperm.xlu0 %10451, %v11352_v51  }
 0x444   : > { %10410 = vset.pattern.permute.xlu1 %v15214_v29 }
 0x445   : > { %2306 = vperm.xlu1 %10410, %v11142_v59  }
 0x447   : > { %3679 = vrot.lane.b32.xlu0 %v11346_v37, %s15044_s26  ;;  %v11496_v37 = vpop.permute.xlu0 %2443 }
 0x448   : > { %10454 = vset.pattern.permute.xlu0 %v15221_v33  ;;  %15223 = vst [vmem:[#allocation43_spill] sm:$0xff] %v11496_v37 }
 0x449   : > { %2445 = vrot.lane.b32.xlu1 %v11475_v16, %s10704_s23  ;;  %s10726_s23 = smov 64  }
 0x44a   : > { %10411 = vset.pattern.permute.xlu1 %v15222_v9 }
 0x44b   : > { %4166 = vrot.lane.b32.xlu0 %v11340_v34, %s15022_s18  ;;  %v11501_v53 = vpop.permute.xlu0 %2293  ;;  %v15225_v34 = vmov 4  }
 0x44c   : > { %15224 = vst [vmem:[#allocation44_spill] sm:$0xff] %v11501_v53  ;;  %v15235_v53 = vmov 24  }
 0x44d   : > { %2295 = vrot.lane.b32.xlu1 %v11488_v5, %s10706_s0  ;;  %s15160_s0 = smov 96  }
 0x44f   : > { %4430 = vrot.lane.b32.xlu0 %v4425_v46, %s15021_s28  ;;  %v11508_v55 = vpop.permute.xlu0 %3536 }
 0x451   : > { %2474 = vperm.xlu1 %10411, %v11142_v59  }
 0x453   : > { %3478 = vperm.xlu0 %10454, %v11364_v58   ;;  %v11513_v31 = vpop.permute.xlu0 %3975 }
 0x454   : > { %15227 = vst [vmem:[#allocation45_spill] sm:$0xff] %v11513_v31  ;;  %v15240_v31 = vmov 13  }
 0x455   : > { %10412 = vset.pattern.permute.xlu1 %v15221_v33 }
 0x456   : > { %2481 = vperm.xlu1 %10412, %v11142_v59  }
 0x457   : > { %10455 = vset.pattern.permute.xlu0 %v15225_v34  ;;  %v11517_v46 = vpop.permute.xlu0 %4023 }
 0x458   : > { %2227 = vperm.xlu0 %10455, %v11142_v59   ;;  %15229 = vst [vmem:[#allocation46_spill] sm:$0xff] %v11517_v46  ;;  %v14966_v59 = vmov 23   ;;  %v15246_v46 = vmov 15  }
 0x45a   : > { %10413 = vset.pattern.permute.xlu1 %v15226_v38 }
 0x45b   : > { %3488 = vperm.xlu1 %10413, %v11352_v51   ;;  %v11521_v13 = vpop.permute.xlu0 %4071 }
 0x45c   : > { %15230 = vst [vmem:[#allocation47_spill] sm:$0xff] %v11521_v13 }
 0x45f   : > { %10415 = vset.pattern.permute.xlu1 %v14964_v28  ;;  %v11525_v28 = vpop.permute.xlu0 %4119 }
 0x460   : > { %3584 = vperm.xlu1 %10415, %v11352_v51   ;;  %15232 = vst [vmem:[#allocation48_spill] sm:$0xff] %v11525_v28  ;;  %v14976_v28 = vmov 21  }
 0x463   : > { %v11530_v38 = vpop.permute.xlu0 %3492 }
 0x464   : > { %10416 = vset.pattern.permute.xlu1 %v15228_v0  ;;  %v15233_v0 = vmov 19   ;;  %15234 = vst [vmem:[#allocation49_spill] sm:$0xff] %v11530_v38  ;;  %v15238_v38 = vmov 26  }
 0x465   : > { %3739 = vperm.xlu1 %10416, %v11352_v51  }
 0x469   : > { %10418 = vset.pattern.permute.xlu1 %v14966_v59  ;;  %v14972_v59 = vmov 16  }
 0x46a   : > { %3632 = vperm.xlu1 %10418, %v11352_v51  }
 0x46e   : > { %10419 = vset.pattern.permute.xlu1 %v15231_v43  ;;  %v11535_v43 = vpop.permute.xlu0 %2386 }
 0x46f   : > { %3787 = vperm.xlu1 %10419, %v11352_v51  }
 0x472   : > { %v11539_v13 = vpop.permute.xlu0 %3743 }
 0x473   : > { %10421 = vset.pattern.permute.xlu1 %v15217_v18  ;;  %15236 = vst [vmem:[#allocation50_spill] sm:$0xff] %v11539_v13 }
 0x474   : > { %4227 = vperm.xlu1 %10421, %v11352_v51  }
 0x478   : > { %10422 = vset.pattern.permute.xlu1 %v15233_v0  ;;  %v11543_v0 = vpop.permute.xlu0 %3791 }
 0x479   : > { %3835 = vperm.xlu1 %10422, %v11352_v51   ;;  %15237 = vst [vmem:[#allocation51_spill] sm:$0xff] %v11543_v0 }
 0x47d   : > { %10424 = vset.pattern.permute.xlu1 %v14972_v59  ;;  %v11547_v59 = vpop.permute.xlu0 %3839 }
 0x47e   : > { %4275 = vperm.xlu1 %10424, %v11352_v51   ;;  %15239 = vst [vmem:[#allocation52_spill] sm:$0xff] %v11547_v59  ;;  %v15245_v59 = vmov 23  }
 0x481   : > { %v11552_v13 = vpop.permute.xlu0 %3887 }
 0x482   : > { %10425 = vset.pattern.permute.xlu1 %v15235_v53  ;;  %v15241_v53 = vmov 18   ;;  %15242 = vst [vmem:[#allocation53_spill] sm:$0xff] %v11552_v13 }
 0x483   : > { %3883 = vperm.xlu1 %10425, %v11352_v51  }
 0x487   : > { %10427 = vset.pattern.permute.xlu1 %v14976_v28  ;;  %v11557_v28 = vpop.permute.xlu0 %4375 }
 0x488   : > { %4323 = vperm.xlu1 %10427, %v11352_v51   ;;  %15243 = vst [vmem:[#allocation54_spill] sm:$0xff] %v11557_v28 }
 0x48c   : > { %10428 = vset.pattern.permute.xlu1 %v15238_v38 }
 0x48d   : > { %4371 = vperm.xlu1 %10428, %v11352_v51  }
 0x491   : > { %10431 = vset.pattern.permute.xlu1 %v15240_v31  ;;  %v11566_v31 = vpop.permute.xlu0 %3329 }
 0x492   : > { %3540 = vperm.xlu1 %10431, %v11364_v58  }
 0x496   : > { %10432 = vset.pattern.permute.xlu1 %v15241_v53 }
 0x497   : > { %3588 = vperm.xlu1 %10432, %v11364_v58  }
 0x49b   : > { %10433 = vset.pattern.permute.xlu1 %v15219_v3 }
 0x49c   : > { %3979 = vperm.xlu1 %10433, %v11364_v58  }
 0x49f   : > { %v1623_v38 = vpop.permute.xlu1 %1622 }
 0x4a0   : > { %v11560_v0 = vadd.f32 %v11375_v17, %v1623_v38  ;;  %10434 = vset.pattern.permute.xlu1 %v15245_v59  ;;  %v15247_v59 = vand.u32 4294901760, %v11393_v54 }
 0x4a1   : > { %3636 = vperm.xlu1 %10434, %v11364_v58  }
 0x4a2   : > { %15244 = vst [vmem:[#allocation55_spill] sm:$0xff] %v11560_v0  ;;  %v2528_v53 = vsel %vm2523_vm11, %v11560_v0, 0 }
 0x4a3   : > { %v11568_v13 = vand.u32 4294901760, %v2528_v53 }
 0x4a5   : > { %v2623_v3 = vsub.f32 %v2528_v53, %v11568_v13  ;;  %10436 = vset.pattern.permute.xlu1 %v15246_v46  ;;  %2786 = vmatmul.mubr.f32.gmra.mxu1 %v11568_v13 }
 0x4a6   : > { %4027 = vperm.xlu1 %10436, %v11364_v58   ;;  %2985 = vmatprep.mubr.f32.mxu1 %v15212_v11 }
 0x4a7   : > { %v2624_v17 = vand.u32 4294901760, %v2623_v3 }
 0x4a8   : > { %v11575_v38 = vpop.permute.xlu0 %2213 }
 0x4a9   : > { %2222 = vst.msk [vmem:[#allocation2 + $0x10] sm:$0xff] %vm1221_vm12, %v11575_v38  ;;  %2989 = vmatmul.mubr.f32.vlgmr.msra.gmra.mxu1 %v15247_v59  ;;  %v2625_v0 = vsub.f32 %v2623_v3, %v2624_v17  ;;  %v4421_v59 = vrot.slane %v11334_v52, %v11480_v23 }
 0x4aa   : > { %3150 = vmatpush1.msra.mxu1 %v11151_v7  ;;  %10437 = vset.pattern.permute.xlu1 %v15217_v18  ;;  %v15248_v7 = vmov 20  }
 0x4ab   : > { %3152 = vmatprep.subr.mxu1 %v11157_v63  ;;  %4231 = vperm.xlu1 %10437, %v11364_v58   ;;  %v2626_v53 = vand.u32 4294901760, %v2625_v0 }
 0x4ac   : > { %3154 = vmatpush1.msra.mxu1 %v11164_v1  ;;  %v11586_v46 = vpop.permute.xlu1 %2313  ;;  %2994 = vmatprep.mubr.f32.mxu1 %v15212_v11  ;;  %v15249_v1 = vand.u32 4294901760, %v11162_v15 }
 0x4ad   : > { %3156 = vmatprep.subr.mxu1 %v11172_v20  ;;  %2627 = vmatmul.mubr.f32.gmra.mxu0 %v2626_v53  ;;  %v15250_v20 = vand.u32 4294901760, %v11170_v19  ;;  %v15255_v19 = vand.u32 4294901760, %v11217_v57  ;;  %v15262_v57 = vand.u32 4294901760, %v11278_v44 }
 0x4ae   : > { %2998 = vmatmul.mubr.f32.gmra.mxu1 %v2624_v17  ;;  %2888 = vmatprep.mubr.f32.mxu0 %v15212_v11 }
 0x4af   : > { %3158 = vmatpush1.msra.mxu1 %v11180_v26  ;;  %10439 = vset.pattern.permute.xlu1 %v15248_v7  ;;  %v15251_v26 = vand.u32 4294901760, %v11178_v24  ;;  %v15256_v24 = vand.u32 4294901760, %v11225_v8 }
 0x4b0   : > { %3160 = vmatprep.subr.mxu1 %v11191_v40  ;;  %4075 = vperm.xlu1 %10439, %v11364_v58   ;;  %v15252_v40 = vmov 16  }
 0x4b1   : > { %3162 = vmatpush1.msra.mxu1 %v11202_v47  ;;  %v11596_v63 = vpop.permute.xlu1 %2337  ;;  %2891 = vmatmul.mubr.f32.vlgmr.msra.gmra.mxu0 %v11393_v54  ;;  %v15253_v47 = vand.u32 4294901760, %v11189_v35 }
 0x4b2   : > { %3164 = vmatprep.subr.mxu1 %v11227_v10  ;;  %3027 = vmatpush1.msra.mxu0 %v15249_v1  ;;  %v15263_v10 = vand.u32 4294901760, %v11286_v48  ;;  %v14984_v48 = vmov 17  }
 0x4b3   : > { %3166 = vmatpush1.msra.mxu1 %v11234_v42  ;;  %3031 = vmatprep.subr.mxu0 %v15250_v20  ;;  %v15264_v42 = vmov 21  }
 0x4b4   : > { %3168 = vmatprep.subr.mxu1 %v11241_v2  ;;  %3035 = vmatpush1.msra.mxu0 %v15251_v26  ;;  %v15254_v2 = vand.u32 4294901760, %v11200_v45  ;;  %v15261_v45 = vand.u32 4294901760, %v11267_v30 }
 0x4b5   : > { %3170 = vmatpush1.msra.mxu1 %v11251_v6  ;;  %10440 = vset.pattern.permute.xlu1 %v15252_v40 }
 0x4b6   : > { %2896 = vmatprep.mubr.f32.mxu0 %v15212_v11  ;;  %3039 = vmatprep.subr.mxu0 %v15253_v47  ;;  %v11613_v15 = vpop.permute.xlu1 %2410 }
 0x4b7   : > { %3172 = vmatprep.subr.mxu1 %v11261_v50  ;;  %4279 = vperm.xlu1 %10440, %v11364_v58   ;;  %v15257_v50 = vand.u32 4294901760, %v11239_v41  ;;  %v15265_v41 = vand.u32 4294901760, %v11306_v39 }
 0x4b8   : > { %2899 = vmatmul.mubr.f32.gmra.mxu0 %v2623_v3  ;;  %3174 = vmatpush1.msra.mxu1 %v11269_v32  ;;  %v15258_v32 = vmov 25  }
 0x4b9   : > { %3043 = vmatpush1.msra.mxu0 %v15254_v2  ;;  %3176 = vmatprep.subr.mxu1 %v11288_v61  ;;  %v15259_v61 = vand.u32 4294901760, %v11249_v60  ;;  %v15266_v60 = vand.u32 4294901760, %v11313_v12  ;;  %v2197_v12 = vmul.f32 %v11448_v56, %v11378_v36  ;;  %v14986_v56 = vmov 22  }
 0x4ba   : > { %3047 = vmatprep.subr.mxu0 %v15255_v19  ;;  %3178 = vmatpush1.msra.mxu1 %v11295_v62  ;;  %v15260_v62 = vand.u32 4294901760, %v11259_v27  ;;  %v15268_v27 = vmov 7  }
 0x4bb   : > { %3051 = vmatpush1.msra.mxu0 %v15256_v24  ;;  %3211 = vmatprep.mubr.f32.mxu1 %v15212_v11  ;;  %v11627_v35 = vpop.permute.xlu1 %2259  ;;  %v2203_v44 = vadd.f32 %v11453_v25, %v2197_v12 }
 0x4bc   : > { %3055 = vmatprep.subr.mxu0 %v15257_v50  ;;  %3213 = vmatmul.mubr.f32.vlgmr.msra.gmra.mxu1 %v11389_v22 }
 0x4bd   : > { %10442 = vset.pattern.permute.xlu1 %v15258_v32  ;;  %3059 = vmatpush1.msra.mxu0 %v15259_v61  ;;  %v2205_v54 = vmax.f32 %v2203_v44, 0.0 }
 0x4be   : > { %4123 = vperm.xlu1 %10442, %v11364_v58   ;;  %3063 = vmatprep.subr.mxu0 %v15260_v62 }
 0x4bf   : > { %3067 = vmatpush1.msra.mxu0 %v15261_v45  ;;  %3218 = vmatprep.mubr.f32.mxu1 %v15212_v11  ;;  %v11679_v3 = vmin.f32 %v2205_v54, 6.0 }
 0x4c0   : > { %3071 = vmatprep.subr.mxu0 %v15262_v57  ;;  %3220 = vmatmul.mubr.f32.gmra.mxu1 %v11568_v13  ;;  %v11644_v8 = vpop.permute.xlu1 %2306 }
 0x4c1   : > { %3075 = vmatpush1.msra.mxu0 %v15263_v10  ;;  %3116 = vmatprep.mubr.f32.mxu0 %v15212_v11 }
 0x4c2   : > { %10443 = vset.pattern.permute.xlu1 %v15264_v42  ;;  %3079 = vmatprep.subr.mxu0 %v15265_v41 }
 0x4c3   : > { %4327 = vperm.xlu1 %10443, %v11364_v58   ;;  %3083 = vmatpush1.msra.mxu0 %v15266_v60 }
 0x4c4   : > { %3118 = vmatmul.mubr.f32.vlgmr.msra.gmra.mxu0 %v11389_v22  ;;  %v11656_v6 = vpop.permute.xlu1 %2445 }
 0x4c5   : > { %15267 = vst [vmem:[#allocation56_spill] sm:$0xff] %v11656_v6  ;;  %3123 = vmatprep.mubr.f32.mxu0 %v15212_v11 }
 0x4c7   : > { %10445 = vset.pattern.permute.xlu1 %v15268_v27 }
 0x4c8   : > { %3285 = vperm.xlu1 %10445, %v11352_v51   ;;  %3125 = vmatmul.mubr.f32.gmra.mxu0 %v11568_v13  ;;  %v11662_v30 = vpop.permute.xlu1 %2295 }
 0x4c9   : > { %15269 = vst [vmem:[#allocation57_spill] sm:$0xff] %v11662_v30 }
 0x4cc   : > { %10446 = vset.pattern.permute.xlu1 %v15221_v33  ;;  %v11665_v39 = vpop.permute.xlu1 %2474 }
 0x4cd   : > { %3474 = vperm.xlu1 %10446, %v11352_v51  }
 0x4d1   : > { %10448 = vset.pattern.permute.xlu1 %v14984_v48  ;;  %v11672_v22 = vpop.permute.xlu1 %2481 }
 0x4d2   : > { %3373 = vperm.xlu1 %10448, %v11352_v51  }
 0x4d6   : > { %10449 = vset.pattern.permute.xlu1 %v15225_v34  ;;  %v11676_v13 = vpop.permute.xlu1 %3488 }
 0x4d7   : > { %3725 = vperm.xlu1 %10449, %v11352_v51  }
 0x4db   : > { %2211 = vrot.lane.b32.xlu1 %v11679_v3, %s15108_s1  ;;  %v11683_v36 = vpop.permute.xlu1 %3584 }
 0x4dc   : > { %10452 = vset.pattern.permute.xlu1 %v14986_v56  ;;  %v11758_v56 = vpop.f32.mrf.mxu1 }
 0x4df   : > { %3418 = vperm.xlu1 %10452, %v11352_v51  }
 0x4e0   : > { %v11687_v25 = vpop.permute.xlu1 %3739 }
 0x4e3   : > { %3681 = vrot.lane.b32.xlu1 %v11488_v5, %s15044_s26  ;;  %s15342_s26 = smov 124  }
 0x4e4   : > { %10453 = vset.pattern.permute.xlu1 %v15268_v27 }
 0x4e5   : > { %v11692_v0 = vpop.permute.xlu1 %3632 }
 0x4e7   : > { %4168 = vrot.lane.b32.xlu1 %v11475_v16, %s15022_s18  ;;  %s15030_s18 = smov 111  }
 0x4ea   : > { %v11698_v17 = vpop.permute.xlu1 %3787 }
 0x4eb   : > { %4428 = vrot.lane.b32.xlu1 %v4421_v59, %s15021_s28  ;;  %s10727_s28 = smov 80  }
 0x4ef   : > { %v11701_v51 = vpop.permute.xlu1 %4227  ;;  %3289 = vperm.xlu1 %10453, %v11364_v58  }
 0x4f3   : > { %10456 = vset.pattern.permute.xlu1 %v15213_v49 }
 0x4f4   : > { %v11705_v5 = vpop.permute.xlu1 %3835  ;;  %3333 = vperm.xlu1 %10456, %v11364_v58  }
 0x4f8   : > { %10457 = vset.pattern.permute.xlu1 %v14984_v48  ;;  %v11754_v48 = vld [vmem:[#allocation2 + $0x10] sm:$0xff] }
 0x4f9   : > { %v11709_v16 = vpop.permute.xlu1 %4275  ;;  %3377 = vperm.xlu1 %10457, %v11364_v58   ;;  %v2318_v23 = vmul.f32 %v11586_v46, %v11754_v48  ;;  %v2342_v27 = vmul.f32 %v11596_v63, %v11754_v48 }
 0x4fd   : > { %10458 = vset.pattern.permute.xlu1 %v15214_v29  ;;  %v2782_v29 = vpop.f32.mrf.mxu1 }
 0x4fe   : > { %v11713_v52 = vpop.permute.xlu1 %3883 }
 0x503   : > { %v11715_v53 = vpop.permute.xlu1 %4323 }
 0x508   : > { %v11717_v1 = vpop.permute.xlu1 %4371 }
 0x50d   : > { %v11719_v20 = vpop.permute.xlu1 %3540 }
 0x50e   : > { %15270 = vst [vmem:[#allocation58_spill] sm:$0xff] %v11719_v20 }
 0x512   : > { %v11721_v26 = vpop.permute.xlu1 %3588 }
 0x513   : > { %15271 = vst [vmem:[#allocation59_spill] sm:$0xff] %v11721_v26 }
 0x517   : > { %v11723_v47 = vpop.permute.xlu1 %3979 }
 0x518   : > { %15272 = vst [vmem:[#allocation60_spill] sm:$0xff] %v11723_v47 }
 0x51c   : > { %v11725_v2 = vpop.permute.xlu1 %3636 }
 0x51d   : > { %15273 = vst [vmem:[#allocation61_spill] sm:$0xff] %v11725_v2 }
 0x521   : > { %v11727_v19 = vpop.permute.xlu1 %4027 }
 0x522   : > { %15274 = vst [vmem:[#allocation62_spill] sm:$0xff] %v11727_v19 }
 0x526   : > { %v11729_v24 = vpop.permute.xlu1 %4231 }
 0x527   : > { %15275 = vst [vmem:[#allocation63_spill] sm:$0xff] %v11729_v24 }
 0x52b   : > { %v11731_v50 = vpop.permute.xlu1 %4075 }
 0x52c   : > { %15276 = vst [vmem:[#allocation64_spill] sm:$0xff] %v11731_v50 }
 0x532   : > { %v11733_v61 = vpop.permute.xlu1 %4279 }
 0x533   : > { %15277 = vst [vmem:[#allocation65_spill] sm:$0xff] %v11733_v61 }
 0x539   : > { %v11735_v62 = vpop.permute.xlu1 %4123 }
 0x53a   : > { %15278 = vst [vmem:[#allocation66_spill] sm:$0xff] %v11735_v62 }
 0x53e   : > { %v11737_v45 = vpop.permute.xlu1 %4327 }
 0x53f   : > { %15279 = vst [vmem:[#allocation67_spill] sm:$0xff] %v11737_v45 }
 0x543   : > { %v11739_v57 = vpop.permute.xlu1 %3285 }
 0x548   : > { %v11741_v10 = vpop.permute.xlu1 %3474 }
 0x54d   : > { %v11743_v41 = vpop.permute.xlu1 %3373 }
 0x552   : > { %v11745_v60 = vpop.permute.xlu1 %3725 }
 0x556   : > { %v2212_v12 = vpop.permute.xlu1 %2211 }
 0x557   : > { %2220 = vst.msk [vmem:[#allocation2] sm:$0xff] %vm2219_vm14, %v2212_v12 }
 0x55e   : > { %v11748_v44 = vld [vmem:[#allocation2] sm:$0xff] }
 0x55f   : > { %v2316_v54 = vmul.f32 %v11586_v46, %v11748_v44  ;;  %v2340_v59 = vmul.f32 %v11596_v63, %v11748_v44  ;;  %v2389_v11 = vmul.f32 %v11535_v43, %v11748_v44  ;;  %v2237_v49 = vmul.f32 %v11482_v21, %v11748_v44 }
 0x560   : > { %v2309_v45 = vmul.f32 %v11644_v8, %v11748_v44 }
 0x561   : > { %2322 = vrot.lane.b32.xlu1 %v2316_v54, %s15162_s2  ;;  %2346 = vrot.lane.b32.xlu0 %v2340_v59, %s15160_s0  ;;  %v2617_v54 = vpop.f32.mrf.mxu0  ;;  %v2413_v59 = vmul.f32 %v11613_v15, %v11748_v44 }
 0x563   : > { %v2619_v34 = vpop.f32.mrf.mxu0 }
 0x565   : > { %2395 = vrot.lane.b32.xlu1 %v2389_v11, %s15162_s2  ;;  %2326 = vrot.lane.b32.xlu0 %v2318_v23, %s15162_s2  ;;  %v2787_v42 = vpop.f32.mrf.mxu1  ;;  %v2239_v11 = vmul.f32 %v11482_v21, %v11754_v48  ;;  %v11778_v23 = vsel %vm1221_vm12, %v2212_v12, %v11575_v38 }
 0x566   : > { %v2390_v32 = vmul.f32 %v11535_v43, %v11778_v23  ;;  %v2310_v19 = vmul.f32 %v11644_v8, %v11778_v23 }
 0x567   : > { %v2789_v7 = vpop.f32.mrf.mxu1 }
 0x569   : > { %2419 = vrot.lane.b32.xlu1 %v2413_v59, %s15160_s0  ;;  %2350 = vrot.lane.b32.xlu0 %v2342_v27, %s15160_s0  ;;  %v2262_v27 = vmul.f32 %v11627_v35, %v11748_v44  ;;  %v2990_v18 = vpop.f32.mrf.mxu1 }
 0x56d   : > { %2243 = vrot.lane.b32.xlu1 %v2237_v49, %s15162_s2  ;;  %2247 = vrot.lane.b32.xlu0 %v2239_v11, %s15162_s2  ;;  %v2628_v33 = vpop.f32.mrf.mxu0  ;;  %v2391_v49 = vmul.f32 %v11535_v43, %v11754_v48 }
 0x56e   : > { %v2788_v59 = vadd.f32 %v2787_v42, %v2628_v33  ;;  %v2414_v33 = vmul.f32 %v11613_v15, %v11778_v23  ;;  %v2992_v42 = vpop.f32.mrf.mxu1 }
 0x56f   : > { %v2630_v40 = vpop.f32.mrf.mxu0 }
 0x570   : > { %v2790_v28 = vadd.f32 %v2789_v7, %v2630_v40  ;;  %v2415_v7 = vmul.f32 %v11613_v15, %v11754_v48  ;;  %v2999_v40 = vpop.f32.mrf.mxu1 }
 0x571   : > { %2268 = vrot.lane.b32.xlu1 %v2262_v27, %s15160_s0  ;;  %2397 = vrot.lane.b32.xlu0 %v2390_v32, %s15162_s2  ;;  %v2892_v38 = vpop.f32.mrf.mxu0  ;;  %v2264_v32 = vmul.f32 %v11627_v35, %v11754_v48 }
 0x573   : > { %v2894_v12 = vpop.f32.mrf.mxu0 }
 0x575   : > { %2399 = vrot.lane.b32.xlu1 %v2391_v49, %s15162_s2  ;;  %2421 = vrot.lane.b32.xlu0 %v2414_v33, %s15160_s0  ;;  %v2263_v49 = vmul.f32 %v11627_v35, %v11778_v23  ;;  %v3001_v33 = vpop.f32.mrf.mxu1 }
 0x578   : > { %v2900_v11 = vpop.f32.mrf.mxu0 }
 0x579   : > { %v2901_v27 = vadd.f32 %v2900_v11, %v2788_v59  ;;  %2423 = vrot.lane.b32.xlu1 %v2415_v7, %s15160_s0  ;;  %3729 = vperm.xlu0 %10455, %v11364_v58   ;;  %v2783_v59 = vadd.f32 %v2782_v29, %v2619_v34  ;;  %v2317_v7 = vmul.f32 %v11586_v46, %v11778_v23 }
 0x57a   : > { %v2902_v43 = vpop.f32.mrf.mxu0 }
 0x57b   : > { %v2903_v62 = vadd.f32 %v2902_v43, %v2790_v28  ;;  %v11802_v61 = vadd.f32 %v2999_v40, %v2901_v27  ;;  %v2895_v11 = vadd.f32 %v2894_v12, %v2783_v59  ;;  %v2341_v28 = vmul.f32 %v11596_v63, %v11778_v23 }
 0x57c   : > { %v3214_v35 = vpop.f32.mrf.mxu1  ;;  %v15282_v12 = vmov 22  }
 0x57d   : > { %15280 = vst [vmem:[#allocation68_spill] sm:$0xff] %v11802_v61  ;;  %2272 = vrot.lane.b32.xlu1 %v2264_v32, %s15160_s0  ;;  %2270 = vrot.lane.b32.xlu0 %v2263_v49, %s15160_s0  ;;  %v11806_v15 = vadd.f32 %v3001_v33, %v2903_v62  ;;  %v2993_v27 = vadd.f32 %v2992_v42, %v2895_v11 }
 0x57e   : > { %10464 = vset.pattern.permute.xlu0 %v15222_v9  ;;  %v3216_v32 = vpop.f32.mrf.mxu1  ;;  %v2781_v49 = vadd.f32 %v11758_v56, %v2617_v54  ;;  %v2238_v56 = vmul.f32 %v11482_v21, %v11778_v23  ;;  %v11829_v54 = vpop.permute.xlu0 %3961 }
 0x57f   : > { %15281 = vst [vmem:[#allocation69_spill] sm:$0xff] %v11806_v15  ;;  %15283 = vst [vmem:[#allocation70_spill] sm:$0xff] %v11829_v54 }
 0x580   : > { %v2893_v34 = vadd.f32 %v2892_v38, %v2781_v49  ;;  %v11831_v38 = vpop.permute.xlu1 %3418 }
 0x581   : > { %2324 = vrot.lane.b32.xlu1 %v2317_v7, %s15162_s2 }
 0x582   : > { %v2991_v63 = vadd.f32 %v2990_v18, %v2893_v34  ;;  %v2380_v18 = vpop.permute.xlu0 %2379 }
 0x584   : > { %v3119_v40 = vpop.f32.mrf.mxu0 }
 0x585   : > { %2348 = vrot.lane.b32.xlu1 %v2341_v28, %s15160_s0  ;;  %v3120_v33 = vadd.f32 %v3119_v40, %v2991_v63 }
 0x586   : > { %v3121_v43 = vpop.f32.mrf.mxu0  ;;  %v11833_v59 = vpop.permute.xlu0 %4213 }
 0x587   : > { %v3122_v62 = vadd.f32 %v3121_v43, %v2993_v27  ;;  %v3215_v42 = vadd.f32 %v3214_v35, %v3120_v33  ;;  %15284 = vst [vmem:[#allocation71_spill] sm:$0xff] %v11833_v59  ;;  %v2383_v59 = vmul.f32 %v2380_v18, %v11778_v23 }
 0x589   : > { %v3217_v29 = vadd.f32 %v3216_v32, %v3122_v62  ;;  %3965 = vperm.xlu1 %10458, %v11364_v58  }
 0x58a   : > { %v11837_v7 = vpop.permute.xlu0 %3679 }
 0x58b   : > { %v3227_v46 = vadd.f32 %v3217_v29, %v11457_v4  ;;  %v3226_v4 = vadd.f32 %v3215_v42, %v11679_v3  ;;  %15285 = vst [vmem:[#allocation72_spill] sm:$0xff] %v11837_v7 }
 0x58d   : > { %10459 = vset.pattern.permute.xlu1 %v15282_v12  ;;  %3240 = vrot.lane.b32.xlu0 %v3227_v46, %s15108_s1  ;;  %v2311_v46 = vmul.f32 %v11644_v8, %v11754_v48 }
 0x58e   : > { %3422 = vperm.xlu1 %10459, %v11364_v58   ;;  %v11841_v11 = vpop.permute.xlu0 %4166 }
 0x58f   : > { %15287 = vst [vmem:[#allocation74_spill] sm:$0xff] %v11841_v11 }
 0x592   : > { %10460 = vset.pattern.permute.xlu1 %v15218_v14  ;;  %v11847_v35 = vpop.permute.xlu0 %4430 }
 0x593   : > { %4217 = vperm.xlu1 %10460, %v11364_v58   ;;  %v11835_v58 = vpop.permute.xlu1 %3681  ;;  %15290 = vst [vmem:[#allocation77_spill] sm:$0xff] %v11847_v35 }
 0x596   : > { %v11851_v27 = vpop.permute.xlu0 %3478 }
 0x597   : > { %2245 = vrot.lane.b32.xlu1 %v2238_v56, %s15162_s2  ;;  %v11839_v21 = vpop.permute.xlu1 %4168  ;;  %15292 = vst [vmem:[#allocation79_spill] sm:$0xff] %v11851_v27 }
 0x598   : > { %10461 = vset.pattern.permute.xlu1 %v15222_v9  ;;  %15286 = vst [vmem:[#allocation73_spill] sm:$0xff] %v11839_v21 }
 0x59a   : > { %v11855_v62 = vpop.permute.xlu0 %2227 }
 0x59b   : > { %3238 = vrot.lane.b32.xlu1 %v3226_v4, %s15108_s1  ;;  %v11843_v28 = vpop.permute.xlu1 %4428 }
 0x59c   : > { %15288 = vst [vmem:[#allocation75_spill] sm:$0xff] %v11843_v28 }
 0x59f   : > { %v11845_v3 = vpop.permute.xlu1 %3289 }
 0x5a0   : > { %15289 = vst [vmem:[#allocation76_spill] sm:$0xff] %v11845_v3 }
 0x5a3   : > { %v11849_v40 = vpop.permute.xlu1 %3333 }
 0x5a4   : > { %15291 = vst [vmem:[#allocation78_spill] sm:$0xff] %v11849_v40 }
 0x5a7   : > { %v11853_v43 = vpop.permute.xlu1 %3377 }
 0x5a8   : > { %15293 = vst [vmem:[#allocation80_spill] sm:$0xff] %v11853_v43 }
 0x5d3   : > { %v2323_v32 = vpop.permute.xlu1 %2322  ;;  %v2347_v49 = vpop.permute.xlu0 %2346 }
 0x5d7   : > { %v2396_v29 = vpop.permute.xlu1 %2395  ;;  %v2327_v34 = vpop.permute.xlu0 %2326 }
 0x5d8   : > { %v2335_v63 = vadd.f32 %v2327_v34, %v2311_v46  ;;  %v2384_v46 = vmul.f32 %v2380_v18, %v11754_v48 }
 0x5db   : > { %v2420_v33 = vpop.permute.xlu1 %2419  ;;  %v2351_v42 = vpop.permute.xlu0 %2350 }
 0x5dc   : > { %v2359_v56 = vadd.f32 %v2351_v42, %v2335_v63 }
 0x5de   : > { %2367 = vrot.lane.b32.xlu0 %v2359_v56, %s15158_s10 }
 0x5df   : > { %v11860_v4 = vpop.permute.xlu1 %2243  ;;  %v11864_v9 = vpop.permute.xlu0 %2247 }
 0x5e3   : > { %v11862_v14 = vpop.permute.xlu1 %2268  ;;  %v2398_v27 = vpop.permute.xlu0 %2397 }
 0x5e7   : > { %v2400_v12 = vpop.permute.xlu1 %2399  ;;  %v2422_v3 = vpop.permute.xlu0 %2421 }
 0x5e8   : > { %v2402_v63 = vsel %vm2249_vm15, %v2398_v27, %v2400_v12  ;;  %v2408_v20 = vadd.f32 %v2400_v12, %v2384_v46  ;;  %v2425_v7 = vsel %vm2274_vm1, %v2420_v33, %v2422_v3  ;;  %v15300_v46 = vld [vmem:[#allocation48_spill] sm:$0xff] }
 0x5e9   : > { %v2407_v24 = vadd.f32 %v2402_v63, %v2383_v59 }
 0x5eb   : > { %v2424_v43 = vpop.permute.xlu1 %2423 }
 0x5ec   : > { %v2426_v2 = vsel %vm2274_vm1, %v2422_v3, %v2424_v43  ;;  %v2432_v8 = vadd.f32 %v2424_v43, %v2408_v20  ;;  %v15298_v3 = vld [vmem:[#allocation46_spill] sm:$0xff] }
 0x5ed   : > { %v2431_v11 = vadd.f32 %v2426_v2, %v2407_v24 }
 0x5ee   : > { %v2454_v20 = vmul.f32 %v11656_v6, %v2432_v8 }
 0x5ef   : > { %v11866_v40 = vpop.permute.xlu1 %2272 }
 0x5f3   : > { %v2325_v28 = vpop.permute.xlu1 %2324 }
 0x5f4   : > { %v2328_v56 = vsel %vm2249_vm15, %v2323_v32, %v2325_v28  ;;  %v2329_v35 = vsel %vm2249_vm15, %v2325_v28, %v2327_v34  ;;  %v11877_v50 = vpop.permute.xlu0 %3729  ;;  %v2382_v28 = vmul.f32 %v2380_v18, %v11748_v44  ;;  %v2401_v34 = vsel %vm2249_vm15, %v2396_v29, %v2398_v27 }
 0x5f5   : > { %15294 = vst [vmem:[#allocation81_spill] sm:$0xff] %v11877_v50  ;;  %v2333_v47 = vadd.f32 %v2328_v56, %v2309_v45  ;;  %v2334_v32 = vadd.f32 %v2329_v35, %v2310_v19  ;;  %v11892_v19 = vsel %vm2447_vm2, %v11496_v37, %v11656_v6  ;;  %vm2502_vm2 = vcmask 908288  }
 0x5f6   : > { %v2406_v54 = vadd.f32 %v2401_v34, %v2382_v28  ;;  %15295 = vst [vmem:[#allocation82_spill] sm:$0xff] %v11892_v19  ;;  %v15301_v28 = vld [vmem:[#allocation47_spill] sm:$0xff] }
 0x5f7   : > { %v2349_v26 = vpop.permute.xlu1 %2348 }
 0x5f8   : > { %v2352_v15 = vsel %vm2274_vm1, %v2347_v49, %v2349_v26  ;;  %v2353_v61 = vsel %vm2274_vm1, %v2349_v26, %v2351_v42  ;;  %v11885_v59 = vpop.permute.xlu0 %2270  ;;  %v2430_v45 = vadd.f32 %v2425_v7, %v2406_v54  ;;  %v2453_v26 = vmul.f32 %v11892_v19, %v2431_v11  ;;  %v15299_v49 = vld [vmem:[#allocation45_spill] sm:$0xff]  ;;  %v15323_v19 = vld [vmem:[#allocation60_spill] sm:$0xff] }
 0x5f9   : > { %v2357_v21 = vadd.f32 %v2352_v15, %v2333_v47  ;;  %v2358_v50 = vadd.f32 %v2353_v61, %v2334_v32 }
 0x5fa   : > { %v2452_v2 = vmul.f32 %v11496_v37, %v2430_v45 }
 0x5fb   : > { %2363 = vrot.lane.b32.xlu0 %v2357_v21, %s15158_s10  ;;  %2365 = vrot.lane.b32.xlu1 %v2358_v50, %s15158_s10 }
 0x5ff   : > { %2462 = vrot.lane.b32.xlu0 %v2454_v20, %s15129_s11  ;;  %v11897_v47 = vpop.permute.xlu0 %3240  ;;  %2460 = vrot.lane.b32.xlu1 %v2453_v26, %s15129_s11 }
 0x600   : > { %3256 = vst.msk [vmem:[#allocation2 + $0x10] sm:$0xff] %vm1221_vm12, %v11897_v47 }
 0x603   : > { %2458 = vrot.lane.b32.xlu0 %v2452_v2, %s15129_s11 }
 0x604   : > { %v11904_v24 = vpop.permute.xlu1 %3965 }
 0x605   : > { %15296 = vst [vmem:[#allocation83_spill] sm:$0xff] %v11904_v24  ;;  %v15332_v24 = vld [vmem:[#allocation52_spill] sm:$0xff] }
 0x607   : > { %v11958_v8 = vld [vmem:[#allocation2 + $0x10] sm:$0xff] }
 0x608   : > { %v3545_v45 = vmul.f32 %v11508_v55, %v11958_v8  ;;  %v3748_v20 = vmul.f32 %v11687_v25, %v11958_v8 }
 0x609   : > { %v11906_v50 = vpop.permute.xlu1 %3422 }
 0x60e   : > { %v11908_v61 = vpop.permute.xlu1 %4217 }
 0x60f   : > { %15297 = vst [vmem:[#allocation84_spill] sm:$0xff] %v11908_v61 }
 0x612   : > { %v11910_v15 = vpop.permute.xlu1 %2245 }
 0x616   : > { %v11912_v12 = vpop.permute.xlu1 %3238 }
 0x617   : > { %3254 = vst.msk [vmem:[#allocation2] sm:$0xff] %vm2219_vm14, %v11912_v12 }
 0x61e   : > { %v11916_v54 = vld [vmem:[#allocation2] sm:$0xff] }
 0x61f   : > { %v3746_v18 = vmul.f32 %v11687_v25, %v11916_v54  ;;  %v3495_v7 = vmul.f32 %v11676_v13, %v11916_v54  ;;  %v3639_v21 = vmul.f32 %v11692_v0, %v11916_v54  ;;  %v3543_v11 = vmul.f32 %v11508_v55, %v11916_v54 }
 0x620   : > { %v4030_v35 = vmul.f32 %v15298_v3, %v11916_v54  ;;  %v3591_v27 = vmul.f32 %v11683_v36, %v11916_v54  ;;  %v3842_v43 = vmul.f32 %v11705_v5, %v11916_v54  ;;  %v3982_v29 = vmul.f32 %v15299_v49, %v11916_v54 }
 0x621   : > { %3758 = vrot.lane.b32.xlu0 %v3746_v18, %s15162_s2  ;;  %3507 = vrot.lane.b32.xlu1 %v3495_v7, %s15162_s2  ;;  %v4282_v33 = vmul.f32 %v11709_v16, %v11916_v54  ;;  %v3794_v42 = vmul.f32 %v11698_v17, %v11916_v54  ;;  %v4126_v63 = vmul.f32 %v15300_v46, %v11916_v54 }
 0x622   : > { %v4234_v56 = vmul.f32 %v11701_v51, %v11916_v54  ;;  %v4378_v32 = vmul.f32 %v11717_v1, %v11916_v54  ;;  %v4078_v34 = vmul.f32 %v15301_v28, %v11916_v54  ;;  %v3890_v26 = vmul.f32 %v11713_v52, %v11916_v54 }
 0x623   : > { %v4330_v2 = vmul.f32 %v11715_v53, %v11916_v54  ;;  %v3641_v18 = vmul.f32 %v11692_v0, %v11958_v8  ;;  %v3497_v7 = vmul.f32 %v11676_v13, %v11958_v8 }
 0x625   : > { %3651 = vrot.lane.b32.xlu0 %v3639_v21, %s10726_s23  ;;  %3555 = vrot.lane.b32.xlu1 %v3543_v11, %s15160_s0  ;;  %v4032_v21 = vmul.f32 %v15298_v3, %v11958_v8  ;;  %v3593_v11 = vmul.f32 %v11683_v36, %v11958_v8 }
 0x629   : > { %4042 = vrot.lane.b32.xlu0 %v4030_v35, %s15160_s0  ;;  %3603 = vrot.lane.b32.xlu1 %v3591_v27, %s10727_s28  ;;  %v3844_v35 = vmul.f32 %v11705_v5, %v11958_v8  ;;  %v3984_v27 = vmul.f32 %v15299_v49, %v11958_v8 }
 0x62d   : > { %3854 = vrot.lane.b32.xlu0 %v3842_v43, %s10727_s28  ;;  %3994 = vrot.lane.b32.xlu1 %v3982_v29, %s15162_s2  ;;  %v4284_v43 = vmul.f32 %v11709_v16, %v11958_v8  ;;  %v3796_v29 = vmul.f32 %v11698_v17, %v11958_v8 }
 0x631   : > { %4294 = vrot.lane.b32.xlu0 %v4282_v33, %s15160_s0  ;;  %3806 = vrot.lane.b32.xlu1 %v3794_v42, %s15160_s0  ;;  %v4128_v33 = vmul.f32 %v15300_v46, %v11958_v8  ;;  %v4236_v42 = vmul.f32 %v11701_v51, %v11958_v8 }
 0x635   : > { %4138 = vrot.lane.b32.xlu0 %v4126_v63, %s10726_s23  ;;  %4246 = vrot.lane.b32.xlu1 %v4234_v56, %s15162_s2  ;;  %v4380_v63 = vmul.f32 %v11717_v1, %v11958_v8  ;;  %v4080_v56 = vmul.f32 %v15301_v28, %v11958_v8 }
 0x639   : > { %4390 = vrot.lane.b32.xlu0 %v4378_v32, %s10726_s23  ;;  %4090 = vrot.lane.b32.xlu1 %v4078_v34, %s10727_s28  ;;  %v12011_v32 = vsel %vm1221_vm12, %v11912_v12, %v11897_v47  ;;  %v3892_v34 = vmul.f32 %v11713_v52, %v11958_v8 }
 0x63a   : > { %v3592_v47 = vmul.f32 %v11683_v36, %v12011_v32  ;;  %v3544_v12 = vmul.f32 %v11508_v55, %v12011_v32  ;;  %v2232_v36 = vmul.f32 %v11855_v62, %v11754_v48  ;;  %v3747_v55 = vmul.f32 %v11687_v25, %v12011_v32 }
 0x63b   : > { %v2276_v25 = vsel %vm2274_vm1, %v11885_v59, %v11866_v40 }
 0x63d   : > { %3559 = vrot.lane.b32.xlu0 %v3545_v45, %s15160_s0  ;;  %3902 = vrot.lane.b32.xlu1 %v3890_v26, %s10726_s23  ;;  %v3496_v45 = vmul.f32 %v11676_v13, %v12011_v32  ;;  %v4332_v26 = vmul.f32 %v11715_v53, %v11958_v8  ;;  %v3983_v13 = vmul.f32 %v15299_v49, %v12011_v32 }
 0x63e   : > { %v3795_v49 = vmul.f32 %v11698_v17, %v12011_v32 }
 0x641   : > { %3762 = vrot.lane.b32.xlu0 %v3748_v20, %s15162_s2  ;;  %4342 = vrot.lane.b32.xlu1 %v4330_v2, %s10727_s28  ;;  %v2251_v20 = vsel %vm2249_vm15, %v11910_v15, %v11864_v9  ;;  %v2231_v2 = vmul.f32 %v11855_v62, %v11778_v23  ;;  %v2250_v23 = vsel %vm2249_vm15, %v11860_v4, %v11910_v15  ;;  %v15302_v15 = vld [vmem:[#allocation44_spill] sm:$0xff] }
 0x642   : > { %v3640_v4 = vmul.f32 %v11692_v0, %v12011_v32 }
 0x645   : > { %3655 = vrot.lane.b32.xlu0 %v3641_v18, %s10726_s23  ;;  %3511 = vrot.lane.b32.xlu1 %v3497_v7, %s15162_s2  ;;  %v2256_v18 = vadd.f32 %v2251_v20, %v2231_v2  ;;  %v2257_v7 = vadd.f32 %v11864_v9, %v2232_v36 }
 0x647   : > { %v2282_v48 = vadd.f32 %v11866_v40, %v2257_v7  ;;  %v2281_v17 = vadd.f32 %v2276_v25, %v2256_v18 }
 0x649   : > { %4046 = vrot.lane.b32.xlu0 %v4032_v21, %s15160_s0  ;;  %3607 = vrot.lane.b32.xlu1 %v3593_v11, %s10727_s28  ;;  %v2230_v21 = vmul.f32 %v11855_v62, %v11748_v44  ;;  %v4235_v44 = vmul.f32 %v11701_v51, %v12011_v32 }
 0x64b   : > { %v2255_v9 = vadd.f32 %v2250_v23, %v2230_v21 }
 0x64d   : > { %3858 = vrot.lane.b32.xlu0 %v3844_v35, %s10727_s28  ;;  %3998 = vrot.lane.b32.xlu1 %v3984_v27, %s15162_s2  ;;  %v12064_v35 = vsel %vm2297_vm4, %v15302_v15, %v11662_v30  ;;  %v2275_v27 = vsel %vm2274_vm1, %v11862_v14, %v11885_v59  ;;  %vm4432_vm4 = vcmask 31744  }
 0x64e   : > { %15303 = vst [vmem:[#allocation46_spill] sm:$0xff] %v12064_v35  ;;  %v2280_v51 = vadd.f32 %v2275_v27, %v2255_v9  ;;  %v3380_v27 = vmul.f32 %v11743_v41, %v11916_v54 }
 0x650   : > { %v2368_v11 = vpop.permute.xlu0 %2367 }
 0x651   : > { %4298 = vrot.lane.b32.xlu0 %v4284_v43, %s15160_s0  ;;  %3810 = vrot.lane.b32.xlu1 %v3796_v29, %s15160_s0  ;;  %v2304_v43 = vmul.f32 %v11662_v30, %v2282_v48  ;;  %v2303_v29 = vmul.f32 %v12064_v35, %v2281_v17  ;;  %v4127_v48 = vmul.f32 %v15300_v46, %v12011_v32 }
 0x652   : > { %v3292_v46 = vmul.f32 %v11739_v57, %v11916_v54 }
 0x655   : > { %4142 = vrot.lane.b32.xlu0 %v4128_v33, %s10726_s23  ;;  %4250 = vrot.lane.b32.xlu1 %v4236_v42, %s15162_s2  ;;  %v4031_v33 = vmul.f32 %v15298_v3, %v12011_v32  ;;  %v4079_v42 = vmul.f32 %v15301_v28, %v12011_v32  ;;  %v3843_v3 = vmul.f32 %v11705_v5, %v12011_v32 }
 0x656   : > { %v3891_v28 = vmul.f32 %v11713_v52, %v12011_v32  ;;  %v4283_v5 = vmul.f32 %v11709_v16, %v12011_v32  ;;  %v4331_v52 = vmul.f32 %v11715_v53, %v12011_v32 }
 0x659   : > { %4394 = vrot.lane.b32.xlu0 %v4380_v63, %s10726_s23  ;;  %4094 = vrot.lane.b32.xlu1 %v4080_v56, %s10727_s28  ;;  %v2377_v63 = vadd.f32 %v2368_v11, %v2304_v43 }
 0x65d   : > { %3906 = vrot.lane.b32.xlu1 %v3892_v34, %s10726_s23  ;;  %3509 = vrot.lane.b32.xlu0 %v3496_v45, %s15162_s2 }
 0x661   : > { %4346 = vrot.lane.b32.xlu1 %v4332_v26, %s10727_s28  ;;  %3605 = vrot.lane.b32.xlu0 %v3592_v47, %s10727_s28  ;;  %v2302_v47 = vmul.f32 %v15302_v15, %v2280_v51  ;;  %v3382_v51 = vmul.f32 %v11743_v41, %v11958_v8 }
 0x665   : > { %3557 = vrot.lane.b32.xlu1 %v3544_v12, %s15160_s0  ;;  %3996 = vrot.lane.b32.xlu0 %v3983_v13, %s15162_s2 }
 0x669   : > { %3760 = vrot.lane.b32.xlu1 %v3747_v55, %s15162_s2  ;;  %3808 = vrot.lane.b32.xlu0 %v3795_v49, %s15160_s0 }
 0x66d   : > { %v2364_v62 = vpop.permute.xlu0 %2363  ;;  %3653 = vrot.lane.b32.xlu1 %v3640_v4, %s10726_s23  ;;  %4248 = vrot.lane.b32.xlu0 %v4235_v44, %s15162_s2  ;;  %v2366_v40 = vpop.permute.xlu1 %2365  ;;  %v12115_v4 = vld [vmem:[%s15209_s7] sm:$0xff]  ;;  %v3337_v44 = vmul.f32 %v11566_v31, %v12011_v32 }
 0x66e   : > { %v2371_v0 = vsel %vm2369_vm5, %v2366_v40, %v2368_v11  ;;  %v2370_v59 = vsel %vm2369_vm5, %v2364_v62, %v2366_v40  ;;  %v15304_v62 = vmov 0   ;;  %v3336_v40 = vmul.f32 %v11566_v31, %v11916_v54 }
 0x66f   : > { %v2376_v56 = vadd.f32 %v2371_v0, %v2303_v29  ;;  %v2375_v20 = vadd.f32 %v2370_v59, %v2302_v47  ;;  %v3338_v0 = vmul.f32 %v11566_v31, %v11958_v8 }
 0x671   : > { %v2463_v34 = vpop.permute.xlu0 %2462  ;;  %4044 = vrot.lane.b32.xlu1 %v4031_v33, %s15160_s0  ;;  %4092 = vrot.lane.b32.xlu0 %v4079_v42, %s10727_s28  ;;  %v2461_v14 = vpop.permute.xlu1 %2460  ;;  %v3381_v42 = vmul.f32 %v11743_v41, %v12011_v32  ;;  %v3427_v41 = vmul.f32 %v11831_v38, %v11958_v8 }
 0x672   : > { %v2472_v45 = vadd.f32 %v2463_v34, %v2377_v63  ;;  %v2466_v26 = vsel %vm2464_vm7, %v2461_v14, %v2463_v34  ;;  %v3426_v63 = vmul.f32 %v11831_v38, %v12011_v32  ;;  %v3425_v34 = vmul.f32 %v11831_v38, %v11916_v54 }
 0x673   : > { %v2471_v12 = vadd.f32 %v2466_v26, %v2376_v56  ;;  %v3483_v38 = vmul.f32 %v11741_v10, %v11958_v8 }
 0x674   : > { %v2479_v13 = vmul.f32 %v11665_v39, %v2472_v45 }
 0x675   : > { %v2459_v2 = vpop.permute.xlu0 %2458  ;;  %3856 = vrot.lane.b32.xlu1 %v3843_v3, %s10727_s28  ;;  %3904 = vrot.lane.b32.xlu0 %v3891_v28, %s10726_s23  ;;  %v2478_v55 = vmul.f32 %v11665_v39, %v2471_v12 }
 0x676   : > { %v2486_v36 = vadd.f32 %v11672_v22, %v2479_v13  ;;  %v2465_v18 = vsel %vm2464_vm7, %v2459_v2, %v2461_v14 }
 0x677   : > { %v2470_v49 = vadd.f32 %v2465_v18, %v2375_v20  ;;  %v2485_v25 = vadd.f32 %v11672_v22, %v2478_v55 }
 0x678   : > { %v2489_v7 = vmax.f32 %v2486_v36, 0.0 }
 0x679   : > { %v2477_v23 = vmul.f32 %v11665_v39, %v2470_v49  ;;  %4296 = vrot.lane.b32.xlu1 %v4283_v5, %s15160_s0  ;;  %4344 = vrot.lane.b32.xlu0 %v4331_v52, %s10727_s28  ;;  %v4379_v39 = vmul.f32 %v11717_v1, %v12011_v32  ;;  %v2488_v9 = vmax.f32 %v2485_v25, 0.0  ;;  %v3293_v1 = vmul.f32 %v11739_v57, %v12011_v32 }
 0x67a   : > { %v2492_v21 = vmin.f32 %v2489_v7, 6.0 }
 0x67b   : > { %v2484_v11 = vadd.f32 %v11672_v22, %v2477_v23  ;;  %v2491_v17 = vmin.f32 %v2488_v9, 6.0  ;;  %v3294_v22 = vmul.f32 %v11739_v57, %v11958_v8 }
 0x67d   : > { %v2487_v16 = vmax.f32 %v2484_v11, 0.0  ;;  %4140 = vrot.lane.b32.xlu1 %v4127_v48, %s10726_s23  ;;  %2500 = vrot.lane.b32.xlu0 %v2492_v21, %s15030_s18 }
 0x67f   : > { %v2490_v53 = vmin.f32 %v2487_v16, 6.0 }
 0x681   : > { %4392 = vrot.lane.b32.xlu1 %v4379_v39, %s10726_s23  ;;  %2496 = vrot.lane.b32.xlu0 %v2490_v53, %s15030_s18  ;;  %v3734_v53 = vmul.f32 %v11745_v60, %v11958_v8 }
 0x685   : > { %2498 = vrot.lane.b32.xlu1 %v2491_v17, %s15030_s18  ;;  %3304 = vrot.lane.b32.xlu0 %v3292_v46, %s15162_s2  ;;  %s15127_s18 = smov 125  }
 0x689   : > { %3266 = vperm.xlu1 %10461, %v12115_v4   ;;  %3308 = vrot.lane.b32.xlu0 %v3294_v22, %s15162_s2 }
 0x68d   : > { %3306 = vrot.lane.b32.xlu1 %v3293_v1, %s15162_s2  ;;  %3350 = vrot.lane.b32.xlu0 %v3337_v44, %s15160_s0 }
 0x68e   : > { %10462 = vset.pattern.permute.xlu1 %v15304_v62 }
 0x691   : > { %3348 = vrot.lane.b32.xlu1 %v3336_v40, %s15160_s0  ;;  %3392 = vrot.lane.b32.xlu0 %v3380_v27, %s10727_s28 }
 0x693   : > { %v12132_v57 = vpop.permute.xlu0 %3758  ;;  %v12134_v43 = vpop.permute.xlu1 %3507 }
 0x695   : > { %3352 = vrot.lane.b32.xlu1 %v3338_v0, %s15160_s0  ;;  %3396 = vrot.lane.b32.xlu0 %v3382_v51, %s10727_s28 }
 0x697   : > { %v12142_v29 = vpop.permute.xlu0 %3651  ;;  %v3556_v33 = vpop.permute.xlu1 %3555 }
 0x699   : > { %3394 = vrot.lane.b32.xlu1 %v3381_v42, %s10727_s28  ;;  %3439 = vrot.lane.b32.xlu0 %v3426_v63, %s10726_s23 }
 0x69b   : > { %v12150_v31 = vpop.permute.xlu0 %4042  ;;  %v12152_v56 = vpop.permute.xlu1 %3603 }
 0x69d   : > { %3437 = vrot.lane.b32.xlu1 %v3425_v34, %s10726_s23 }
 0x69f   : > { %v12157_v14 = vpop.permute.xlu0 %3854  ;;  %v12159_v59 = vpop.permute.xlu1 %3994 }
 0x6a1   : > { %3441 = vrot.lane.b32.xlu1 %v3427_v41, %s10726_s23 }
 0x6a3   : > { %v12164_v45 = vpop.permute.xlu0 %4294  ;;  %v12166_v26 = vpop.permute.xlu1 %3806 }
 0x6a7   : > { %v12168_v47 = vpop.permute.xlu0 %4138  ;;  %v12170_v12 = vpop.permute.xlu1 %4246 }
 0x6ab   : > { %v12172_v3 = vpop.permute.xlu0 %4390  ;;  %v12174_v28 = vpop.permute.xlu1 %4090 }
 0x6af   : > { %v3560_v13 = vpop.permute.xlu0 %3559  ;;  %v12176_v20 = vpop.permute.xlu1 %3902 }
 0x6b3   : > { %v3763_v2 = vpop.permute.xlu0 %3762  ;;  %v12178_v36 = vpop.permute.xlu1 %4342 }
 0x6b4   : > { %v3782_v46 = vadd.f32 %v3763_v2, %v3734_v53 }
 0x6b7   : > { %v12182_v18 = vpop.permute.xlu0 %3655  ;;  %v3512_v55 = vpop.permute.xlu1 %3511 }
 0x6b8   : > { %v3531_v49 = vadd.f32 %v3512_v55, %v3483_v38 }
 0x6ba   : > { %v3579_v5 = vadd.f32 %v3560_v13, %v3531_v49 }
 0x6bb   : > { %v12184_v52 = vpop.permute.xlu0 %4046  ;;  %v3608_v7 = vpop.permute.xlu1 %3607 }
 0x6bc   : > { %v3627_v23 = vadd.f32 %v3608_v7, %v3579_v5 }
 0x6be   : > { %v3675_v21 = vadd.f32 %v12182_v18, %v3627_v23 }
 0x6bf   : > { %v12187_v11 = vpop.permute.xlu0 %3858  ;;  %v12189_v48 = vpop.permute.xlu1 %3998 }
 0x6c0   : > { %v3690_v25 = vmul.f32 %v11835_v58, %v3675_v21  ;;  %v3481_v21 = vmul.f32 %v11741_v10, %v11916_v54 }
 0x6c2   : > { %3704 = vrot.lane.b32.xlu0 %v3690_v25, %s15158_s10  ;;  %v3482_v25 = vmul.f32 %v11741_v10, %v12011_v32  ;;  %v3733_v10 = vmul.f32 %v11745_v60, %v12011_v32 }
 0x6c3   : > { %v12193_v16 = vpop.permute.xlu0 %4298  ;;  %v3811_v39 = vpop.permute.xlu1 %3810 }
 0x6c4   : > { %v3830_v22 = vadd.f32 %v3811_v39, %v3782_v46 }
 0x6c6   : > { %v3878_v40 = vadd.f32 %v12187_v11, %v3830_v22 }
 0x6c7   : > { %v12197_v9 = vpop.permute.xlu0 %4142  ;;  %v12199_v17 = vpop.permute.xlu1 %4250 }
 0x6cb   : > { %v12201_v1 = vpop.permute.xlu0 %4394  ;;  %v12203_v44 = vpop.permute.xlu1 %4094 }
 0x6cf   : > { %v3510_v27 = vpop.permute.xlu0 %3509  ;;  %v3907_v0 = vpop.permute.xlu1 %3906 }
 0x6d0   : > { %v3926_v51 = vadd.f32 %v3907_v0, %v3878_v40  ;;  %v3519_v5 = vsel %vm2249_vm15, %v12134_v43, %v3510_v27  ;;  %v3520_v23 = vsel %vm2249_vm15, %v3510_v27, %v3512_v55  ;;  %v3732_v27 = vmul.f32 %v11745_v60, %v11916_v54 }
 0x6d1   : > { %v3530_v35 = vadd.f32 %v3520_v23, %v3482_v25 }
 0x6d2   : > { %3940 = vrot.lane.b32.xlu1 %v3926_v51, %s15129_s11  ;;  %v3529_v51 = vadd.f32 %v3519_v5, %v3481_v21  ;;  %v15305_v5 = vld [vmem:[#allocation70_spill] sm:$0xff] }
 0x6d3   : > { %v3606_v42 = vpop.permute.xlu0 %3605  ;;  %v12207_v63 = vpop.permute.xlu1 %4346  ;;  %v3968_v23 = vmul.f32 %v15305_v5, %v11916_v54 }
 0x6d7   : > { %v3997_v34 = vpop.permute.xlu0 %3996  ;;  %v3558_v41 = vpop.permute.xlu1 %3557 }
 0x6d8   : > { %v3567_v53 = vsel %vm2274_vm1, %v3556_v33, %v3558_v41  ;;  %v3568_v46 = vsel %vm2274_vm1, %v3558_v41, %v3560_v13  ;;  %v4006_v60 = vsel %vm2249_vm15, %v12159_v59, %v3997_v34 }
 0x6d9   : > { %v3577_v33 = vadd.f32 %v3567_v53, %v3529_v51  ;;  %v3578_v15 = vadd.f32 %v3568_v46, %v3530_v35  ;;  %v4007_v35 = vsel %vm2249_vm15, %v3997_v34, %v12189_v48 }
 0x6db   : > { %v3809_v38 = vpop.permute.xlu0 %3808  ;;  %v3761_v49 = vpop.permute.xlu1 %3760 }
 0x6dc   : > { %v3770_v43 = vsel %vm2249_vm15, %v12132_v57, %v3761_v49  ;;  %v3771_v55 = vsel %vm2249_vm15, %v3761_v49, %v3763_v2  ;;  %v3969_v57 = vmul.f32 %v15305_v5, %v12011_v32  ;;  %v3615_v2 = vsel %vm3404_vm8, %v12152_v56, %v3606_v42 }
 0x6dd   : > { %v3780_v13 = vadd.f32 %v3770_v43, %v3732_v27  ;;  %v3781_v41 = vadd.f32 %v3771_v55, %v3733_v10  ;;  %v3616_v49 = vsel %vm3404_vm8, %v3606_v42, %v3608_v7  ;;  %v3818_v21 = vsel %vm2274_vm1, %v12166_v26, %v3809_v38 }
 0x6de   : > { %v3819_v25 = vsel %vm2274_vm1, %v3809_v38, %v3811_v39  ;;  %v3625_v53 = vadd.f32 %v3615_v2, %v3577_v33  ;;  %v3626_v46 = vadd.f32 %v3616_v49, %v3578_v15  ;;  %v4017_v38 = vadd.f32 %v4007_v35, %v3969_v57 }
 0x6df   : > { %v12218_v22 = vpop.permute.xlu0 %4248  ;;  %v3654_v40 = vpop.permute.xlu1 %3653  ;;  %v3828_v42 = vadd.f32 %v3818_v21, %v3780_v13  ;;  %v3829_v43 = vadd.f32 %v3819_v25, %v3781_v41 }
 0x6e0   : > { %v3663_v51 = vsel %vm2523_vm11, %v12142_v29, %v3654_v40  ;;  %v3664_v56 = vsel %vm2523_vm11, %v3654_v40, %v12182_v18  ;;  %v4016_v29 = vadd.f32 %v4006_v60, %v3968_v23  ;;  %v15306_v23 = vld [vmem:[#allocation72_spill] sm:$0xff] }
 0x6e1   : > { %v3673_v40 = vadd.f32 %v3663_v51, %v3625_v53  ;;  %v3674_v27 = vadd.f32 %v3664_v56, %v3626_v46  ;;  %v12265_v57 = vsel %vm3683_vm10, %v15306_v23, %v11835_v58  ;;  %vm4199_vm10 = vcmask 1022976  }
 0x6e2   : > { %15307 = vst [vmem:[#allocation45_spill] sm:$0xff] %v12265_v57 }
 0x6e3   : > { %v4093_v30 = vpop.permute.xlu0 %4092  ;;  %v4045_v6 = vpop.permute.xlu1 %4044  ;;  %v3688_v49 = vmul.f32 %v15306_v23, %v3673_v40  ;;  %v3689_v60 = vmul.f32 %v12265_v57, %v3674_v27  ;;  %v15330_v57 = vld [vmem:[#allocation62_spill] sm:$0xff] }
 0x6e4   : > { %v4054_v34 = vsel %vm2274_vm1, %v12150_v31, %v4045_v6  ;;  %v4055_v26 = vsel %vm2274_vm1, %v4045_v6, %v12184_v52 }
 0x6e5   : > { %v4064_v33 = vadd.f32 %v4054_v34, %v4016_v29  ;;  %v4065_v13 = vadd.f32 %v4055_v26, %v4017_v38  ;;  %v15311_v34 = vld [vmem:[#allocation68_spill] sm:$0xff] }
 0x6e7   : > { %v3905_v7 = vpop.permute.xlu0 %3904  ;;  %v3857_v59 = vpop.permute.xlu1 %3856 }
 0x6e8   : > { %v3866_v39 = vsel %vm3404_vm8, %v12157_v14, %v3857_v59  ;;  %v3867_v15 = vsel %vm3404_vm8, %v3857_v59, %v12187_v11  ;;  %v3914_v10 = vsel %vm2523_vm11, %v12176_v20, %v3905_v7  ;;  %v3915_v31 = vsel %vm2523_vm11, %v3905_v7, %v3907_v0  ;;  %v3126_v11 = vpop.f32.mrf.mxu0 }
 0x6e9   : > { %v3876_v55 = vadd.f32 %v3866_v39, %v3828_v42  ;;  %v3877_v18 = vadd.f32 %v3867_v15, %v3829_v43  ;;  %v4102_v20 = vsel %vm3404_vm8, %v12174_v28, %v4093_v30  ;;  %v4103_v0 = vsel %vm3404_vm8, %v4093_v30, %v12203_v44  ;;  %v3221_v30 = vpop.f32.mrf.mxu1  ;;  %v15308_v42 = vld [vmem:[#allocation73_spill] sm:$0xff]  ;;  %v15309_v43 = vld [vmem:[#allocation74_spill] sm:$0xff] }
 0x6ea   : > { %v4112_v35 = vadd.f32 %v4102_v20, %v4064_v33  ;;  %v4113_v21 = vadd.f32 %v4103_v0, %v4065_v13  ;;  %v3128_v53 = vpop.f32.mrf.mxu0  ;;  %v12282_v59 = vsel %vm4170_vm13, %v15309_v43, %v15308_v42  ;;  %v3127_v26 = vadd.f32 %v3126_v11, %v15311_v34  ;;  %v15312_v39 = vld [vmem:[#allocation69_spill] sm:$0xff] }
 0x6eb   : > { %v3924_v6 = vadd.f32 %v3914_v10, %v3876_v55  ;;  %v3925_v41 = vadd.f32 %v3915_v31, %v3877_v18  ;;  %v12256_v2 = vpop.permute.xlu0 %4344  ;;  %v12258_v14 = vpop.permute.xlu1 %4296  ;;  %15310 = vst [vmem:[#allocation48_spill] sm:$0xff] %v12282_v59  ;;  %vm4461_vm13 = vcmask 1014784  }
 0x6ec   : > { %v3223_v55 = vpop.f32.mrf.mxu1  ;;  %v3222_v18 = vadd.f32 %v3221_v30, %v3127_v26 }
 0x6ed   : > { %3938 = vrot.lane.b32.xlu0 %v3925_v41, %s15129_s11  ;;  %3936 = vrot.lane.b32.xlu1 %v3924_v6, %s15129_s11 }
 0x6ef   : > { %v4141_v25 = vpop.permute.xlu1 %4140  ;;  %v2501_v56 = vpop.permute.xlu0 %2500 }
 0x6f0   : > { %v4150_v46 = vsel %vm2523_vm11, %v12168_v47, %v4141_v25  ;;  %v4151_v51 = vsel %vm2523_vm11, %v4141_v25, %v12197_v9  ;;  %v3129_v47 = vadd.f32 %v3128_v53, %v15312_v39 }
 0x6f1   : > { %v4160_v7 = vadd.f32 %v4150_v46, %v4112_v35  ;;  %v4161_v28 = vadd.f32 %v4151_v51, %v4113_v21  ;;  %3700 = vrot.lane.b32.xlu0 %v3688_v49, %s15158_s10  ;;  %3702 = vrot.lane.b32.xlu1 %v3689_v60, %s15158_s10 }
 0x6f2   : > { %v3224_v40 = vadd.f32 %v3223_v55, %v3129_v47 }
 0x6f3   : > { %v4175_v15 = vmul.f32 %v15309_v43, %v4160_v7  ;;  %v4176_v29 = vmul.f32 %v12282_v59, %v4161_v28  ;;  %v12288_v38 = vpop.permute.xlu1 %4392  ;;  %v2497_v27 = vpop.permute.xlu0 %2496  ;;  %v15324_v43 = vld [vmem:[#allocation58_spill] sm:$0xff] }
 0x6f4   : > { %v15326_v59 = vld [vmem:[#allocation50_spill] sm:$0xff] }
 0x6f5   : > { %4189 = vrot.lane.b32.xlu1 %v4176_v29, %s15127_s18  ;;  %4187 = vrot.lane.b32.xlu0 %v4175_v15, %s15127_s18 }
 0x6f7   : > { %v2499_v10 = vpop.permute.xlu1 %2498  ;;  %v12298_v11 = vpop.permute.xlu0 %3304 }
 0x6f8   : > { %v2503_v31 = vsel %vm2502_vm2, %v2497_v27, %v2499_v10  ;;  %v2504_v33 = vsel %vm2502_vm2, %v2499_v10, %v2501_v56  ;;  %v15322_v10 = vld [vmem:[#allocation49_spill] sm:$0xff] }
 0x6f9   : > { %v3228_v13 = vadd.f32 %v3222_v18, %v2503_v31  ;;  %v3229_v6 = vadd.f32 %v3224_v40, %v2504_v33  ;;  %v15321_v40 = vld [vmem:[#allocation59_spill] sm:$0xff] }
 0x6fb   : > { %3244 = vrot.lane.b32.xlu1 %v3229_v6, %s15108_s1  ;;  %3242 = vrot.lane.b32.xlu0 %v3228_v13, %s15108_s1  ;;  %v12302_v0 = vpop.permute.xlu0 %3308 }
 0x6ff   : > { %v12306_v60 = vpop.permute.xlu0 %3350 }
 0x703   : > { %v12310_v21 = vpop.permute.xlu0 %3392 }
 0x704   : > { %v12296_v41 = vpop.permute.xlu1 %3266 }
 0x707   : > { %v12314_v53 = vpop.permute.xlu0 %3396 }
 0x708   : > { %v12300_v20 = vpop.permute.xlu1 %3306 }
 0x70b   : > { %v12318_v51 = vpop.permute.xlu0 %3439 }
 0x70c   : > { %v12304_v49 = vpop.permute.xlu1 %3348 }
 0x710   : > { %v12308_v35 = vpop.permute.xlu1 %3352 }
 0x714   : > { %v12312_v25 = vpop.permute.xlu1 %3394 }
 0x718   : > { %v12316_v46 = vpop.permute.xlu1 %3437 }
 0x71c   : > { %v12320_v56 = vpop.permute.xlu1 %3441 }
 0x734   : > { %v12322_v7 = vpop.permute.xlu0 %3704 }
 0x735   : > { %15313 = vst [vmem:[#allocation47_spill] sm:$0xff] %v12322_v7 }
 0x744   : > { %v12324_v28 = vpop.permute.xlu1 %3940 }
 0x745   : > { %15314 = vst [vmem:[#allocation70_spill] sm:$0xff] %v12324_v28 }
 0x75f   : > { %v12326_v30 = vpop.permute.xlu0 %3938  ;;  %v12328_v34 = vpop.permute.xlu1 %3936 }
 0x760   : > { %15315 = vst [vmem:[#allocation73_spill] sm:$0xff] %v12326_v30  ;;  %15316 = vst [vmem:[#allocation68_spill] sm:$0xff] %v12328_v34 }
 0x763   : > { %v12330_v26 = vpop.permute.xlu0 %3700  ;;  %v12332_v39 = vpop.permute.xlu1 %3702 }
 0x764   : > { %15317 = vst [vmem:[#allocation69_spill] sm:$0xff] %v12330_v26  ;;  %15318 = vst [vmem:[#allocation85_spill] sm:$0xff] %v12332_v39  ;;  %v15334_v26 = vld [vmem:[#allocation65_spill] sm:$0xff] }
 0x767   : > { %v12334_v47 = vpop.permute.xlu0 %4187  ;;  %v12336_v15 = vpop.permute.xlu1 %4189 }
 0x768   : > { %15319 = vst [vmem:[#allocation86_spill] sm:$0xff] %v12334_v47  ;;  %15320 = vst [vmem:[#allocation87_spill] sm:$0xff] %v12336_v15  ;;  %v15328_v47 = vld [vmem:[#allocation61_spill] sm:$0xff] }
 0x76d   : > { %v3243_v29 = vpop.permute.xlu0 %3242  ;;  %v3245_v55 = vpop.permute.xlu1 %3244 }
 0x76e   : > { %3257 = vst.msk [vmem:[#allocation2 + $0x18] sm:$0xff] %vm2219_vm14, %v3243_v29 }
 0x76f   : > { %3259 = vst.msk [vmem:[#allocation2 + $0x28] sm:$0xff] %vm1221_vm12, %v3245_v55 }
 0x775   : > { %v12340_v18 = vld [vmem:[#allocation2 + $0x18] sm:$0xff] }
 0x776   : > { %v3594_v27 = vmul.f32 %v15321_v40, %v12340_v18  ;;  %v3498_v31 = vmul.f32 %v15322_v10, %v12340_v18  ;;  %v12346_v33 = vld [vmem:[#allocation2 + $0x28] sm:$0xff]  ;;  %v3985_v37 = vmul.f32 %v15323_v19, %v12340_v18  ;;  %v3546_v28 = vmul.f32 %v15324_v43, %v12340_v18 }
 0x777   : > { %v3596_v13 = vmul.f32 %v15321_v40, %v12346_v33  ;;  %v3500_v6 = vmul.f32 %v15322_v10, %v12346_v33  ;;  %v3749_v23 = vmul.f32 %v15326_v59, %v12340_v18  ;;  %v3642_v15 = vmul.f32 %v15328_v47, %v12340_v18 }
 0x778   : > { %3609 = vrot.lane.b32.xlu1 %v3594_v27, %s10727_s28  ;;  %3513 = vrot.lane.b32.xlu0 %v3498_v31, %s15162_s2  ;;  %v3987_v27 = vmul.f32 %v15323_v19, %v12346_v33  ;;  %v3548_v31 = vmul.f32 %v15324_v43, %v12346_v33  ;;  %v4033_v61 = vmul.f32 %v15330_v57, %v12340_v18 }
 0x779   : > { %v3845_v7 = vmul.f32 %v15332_v24, %v12340_v18  ;;  %v4285_v39 = vmul.f32 %v15334_v26, %v12340_v18 }
 0x77c   : > { %3613 = vrot.lane.b32.xlu1 %v3596_v13, %s10727_s28  ;;  %3517 = vrot.lane.b32.xlu0 %v3500_v6, %s15162_s2  ;;  %v15325_v13 = vld [vmem:[#allocation51_spill] sm:$0xff] }
 0x77d   : > { %v3797_v6 = vmul.f32 %v15325_v13, %v12340_v18 }
 0x780   : > { %4000 = vrot.lane.b32.xlu1 %v3985_v37, %s15162_s2  ;;  %3561 = vrot.lane.b32.xlu0 %v3546_v28, %s15160_s0  ;;  %v3799_v37 = vmul.f32 %v15325_v13, %v12346_v33  ;;  %v3751_v28 = vmul.f32 %v15326_v59, %v12346_v33 }
 0x784   : > { %4004 = vrot.lane.b32.xlu1 %v3987_v27, %s15162_s2  ;;  %3565 = vrot.lane.b32.xlu0 %v3548_v31, %s15160_s0  ;;  %v15327_v27 = vld [vmem:[#allocation63_spill] sm:$0xff] }
 0x785   : > { %v4237_v31 = vmul.f32 %v15327_v27, %v12340_v18 }
 0x788   : > { %3812 = vrot.lane.b32.xlu1 %v3797_v6, %s15160_s0  ;;  %3764 = vrot.lane.b32.xlu0 %v3749_v23, %s15162_s2  ;;  %v4239_v23 = vmul.f32 %v15327_v27, %v12346_v33  ;;  %v3644_v6 = vmul.f32 %v15328_v47, %v12346_v33 }
 0x78c   : > { %3816 = vrot.lane.b32.xlu1 %v3799_v37, %s15160_s0  ;;  %3768 = vrot.lane.b32.xlu0 %v3751_v28, %s15162_s2  ;;  %v15329_v37 = vld [vmem:[#allocation64_spill] sm:$0xff] }
 0x78d   : > { %v4081_v28 = vmul.f32 %v15329_v37, %v12340_v18 }
 0x790   : > { %4252 = vrot.lane.b32.xlu1 %v4237_v31, %s15162_s2  ;;  %3657 = vrot.lane.b32.xlu0 %v3642_v15, %s10726_s23  ;;  %v4083_v15 = vmul.f32 %v15329_v37, %v12346_v33  ;;  %v4035_v31 = vmul.f32 %v15330_v57, %v12346_v33 }
 0x794   : > { %4256 = vrot.lane.b32.xlu1 %v4239_v23, %s15162_s2  ;;  %3661 = vrot.lane.b32.xlu0 %v3644_v6, %s10726_s23  ;;  %v15331_v23 = vld [vmem:[#allocation53_spill] sm:$0xff] }
 0x795   : > { %v3893_v6 = vmul.f32 %v15331_v23, %v12340_v18 }
 0x798   : > { %4096 = vrot.lane.b32.xlu1 %v4081_v28, %s10727_s28  ;;  %4048 = vrot.lane.b32.xlu0 %v4033_v61, %s15160_s0  ;;  %v3895_v61 = vmul.f32 %v15331_v23, %v12346_v33  ;;  %v3847_v28 = vmul.f32 %v15332_v24, %v12346_v33 }
 0x79c   : > { %4100 = vrot.lane.b32.xlu1 %v4083_v15, %s10727_s28  ;;  %4052 = vrot.lane.b32.xlu0 %v4035_v31, %s15160_s0  ;;  %v15333_v15 = vld [vmem:[#allocation67_spill] sm:$0xff] }
 0x79d   : > { %v4333_v31 = vmul.f32 %v15333_v15, %v12340_v18 }
 0x7a0   : > { %3908 = vrot.lane.b32.xlu1 %v3893_v6, %s10726_s23  ;;  %3860 = vrot.lane.b32.xlu0 %v3845_v7, %s10727_s28  ;;  %v4335_v7 = vmul.f32 %v15333_v15, %v12346_v33  ;;  %v4287_v6 = vmul.f32 %v15334_v26, %v12346_v33 }
 0x7a4   : > { %3912 = vrot.lane.b32.xlu1 %v3895_v61, %s10726_s23  ;;  %3864 = vrot.lane.b32.xlu0 %v3847_v28, %s10727_s28  ;;  %v12427_v61 = vsel %vm1221_vm12, %v3243_v29, %v3245_v55  ;;  %v15335_v28 = vld [vmem:[#allocation66_spill] sm:$0xff] }
 0x7a5   : > { %v4129_v34 = vmul.f32 %v15335_v28, %v12340_v18  ;;  %v3547_v29 = vmul.f32 %v15324_v43, %v12427_v61  ;;  %v15336_v55 = vld [vmem:[#allocation54_spill] sm:$0xff]  ;;  %v3643_v43 = vmul.f32 %v15328_v47, %v12427_v61  ;;  %v3846_v47 = vmul.f32 %v15332_v24, %v12427_v61 }
 0x7a6   : > { %v3970_v24 = vmul.f32 %v15305_v5, %v11958_v8  ;;  %v4082_v5 = vmul.f32 %v15329_v37, %v12427_v61 }
 0x7a8   : > { %4348 = vrot.lane.b32.xlu1 %v4333_v31, %s10727_s28  ;;  %4300 = vrot.lane.b32.xlu0 %v4285_v39, %s15160_s0  ;;  %v3499_v31 = vmul.f32 %v15322_v10, %v12427_v61  ;;  %v4131_v39 = vmul.f32 %v15335_v28, %v12346_v33  ;;  %v3750_v10 = vmul.f32 %v15326_v59, %v12427_v61 }
 0x7a9   : > { %v4034_v59 = vmul.f32 %v15330_v57, %v12427_v61  ;;  %v4286_v57 = vmul.f32 %v15334_v26, %v12427_v61  ;;  %v4238_v26 = vmul.f32 %v15327_v27, %v12427_v61  ;;  %v4355_v27 = vsel %vm3404_vm8, %v12256_v2, %v12207_v63 }
 0x7ac   : > { %4352 = vrot.lane.b32.xlu1 %v4335_v7, %s10727_s28  ;;  %4304 = vrot.lane.b32.xlu0 %v4287_v6, %s15160_s0  ;;  %v4381_v7 = vmul.f32 %v15336_v55, %v12340_v18  ;;  %v3595_v6 = vmul.f32 %v15321_v40, %v12427_v61  ;;  %v3798_v40 = vmul.f32 %v15325_v13, %v12427_v61 }
 0x7ad   : > { %v4307_v13 = vsel %vm2274_vm1, %v12258_v14, %v12193_v16 }
 0x7b0   : > { %4144 = vrot.lane.b32.xlu0 %v4129_v34, %s10726_s23  ;;  %3515 = vrot.lane.b32.xlu1 %v3499_v31, %s15162_s2  ;;  %v4383_v34 = vmul.f32 %v15336_v55, %v12346_v33  ;;  %v3986_v31 = vmul.f32 %v15323_v19, %v12427_v61 }
 0x7b4   : > { %4148 = vrot.lane.b32.xlu0 %v4131_v39, %s10726_s23  ;;  %3563 = vrot.lane.b32.xlu1 %v3547_v29, %s15160_s0  ;;  %v4259_v39 = vsel %vm2249_vm15, %v12218_v22, %v12199_v17  ;;  %v15337_v29 = vld [vmem:[#allocation71_spill] sm:$0xff] }
 0x7b5   : > { %v4221_v19 = vmul.f32 %v15337_v29, %v12011_v32 }
 0x7b8   : > { %4396 = vrot.lane.b32.xlu0 %v4381_v7, %s10726_s23  ;;  %3766 = vrot.lane.b32.xlu1 %v3750_v10, %s15162_s2  ;;  %v4269_v7 = vadd.f32 %v4259_v39, %v4221_v19  ;;  %v4130_v10 = vmul.f32 %v15335_v28, %v12427_v61  ;;  %v4220_v28 = vmul.f32 %v15337_v29, %v11916_v54 }
 0x7b9   : > { %v3894_v54 = vmul.f32 %v15331_v23, %v12427_v61  ;;  %v4402_v19 = vsel %vm2523_vm11, %v12172_v3, %v12288_v38 }
 0x7bc   : > { %4400 = vrot.lane.b32.xlu0 %v4383_v34, %s10726_s23  ;;  %3659 = vrot.lane.b32.xlu1 %v3643_v43, %s10726_s23  ;;  %v4018_v34 = vadd.f32 %v12189_v48, %v3970_v24  ;;  %v4317_v43 = vadd.f32 %v4307_v13, %v4269_v7  ;;  %v4403_v48 = vsel %vm2523_vm11, %v12288_v38, %v12201_v1  ;;  %v15344_v38 = vld [vmem:[#allocation78_spill] sm:$0xff] }
 0x7c0   : > { %3611 = vrot.lane.b32.xlu0 %v3595_v6, %s10727_s28  ;;  %4050 = vrot.lane.b32.xlu1 %v4034_v59, %s15160_s0  ;;  %v4066_v6 = vadd.f32 %v12184_v52, %v4018_v34  ;;  %v4258_v59 = vsel %vm2249_vm15, %v12170_v12, %v12218_v22  ;;  %v4222_v12 = vmul.f32 %v15337_v29, %v11958_v8  ;;  %v15338_v8 = vld [vmem:[#allocation77_spill] sm:$0xff] }
 0x7c1   : > { %v4306_v22 = vsel %vm2274_vm1, %v12164_v45, %v12258_v14  ;;  %v4268_v37 = vadd.f32 %v4258_v59, %v4220_v28  ;;  %v15341_v45 = vmov 1  }
 0x7c2   : > { %v4114_v52 = vadd.f32 %v12203_v44, %v4066_v6  ;;  %v15339_v44 = vld [vmem:[#allocation75_spill] sm:$0xff]  ;;  %v15346_v6 = vmov 8  }
 0x7c3   : > { %v4316_v39 = vadd.f32 %v4306_v22, %v4268_v37  ;;  %v12522_v29 = vsel %vm4432_vm4, %v15339_v44, %v15338_v8 }
 0x7c4   : > { %4002 = vrot.lane.b32.xlu0 %v3986_v31, %s15162_s2  ;;  %3862 = vrot.lane.b32.xlu1 %v3846_v47, %s10727_s28  ;;  %v4365_v31 = vadd.f32 %v4355_v27, %v4317_v43  ;;  %15340 = vst [vmem:[#allocation59_spill] sm:$0xff] %v12522_v29  ;;  %v4162_v14 = vadd.f32 %v12197_v9, %v4114_v52 }
 0x7c6   : > { %v4413_v47 = vadd.f32 %v4403_v48, %v4365_v31  ;;  %v15347_v48 = vld [vmem:[#allocation80_spill] sm:$0xff]  ;;  %v3430_v31 = vmul.f32 %v11906_v50, %v12346_v33 }
 0x7c7   : > { %v3383_v28 = vmul.f32 %v15347_v48, %v12340_v18  ;;  %v3385_v22 = vmul.f32 %v15347_v48, %v12346_v33 }
 0x7c8   : > { %3814 = vrot.lane.b32.xlu0 %v3798_v40, %s15160_s0  ;;  %4302 = vrot.lane.b32.xlu1 %v4286_v57, %s15160_s0  ;;  %v4382_v40 = vmul.f32 %v15336_v55, %v12427_v61  ;;  %v4270_v57 = vadd.f32 %v12199_v17, %v4222_v12  ;;  %v4438_v23 = vmul.f32 %v12522_v29, %v4413_v47  ;;  %v15352_v29 = vld [vmem:[#allocation33_spill] sm:$0xff] }
 0x7c9   : > { %v4334_v55 = vmul.f32 %v15333_v15, %v12427_v61  ;;  %v4354_v17 = vsel %vm3404_vm8, %v12178_v36, %v12256_v2  ;;  %v4177_v15 = vmul.f32 %v15308_v42, %v4162_v14  ;;  %v3429_v14 = vmul.f32 %v11906_v50, %v12427_v61 }
 0x7ca   : > { %v4318_v24 = vadd.f32 %v12193_v16, %v4270_v57  ;;  %v4364_v13 = vadd.f32 %v4354_v17, %v4316_v39  ;;  %v15343_v16 = vld [vmem:[#allocation76_spill] sm:$0xff] }
 0x7cb   : > { %v3295_v2 = vmul.f32 %v15343_v16, %v12340_v18  ;;  %v3297_v43 = vmul.f32 %v15343_v16, %v12346_v33 }
 0x7cc   : > { %4254 = vrot.lane.b32.xlu0 %v4238_v26, %s15162_s2  ;;  %4146 = vrot.lane.b32.xlu1 %v4130_v10, %s10726_s23  ;;  %v4366_v9 = vadd.f32 %v12207_v63, %v4318_v24  ;;  %v4412_v7 = vadd.f32 %v4402_v19, %v4364_v13  ;;  %v3339_v26 = vmul.f32 %v15344_v38, %v12340_v18 }
 0x7ce   : > { %v4414_v36 = vadd.f32 %v12201_v1, %v4366_v9  ;;  %v4437_v3 = vmul.f32 %v15339_v44, %v4412_v7  ;;  %v12557_v1 = vld [vmem:[%s15209_s7 + $0x8] sm:$0xff]  ;;  %s15167_s7 = smov 116  }
 0x7cf   : > { %15345 = vst [vmem:[#allocation49_spill] sm:$0xff] %v12557_v1 }
 0x7d0   : > { %4098 = vrot.lane.b32.xlu0 %v4082_v5, %s10727_s28  ;;  %4475 = vperm.xlu1 %10462, %v12115_v4   ;;  %v4439_v63 = vmul.f32 %v15338_v8, %v4414_v36  ;;  %v3428_v5 = vmul.f32 %v11906_v50, %v12340_v18 }
 0x7d4   : > { %3910 = vrot.lane.b32.xlu0 %v3894_v54, %s10726_s23  ;;  %4398 = vrot.lane.b32.xlu1 %v4382_v40, %s10726_s23  ;;  %v3340_v54 = vmul.f32 %v15344_v38, %v12427_v61  ;;  %v3296_v40 = vmul.f32 %v15343_v16, %v12427_v61 }
 0x7d5   : > { %10463 = vset.pattern.permute.xlu1 %v15341_v45 }
 0x7d8   : > { %4350 = vrot.lane.b32.xlu0 %v4334_v55, %s10727_s28  ;;  %4451 = vrot.lane.b32.xlu1 %v4438_v23, %s15342_s26  ;;  %v3384_v23 = vmul.f32 %v15347_v48, %v12427_v61  ;;  %v15348_v55 = vld [vmem:[#allocation79_spill] sm:$0xff] }
 0x7d9   : > { %v3486_v17 = vmul.f32 %v15348_v55, %v12346_v33 }
 0x7dc   : > { %4191 = vrot.lane.b32.xlu0 %v4177_v15, %s15127_s18  ;;  %4487 = vperm.xlu1 %10463, %v12115_v4   ;;  %v3341_v4 = vmul.f32 %v15344_v38, %v12346_v33 }
 0x7e0   : > { %4449 = vrot.lane.b32.xlu0 %v4437_v3, %s15342_s26  ;;  %3310 = vrot.lane.b32.xlu1 %v3295_v2, %s15162_s2 }
 0x7e1   : > { %10465 = vset.pattern.permute.xlu1 %v15304_v62  ;;  %v10625_v62 = vld [vmem:[#allocation2] sm:$0xff] }
 0x7e4   : > { %4453 = vrot.lane.b32.xlu0 %v4439_v63, %s15342_s26  ;;  %3354 = vrot.lane.b32.xlu1 %v3339_v26, %s15160_s0 }
 0x7e8   : > { %3271 = vperm.xlu0 %10464, %v12557_v1   ;;  %3358 = vrot.lane.b32.xlu1 %v3341_v4, %s15160_s0 }
 0x7ea   : > { %v12561_v10 = vpop.permute.xlu0 %3513  ;;  %v12563_v34 = vpop.permute.xlu1 %3609 }
 0x7ec   : > { %3314 = vrot.lane.b32.xlu0 %v3297_v43, %s15162_s2  ;;  %3443 = vrot.lane.b32.xlu1 %v3428_v5, %s10726_s23  ;;  %v15349_v43 = vld [vmem:[#allocation81_spill] sm:$0xff] }
 0x7ed   : > { %10467 = vset.pattern.permute.xlu0 %v15346_v6  ;;  %v3737_v5 = vmul.f32 %v15349_v43, %v12346_v33  ;;  %v3275_v6 = vmul.f32 %v12296_v41, %v12011_v32  ;;  %v3405_v32 = vsel %vm3404_vm8, %v12310_v21, %v12312_v25 }
 0x7ee   : > { %v12572_v59 = vpop.permute.xlu0 %3517  ;;  %v12574_v27 = vpop.permute.xlu1 %3613 }
 0x7ef   : > { %v3534_v13 = vadd.f32 %v12572_v59, %v3486_v17 }
 0x7f0   : > { %3398 = vrot.lane.b32.xlu0 %v3383_v28, %s10727_s28  ;;  %3447 = vrot.lane.b32.xlu1 %v3430_v31, %s10726_s23 }
 0x7f2   : > { %v12582_v12 = vpop.permute.xlu0 %3561  ;;  %v12584_v52 = vpop.permute.xlu1 %4000 }
 0x7f4   : > { %3402 = vrot.lane.b32.xlu0 %v3385_v22, %s10727_s28  ;;  %4479 = vperm.xlu1 %10465, %v12557_v1   ;;  %v3360_v1 = vsel %vm2274_vm1, %v12304_v49, %v12306_v60 }
 0x7f6   : > { %v12590_v37 = vpop.permute.xlu0 %3565  ;;  %v12592_v47 = vpop.permute.xlu1 %4004 }
 0x7f7   : > { %v3582_v9 = vadd.f32 %v12590_v37, %v3534_v13 }
 0x7f8   : > { %3356 = vrot.lane.b32.xlu0 %v3340_v54, %s15160_s0  ;;  %3312 = vrot.lane.b32.xlu1 %v3296_v40, %s15162_s2 }
 0x7f9   : > { %10466 = vset.pattern.permute.xlu1 %v15341_v45  ;;  %v3630_v15 = vadd.f32 %v12574_v27, %v3582_v9  ;;  %v3274_v45 = vmul.f32 %v10625_v62, %v12296_v41  ;;  %v3406_v62 = vsel %vm3404_vm8, %v12312_v25, %v12314_v53 }
 0x7fa   : > { %v12601_v57 = vpop.permute.xlu0 %3764  ;;  %v12603_v39 = vpop.permute.xlu1 %3812 }
 0x7fc   : > { %3445 = vrot.lane.b32.xlu0 %v3429_v14, %s10726_s23  ;;  %3400 = vrot.lane.b32.xlu1 %v3384_v23, %s10727_s28  ;;  %s15381_s28 = sld [smem:[#allocation9_spill]]  ;;  %s10730_s23 = smov 93  }
 0x7fe   : > { %v12613_v19 = vpop.permute.xlu0 %3768  ;;  %v12615_v24 = vpop.permute.xlu1 %3816 }
 0x7ff   : > { %v3785_v48 = vadd.f32 %v12613_v19, %v3737_v5 }
 0x802   : > { %v12619_v7 = vpop.permute.xlu0 %3657  ;;  %v12621_v50 = vpop.permute.xlu1 %4252 }
 0x806   : > { %v12624_v36 = vpop.permute.xlu0 %3661  ;;  %v12626_v3 = vpop.permute.xlu1 %4256 }
 0x807   : > { %v3678_v16 = vadd.f32 %v12624_v36, %v3630_v15 }
 0x809   : > { %v3693_v2 = vmul.f32 %v11835_v58, %v3678_v16  ;;  %v3833_v58 = vadd.f32 %v12615_v24, %v3785_v48 }
 0x80a   : > { %v12630_v63 = vpop.permute.xlu0 %4048  ;;  %v12632_v38 = vpop.permute.xlu1 %4096 }
 0x80b   : > { %3710 = vrot.lane.b32.xlu0 %v3693_v2, %s15158_s10 }
 0x80e   : > { %v12635_v26 = vpop.permute.xlu0 %4052  ;;  %v12637_v4 = vpop.permute.xlu1 %4100 }
 0x812   : > { %v12642_v28 = vpop.permute.xlu0 %3860  ;;  %v12644_v31 = vpop.permute.xlu1 %3908 }
 0x816   : > { %v12647_v22 = vpop.permute.xlu0 %3864  ;;  %v12649_v54 = vpop.permute.xlu1 %3912 }
 0x817   : > { %v3881_v40 = vadd.f32 %v12647_v22, %v3833_v58 }
 0x819   : > { %v3929_v14 = vadd.f32 %v12649_v54, %v3881_v40  ;;  %v3316_v40 = vsel %vm2249_vm15, %v12298_v11, %v12300_v20  ;;  %v3361_v11 = vsel %vm2274_vm1, %v12306_v60, %v12308_v35  ;;  %v3449_v60 = vsel %vm2523_vm11, %v12316_v46, %v12318_v51 }
 0x81a   : > { %v12653_v23 = vpop.permute.xlu0 %4300  ;;  %v12655_v17 = vpop.permute.xlu1 %4348  ;;  %v3450_v35 = vsel %vm2523_vm11, %v12318_v51, %v12320_v56  ;;  %v15356_v51 = vld [vmem:[#allocation68_spill] sm:$0xff] }
 0x81b   : > { %3946 = vrot.lane.b32.xlu1 %v3929_v14, %s15129_s11  ;;  %v3317_v14 = vsel %vm2249_vm15, %v12300_v20, %v12302_v0  ;;  %v3324_v20 = vadd.f32 %v3316_v40, %v3274_v45  ;;  %v10626_v40 = vld [vmem:[%s10760_s17] sm:$0x1f]  ;;  %v12719_v56 = vsel %vm2464_vm7, %v15356_v51, %v12326_v30 }
 0x81c   : > { %v3325_v0 = vadd.f32 %v3317_v14, %v3275_v6 }
 0x81d   : > { %v3368_v41 = vadd.f32 %v3360_v1, %v3324_v20  ;;  %v10627_v1 = vld [vmem:[%s10760_s17 + $0x8] sm:$0x1f] }
 0x81e   : > { %v12658_v13 = vpop.permute.xlu0 %4304  ;;  %v12660_v9 = vpop.permute.xlu1 %4352  ;;  %v3369_v49 = vadd.f32 %v3361_v11, %v3325_v0 }
 0x81f   : > { %v3413_v45 = vadd.f32 %v3405_v32, %v3368_v41  ;;  %v15358_v41 = vld [vmem:[#allocation69_spill] sm:$0xff] }
 0x820   : > { %v3414_v21 = vadd.f32 %v3406_v62, %v3369_v49  ;;  %v15357_v62 = vld [vmem:[#allocation85_spill] sm:$0xff] }
 0x821   : > { %v3457_v53 = vadd.f32 %v3449_v60, %v3413_v45  ;;  %v3712_v49 = vsel %vm2369_vm5, %v15358_v41, %v15357_v62  ;;  %v15359_v60 = vld [vmem:[#allocation47_spill] sm:$0xff]  ;;  %v3485_v45 = vmul.f32 %v15348_v55, %v12427_v61  ;;  %v3735_v41 = vmul.f32 %v15349_v43, %v12340_v18 }
 0x822   : > { %v12662_v15 = vpop.permute.xlu0 %4144  ;;  %v3516_v16 = vpop.permute.xlu1 %3515  ;;  %v3458_v11 = vadd.f32 %v3450_v35, %v3414_v21  ;;  %v12727_v35 = vsel %vm2369_vm5, %v15357_v62, %v15359_v60  ;;  %v3736_v62 = vmul.f32 %v15349_v43, %v12427_v61 }
 0x823   : > { %v3521_v21 = vsel %vm2249_vm15, %v12561_v10, %v3516_v16  ;;  %v3522_v51 = vsel %vm2249_vm15, %v3516_v16, %v12572_v59 }
 0x824   : > { %v3533_v43 = vadd.f32 %v3522_v51, %v3485_v45 }
 0x826   : > { %v12664_v2 = vpop.permute.xlu0 %4148  ;;  %v3564_v5 = vpop.permute.xlu1 %3563 }
 0x827   : > { %v3569_v59 = vsel %vm2274_vm1, %v12582_v12, %v3564_v5  ;;  %v3570_v16 = vsel %vm2274_vm1, %v3564_v5, %v12590_v37 }
 0x828   : > { %v3581_v5 = vadd.f32 %v3570_v16, %v3533_v43 }
 0x82a   : > { %v12666_v48 = vpop.permute.xlu0 %4396  ;;  %v3767_v58 = vpop.permute.xlu1 %3766 }
 0x82b   : > { %15350 = vst [vmem:[#allocation60_spill] sm:$0xff] %v12666_v48  ;;  %v12694_v48 = vsub.s32 0, %v15352_v29  ;;  %v3772_v60 = vsel %vm2249_vm15, %v12601_v57, %v3767_v58  ;;  %v3773_v10 = vsel %vm2249_vm15, %v3767_v58, %v12613_v19 }
 0x82d   : > { %15353 = vst [vmem:[#allocation51_spill] sm:$0xff] %v12694_v48  ;;  %v12706_v25 = vrot.slane %v10626_v40, %v12694_v48  ;;  %v12710_v14 = vrot.slane %v10627_v1, %v12694_v48 }
 0x82e   : > { %v12677_v8 = vpop.permute.xlu0 %4400  ;;  %v12685_v44 = vpop.permute.xlu1 %3659 }
 0x82f   : > { %15351 = vst [vmem:[#allocation58_spill] sm:$0xff] %v12677_v8  ;;  %15354 = vst [vmem:[#allocation50_spill] sm:$0xff] %v12706_v25  ;;  %v3469_v46 = vmul.f32 %v12706_v25, %v3457_v53  ;;  %v12714_v0 = vmul.f32 %v12710_v14, %v3458_v11  ;;  %v15360_v53 = vld [vmem:[#allocation83_spill] sm:$0xff]  ;;  %v3484_v11 = vmul.f32 %v15348_v55, %v12340_v18 }
 0x830   : > { %15355 = vst [vmem:[#allocation63_spill] sm:$0xff] %v12710_v14  ;;  %v3973_v1 = vmul.f32 %v15360_v53, %v12346_v33  ;;  %v3972_v29 = vmul.f32 %v15360_v53, %v12427_v61 }
 0x831   : > { %v3532_v48 = vadd.f32 %v3521_v21, %v3484_v11  ;;  %v3783_v21 = vadd.f32 %v3772_v60, %v3735_v41  ;;  %v3784_v11 = vadd.f32 %v3773_v10, %v3736_v62  ;;  %v3720_v25 = vadd.f32 %v3712_v49, %v3469_v46  ;;  %v15361_v41 = vld [vmem:[#allocation84_spill] sm:$0xff] }
 0x832   : > { %v3612_v8 = vpop.permute.xlu0 %3611  ;;  %v12702_v6 = vpop.permute.xlu1 %4050  ;;  %v4021_v55 = vadd.f32 %v12592_v47, %v3973_v1  ;;  %v4225_v62 = vmul.f32 %v15361_v41, %v12346_v33 }
 0x833   : > { %v3618_v12 = vsel %vm3404_vm8, %v3612_v8, %v12574_v27  ;;  %v3580_v37 = vadd.f32 %v3569_v59, %v3532_v48  ;;  %v3617_v45 = vsel %vm3404_vm8, %v12563_v34, %v3612_v8  ;;  %v3971_v27 = vmul.f32 %v15360_v53, %v12340_v18 }
 0x834   : > { %v4069_v1 = vadd.f32 %v12635_v26, %v4021_v55  ;;  %v3629_v60 = vadd.f32 %v3618_v12, %v3581_v5  ;;  %v4224_v48 = vmul.f32 %v15361_v41, %v12427_v61  ;;  %v3666_v34 = vsel %vm2523_vm11, %v12685_v44, %v12624_v36 }
 0x836   : > { %v4003_v20 = vpop.permute.xlu0 %4002  ;;  %v3863_v40 = vpop.permute.xlu1 %3862  ;;  %v4117_v8 = vadd.f32 %v12637_v4, %v4069_v1 }
 0x837   : > { %v4009_v57 = vsel %vm2249_vm15, %v4003_v20, %v12592_v47  ;;  %v3868_v33 = vsel %vm3404_vm8, %v12642_v28, %v3863_v40  ;;  %v3869_v46 = vsel %vm3404_vm8, %v3863_v40, %v12647_v22 }
 0x838   : > { %v4020_v51 = vadd.f32 %v4009_v57, %v3972_v29  ;;  %v3628_v29 = vadd.f32 %v3617_v45, %v3580_v37  ;;  %v4165_v16 = vadd.f32 %v12664_v2, %v4117_v8 }
 0x83a   : > { %v3815_v32 = vpop.permute.xlu0 %3814  ;;  %v4303_v47 = vpop.permute.xlu1 %4302 }
 0x83b   : > { %v3820_v19 = vsel %vm2274_vm1, %v12603_v39, %v3815_v32  ;;  %v3821_v58 = vsel %vm2274_vm1, %v3815_v32, %v12615_v24  ;;  %v4008_v39 = vsel %vm2249_vm15, %v12584_v52, %v4003_v20  ;;  %v4057_v52 = vsel %vm2274_vm1, %v12702_v6, %v12635_v26 }
 0x83c   : > { %v3831_v30 = vadd.f32 %v3820_v19, %v3783_v21  ;;  %v3832_v24 = vadd.f32 %v3821_v58, %v3784_v11  ;;  %v4019_v20 = vadd.f32 %v4008_v39, %v3971_v27  ;;  %v4068_v10 = vadd.f32 %v4057_v52, %v4020_v51  ;;  %v15365_v27 = vld [vmem:[#allocation72_spill] sm:$0xff] }
 0x83d   : > { %v3677_v26 = vadd.f32 %v3666_v34, %v3629_v60  ;;  %v4223_v21 = vmul.f32 %v15361_v41, %v12340_v18  ;;  %v3721_v39 = vadd.f32 %v12727_v35, %v12714_v0  ;;  %v4308_v8 = vsel %vm2274_vm1, %v12653_v23, %v4303_v47  ;;  %v15367_v52 = vld [vmem:[#allocation48_spill] sm:$0xff] }
 0x83e   : > { %v4255_v14 = vpop.permute.xlu0 %4254  ;;  %v3879_v55 = vadd.f32 %v3868_v33, %v3831_v30  ;;  %v3880_v59 = vadd.f32 %v3869_v46, %v3832_v24  ;;  %v4147_v43 = vpop.permute.xlu1 %4146  ;;  %v4056_v30 = vsel %vm2274_vm1, %v12630_v63, %v12702_v6  ;;  %v4180_v63 = vmul.f32 %v15308_v42, %v4165_v16  ;;  %v15363_v24 = vld [vmem:[#allocation87_spill] sm:$0xff]  ;;  %v15368_v33 = vld [vmem:[#allocation60_spill] sm:$0xff] }
 0x83f   : > { %v4261_v53 = vsel %vm2249_vm15, %v4255_v14, %v12626_v3  ;;  %v4260_v58 = vsel %vm2249_vm15, %v12621_v50, %v4255_v14  ;;  %v4309_v50 = vsel %vm2274_vm1, %v4303_v47, %v12658_v13  ;;  %v4153_v6 = vsel %vm2523_vm11, %v4147_v43, %v12664_v2  ;;  %v15362_v14 = vld [vmem:[#allocation45_spill] sm:$0xff] }
 0x840   : > { %v4272_v1 = vadd.f32 %v4261_v53, %v4224_v48  ;;  %v3692_v11 = vmul.f32 %v15362_v14, %v3677_v26  ;;  %v4271_v12 = vadd.f32 %v4260_v58, %v4223_v21  ;;  %v3956_v42 = vadd.f32 %v12719_v56, %v3720_v25  ;;  %v15370_v53 = vld [vmem:[#allocation73_spill] sm:$0xff]  ;;  %v15373_v21 = vld [vmem:[#allocation75_spill] sm:$0xff] }
 0x841   : > { %v4273_v2 = vadd.f32 %v12626_v3, %v4225_v62  ;;  %v4152_v25 = vsel %vm2523_vm11, %v12662_v15, %v4147_v43  ;;  %v15366_v62 = vld [vmem:[#allocation58_spill] sm:$0xff] }
 0x842   : > { %v4099_v32 = vpop.permute.xlu0 %4098  ;;  %v4320_v51 = vadd.f32 %v4309_v50, %v4272_v1  ;;  %v4319_v3 = vadd.f32 %v4308_v8, %v4271_v12 }
 0x843   : > { %v4105_v49 = vsel %vm3404_vm8, %v4099_v32, %v12637_v4  ;;  %v3665_v4 = vsel %vm2523_vm11, %v12619_v7, %v12685_v44  ;;  %v4067_v44 = vadd.f32 %v4056_v30, %v4019_v20  ;;  %v4321_v23 = vadd.f32 %v12658_v13, %v4273_v2 }
 0x844   : > { %v4116_v40 = vadd.f32 %v4105_v49, %v4068_v10 }
 0x846   : > { %v3911_v36 = vpop.permute.xlu0 %3910  ;;  %v4164_v5 = vadd.f32 %v4153_v6, %v4116_v40  ;;  %v15374_v6 = vld [vmem:[#allocation49_spill] sm:$0xff] }
 0x847   : > { %v3916_v28 = vsel %vm2523_vm11, %v12644_v31, %v3911_v36  ;;  %v3917_v22 = vsel %vm2523_vm11, %v3911_v36, %v12649_v54  ;;  %v4104_v31 = vsel %vm3404_vm8, %v12632_v38, %v4099_v32  ;;  %v3676_v54 = vadd.f32 %v3665_v4, %v3628_v29  ;;  %v15364_v32 = vld [vmem:[#allocation86_spill] sm:$0xff] }
 0x848   : > { %v3927_v57 = vadd.f32 %v3916_v28, %v3879_v55  ;;  %v3928_v19 = vadd.f32 %v3917_v22, %v3880_v59  ;;  %v4115_v37 = vadd.f32 %v4104_v31, %v4067_v44  ;;  %v4200_v41 = vsel %vm4199_vm10, %v15364_v32, %v15363_v24  ;;  %v15371_v59 = vld [vmem:[#allocation59_spill] sm:$0xff]  ;;  %v15372_v22 = vld [vmem:[#allocation74_spill] sm:$0xff] }
 0x849   : > { %v3691_v48 = vmul.f32 %v15365_v27, %v3676_v54  ;;  %v4179_v20 = vmul.f32 %v15367_v52, %v4164_v5  ;;  %v4208_v36 = vadd.f32 %v4200_v41, %v3956_v42  ;;  %v15376_v5 = vmov 8  }
 0x84a   : > { %v4351_v7 = vpop.permute.xlu0 %4350  ;;  %3944 = vrot.lane.b32.xlu0 %v3928_v19, %s15129_s11  ;;  %3942 = vrot.lane.b32.xlu1 %v3927_v57, %s15129_s11  ;;  %v4163_v34 = vadd.f32 %v4152_v25, %v4115_v37  ;;  %v4369_v57 = vadd.f32 %v12660_v9, %v4321_v23  ;;  %s15421_s11 = smov 18  }
 0x84b   : > { %v4476_v38 = vpop.permute.xlu1 %4475  ;;  %v4357_v45 = vsel %vm3404_vm8, %v4351_v7, %v12660_v9  ;;  %v4356_v0 = vsel %vm3404_vm8, %v12655_v17, %v4351_v7  ;;  %v15369_v17 = vld [vmem:[#allocation70_spill] sm:$0xff]  ;;  %v15375_v9 = vld [vmem:[#allocation77_spill] sm:$0xff] }
 0x84c   : > { %v4368_v56 = vadd.f32 %v4357_v45, %v4320_v51  ;;  %v4367_v15 = vadd.f32 %v4356_v0, %v4319_v3  ;;  %v3949_v10 = vsel %vm2464_vm7, %v15370_v53, %v15369_v17  ;;  %v4178_v4 = vmul.f32 %v15372_v22, %v4163_v34 }
 0x84d   : > { %v3957_v43 = vadd.f32 %v3949_v10, %v3721_v39  ;;  %v4417_v54 = vadd.f32 %v15366_v62, %v4369_v57  ;;  %v15380_v57 = vld [vmem:[#allocation63_spill] sm:$0xff] }
 0x84e   : > { %v4192_v60 = vpop.permute.xlu0 %4191  ;;  %4197 = vrot.lane.b32.xlu0 %v4180_v63, %s15127_s18  ;;  %3708 = vrot.lane.b32.xlu1 %v3692_v11, %s15158_s10 }
 0x84f   : > { %v4399_v35 = vpop.permute.xlu1 %4398  ;;  %v4201_v55 = vsel %vm4199_vm10, %v15363_v24, %v4192_v60  ;;  %v4442_v14 = vmul.f32 %v15375_v9, %v4417_v54 }
 0x850   : > { %v4405_v29 = vsel %vm2523_vm11, %v4399_v35, %v15366_v62  ;;  %v4404_v46 = vsel %vm2523_vm11, %v15368_v33, %v4399_v35  ;;  %v4209_v19 = vadd.f32 %v4201_v55, %v3957_v43 }
 0x851   : > { %v4416_v49 = vadd.f32 %v4405_v29, %v4368_v56  ;;  %v4415_v28 = vadd.f32 %v4404_v46, %v4367_v15 }
 0x852   : > { %v4450_v47 = vpop.permute.xlu0 %4449  ;;  %3706 = vrot.lane.b32.xlu0 %v3691_v48, %s15158_s10  ;;  %4195 = vrot.lane.b32.xlu1 %v4179_v20, %s15127_s18 }
 0x853   : > { %v4441_v16 = vmul.f32 %v15371_v59, %v4416_v49  ;;  %v4452_v26 = vpop.permute.xlu1 %4451  ;;  %v4440_v44 = vmul.f32 %v15373_v21, %v4415_v28 }
 0x854   : > { %v4462_v13 = vsel %vm4461_vm13, %v4450_v47, %v4452_v26 }
 0x855   : > { %v4470_v40 = vadd.f32 %v4462_v13, %v4208_v36  ;;  %v15379_v13 = vld [vmem:[#allocation50_spill] sm:$0xff] }
 0x856   : > { %v4454_v30 = vpop.permute.xlu0 %4453  ;;  %4193 = vrot.lane.b32.xlu0 %v4178_v4, %s15127_s18  ;;  %4457 = vrot.lane.b32.xlu1 %v4441_v16, %s15342_s26  ;;  %s15420_s18 = sld [smem:[#allocation14_spill]] }
 0x857   : > { %v4463_v58 = vsel %vm4461_vm13, %v4452_v26, %v4454_v30  ;;  %v4482_v1 = vmul.f32 %v4476_v38, %v4470_v40  ;;  %v4488_v31 = vpop.permute.xlu1 %4487 }
 0x858   : > { %v4471_v7 = vadd.f32 %v4463_v58, %v4209_v19 }
 0x859   : > { %v4494_v63 = vadd.f32 %v4488_v31, %v4482_v1 }
 0x85a   : > { %v4483_v50 = vmul.f32 %v4476_v38, %v4471_v7  ;;  %4491 = vperm.xlu1 %10466, %v15374_v6   ;;  %4455 = vrot.lane.b32.xlu0 %v4440_v44, %s15342_s26 }
 0x85b   : > { %v4498_v12 = vmax.f32 %v4494_v63, 0.0  ;;  %v3311_v38 = vpop.permute.xlu1 %3310 }
 0x85c   : > { %v4495_v11 = vadd.f32 %v4488_v31, %v4483_v50 }
 0x85d   : > { %v12858_v45 = vmin.f32 %v4498_v12, 6.0 }
 0x85e   : > { %v4499_v37 = vmax.f32 %v4495_v11, 0.0  ;;  %4459 = vrot.lane.b32.xlu0 %v4442_v14, %s15342_s26  ;;  %10468 = vset.pattern.permute.xlu1 %v15376_v5  ;;  %v5200_v5 = vld [vmem:[%s15381_s28 + $0xa0] sm:$0xff] }
 0x85f   : > { %15377 = vst [vmem:[#allocation61_spill] sm:$0xff] %v12858_v45  ;;  %v3355_v42 = vpop.permute.xlu1 %3354 }
 0x860   : > { %v12860_v39 = vmin.f32 %v4499_v37, 6.0 }
 0x862   : > { %15378 = vst [vmem:[#allocation64_spill] sm:$0xff] %v12860_v39  ;;  %5064 = vrot.lane.b32.xlu1 %v12860_v39, %s15108_s1  ;;  %5062 = vrot.lane.b32.xlu0 %v12858_v45, %s15108_s1 }
 0x863   : > { %v3272_v51 = vpop.permute.xlu0 %3271  ;;  %v3359_v24 = vpop.permute.xlu1 %3358 }
 0x864   : > { %v3276_v56 = vmul.f32 %v12340_v18, %v3272_v51  ;;  %v3277_v34 = vmul.f32 %v3272_v51, %v12427_v61 }
 0x867   : > { %v3315_v32 = vpop.permute.xlu0 %3314  ;;  %v3444_v41 = vpop.permute.xlu1 %3443 }
 0x86b   : > { %v3399_v2 = vpop.permute.xlu0 %3398  ;;  %v3448_v60 = vpop.permute.xlu1 %3447 }
 0x86f   : > { %v3403_v27 = vpop.permute.xlu0 %3402  ;;  %v4480_v48 = vpop.permute.xlu1 %4479 }
 0x873   : > { %v3357_v8 = vpop.permute.xlu0 %3356  ;;  %v3313_v25 = vpop.permute.xlu1 %3312 }
 0x874   : > { %v3318_v0 = vsel %vm2249_vm15, %v3311_v38, %v3313_v25  ;;  %v3319_v35 = vsel %vm2249_vm15, %v3313_v25, %v3315_v32  ;;  %v3362_v20 = vsel %vm2274_vm1, %v3355_v42, %v3357_v8  ;;  %v3363_v23 = vsel %vm2274_vm1, %v3357_v8, %v3359_v24 }
 0x875   : > { %v3326_v3 = vadd.f32 %v3318_v0, %v3276_v56  ;;  %v3327_v52 = vadd.f32 %v3319_v35, %v3277_v34 }
 0x877   : > { %v3446_v62 = vpop.permute.xlu0 %3445  ;;  %v3401_v29 = vpop.permute.xlu1 %3400  ;;  %v3370_v33 = vadd.f32 %v3362_v20, %v3326_v3  ;;  %v3371_v47 = vadd.f32 %v3363_v23, %v3327_v52  ;;  %v5210_v52 = vld [vmem:[%s15381_s28 + $0xf0] sm:$0xff]  ;;  %v5209_v23 = vld [vmem:[%s15381_s28 + $0xe8] sm:$0xff] }
 0x878   : > { %v3407_v15 = vsel %vm3404_vm8, %v3399_v2, %v3401_v29  ;;  %v3408_v18 = vsel %vm3404_vm8, %v3401_v29, %v3403_v27  ;;  %v3451_v36 = vsel %vm2523_vm11, %v3444_v41, %v3446_v62  ;;  %v3452_v26 = vsel %vm2523_vm11, %v3446_v62, %v3448_v60  ;;  %v5211_v62 = vld [vmem:[%s15381_s28 + $0xf8] sm:$0xff] }
 0x879   : > { %v3415_v17 = vadd.f32 %v3407_v15, %v3370_v33  ;;  %v3416_v61 = vadd.f32 %v3408_v18, %v3371_v47  ;;  %v5195_v29 = vld [vmem:[%s15381_s28 + $0x78] sm:$0xff]  ;;  %v12912_v20 = vand.u32 4294901760, %v5211_v62  ;;  %v5193_v15 = vld [vmem:[%s15381_s28 + $0x68] sm:$0xff]  ;;  %v12923_v18 = vand.u32 4294901760, %v5209_v23 }
 0x87a   : > { %v12914_v33 = vand.u32 4294901760, %v5195_v29  ;;  %vm5108_vm8 = vcmask 760832  }
 0x87b   : > { %v3459_v55 = vadd.f32 %v3451_v36, %v3415_v17  ;;  %v3460_v43 = vadd.f32 %v3452_v26, %v3416_v61  ;;  %v12925_v17 = vand.u32 4294901760, %v5193_v15  ;;  %v12930_v61 = vsub.f32 %v5211_v62, %v12912_v20  ;;  %9700 = vmatprep.subr.mxu0 %v12912_v20 }
 0x87c   : > { %v12933_v36 = vsub.f32 %v5195_v29, %v12914_v33  ;;  %v12945_v26 = vsub.f32 %v5209_v23, %v12923_v18  ;;  %9701 = vmatpush3.msra.mxu0 %v12914_v33  ;;  %v5206_v23 = vld [vmem:[%s15381_s28 + $0xd0] sm:$0xff] }
 0x87d   : > { %v3711_v46 = vpop.permute.xlu0 %3710  ;;  %v3471_v22 = vmul.f32 %v15379_v13, %v3459_v55  ;;  %v3472_v19 = vmul.f32 %v15380_v57, %v3460_v43  ;;  %v12948_v43 = vsub.f32 %v5193_v15, %v12925_v17  ;;  %v15071_v13 = vand.u32 4294901760, %v12930_v61 }
 0x87e   : > { %v13020_v15 = vand.u32 4294901760, %v5206_v23 }
 0x88d   : > { %v3947_v49 = vpop.permute.xlu1 %3946 }
 0x8bc   : > { %v3945_v53 = vpop.permute.xlu0 %3944  ;;  %v3943_v10 = vpop.permute.xlu1 %3942 }
 0x8bd   : > { %v3950_v54 = vsel %vm2464_vm7, %v3943_v10, %v3945_v53  ;;  %v3951_v44 = vsel %vm2464_vm7, %v3945_v53, %v3947_v49  ;;  %v5194_v49 = vld [vmem:[%s15381_s28 + $0x70] sm:$0xff]  ;;  %v5208_v53 = vld [vmem:[%s15381_s28 + $0xe0] sm:$0xff] }
 0x8be   : > { %v12921_v47 = vand.u32 4294901760, %v5194_v49  ;;  %v5192_v10 = vld [vmem:[%s15381_s28 + $0x60] sm:$0xff] }
 0x8c0   : > { %v4198_v59 = vpop.permute.xlu0 %4197  ;;  %v3709_v16 = vpop.permute.xlu1 %3708 }
 0x8c1   : > { %v3715_v4 = vsel %vm2369_vm5, %v3709_v16, %v3711_v46  ;;  %v12916_v46 = vand.u32 4294901760, %v5210_v52 }
 0x8c2   : > { %v3723_v1 = vadd.f32 %v3715_v4, %v3472_v19  ;;  %v15064_v19 = vand.u32 4294901760, %v12945_v26 }
 0x8c3   : > { %v12936_v55 = vsub.f32 %v5210_v52, %v12916_v46  ;;  %9702 = vmatprep.subr.mxu0 %v12916_v46 }
 0x8c4   : > { %v3707_v28 = vpop.permute.xlu0 %3706  ;;  %v4196_v58 = vpop.permute.xlu1 %4195  ;;  %v3959_v63 = vadd.f32 %v3951_v44, %v3723_v1  ;;  %9703 = vmatpush3.msra.mxu0 %v12921_v47  ;;  %v5455_v1 = vsub.f32 %v12930_v61, %v15071_v13 }
 0x8c5   : > { %v3714_v40 = vsel %vm2369_vm5, %v3707_v28, %v3709_v16  ;;  %v4203_v9 = vsel %vm4199_vm10, %v4196_v58, %v4198_v59  ;;  %v12938_v59 = vand.u32 4294901760, %v5208_v53  ;;  %v12942_v16 = vsub.f32 %v5194_v49, %v12921_v47  ;;  %9704 = vmatprep.subr.mxu0 %v12923_v18 }
 0x8c6   : > { %v3722_v30 = vadd.f32 %v3714_v40, %v3471_v22  ;;  %v4211_v12 = vadd.f32 %v4203_v9, %v3959_v63  ;;  %v12950_v28 = vand.u32 4294901760, %v5192_v10  ;;  %v15070_v22 = vand.u32 4294901760, %v12933_v36  ;;  %v5191_v9 = vld [vmem:[%s15381_s28 + $0x58] sm:$0xff]  ;;  %9705 = vmatpush3.msra.mxu0 %v12925_v17 }
 0x8c7   : > { %v15067_v4 = vand.u32 4294901760, %v12936_v55  ;;  %v12957_v40 = vsub.f32 %v5208_v53, %v12938_v59  ;;  %v15066_v57 = vand.u32 4294901760, %v12942_v16  ;;  %9706 = vmatprep.subr.mxu0 %v12938_v59  ;;  %v5190_v53 = vld [vmem:[%s15381_s28 + $0x50] sm:$0xff] }
 0x8c8   : > { %v4194_v31 = vpop.permute.xlu0 %4193  ;;  %v3958_v21 = vadd.f32 %v3950_v54, %v3722_v30  ;;  %v4458_v50 = vpop.permute.xlu1 %4457  ;;  %v15063_v30 = vand.u32 4294901760, %v12948_v43  ;;  %9707 = vmatpush3.msra.mxu0 %v12950_v28 }
 0x8c9   : > { %v4202_v7 = vsel %vm4199_vm10, %v4194_v31, %v4196_v58  ;;  %v12964_v58 = vsub.f32 %v5192_v10, %v12950_v28  ;;  %v5343_v31 = vsub.f32 %v12933_v36, %v15070_v22  ;;  %v5462_v54 = vsub.f32 %v12936_v55, %v15067_v4 }
 0x8ca   : > { %v4210_v11 = vadd.f32 %v4202_v7, %v3958_v21  ;;  %v15061_v21 = vand.u32 4294901760, %v12957_v40  ;;  %v5350_v44 = vsub.f32 %v12942_v16, %v15066_v57  ;;  %v5469_v7 = vsub.f32 %v12945_v26, %v15064_v19 }
 0x8cb   : > { %v5357_v63 = vsub.f32 %v12948_v43, %v15063_v30  ;;  %v13023_v10 = vand.u32 4294901760, %v5190_v53  ;;  %vm5167_vm10 = vcmask 637952  }
 0x8cc   : > { %v4456_v6 = vpop.permute.xlu0 %4455 }
 0x8cd   : > { %v4464_v14 = vsel %vm4461_vm13, %v4456_v6, %v4458_v50  ;;  %v5207_v6 = vld [vmem:[%s15381_s28 + $0xd8] sm:$0xff] }
 0x8ce   : > { %v4472_v37 = vadd.f32 %v4464_v14, %v4210_v11  ;;  %v5456_v14 = vand.u32 4294901760, %v5455_v1  ;;  %v5344_v11 = vand.u32 4294901760, %v5343_v31  ;;  %v5205_v1 = vld [vmem:[%s15381_s28 + $0xc8] sm:$0xff]  ;;  %v13027_v31 = vsub.f32 %v5206_v23, %v13020_v15 }
 0x8d0   : > { %v4460_v38 = vpop.permute.xlu0 %4459  ;;  %v4484_v24 = vmul.f32 %v4480_v48, %v4472_v37  ;;  %v5476_v37 = vsub.f32 %v12957_v40, %v15061_v21  ;;  %9738 = vmatprep.subr.mxu1 %v5456_v14  ;;  %v5201_v21 = vld [vmem:[%s15381_s28 + $0xa8] sm:$0xff] }
 0x8d1   : > { %v4465_v42 = vsel %vm4461_vm13, %v4458_v50, %v4460_v38  ;;  %v15060_v50 = vand.u32 4294901760, %v12964_v58  ;;  %v5351_v38 = vand.u32 4294901760, %v5350_v44  ;;  %9739 = vmatpush3.msra.mxu1 %v5344_v11  ;;  %v5189_v44 = vld [vmem:[%s15381_s28 + $0x48] sm:$0xff]  ;;  %vm7106_vm13 = vcmask 1041408  }
 0x8d2   : > { %v4473_v51 = vadd.f32 %v4465_v42, %v4211_v12  ;;  %v5463_v12 = vand.u32 4294901760, %v5462_v54  ;;  %v13029_v54 = vand.u32 4294901760, %v5205_v1 }
 0x8d3   : > { %v5364_v42 = vsub.f32 %v12964_v58, %v15060_v50  ;;  %v5186_v50 = vld [vmem:[%s15381_s28 + $0x30] sm:$0xff] }
 0x8d4   : > { %v4485_v32 = vmul.f32 %v4480_v48, %v4473_v51  ;;  %v5063_v41 = vpop.permute.xlu0 %5062  ;;  %v5470_v51 = vand.u32 4294901760, %v5469_v7  ;;  %9740 = vmatprep.subr.mxu1 %v5463_v12  ;;  %v13034_v7 = vsub.f32 %v5190_v53, %v13023_v10  ;;  %v13042_v14 = vsub.f32 %v5205_v1, %v13029_v54  ;;  %v5188_v12 = vld [vmem:[%s15381_s28 + $0x40] sm:$0xff] }
 0x8d5   : > { %5078 = vst.msk [vmem:[#allocation2] sm:$0xff] %vm2219_vm14, %v5063_v41  ;;  %v4492_v2 = vpop.permute.xlu1 %4491  ;;  %9741 = vmatpush3.msra.mxu1 %v5351_v38 }
 0x8d6   : > { %v4496_v60 = vadd.f32 %v4492_v2, %v4484_v24  ;;  %v4497_v27 = vadd.f32 %v4492_v2, %v4485_v32  ;;  %v12999_v24 = vand.u32 4294901760, %v5207_v6  ;;  %v13001_v32 = vand.u32 4294901760, %v5191_v9  ;;  %9742 = vmatprep.subr.mxu1 %v5470_v51  ;;  %15384 = vst [vmem:[#allocation52_spill] sm:$0xff] %v13042_v14  ;;  %v5203_v51 = vld [vmem:[%s15381_s28 + $0xb8] sm:$0xff] }
 0x8d7   : > { %v5477_v2 = vand.u32 4294901760, %v5476_v37  ;;  %v15056_v37 = vand.u32 4294901760, %v13034_v7 }
 0x8d8   : > { %v4500_v8 = vmax.f32 %v4496_v60, 0.0  ;;  %v4501_v25 = vmax.f32 %v4497_v27, 0.0  ;;  %v13004_v60 = vsub.f32 %v5207_v6, %v12999_v24  ;;  %v13007_v27 = vsub.f32 %v5191_v9, %v13001_v32  ;;  %9708 = vmatprep.subr.mxu0 %v12999_v24  ;;  %v5204_v6 = vld [vmem:[%s15381_s28 + $0xc0] sm:$0xff] }
 0x8d9   : > { %v5065_v0 = vpop.permute.xlu1 %5064  ;;  %9709 = vmatpush3.msra.mxu0 %v13001_v32  ;;  %v15057_v9 = vand.u32 4294901760, %v13027_v31  ;;  %v13044_v11 = vand.u32 4294901760, %v5204_v6  ;;  %v5378_v53 = vsub.f32 %v13034_v7, %v15056_v37 }
 0x8da   : > { %v12887_v56 = vmin.f32 %v4500_v8, 6.0  ;;  %v12889_v35 = vmin.f32 %v4501_v25, 6.0  ;;  %5080 = vst.msk [vmem:[#allocation2 + $0x10] sm:$0xff] %vm1221_vm12, %v5065_v0  ;;  %v12897_v48 = vsel %vm1221_vm12, %v5063_v41, %v5065_v0  ;;  %v5358_v41 = vand.u32 4294901760, %v5357_v63  ;;  %9710 = vmatprep.subr.mxu0 %v13020_v15 }
 0x8db   : > { %v5365_v8 = vand.u32 4294901760, %v5364_v42  ;;  %v15059_v25 = vand.u32 4294901760, %v13004_v60  ;;  %v15058_v0 = vand.u32 4294901760, %v13007_v27  ;;  %v13036_v63 = vand.u32 4294901760, %v5189_v44  ;;  %9711 = vmatpush3.msra.mxu0 %v13023_v10 }
 0x8dc   : > { %15382 = vst [vmem:[#allocation62_spill] sm:$0xff] %v12887_v56  ;;  %15383 = vst [vmem:[#allocation53_spill] sm:$0xff] %v12889_v35  ;;  %5068 = vrot.lane.b32.xlu1 %v12889_v35, %s15108_s1  ;;  %5066 = vrot.lane.b32.xlu0 %v12887_v56, %s15108_s1  ;;  %v12905_v3 = vld [vmem:[#allocation2] sm:$0xff]  ;;  %v13052_v42 = vand.u32 4294901760, %v5188_v12  ;;  %s10731_s1 = smov 78  }
 0x8dd   : > { %9743 = vmatpush3.msra.mxu1 %v5358_v41  ;;  %v5483_v62 = vsub.f32 %v13004_v60, %v15059_v25  ;;  %v5371_v29 = vsub.f32 %v13007_v27, %v15058_v0  ;;  %9712 = vmatprep.subr.mxu0 %v13029_v54  ;;  %v13050_v38 = vsub.f32 %v5189_v44, %v13036_v63 }
 0x8de   : > { %9744 = vmatprep.subr.mxu1 %v5477_v2  ;;  %9713 = vmatpush3.msra.mxu0 %v13036_v63  ;;  %v13077_v44 = vsub.f32 %v5188_v12, %v13052_v42  ;;  %v5379_v12 = vand.u32 4294901760, %v5378_v53 }
 0x8df   : > { %9745 = vmatpush3.msra.mxu1 %v5365_v8  ;;  %v5484_v52 = vand.u32 4294901760, %v5483_v62  ;;  %v5372_v49 = vand.u32 4294901760, %v5371_v29  ;;  %15385 = vst [vmem:[#allocation67_spill] sm:$0xff] %v13050_v38  ;;  %v5490_v8 = vsub.f32 %v13027_v31, %v15057_v9  ;;  %v15062_v62 = vand.u32 4294901760, %v13042_v14  ;;  %9714 = vmatprep.subr.mxu0 %v13044_v11  ;;  %v5202_v9 = vld [vmem:[%s15381_s28 + $0xb0] sm:$0xff] }
 0x8e0   : > { %5123 = vrot.lane.b32.xlu0 %v12897_v48, %s15158_s10  ;;  %v13061_v29 = vsub.f32 %v5204_v6, %v13044_v11  ;;  %v15065_v1 = vand.u32 4294901760, %v13050_v38  ;;  %15387 = vst [vmem:[#allocation66_spill] sm:$0xff] %v13077_v44  ;;  %9715 = vmatpush3.msra.mxu0 %v13052_v42  ;;  %v15069_v25 = vand.u32 4294901760, %v13077_v44  ;;  %v13109_v4 = vand.u32 4294901760, %v5202_v9 }
 0x8e1   : > { %v12901_v34 = vld [vmem:[#allocation2 + $0x10] sm:$0xff]  ;;  %9746 = vmatprep.subr.mxu1 %v5484_v52  ;;  %v13063_v52 = vand.u32 4294901760, %v5203_v51  ;;  %v5491_v6 = vand.u32 4294901760, %v5490_v8 }
 0x8e2   : > { %5125 = vrot.lane.b32.xlu1 %v12901_v34, %s15158_s10  ;;  %9747 = vmatpush3.msra.mxu1 %v5372_v49  ;;  %15386 = vst [vmem:[#allocation65_spill] sm:$0xff] %v13061_v29  ;;  %v5187_v49 = vld [vmem:[%s15381_s28 + $0x38] sm:$0xff]  ;;  %v5385_v0 = vsub.f32 %v13050_v38, %v15065_v1  ;;  %v5392_v1 = vsub.f32 %v13077_v44, %v15069_v25  ;;  %v5185_v25 = vld [vmem:[%s15381_s28 + $0x28] sm:$0xff]  ;;  %v13162_v44 = vand.u32 4294901760, %v5200_v5 }
 0x8e3   : > { %v13087_v37 = vsub.f32 %v5203_v51, %v13063_v52  ;;  %9716 = vmatprep.subr.mxu0 %v13063_v52  ;;  %v13095_v8 = vand.u32 4294901760, %v5187_v49  ;;  %9748 = vmatprep.subr.mxu1 %v5491_v6  ;;  %v5183_v38 = vld [vmem:[%s15381_s28 + $0x18] sm:$0xff] }
 0x8e4   : > { %5121 = vrot.lane.b32.xlu0 %v12905_v3, %s15158_s10  ;;  %9749 = vmatpush3.msra.mxu1 %v5379_v12  ;;  %v5386_v19 = vand.u32 4294901760, %v5385_v0  ;;  %v13117_v12 = vand.u32 4294901760, %v5186_v50  ;;  %v5393_v22 = vand.u32 4294901760, %v5392_v1  ;;  %15396 = vst [vmem:[#allocation85_spill] sm:$0xff] %v13162_v44 }
 0x8e5   : > { %15388 = vst [vmem:[#allocation54_spill] sm:$0xff] %v13087_v37  ;;  %v15072_v53 = vand.u32 4294901760, %v13087_v37  ;;  %v13107_v57 = vsub.f32 %v5187_v49, %v13095_v8  ;;  %9717 = vmatpush3.msra.mxu0 %v13095_v8 }
 0x8e6   : > { %15390 = vst [vmem:[#allocation76_spill] sm:$0xff] %v13117_v12  ;;  %9718 = vmatprep.subr.mxu0 %v13109_v4  ;;  %v13139_v1 = vsub.f32 %v5186_v50, %v13117_v12  ;;  %v13155_v50 = vand.u32 4294901760, %v5185_v25 }
 0x8e7   : > { %15389 = vst [vmem:[#allocation71_spill] sm:$0xff] %v13107_v57  ;;  %v5511_v0 = vsub.f32 %v13087_v37, %v15072_v53  ;;  %v15085_v13 = vand.u32 4294901760, %v13107_v57  ;;  %9719 = vmatpush3.msra.mxu0 %v13117_v12 }
 0x8e8   : > { %15393 = vst [vmem:[#allocation79_spill] sm:$0xff] %v13139_v1  ;;  %15395 = vst [vmem:[#allocation68_spill] sm:$0xff] %v13155_v50 }
 0x8e9   : > { %v5512_v35 = vand.u32 4294901760, %v5511_v0  ;;  %v5184_v0 = vld [vmem:[%s15381_s28 + $0x20] sm:$0xff] }
 0x94e   : > { %v5067_v41 = vpop.permute.xlu0 %5066  ;;  %v5069_v2 = vpop.permute.xlu1 %5068 }
 0x94f   : > { %5081 = vst.msk [vmem:[#allocation2 + $0x18] sm:$0xff] %vm2219_vm14, %v5067_v41  ;;  %v13069_v23 = vsel %vm1221_vm12, %v5067_v41, %v5069_v2  ;;  %v5497_v41 = vsub.f32 %v13042_v14, %v15062_v62  ;;  %v5197_v14 = vld [vmem:[%s15381_s28 + $0x88] sm:$0xff] }
 0x950   : > { %5083 = vst.msk [vmem:[#allocation2 + $0x28] sm:$0xff] %vm1221_vm12, %v5069_v2  ;;  %5129 = vrot.lane.b32.xlu1 %v13069_v23, %s15158_s10  ;;  %v15068_v2 = vand.u32 4294901760, %v13061_v29 }
 0x951   : > { %v5498_v30 = vand.u32 4294901760, %v5497_v41 }
 0x952   : > { %v5124_v62 = vpop.permute.xlu0 %5123  ;;  %v5504_v51 = vsub.f32 %v13061_v29, %v15068_v2  ;;  %v13119_v2 = vand.u32 4294901760, %v5201_v21  ;;  %v5199_v29 = vld [vmem:[%s15381_s28 + $0x98] sm:$0xff] }
 0x953   : > { %9750 = vmatprep.subr.mxu1 %v5498_v30 }
 0x954   : > { %v13112_v6 = vpop.permute.xlu1 %5125  ;;  %v5505_v41 = vand.u32 4294901760, %v5504_v51  ;;  %15391 = vst [vmem:[#allocation78_spill] sm:$0xff] %v13119_v2  ;;  %9751 = vmatpush3.msra.mxu1 %v5386_v19  ;;  %v13136_v19 = vsub.f32 %v5202_v9, %v13109_v4  ;;  %v5399_v9 = vsub.f32 %v13107_v57, %v15085_v13  ;;  %9720 = vmatprep.subr.mxu0 %v13119_v2 }
 0x955   : > { %v13124_v49 = vsel %vm2369_vm5, %v5124_v62, %v13112_v6  ;;  %9721 = vmatpush3.msra.mxu0 %v13155_v50 }
 0x956   : > { %v5122_v53 = vpop.permute.xlu0 %5121  ;;  %v13133_v56 = vld [vmem:[#allocation2 + $0x18] sm:$0xff]  ;;  %9752 = vmatprep.subr.mxu1 %v5505_v41  ;;  %15392 = vst [vmem:[#allocation80_spill] sm:$0xff] %v13136_v19  ;;  %v13153_v41 = vsub.f32 %v5201_v21, %v13119_v2  ;;  %v5144_v37 = vmax.f32 %v12897_v48, %v13124_v49  ;;  %v5400_v13 = vand.u32 4294901760, %v5399_v9  ;;  %v13183_v9 = vand.u32 4294901760, %v5184_v0  ;;  %9722 = vmatprep.subr.mxu0 %v13162_v44  ;;  %v5198_v21 = vld [vmem:[%s15381_s28 + $0x90] sm:$0xff] }
 0x957   : > { %v13131_v51 = vld [vmem:[#allocation2 + $0x28] sm:$0xff]  ;;  %v13145_v30 = vsel %vm2369_vm5, %v5122_v53, %v5124_v62  ;;  %5127 = vrot.lane.b32.xlu1 %v13133_v56, %s15158_s10  ;;  %9753 = vmatpush3.msra.mxu1 %v5393_v22  ;;  %v15091_v62 = vand.u32 4294901760, %v13136_v19  ;;  %v15090_v53 = vand.u32 4294901760, %v13139_v1  ;;  %v13171_v22 = vsub.f32 %v5185_v25, %v13155_v50 }
 0x958   : > { %5131 = vrot.lane.b32.xlu0 %v13131_v51, %s15158_s10  ;;  %15394 = vst [vmem:[#allocation81_spill] sm:$0xff] %v13153_v41  ;;  %9754 = vmatprep.subr.mxu1 %v5512_v35  ;;  %v15102_v57 = vand.u32 4294901760, %v13153_v41  ;;  %v13181_v35 = vsub.f32 %v5200_v5, %v13162_v44  ;;  %15399 = vst [vmem:[#allocation83_spill] sm:$0xff] %v13183_v9  ;;  %v13194_v5 = vand.u32 4294901760, %v5199_v29  ;;  %s15531_s10 = smov 1  }
 0x959   : > { %15397 = vst [vmem:[#allocation69_spill] sm:$0xff] %v13171_v22  ;;  %v5518_v49 = vsub.f32 %v13136_v19, %v15091_v62  ;;  %v5406_v2 = vsub.f32 %v13139_v1, %v15090_v53  ;;  %v15107_v53 = vand.u32 4294901760, %v13171_v22  ;;  %v13196_v62 = vand.u32 4294901760, %v5183_v38  ;;  %v5182_v1 = vld [vmem:[%s15381_s28 + $0x10] sm:$0xff]  ;;  %9755 = vmatpush3.msra.mxu1 %v5400_v13  ;;  %9723 = vmatpush3.msra.mxu0 %v13183_v9 }
 0x95a   : > { %15398 = vst [vmem:[#allocation47_spill] sm:$0xff] %v13181_v35  ;;  %v5525_v25 = vsub.f32 %v13153_v41, %v15102_v57  ;;  %15400 = vst [vmem:[#allocation84_spill] sm:$0xff] %v13194_v5  ;;  %v13202_v50 = vsub.f32 %v5184_v0, %v13183_v9  ;;  %v13210_v12 = vsub.f32 %v5199_v29, %v13194_v5  ;;  %9724 = vmatprep.subr.mxu0 %v13194_v5  ;;  %v5196_v0 = vld [vmem:[%s15381_s28 + $0x80] sm:$0xff] }
 0x95b   : > { %5100 = vrot.lane.b32.xlu1 %v12901_v34, %s10730_s23  ;;  %15401 = vst [vmem:[#allocation45_spill] sm:$0xff] %v13196_v62  ;;  %v5519_v19 = vand.u32 4294901760, %v5518_v49  ;;  %v5407_v44 = vand.u32 4294901760, %v5406_v2  ;;  %v5413_v41 = vsub.f32 %v13171_v22, %v15107_v53  ;;  %v13213_v13 = vsub.f32 %v5183_v38, %v13196_v62  ;;  %v5181_v53 = vld [vmem:[%s15381_s28 + $0x8] sm:$0xff]  ;;  %9725 = vmatpush3.msra.mxu0 %v13196_v62 }
 0x95c   : > { %5098 = vrot.lane.b32.xlu0 %v12897_v48, %s10730_s23  ;;  %v15110_v48 = vand.u32 4294901760, %v13181_v35  ;;  %15402 = vst [vmem:[#allocation87_spill] sm:$0xff] %v13202_v50  ;;  %v5526_v57 = vand.u32 4294901760, %v5525_v25  ;;  %15403 = vst [vmem:[#allocation86_spill] sm:$0xff] %v13210_v12  ;;  %v13220_v49 = vand.u32 4294901760, %v5198_v21  ;;  %v13222_v25 = vand.u32 4294901760, %v5182_v1 }
 0x95d   : > { %15404 = vst [vmem:[#allocation72_spill] sm:$0xff] %v13213_v13  ;;  %9756 = vmatprep.subr.mxu1 %v5519_v19  ;;  %v5414_v38 = vand.u32 4294901760, %v5413_v41  ;;  %v15124_v29 = vand.u32 4294901760, %v13210_v12  ;;  %v15123_v19 = vand.u32 4294901760, %v13213_v13  ;;  %v15408_v22 = vand.u32 4294901760, %v13202_v50 }
 0x95e   : > { %v5532_v2 = vsub.f32 %v13181_v35, %v15110_v48  ;;  %15405 = vst [vmem:[#allocation58_spill] sm:$0xff] %v13220_v49  ;;  %15406 = vst [vmem:[#allocation48_spill] sm:$0xff] %v13222_v25  ;;  %v13231_v48 = vand.u32 4294901760, %v5197_v14  ;;  %9757 = vmatpush3.msra.mxu1 %v5407_v44  ;;  %v13238_v5 = vsub.f32 %v5198_v21, %v13220_v49  ;;  %9726 = vmatprep.subr.mxu0 %v13220_v49  ;;  %v5180_v21 = vld [vmem:[%s15381_s28] sm:$0xff] }
 0x95f   : > { %5157 = vrot.lane.b32.xlu1 %v5144_v37, %s10731_s1  ;;  %v5420_v62 = vsub.f32 %v13202_v50, %v15408_v22  ;;  %v13241_v37 = vsub.f32 %v5182_v1, %v13222_v25  ;;  %9758 = vmatprep.subr.mxu1 %v5526_v57  ;;  %v5539_v41 = vsub.f32 %v13210_v12, %v15124_v29  ;;  %v13253_v22 = vand.u32 4294901760, %v5181_v53 }
 0x960   : > { %5096 = vrot.lane.b32.xlu0 %v12905_v3, %s10730_s23  ;;  %15407 = vst [vmem:[#allocation60_spill] sm:$0xff] %v13231_v48  ;;  %v5533_v35 = vand.u32 4294901760, %v5532_v2  ;;  %15409 = vst [vmem:[#allocation70_spill] sm:$0xff] %v13238_v5  ;;  %v5427_v44 = vsub.f32 %v13213_v13, %v15123_v19  ;;  %v13251_v2 = vsub.f32 %v5197_v14, %v13231_v48  ;;  %9727 = vmatpush3.msra.mxu0 %v13222_v25 }
 0x961   : > { %15410 = vst [vmem:[#allocation73_spill] sm:$0xff] %v13241_v37  ;;  %15412 = vst [vmem:[#allocation74_spill] sm:$0xff] %v13253_v22  ;;  %9759 = vmatpush3.msra.mxu1 %v5414_v38  ;;  %v5421_v1 = vand.u32 4294901760, %v5420_v62  ;;  %v15135_v57 = vand.u32 4294901760, %v13238_v5  ;;  %v13259_v49 = vand.u32 4294901760, %v5196_v0  ;;  %9728 = vmatprep.subr.mxu0 %v13231_v48  ;;  %v15413_v14 = vmax.f32 %v12901_v34, %v13112_v6 }
 0x962   : > { %15411 = vst [vmem:[#allocation59_spill] sm:$0xff] %v13251_v2  ;;  %v15414_v19 = vmax.f32 %v12905_v3, %v13145_v30  ;;  %v5540_v38 = vand.u32 4294901760, %v5539_v41  ;;  %v5428_v62 = vand.u32 4294901760, %v5427_v44  ;;  %v15133_v29 = vand.u32 4294901760, %v13251_v2  ;;  %9760 = vmatprep.subr.mxu1 %v5533_v35  ;;  %9729 = vmatpush3.msra.mxu0 %v13253_v22 }
 0x963   : > { %v13272_v50 = vsub.f32 %v5181_v53, %v13253_v22  ;;  %v5546_v13 = vsub.f32 %v13238_v5, %v15135_v57  ;;  %v15416_v34 = vand.u32 4294901760, %v13241_v37  ;;  %v13283_v3 = vand.u32 4294901760, %v5180_v21  ;;  %9761 = vmatpush3.msra.mxu1 %v5421_v1  ;;  %9730 = vmatprep.subr.mxu0 %v13259_v49 }
 0x964   : > { %5159 = vrot.lane.b32.xlu0 %v15413_v14, %s10731_s1  ;;  %5155 = vrot.lane.b32.xlu1 %v15414_v19, %s10731_s1  ;;  %v13281_v14 = vsub.f32 %v5196_v0, %v13259_v49  ;;  %v5553_v30 = vsub.f32 %v13251_v2, %v15133_v29 }
 0x965   : > { %15415 = vst [vmem:[#allocation75_spill] sm:$0xff] %v13272_v50  ;;  %v5434_v6 = vsub.f32 %v13241_v37, %v15416_v34  ;;  %15418 = vst [vmem:[#allocation77_spill] sm:$0xff] %v13283_v3  ;;  %v15131_v53 = vand.u32 4294901760, %v13272_v50  ;;  %9762 = vmatprep.subr.mxu1 %v5540_v38  ;;  %v5547_v35 = vand.u32 4294901760, %v5546_v13  ;;  %v13293_v0 = vsub.f32 %v5180_v21, %v13283_v3 }
 0x966   : > { %15417 = vst [vmem:[#allocation49_spill] sm:$0xff] %v13281_v14  ;;  %v15132_v41 = vand.u32 4294901760, %v13281_v14  ;;  %9731 = vmatpush3.msra.mxu0 %v13283_v3  ;;  %9763 = vmatpush3.msra.mxu1 %v5428_v62  ;;  %v5554_v44 = vand.u32 4294901760, %v5553_v30  ;;  %v15423_v62 = vld [vmem:[#allocation55_spill] sm:$0xff]  ;;  %v13316_v30 = vld [vmem:[%s15420_s18] sm:$0xff] }
 0x967   : > { %v5435_v19 = vand.u32 4294901760, %v5434_v6  ;;  %15419 = vst [vmem:[#allocation50_spill] sm:$0xff] %v13293_v0  ;;  %v5441_v13 = vsub.f32 %v13272_v50, %v15131_v53  ;;  %v15134_v1 = vand.u32 4294901760, %v13293_v0  ;;  %9776 = vmatprep.subr.mxu0 %v12930_v61  ;;  %9764 = vmatprep.subr.mxu1 %v5547_v35  ;;  %v15422_v53 = vld [vmem:[#allocation40_spill] sm:$0xff]  ;;  %v15425_v35 = vmov 18  }
 0x968   : > { %5102 = vrot.lane.b32.xlu0 %v13133_v56, %s10730_s23  ;;  %5106 = vrot.lane.b32.xlu1 %v13131_v51, %s10730_s23  ;;  %v5560_v21 = vsub.f32 %v13281_v14, %v15132_v41  ;;  %v13319_v41 = vld [vmem:[%s15420_s18 + $0x8] sm:$0xff] }
 0x969   : > { %v5442_v38 = vand.u32 4294901760, %v5441_v13  ;;  %9765 = vmatpush3.msra.mxu1 %v5435_v19  ;;  %v5448_v6 = vsub.f32 %v13293_v0, %v15134_v1 }
 0x96a   : > { %v5561_v34 = vand.u32 4294901760, %v5560_v21  ;;  %9766 = vmatprep.subr.mxu1 %v5554_v44 }
 0x96b   : > { %v5449_v29 = vand.u32 4294901760, %v5448_v6  ;;  %9767 = vmatpush3.msra.mxu1 %v5442_v38 }
 0x96c   : > { %4506 = vrot.lane.b32.xlu0 %v15422_v53, %s15421_s11  ;;  %4508 = vrot.lane.b32.xlu1 %v15423_v62, %s15421_s11  ;;  %v15424_v53 = vmov 13  }
 0x96d   : > { %9768 = vmatprep.subr.mxu1 %v5561_v34 }
 0x96e   : > { %9769 = vmatpush3.msra.mxu1 %v5449_v29 }
 0x96f   : > { %9814 = vmatprep.subr.mxu1 %v12912_v20 }
 0x970   : > { %4625 = vperm.xlu0 %10467, %v13316_v30   ;;  %4629 = vperm.xlu1 %10468, %v13319_v41  }
 0x974   : > { %5104 = vrot.lane.b32.xlu0 %v13069_v23, %s10730_s23  ;;  %10469 = vset.pattern.permute.xlu1 %v15424_v53  ;;  %s10732_s23 = smov 104  }
 0x975   : > { %4645 = vperm.xlu1 %10469, %v13316_v30   ;;  %10470 = vset.pattern.permute.xlu0 %v15424_v53 }
 0x979   : > { %10471 = vset.pattern.permute.xlu1 %v15425_v35 }
 0x9c2   : > { %v5130_v19 = vpop.permute.xlu1 %5129 }
 0x9c9   : > { %v5128_v44 = vpop.permute.xlu1 %5127 }
 0x9ca   : > { %v5132_v13 = vpop.permute.xlu0 %5131  ;;  %v5135_v34 = vsel %vm2369_vm5, %v5128_v44, %v5130_v19 }
 0x9cb   : > { %v5148_v21 = vmax.f32 %v13131_v51, %v5132_v13  ;;  %v5136_v29 = vsel %vm2369_vm5, %v5130_v19, %v5132_v13  ;;  %v5146_v53 = vmax.f32 %v13133_v56, %v5135_v34 }
 0x9cc   : > { %v5147_v38 = vmax.f32 %v13069_v23, %v5136_v29 }
 0x9cd   : > { %5165 = vrot.lane.b32.xlu0 %v5148_v21, %s10731_s1  ;;  %v5101_v62 = vpop.permute.xlu1 %5100  ;;  %v15426_v21 = vmov 10  }
 0x9ce   : > { %v5099_v6 = vpop.permute.xlu0 %5098  ;;  %5163 = vrot.lane.b32.xlu1 %v5147_v38, %s10731_s1 }
 0x9cf   : > { %v5110_v23 = vsel %vm5108_vm8, %v5099_v6, %v5101_v62 }
 0x9d0   : > { %v5118_v44 = vmax.f32 %v12860_v39, %v5110_v23  ;;  %v15444_v39 = vld [vmem:[#allocation54_spill] sm:$0xff] }
 0x9d1   : > { %4649 = vperm.xlu0 %10470, %v13319_v41   ;;  %v5158_v51 = vpop.permute.xlu1 %5157 }
 0x9d2   : > { %v5097_v1 = vpop.permute.xlu0 %5096  ;;  %5161 = vrot.lane.b32.xlu1 %v5146_v53, %s10731_s1  ;;  %s15465_s1 = smov 120  }
 0x9d3   : > { %v5109_v13 = vsel %vm5108_vm8, %v5097_v1, %v5099_v6 }
 0x9d4   : > { %v5117_v19 = vmax.f32 %v12858_v45, %v5109_v13  ;;  %v15427_v13 = vmov 9   ;;  %v15443_v45 = vld [vmem:[#allocation66_spill] sm:$0xff] }
 0x9d5   : > { %10473 = vset.pattern.permute.xlu0 %v15426_v21 }
 0x9d6   : > { %4830 = vperm.xlu0 %10473, %v13316_v30   ;;  %v5160_v56 = vpop.permute.xlu0 %5159  ;;  %4665 = vperm.xlu1 %10471, %v13316_v30   ;;  %v5156_v29 = vpop.permute.xlu1 %5155 }
 0x9d7   : > { %v5169_v38 = vsel %vm5167_vm10, %v5158_v51, %v5160_v56  ;;  %v5168_v34 = vsel %vm5167_vm10, %v5156_v29, %v5158_v51 }
 0x9d8   : > { %v5177_v1 = vmax.f32 %v5118_v44, %v5169_v38  ;;  %v5176_v53 = vmax.f32 %v5117_v19, %v5168_v34  ;;  %v15429_v44 = vmov 14  }
 0x9da   : > { %v13348_v6 = vand.u32 4294901760, %v5177_v1  ;;  %4834 = vperm.xlu0 %10473, %v13319_v41   ;;  %v13351_v62 = vpop.permute.xlu0 %5102  ;;  %10472 = vset.pattern.permute.xlu1 %v15427_v13  ;;  %v13354_v23 = vand.u32 4294901760, %v5176_v53  ;;  %v13356_v57 = vpop.permute.xlu1 %5106 }
 0x9db   : > { %4730 = vperm.xlu1 %10472, %v13316_v30  }
 0x9dc   : > { %15428 = vst [vmem:[#allocation63_spill] sm:$0xff] %v13354_v23  ;;  %v13360_v56 = vsub.f32 %v5177_v1, %v13348_v6  ;;  %v13363_v51 = vsub.f32 %v5176_v53, %v13354_v23  ;;  %5564 = vmatprep.mubr.f32.mxu1 %v13348_v6 }
 0x9dd   : > { %5566 = vmatmul.mubr.f32.vlgmr.msra.gmra.mxu1 %v13354_v23  ;;  %v15446_v23 = vmov 19  }
 0x9de   : > { %v15136_v19 = vand.u32 4294901760, %v13363_v51  ;;  %10477 = vset.pattern.permute.xlu0 %v15429_v44  ;;  %v4507_v29 = vpop.permute.xlu0 %4506  ;;  %v4509_v38 = vpop.permute.xlu1 %4508  ;;  %v15137_v34 = vand.u32 4294901760, %v13360_v56  ;;  %9815 = vmatpush3.msra.mxu1 %v12914_v33 }
 0x9df   : > { %4512 = vst.msk [vmem:[#allocation3] sm:$0xff] %vm1503_vm9, %v4507_v29  ;;  %4750 = vperm.xlu0 %10477, %v13316_v30   ;;  %10474 = vset.pattern.permute.xlu1 %v15425_v35  ;;  %4513 = vst.msk [vmem:[#allocation3 + $0x8] sm:$0xff] %vm1503_vm9, %v4509_v38  ;;  %v15430_v35 = vmov 23   ;;  %v15431_v38 = vmov 11  }
 0x9e0   : > { %v5317_v1 = vsub.f32 %v13363_v51, %v15136_v19  ;;  %4669 = vperm.xlu1 %10474, %v13319_v41   ;;  %v5311_v53 = vsub.f32 %v13360_v56, %v15137_v34  ;;  %9816 = vmatprep.subr.mxu1 %v12916_v46  ;;  %v15439_v19 = vld [vmem:[#allocation68_spill] sm:$0xff]  ;;  %v15441_v34 = vld [vmem:[#allocation85_spill] sm:$0xff] }
 0x9e1   : > { %9817 = vmatpush3.msra.mxu1 %v12921_v47 }
 0x9e2   : > { %v5318_v29 = vand.u32 4294901760, %v5317_v1  ;;  %v5312_v21 = vand.u32 4294901760, %v5311_v53  ;;  %9818 = vmatprep.subr.mxu1 %v12923_v18  ;;  %v15433_v1 = vmov 15   ;;  %v15434_v53 = vmov 25  }
 0x9e3   : > { %10480 = vset.pattern.permute.xlu0 %v15430_v35  ;;  %9819 = vmatpush3.msra.mxu1 %v12925_v17 }
 0x9e4   : > { %4689 = vperm.xlu0 %10480, %v13319_v41   ;;  %10475 = vset.pattern.permute.xlu1 %v15427_v13  ;;  %v15445_v13 = vld [vmem:[#allocation84_spill] sm:$0xff] }
 0x9e5   : > { %5313 = vmatprep.mubr.f32.mxu0 %v5312_v21  ;;  %4734 = vperm.xlu1 %10475, %v13319_v41   ;;  %v15432_v21 = vmov 16  }
 0x9e6   : > { %5319 = vmatmul.mubr.f32.vlgmr.msra.gmra.mxu0 %v5318_v29  ;;  %9820 = vmatprep.subr.mxu1 %v12938_v59  ;;  %v15435_v29 = vld [vmem:[#allocation76_spill] sm:$0xff] }
 0x9e7   : > { %9821 = vmatpush3.msra.mxu1 %v12950_v28  ;;  %9777 = vmatpush3.msra.mxu0 %v12933_v36 }
 0x9e8   : > { %10483 = vset.pattern.permute.xlu0 %v15431_v38  ;;  %9822 = vmatprep.subr.mxu1 %v12999_v24 }
 0x9e9   : > { %4939 = vperm.xlu0 %10483, %v13319_v41   ;;  %10476 = vset.pattern.permute.xlu1 %v15430_v35  ;;  %v15436_v35 = vld [vmem:[#allocation52_spill] sm:$0xff] }
 0x9ea   : > { %4685 = vperm.xlu1 %10476, %v13316_v30   ;;  %9823 = vmatpush3.msra.mxu1 %v13001_v32 }
 0x9eb   : > { %9778 = vmatprep.subr.mxu0 %v12936_v55  ;;  %9824 = vmatprep.subr.mxu1 %v13020_v15 }
 0x9ec   : > { %9779 = vmatpush3.msra.mxu0 %v12942_v16  ;;  %9825 = vmatpush3.msra.mxu1 %v13023_v10 }
 0x9ed   : > { %10486 = vset.pattern.permute.xlu0 %v15432_v21  ;;  %9780 = vmatprep.subr.mxu0 %v12945_v26  ;;  %v15437_v21 = vld [vmem:[#allocation78_spill] sm:$0xff] }
 0x9ee   : > { %4955 = vperm.xlu0 %10486, %v13316_v30   ;;  %10478 = vset.pattern.permute.xlu1 %v15433_v1 }
 0x9ef   : > { %4850 = vperm.xlu1 %10478, %v13316_v30   ;;  %9826 = vmatprep.subr.mxu1 %v13029_v54 }
 0x9f0   : > { %9781 = vmatpush3.msra.mxu0 %v12948_v43  ;;  %9827 = vmatpush3.msra.mxu1 %v13036_v63 }
 0x9f1   : > { %9782 = vmatprep.subr.mxu0 %v12957_v40  ;;  %9828 = vmatprep.subr.mxu1 %v13044_v11 }
 0x9f2   : > { %4959 = vperm.xlu0 %10486, %v13319_v41   ;;  %9783 = vmatpush3.msra.mxu0 %v12964_v58 }
 0x9f3   : > { %10479 = vset.pattern.permute.xlu1 %v15431_v38  ;;  %9829 = vmatpush3.msra.mxu1 %v13052_v42  ;;  %v15442_v38 = vmov 26  }
 0x9f4   : > { %4935 = vperm.xlu1 %10479, %v13316_v30   ;;  %9784 = vmatprep.subr.mxu0 %v13004_v60 }
 0x9f5   : > { %9830 = vmatprep.subr.mxu1 %v13063_v52  ;;  %9785 = vmatpush3.msra.mxu0 %v13007_v27 }
 0x9f6   : > { %10490 = vset.pattern.permute.xlu0 %v15434_v53  ;;  %9831 = vmatpush3.msra.mxu1 %v13095_v8  ;;  %v15438_v53 = vld [vmem:[#allocation67_spill] sm:$0xff] }
 0x9f7   : > { %4890 = vperm.xlu0 %10490, %v13316_v30   ;;  %9786 = vmatprep.subr.mxu0 %v13027_v31 }
 0x9f8   : > { %10481 = vset.pattern.permute.xlu1 %v15429_v44  ;;  %9832 = vmatprep.subr.mxu1 %v13109_v4  ;;  %v15440_v44 = vld [vmem:[#allocation65_spill] sm:$0xff] }
 0x9f9   : > { %4754 = vperm.xlu1 %10481, %v13319_v41   ;;  %9787 = vmatpush3.msra.mxu0 %v13034_v7 }
 0x9fa   : > { %9833 = vmatpush3.msra.mxu1 %v15435_v29  ;;  %9788 = vmatprep.subr.mxu0 %v15436_v35 }
 0x9fb   : > { %4894 = vperm.xlu0 %10490, %v13319_v41   ;;  %9834 = vmatprep.subr.mxu1 %v15437_v21 }
 0x9fc   : > { %9789 = vmatpush3.msra.mxu0 %v15438_v53  ;;  %9835 = vmatpush3.msra.mxu1 %v15439_v19  ;;  %v15450_v19 = vld [vmem:[#allocation80_spill] sm:$0xff] }
 0x9fd   : > { %10482 = vset.pattern.permute.xlu1 %v15433_v1  ;;  %9790 = vmatprep.subr.mxu0 %v15440_v44  ;;  %v15447_v1 = vld [vmem:[#allocation71_spill] sm:$0xff]  ;;  %v15448_v44 = vld [vmem:[#allocation45_spill] sm:$0xff] }
 0x9fe   : > { %4854 = vperm.xlu1 %10482, %v13319_v41   ;;  %9836 = vmatprep.subr.mxu1 %v15441_v34  ;;  %v15449_v34 = vmov 3  }
 0x9ff   : > { %10494 = vset.pattern.permute.xlu0 %v15442_v38  ;;  %9791 = vmatpush3.msra.mxu0 %v15443_v45  ;;  %v15451_v45 = vld [vmem:[#allocation58_spill] sm:$0xff] }
 0xa00   : > { %4995 = vperm.xlu0 %10494, %v13316_v30   ;;  %9837 = vmatpush3.msra.mxu1 %v13183_v9  ;;  %v15452_v9 = vld [vmem:[#allocation79_spill] sm:$0xff] }
 0xa01   : > { %9792 = vmatprep.subr.mxu0 %v15444_v39  ;;  %9838 = vmatprep.subr.mxu1 %v15445_v13  ;;  %v15453_v13 = vmov 20   ;;  %v15454_v39 = vld [vmem:[#allocation81_spill] sm:$0xff] }
 0xa02   : > { %10484 = vset.pattern.permute.xlu1 %v15446_v23  ;;  %9793 = vmatpush3.msra.mxu0 %v15447_v1  ;;  %v15456_v1 = vld [vmem:[#allocation69_spill] sm:$0xff] }
 0xa03   : > { %4770 = vperm.xlu1 %10484, %v13316_v30   ;;  %9839 = vmatpush3.msra.mxu1 %v15448_v44  ;;  %v15455_v44 = vmov 12  }
 0xa04   : > { %10497 = vset.pattern.permute.xlu0 %v15449_v34  ;;  %9794 = vmatprep.subr.mxu0 %v15450_v19 }
 0xa05   : > { %4615 = vperm.xlu0 %10497, %v13316_v30   ;;  %9840 = vmatprep.subr.mxu1 %v15451_v45  ;;  %v15457_v45 = vld [vmem:[#allocation47_spill] sm:$0xff] }
 0xa06   : > { %9795 = vmatpush3.msra.mxu0 %v15452_v9  ;;  %9841 = vmatpush3.msra.mxu1 %v13222_v25  ;;  %v15458_v25 = vld [vmem:[#allocation87_spill] sm:$0xff] }
 0xa07   : > { %10485 = vset.pattern.permute.xlu1 %v15453_v13  ;;  %9796 = vmatprep.subr.mxu0 %v15454_v39 }
 0xa08   : > { %4870 = vperm.xlu1 %10485, %v13316_v30   ;;  %9842 = vmatprep.subr.mxu1 %v13231_v48  ;;  %v15459_v48 = vmov 4  }
 0xa09   : > { %10499 = vset.pattern.permute.xlu0 %v15455_v44  ;;  %9797 = vmatpush3.msra.mxu0 %v15456_v1 }
 0xa0a   : > { %4549 = vperm.xlu0 %10499, %v13316_v30   ;;  %9843 = vmatpush3.msra.mxu1 %v13253_v22  ;;  %v15460_v22 = vld [vmem:[#allocation72_spill] sm:$0xff] }
 0xa0b   : > { %9798 = vmatprep.subr.mxu0 %v15457_v45  ;;  %9844 = vmatprep.subr.mxu1 %v13259_v49 }
 0xa0c   : > { %10487 = vset.pattern.permute.xlu1 %v15446_v23  ;;  %9799 = vmatpush3.msra.mxu0 %v15458_v25  ;;  %v15461_v23 = vmov 24  }
 0xa0d   : > { %4774 = vperm.xlu1 %10487, %v13319_v41   ;;  %9845 = vmatpush3.msra.mxu1 %v13283_v3 }
 0xa0e   : > { %10502 = vset.pattern.permute.xlu0 %v15459_v48  ;;  %9800 = vmatprep.subr.mxu0 %v13210_v12  ;;  %v15463_v48 = vand.u32 4294901760, %v12930_v61  ;;  %v15467_v61 = vmov 7   ;;  %v15470_v12 = vld [vmem:[#allocation62_spill] sm:$0xff] }
 0xa0f   : > { %4720 = vperm.xlu0 %10502, %v13316_v30   ;;  %9890 = vmatprep.subr.mxu1 %v12912_v20  ;;  %v4626_v20 = vpop.permute.xlu0 %4625 }
 0xa10   : > { %9801 = vmatpush3.msra.mxu0 %v15460_v22 }
 0xa11   : > { %10488 = vset.pattern.permute.xlu1 %v15453_v13  ;;  %9802 = vmatprep.subr.mxu0 %v13238_v5  ;;  %v15462_v13 = vmov 22   ;;  %v15466_v5 = vmov 2  }
 0xa12   : > { %4874 = vperm.xlu1 %10488, %v13319_v41   ;;  %9803 = vmatpush3.msra.mxu0 %v13241_v37  ;;  %v13489_v37 = vld [vmem:[#allocation3] sm:$0xff] }
 0xa13   : > { %4724 = vperm.xlu0 %10502, %v13319_v41   ;;  %9804 = vmatprep.subr.mxu0 %v13251_v2  ;;  %v4630_v2 = vpop.permute.xlu1 %4629 }
 0xa14   : > { %9805 = vmatpush3.msra.mxu0 %v13272_v50  ;;  %v4632_v50 = vmul.f32 %v4626_v20, %v13489_v37 }
 0xa15   : > { %9806 = vmatprep.subr.mxu0 %v13281_v14  ;;  %v15464_v14 = vmov 21  }
 0xa16   : > { %10489 = vset.pattern.permute.xlu1 %v15461_v23  ;;  %9807 = vmatpush3.msra.mxu0 %v13293_v0  ;;  %v13495_v0 = vld [vmem:[#allocation3 + $0x8] sm:$0xff] }
 0xa17   : > { %10506 = vset.pattern.permute.xlu0 %v15462_v13  ;;  %4790 = vperm.xlu1 %10489, %v13316_v30   ;;  %v4633_v22 = vmul.f32 %v4630_v2, %v13495_v0 }
 0xa18   : > { %4589 = vperm.xlu0 %10506, %v13316_v30   ;;  %9852 = vmatprep.subr.mxu0 %v15463_v48  ;;  %v13511_v48 = vpop.permute.xlu1 %4645 }
 0xa1b   : > { %10491 = vset.pattern.permute.xlu1 %v15464_v14 }
 0xa1c   : > { %4636 = vrot.lane.b32.xlu0 %v4632_v50, %s15465_s1  ;;  %4975 = vperm.xlu1 %10491, %v13316_v30   ;;  %v5105_v50 = vpop.permute.xlu0 %5104 }
 0xa1d   : > { %10510 = vset.pattern.permute.xlu0 %v15466_v5  ;;  %v5112_v2 = vsel %vm5108_vm8, %v5105_v50, %v13356_v57  ;;  %v5111_v20 = vsel %vm5108_vm8, %v13351_v62, %v5105_v50  ;;  %v15469_v5 = vmov 17   ;;  %v15471_v62 = vmov 5  }
 0xa1e   : > { %v5119_v57 = vmax.f32 %v15470_v12, %v5111_v20  ;;  %v15472_v20 = vand.u32 4294901760, %v13360_v56  ;;  %vm7231_vm8 = vcmask 1043728  }
 0xa20   : > { %4638 = vrot.lane.b32.xlu0 %v4633_v22, %s15465_s1  ;;  %10492 = vset.pattern.permute.xlu1 %v15461_v23 }
 0xa21   : > { %4794 = vperm.xlu1 %10492, %v13319_v41  }
 0xa25   : > { %10493 = vset.pattern.permute.xlu1 %v15464_v14  ;;  %v15468_v14 = vld [vmem:[#allocation53_spill] sm:$0xff] }
 0xa26   : > { %4979 = vperm.xlu1 %10493, %v13319_v41  }
 0xa2a   : > { %10495 = vset.pattern.permute.xlu1 %v15442_v38  ;;  %v5120_v38 = vmax.f32 %v15468_v14, %v5112_v2 }
 0xa2b   : > { %4999 = vperm.xlu1 %10495, %v13319_v41  }
 0xa2f   : > { %10496 = vset.pattern.permute.xlu1 %v15467_v61 }
 0xa30   : > { %4529 = vperm.xlu1 %10496, %v13316_v30  }
 0xa34   : > { %4533 = vperm.xlu1 %10496, %v13319_v41  }
 0xa38   : > { %10498 = vset.pattern.permute.xlu1 %v15449_v34 }
 0xa39   : > { %4619 = vperm.xlu1 %10498, %v13319_v41  }
 0xa3d   : > { %10500 = vset.pattern.permute.xlu1 %v15455_v44 }
 0xa3e   : > { %4553 = vperm.xlu1 %10500, %v13319_v41  }
 0xa3f   : > { %v5166_v22 = vpop.permute.xlu0 %5165 }
 0xa40   : > { %v5164_v23 = vpop.permute.xlu1 %5163 }
 0xa41   : > { %v5171_v34 = vsel %vm5167_vm10, %v5164_v23, %v5166_v22 }
 0xa42   : > { %v5179_v61 = vmax.f32 %v5120_v38, %v5171_v34  ;;  %10501 = vset.pattern.permute.xlu1 %v15469_v5 }
 0xa43   : > { %4569 = vperm.xlu1 %10501, %v13316_v30  }
 0xa44   : > { %v13524_v3 = vand.u32 4294901760, %v5179_v61  ;;  %v5162_v44 = vpop.permute.xlu1 %5161 }
 0xa45   : > { %v5170_v25 = vsel %vm5167_vm10, %v5162_v44, %v5164_v23  ;;  %vm7234_vm10 = vcmask 273408  }
 0xa46   : > { %v5324_v2 = vsub.f32 %v5179_v61, %v13524_v3  ;;  %v5178_v14 = vmax.f32 %v5119_v57, %v5170_v25  ;;  %5571 = vmatprep.mubr.f32.mxu1 %v13524_v3  ;;  %v15473_v57 = vand.u32 4294901760, %v13363_v51 }
 0xa47   : > { %10503 = vset.pattern.permute.xlu1 %v15471_v62 }
 0xa48   : > { %v13530_v50 = vand.u32 4294901760, %v5178_v14  ;;  %4820 = vperm.xlu1 %10503, %v13316_v30   ;;  %v5325_v34 = vand.u32 4294901760, %v5324_v2 }
 0xa4a   : > { %v5330_v22 = vsub.f32 %v5178_v14, %v13530_v50  ;;  %5573 = vmatmul.mubr.f32.gmra.mxu1 %v13530_v50  ;;  %v5326_v38 = vsub.f32 %v5324_v2, %v5325_v34 }
 0xa4b   : > { %5824 = vmatprep.mubr.f32.mxu1 %v15472_v20 }
 0xa4c   : > { %v4650_v44 = vpop.permute.xlu0 %4649  ;;  %10504 = vset.pattern.permute.xlu1 %v15469_v5  ;;  %v5327_v25 = vand.u32 4294901760, %v5326_v38  ;;  %v5331_v61 = vand.u32 4294901760, %v5330_v22 }
 0xa4d   : > { %v4653_v23 = vmul.f32 %v4650_v44, %v13495_v0  ;;  %4573 = vperm.xlu1 %10504, %v13319_v41  }
 0xa4e   : > { %5328 = vmatprep.mubr.f32.mxu0 %v5327_v25  ;;  %5828 = vmatmul.mubr.f32.vlgmr.msra.gmra.mxu1 %v15473_v57  ;;  %v5332_v14 = vsub.f32 %v5330_v22, %v5331_v61  ;;  %v15502_v25 = vld [vmem:[#allocation58_spill] sm:$0xff]  ;;  %v15505_v57 = vand.u32 4294901760, %v15454_v39 }
 0xa4f   : > { %4658 = vrot.lane.b32.xlu0 %v4653_v23, %s15162_s2  ;;  %9891 = vmatpush3.msra.mxu1 %v12914_v33  ;;  %v15474_v33 = vmov 6   ;;  %v15504_v23 = vld [vmem:[#allocation48_spill] sm:$0xff] }
 0xa50   : > { %5835 = vmatprep.mubr.f32.mxu1 %v5325_v34  ;;  %9892 = vmatprep.subr.mxu1 %v12916_v46  ;;  %v5333_v20 = vand.u32 4294901760, %v5332_v14  ;;  %v15500_v34 = vld [vmem:[#allocation45_spill] sm:$0xff]  ;;  %v15506_v14 = vld [vmem:[#allocation60_spill] sm:$0xff] }
 0xa51   : > { %9893 = vmatpush3.msra.mxu1 %v12921_v47  ;;  %10505 = vset.pattern.permute.xlu1 %v15471_v62  ;;  %v13547_v5 = vpop.permute.xlu1 %4665  ;;  %v15475_v47 = vand.u32 4294901760, %v12933_v36  ;;  %v15478_v36 = vand.u32 4294901760, %v12945_v26 }
 0xa52   : > { %9894 = vmatprep.subr.mxu1 %v12923_v18  ;;  %4824 = vperm.xlu1 %10505, %v13319_v41   ;;  %v4672_v44 = vmul.f32 %v13547_v5, %v13489_v37  ;;  %v15509_v5 = vand.u32 4294901760, %v15457_v45  ;;  %v15516_v45 = vld [vmem:[#allocation72_spill] sm:$0xff] }
 0xa53   : > { %5334 = vmatmul.mubr.f32.gmra.mxu0 %v5333_v20  ;;  %5839 = vmatmul.mubr.f32.gmra.mxu1 %v5331_v61  ;;  %v15503_v61 = vand.u32 4294901760, %v15452_v9  ;;  %v15508_v20 = vld [vmem:[#allocation74_spill] sm:$0xff] }
 0xa54   : > { %9895 = vmatpush3.msra.mxu1 %v12925_v17  ;;  %5708 = vmatprep.mubr.f32.mxu0 %v13360_v56  ;;  %v15476_v17 = vand.u32 4294901760, %v12936_v55  ;;  %v15479_v55 = vand.u32 4294901760, %v12948_v43  ;;  %v15481_v43 = vand.u32 4294901760, %v12964_v58  ;;  %v15492_v56 = vld [vmem:[#allocation66_spill] sm:$0xff] }
 0xa55   : > { %9896 = vmatprep.subr.mxu1 %v12938_v59  ;;  %6116 = vmatprep.mubr.f32.mxu1 %v13348_v6  ;;  %v15477_v59 = vand.u32 4294901760, %v12942_v16  ;;  %v15480_v16 = vand.u32 4294901760, %v12957_v40  ;;  %v15483_v40 = vand.u32 4294901760, %v13007_v27 }
 0xa56   : > { %9897 = vmatpush3.msra.mxu1 %v12950_v28  ;;  %10507 = vset.pattern.permute.xlu1 %v15474_v33  ;;  %v4731_v46 = vpop.permute.xlu1 %4730 }
 0xa57   : > { %9898 = vmatprep.subr.mxu1 %v12999_v24  ;;  %5711 = vmatmul.mubr.f32.vlgmr.msra.gmra.mxu0 %v13363_v51  ;;  %v4737_v18 = vmul.f32 %v4731_v46, %v13489_v37  ;;  %v4831_v24 = vpop.permute.xlu0 %4830  ;;  %v15493_v51 = vand.u32 4294901760, %v15492_v56 }
 0xa58   : > { %9853 = vmatpush3.msra.mxu0 %v15475_v47  ;;  %9899 = vmatpush3.msra.mxu1 %v13001_v32  ;;  %v4837_v46 = vmul.f32 %v4831_v24, %v13489_v37  ;;  %v15510_v47 = vld [vmem:[#allocation87_spill] sm:$0xff]  ;;  %v15518_v24 = vld [vmem:[#allocation70_spill] sm:$0xff] }
 0xa59   : > { %4925 = vperm.xlu1 %10507, %v13316_v30   ;;  %5717 = vmatprep.mubr.f32.mxu0 %v5324_v2  ;;  %v15511_v39 = vand.u32 4294901760, %v15510_v47  ;;  %v15534_v47 = vld [vmem:[#allocation37_spill] sm:$0xff] }
 0xa5a   : > { %9854 = vmatprep.subr.mxu0 %v15476_v17  ;;  %9900 = vmatprep.subr.mxu1 %v13020_v15  ;;  %v15482_v15 = vand.u32 4294901760, %v13004_v60  ;;  %v15485_v60 = vand.u32 4294901760, %v13034_v7  ;;  %v4652_v7 = vmul.f32 %v13511_v48, %v13489_v37  ;;  %v15498_v48 = vld [vmem:[#allocation71_spill] sm:$0xff] }
 0xa5b   : > { %9855 = vmatpush3.msra.mxu0 %v15477_v59  ;;  %9901 = vmatpush3.msra.mxu1 %v13023_v10  ;;  %v4670_v28 = vpop.permute.xlu1 %4669  ;;  %v4835_v10 = vpop.permute.xlu0 %4834  ;;  %v15499_v2 = vand.u32 4294901760, %v15498_v48  ;;  %v15532_v48 = vld [vmem:[#allocation38_spill] sm:$0xff] }
 0xa5c   : > { %9856 = vmatprep.subr.mxu0 %v15478_v36  ;;  %9902 = vmatprep.subr.mxu1 %v13029_v54  ;;  %v4673_v26 = vmul.f32 %v4670_v28, %v13495_v0  ;;  %v15484_v54 = vand.u32 4294901760, %v13027_v31  ;;  %v4838_v27 = vmul.f32 %v4835_v10, %v13495_v0  ;;  %v15487_v31 = vand.u32 4294901760, %v15438_v53  ;;  %v15515_v36 = vld [vmem:[#allocation63_spill] sm:$0xff] }
 0xa5d   : > { %4741 = vrot.lane.b32.xlu0 %v4737_v18, %s15465_s1  ;;  %5720 = vmatmul.mubr.f32.gmra.mxu0 %v5330_v22  ;;  %v15501_v22 = vand.u32 4294901760, %v15450_v19  ;;  %v15507_v19 = vand.u32 4294901760, %v15456_v1  ;;  %v15512_v18 = vld [vmem:[#allocation77_spill] sm:$0xff]  ;;  %v15513_v1 = vld [vmem:[#allocation86_spill] sm:$0xff]  ;;  %v15522_v10 = vld [vmem:[#allocation59_spill] sm:$0xff] }
 0xa5e   : > { %9857 = vmatpush3.msra.mxu0 %v15479_v55  ;;  %9903 = vmatpush3.msra.mxu1 %v13036_v63  ;;  %v15486_v63 = vand.u32 4294901760, %v15436_v35  ;;  %v15514_v28 = vand.u32 4294901760, %v15513_v1  ;;  %v15519_v55 = vand.u32 4294901760, %v15518_v24 }
 0xa5f   : > { %10508 = vset.pattern.permute.xlu1 %v15462_v13  ;;  %9858 = vmatprep.subr.mxu0 %v15480_v16  ;;  %v15497_v13 = vld [vmem:[#allocation84_spill] sm:$0xff] }
 0xa60   : > { %6005 = vmatprep.mubr.f32.mxu0 %v13348_v6  ;;  %9904 = vmatprep.subr.mxu1 %v13044_v11  ;;  %v13583_v32 = vpop.permute.xlu1 %4734  ;;  %v4751_v11 = vpop.permute.xlu0 %4750  ;;  %v15491_v6 = vld [vmem:[#allocation85_spill] sm:$0xff] }
 0xa61   : > { %4593 = vperm.xlu1 %10508, %v13319_v41   ;;  %9859 = vmatpush3.msra.mxu0 %v15481_v43  ;;  %v4757_v35 = vmul.f32 %v4751_v11, %v13489_v37  ;;  %v4738_v16 = vmul.f32 %v13583_v32, %v13495_v0  ;;  %v15526_v32 = vld [vmem:[#allocation49_spill] sm:$0xff]  ;;  %v15529_v11 = vld [vmem:[#allocation50_spill] sm:$0xff] }
 0xa62   : > { %9905 = vmatpush3.msra.mxu1 %v13052_v42  ;;  %9860 = vmatprep.subr.mxu0 %v15482_v15  ;;  %v15489_v42 = vld [vmem:[#allocation65_spill] sm:$0xff] }
 0xa63   : > { %9906 = vmatprep.subr.mxu1 %v13063_v52  ;;  %9861 = vmatpush3.msra.mxu0 %v15483_v40  ;;  %v15490_v52 = vand.u32 4294901760, %v15489_v42  ;;  %v15530_v42 = vand.u32 4294901760, %v15529_v11 }
 0xa64   : > { %9907 = vmatpush3.msra.mxu1 %v13095_v8  ;;  %4678 = vrot.lane.b32.xlu0 %v4673_v26, %s10732_s23  ;;  %v4690_v59 = vpop.permute.xlu0 %4689  ;;  %v15520_v26 = vld [vmem:[#allocation73_spill] sm:$0xff] }
 0xa65   : > { %9862 = vmatprep.subr.mxu0 %v15484_v54  ;;  %9908 = vmatprep.subr.mxu1 %v13109_v4  ;;  %v4686_v58 = vpop.permute.xlu1 %4685  ;;  %v15488_v4 = vld [vmem:[#allocation68_spill] sm:$0xff]  ;;  %v15521_v43 = vand.u32 4294901760, %v15520_v26  ;;  %v15523_v54 = vand.u32 4294901760, %v15522_v10  ;;  %v15537_v26 = vmov 1   ;;  %v15538_v10 = vmov 0  }
 0xa66   : > { %10509 = vset.pattern.permute.xlu1 %v15474_v33  ;;  %9863 = vmatpush3.msra.mxu0 %v15485_v60  ;;  %v15524_v60 = vld [vmem:[#allocation75_spill] sm:$0xff] }
 0xa67   : > { %9909 = vmatpush3.msra.mxu1 %v15435_v29  ;;  %4929 = vperm.xlu1 %10509, %v13319_v41   ;;  %v15494_v29 = vld [vmem:[#allocation83_spill] sm:$0xff] }
 0xa68   : > { %9864 = vmatprep.subr.mxu0 %v15486_v63  ;;  %9910 = vmatprep.subr.mxu1 %v15437_v21  ;;  %v15495_v21 = vld [vmem:[#allocation54_spill] sm:$0xff]  ;;  %v4940_v63 = vpop.permute.xlu0 %4939 }
 0xa69   : > { %9865 = vmatpush3.msra.mxu0 %v15487_v31  ;;  %9911 = vmatpush3.msra.mxu1 %v15488_v4  ;;  %v15496_v53 = vand.u32 4294901760, %v15495_v21  ;;  %v15527_v31 = vand.u32 4294901760, %v15526_v32  ;;  %v15528_v4 = vmov 2  }
 0xa6a   : > { %4843 = vrot.lane.b32.xlu0 %v4838_v27, %s15465_s1  ;;  %9866 = vmatprep.subr.mxu0 %v15490_v52  ;;  %v4851_v8 = vpop.permute.xlu1 %4850  ;;  %v15525_v27 = vand.u32 4294901760, %v15524_v60 }
 0xa6b   : > { %9912 = vmatprep.subr.mxu1 %v15491_v6  ;;  %9867 = vmatpush3.msra.mxu0 %v15493_v51  ;;  %v4943_v6 = vmul.f32 %v4940_v63, %v13495_v0  ;;  %v4857_v56 = vmul.f32 %v4851_v8, %v13489_v37 }
 0xa6c   : > { %9913 = vmatpush3.msra.mxu1 %v15494_v29  ;;  %4656 = vrot.lane.b32.xlu1 %v4652_v7, %s15162_s2  ;;  %v4692_v7 = vmul.f32 %v4686_v58, %v13489_v37  ;;  %v4956_v29 = vpop.permute.xlu0 %4955 }
 0xa6d   : > { %9868 = vmatprep.subr.mxu0 %v15496_v53  ;;  %9914 = vmatprep.subr.mxu1 %v15497_v13  ;;  %v4962_v21 = vmul.f32 %v4956_v29, %v13489_v37 }
 0xa6e   : > { %9869 = vmatpush3.msra.mxu0 %v15499_v2  ;;  %9915 = vmatpush3.msra.mxu1 %v15500_v34 }
 0xa6f   : > { %4761 = vrot.lane.b32.xlu0 %v4757_v35, %s15162_s2  ;;  %9870 = vmatprep.subr.mxu0 %v15501_v22  ;;  %v4936_v38 = vpop.permute.xlu1 %4935  ;;  %v4693_v35 = vmul.f32 %v4690_v59, %v13495_v0 }
 0xa70   : > { %9916 = vmatprep.subr.mxu1 %v15502_v25  ;;  %9871 = vmatpush3.msra.mxu0 %v15503_v61  ;;  %v4942_v17 = vmul.f32 %v4936_v38, %v13489_v37 }
 0xa71   : > { %9917 = vmatpush3.msra.mxu1 %v15504_v23  ;;  %9872 = vmatprep.subr.mxu0 %v15505_v57 }
 0xa72   : > { %9918 = vmatprep.subr.mxu1 %v15506_v14  ;;  %4676 = vrot.lane.b32.xlu1 %v4672_v44, %s10732_s23 }
 0xa73   : > { %9873 = vmatpush3.msra.mxu0 %v15507_v19  ;;  %9919 = vmatpush3.msra.mxu1 %v15508_v20 }
 0xa74   : > { %9874 = vmatprep.subr.mxu0 %v15509_v5  ;;  %9920 = vmatprep.subr.mxu1 %v13259_v49  ;;  %v4755_v9 = vpop.permute.xlu1 %4754  ;;  %v15517_v49 = vand.u32 4294901760, %v15516_v45  ;;  %v15535_v45 = vld [vmem:[#allocation42_spill] sm:$0xff] }
 0xa75   : > { %9875 = vmatpush3.msra.mxu0 %v15511_v39  ;;  %9921 = vmatpush3.msra.mxu1 %v15512_v18  ;;  %v4758_v15 = vmul.f32 %v4755_v9, %v13495_v0 }
 0xa76   : > { %9876 = vmatprep.subr.mxu0 %v15514_v28  ;;  %6118 = vmatmul.mubr.f32.vlgmr.msra.gmra.mxu1 %v15515_v36 }
 0xa77   : > { %4841 = vrot.lane.b32.xlu1 %v4837_v46, %s15465_s1  ;;  %9877 = vmatpush3.msra.mxu0 %v15517_v49 }
 0xa78   : > { %6123 = vmatprep.mubr.f32.mxu1 %v13524_v3  ;;  %9878 = vmatprep.subr.mxu0 %v15519_v55 }
 0xa79   : > { %9879 = vmatpush3.msra.mxu0 %v15521_v43  ;;  %4946 = vrot.lane.b32.xlu0 %v4942_v17, %s15465_s1  ;;  %v4855_v40 = vpop.permute.xlu1 %4854 }
 0xa7a   : > { %9880 = vmatprep.subr.mxu0 %v15523_v54  ;;  %6125 = vmatmul.mubr.f32.gmra.mxu1 %v13530_v50  ;;  %v4858_v8 = vmul.f32 %v4855_v40, %v13495_v0 }
 0xa7b   : > { %4743 = vrot.lane.b32.xlu1 %v4738_v16, %s15465_s1  ;;  %9881 = vmatpush3.msra.mxu0 %v15525_v27 }
 0xa7c   : > { %9882 = vmatprep.subr.mxu0 %v15527_v31  ;;  %10511 = vset.pattern.permute.xlu1 %v15528_v4 }
 0xa7d   : > { %9883 = vmatpush3.msra.mxu0 %v15530_v42  ;;  %4763 = vrot.lane.b32.xlu0 %v4758_v15, %s15162_s2 }
 0xa7e   : > { %6007 = vmatmul.mubr.f32.vlgmr.msra.gmra.mxu0 %v15515_v36  ;;  %v4771_v52 = vpop.permute.xlu1 %4770  ;;  %v13725_v36 = vld [vmem:[%s10765_s21] sm:$0x1f] }
 0xa7f   : > { %4696 = vrot.lane.b32.xlu1 %v4692_v7, %s15160_s0  ;;  %6012 = vmatprep.mubr.f32.mxu0 %v13524_v3  ;;  %v4777_v58 = vmul.f32 %v4771_v52, %v13489_v37  ;;  %v5017_v49 = vrot.slane %v13725_v36, %v15535_v45 }
 0xa81   : > { %4948 = vrot.lane.b32.xlu0 %v4943_v6, %s15465_s1 }
 0xa82   : > { %6014 = vmatmul.mubr.f32.gmra.mxu0 %v13530_v50  ;;  %v4960_v50 = vpop.permute.xlu0 %4959 }
 0xa83   : > { %4861 = vrot.lane.b32.xlu1 %v4857_v56, %s15162_s2  ;;  %v4871_v51 = vpop.permute.xlu1 %4870  ;;  %v4963_v23 = vmul.f32 %v4960_v50, %v13495_v0 }
 0xa84   : > { %v4877_v2 = vmul.f32 %v4871_v51, %v13489_v37 }
 0xa85   : > { %4781 = vrot.lane.b32.xlu0 %v4777_v58, %s10732_s23 }
 0xa86   : > { %v4891_v22 = vpop.permute.xlu0 %4890 }
 0xa87   : > { %4698 = vrot.lane.b32.xlu1 %v4693_v35, %s15160_s0  ;;  %v4897_v20 = vmul.f32 %v4891_v22, %v13489_v37 }
 0xa88   : > { %v4775_v3 = vpop.permute.xlu1 %4774 }
 0xa89   : > { %4966 = vrot.lane.b32.xlu0 %v4962_v21, %s15162_s2  ;;  %v4778_v44 = vmul.f32 %v4775_v3, %v13495_v0 }
 0xa8a   : > { %v4895_v57 = vpop.permute.xlu0 %4894 }
 0xa8b   : > { %4863 = vrot.lane.b32.xlu1 %v4858_v8, %s15162_s2  ;;  %v4898_v14 = vmul.f32 %v4895_v57, %v13495_v0 }
 0xa8d   : > { %v4875_v53 = vpop.permute.xlu1 %4874 }
 0xa8e   : > { %v4878_v13 = vmul.f32 %v4875_v53, %v13495_v0  ;;  %v4996_v46 = vpop.permute.xlu0 %4995 }
 0xa8f   : > { %4704 = vrot.lane.b32.xlu1 %v15532_v48, %s15531_s10  ;;  %s15533_s10 = smov 3   ;;  %v5002_v1 = vmul.f32 %v4996_v46, %v13489_v37 }
 0xa90   : > { %4883 = vrot.lane.b32.xlu0 %v4878_v13, %s10732_s23 }
 0xa92   : > { %v4791_v34 = vpop.permute.xlu1 %4790  ;;  %v4616_v59 = vpop.permute.xlu0 %4615 }
 0xa93   : > { %4881 = vrot.lane.b32.xlu1 %v4877_v2, %s10732_s23  ;;  %v4797_v38 = vmul.f32 %v4791_v34, %v13489_v37 }
 0xa95   : > { %4801 = vrot.lane.b32.xlu0 %v4797_v38, %s15160_s0 }
 0xa96   : > { %v4550_v24 = vpop.permute.xlu0 %4549 }
 0xa97   : > { %4783 = vrot.lane.b32.xlu1 %v4778_v44, %s10732_s23  ;;  %v4976_v25 = vpop.permute.xlu1 %4975  ;;  %v4556_v54 = vmul.f32 %v4550_v24, %v13489_v37 }
 0xa98   : > { %v4982_v61 = vmul.f32 %v4976_v25, %v13489_v37 }
 0xa9a   : > { %4986 = vrot.lane.b32.xlu0 %v4982_v61, %s10732_s23  ;;  %v4721_v43 = vpop.permute.xlu0 %4720 }
 0xa9b   : > { %4968 = vrot.lane.b32.xlu1 %v4963_v23, %s15162_s2 }
 0xa9c   : > { %v4795_v19 = vpop.permute.xlu1 %4794 }
 0xa9d   : > { %v4798_v5 = vmul.f32 %v4795_v19, %v13495_v0 }
 0xa9e   : > { %4903 = vrot.lane.b32.xlu0 %v4898_v14, %s15160_s0  ;;  %v13739_v27 = vpop.permute.xlu0 %4724 }
 0xa9f   : > { %4901 = vrot.lane.b32.xlu1 %v4897_v20, %s15160_s0  ;;  %v4622_v20 = vmul.f32 %v4616_v59, %v13489_v37 }
 0xaa1   : > { %v4980_v9 = vpop.permute.xlu1 %4979 }
 0xaa2   : > { %4909 = vrot.lane.b32.xlu0 %v15534_v47, %s15533_s10  ;;  %v4983_v39 = vmul.f32 %v4980_v9, %v13495_v0  ;;  %s15536_s10 = smov 4   ;;  %v4590_v7 = vpop.permute.xlu0 %4589 }
 0xaa3   : > { %4803 = vrot.lane.b32.xlu1 %v4798_v5, %s15160_s0  ;;  %v4596_v11 = vmul.f32 %v4590_v7, %v13489_v37 }
 0xaa6   : > { %v5000_v18 = vpop.permute.xlu1 %4999  ;;  %v4637_v52 = vpop.permute.xlu0 %4636 }
 0xaa7   : > { %4988 = vrot.lane.b32.xlu1 %v4983_v39, %s10732_s23  ;;  %v5003_v17 = vmul.f32 %v5000_v18, %v13495_v0  ;;  %v4642_v46 = vadd.f32 %v4637_v52, %v4622_v20  ;;  %v4727_v39 = vmul.f32 %v4721_v43, %v13489_v37 }
 0xaa9   : > { %5008 = vrot.lane.b32.xlu0 %v5003_v17, %s15160_s0 }
 0xaaa   : > { %v4639_v58 = vpop.permute.xlu0 %4638 }
 0xaab   : > { %5006 = vrot.lane.b32.xlu1 %v5002_v1, %s15160_s0  ;;  %v4530_v28 = vpop.permute.xlu1 %4529 }
 0xaac   : > { %v4536_v40 = vmul.f32 %v4530_v28, %v13489_v37 }
 0xaad   : > { %4518 = vperm.xlu0 %10510, %v13316_v30  }
 0xaaf   : > { %5019 = vrot.lane.b32.xlu1 %v5017_v49, %s15536_s10  ;;  %v4534_v55 = vpop.permute.xlu1 %4533  ;;  %s15540_s10 = smov 126  }
 0xab0   : > { %v4537_v16 = vmul.f32 %v4534_v55, %v13495_v0 }
 0xab1   : > { %10515 = vset.pattern.permute.xlu0 %v15537_v26 }
 0xab2   : > { %4542 = vrot.lane.b32.xlu0 %v4537_v16, %s15465_s1 }
 0xab3   : > { %4523 = vperm.xlu1 %10511, %v13319_v41  }
 0xab4   : > { %v4620_v15 = vpop.permute.xlu1 %4619 }
 0xab5   : > { %v4623_v19 = vmul.f32 %v4620_v15, %v13495_v0 }
 0xab7   : > { %4540 = vrot.lane.b32.xlu1 %v4536_v40, %s15465_s1  ;;  %v4643_v47 = vadd.f32 %v4639_v58, %v4623_v19 }
 0xab8   : > { %10512 = vset.pattern.permute.xlu1 %v15538_v10 }
 0xab9   : > { %v4554_v60 = vpop.permute.xlu1 %4553 }
 0xaba   : > { %v4557_v63 = vmul.f32 %v4554_v60, %v13495_v0 }
 0xabb   : > { %4560 = vrot.lane.b32.xlu1 %v4556_v54, %s15162_s2 }
 0xabc   : > { %4562 = vrot.lane.b32.xlu0 %v4557_v63, %s15162_s2  ;;  %s10733_s2 = smov 109  }
 0xabe   : > { %v4570_v32 = vpop.permute.xlu1 %4569 }
 0xabf   : > { %v4576_v31 = vmul.f32 %v4570_v32, %v13489_v37 }
 0xac1   : > { %4580 = vrot.lane.b32.xlu1 %v4576_v31, %s10732_s23  ;;  %v4659_v29 = vpop.permute.xlu0 %4658 }
 0xac2   : > { %v4663_v18 = vadd.f32 %v4659_v29, %v4643_v47 }
 0xac3   : > { %v4821_v42 = vpop.permute.xlu1 %4820 }
 0xac5   : > { %4600 = vrot.lane.b32.xlu1 %v4596_v11, %s15160_s0  ;;  %v4728_v11 = vmul.f32 %v13739_v27, %v13495_v0 }
 0xac8   : > { %v4574_v6 = vpop.permute.xlu1 %4573 }
 0xac9   : > { %v4577_v56 = vmul.f32 %v4574_v6, %v13495_v0 }
 0xacb   : > { %4582 = vrot.lane.b32.xlu0 %v4577_v56, %s10732_s23  ;;  %s15539_s23 = smov 127   ;;  %v4827_v56 = vmul.f32 %v4821_v42, %v13489_v37 }
 0xacd   : > { %v4825_v51 = vpop.permute.xlu1 %4824 }
 0xacf   : > { %v4742_v35 = vpop.permute.xlu0 %4741 }
 0xad0   : > { %v4747_v45 = vadd.f32 %v4742_v35, %v4727_v39 }
 0xad4   : > { %v13750_v21 = vpop.permute.xlu1 %4925 }
 0xad6   : > { %v4679_v3 = vpop.permute.xlu0 %4678 }
 0xad7   : > { %v4683_v49 = vadd.f32 %v4679_v3, %v4663_v18 }
 0xadc   : > { %v4594_v8 = vpop.permute.xlu1 %4593  ;;  %v4844_v53 = vpop.permute.xlu0 %4843 }
 0xadd   : > { %v4597_v50 = vmul.f32 %v4594_v8, %v13495_v0  ;;  %v4828_v8 = vmul.f32 %v4825_v51, %v13495_v0 }
 0xadf   : > { %4602 = vrot.lane.b32.xlu0 %v4597_v50, %s15160_s0  ;;  %s15541_s0 = smov 125  }
 0xae1   : > { %v4762_v2 = vpop.permute.xlu0 %4761 }
 0xae2   : > { %v13754_v13 = vpop.permute.xlu1 %4929  ;;  %v4767_v55 = vadd.f32 %v4762_v2, %v4747_v45  ;;  %v10629_v2 = vld [vmem:[%s15420_s18] sm:$0xff] }
 0xae6   : > { %v4657_v48 = vpop.permute.xlu1 %4656 }
 0xae7   : > { %v4662_v17 = vadd.f32 %v4657_v48, %v4642_v46 }
 0xaea   : > { %v4677_v34 = vpop.permute.xlu1 %4676 }
 0xaeb   : > { %v13756_v22 = vpop.permute.xlu0 %4946  ;;  %v4682_v24 = vadd.f32 %v4677_v34, %v4662_v17 }
 0xaee   : > { %v4842_v38 = vpop.permute.xlu1 %4841 }
 0xaef   : > { %v4764_v44 = vpop.permute.xlu0 %4763  ;;  %v4847_v35 = vadd.f32 %v4842_v38, %v4827_v56 }
 0xaf2   : > { %v4744_v25 = vpop.permute.xlu1 %4743 }
 0xaf3   : > { %v13758_v61 = vpop.permute.xlu0 %4948  ;;  %v4748_v6 = vadd.f32 %v4744_v25, %v4728_v11 }
 0xaf5   : > { %v4768_v3 = vadd.f32 %v4764_v44, %v4748_v6  ;;  %v10630_v44 = vld [vmem:[%s15420_s18 + $0x8] sm:$0xff] }
 0xaf6   : > { %v4697_v23 = vpop.permute.xlu1 %4696 }
 0xaf7   : > { %v4782_v57 = vpop.permute.xlu0 %4781  ;;  %v4702_v16 = vadd.f32 %v4697_v23, %v4682_v24 }
 0xaf8   : > { %v4787_v15 = vadd.f32 %v4782_v57, %v4767_v55  ;;  %v4933_v57 = vmul.f32 %v13754_v13, %v13495_v0  ;;  %v9732_v55 = vpop.f32.mrf.mxu0 }
 0xafa   : > { %v4862_v14 = vpop.permute.xlu1 %4861  ;;  %v4953_v20 = vadd.f32 %v13758_v61, %v4933_v57  ;;  %v15542_v57 = vld [vmem:[#allocation51_spill] sm:$0xff] }
 0xafb   : > { %v4967_v5 = vpop.permute.xlu0 %4966  ;;  %v4867_v50 = vadd.f32 %v4862_v14, %v4847_v35 }
 0xafe   : > { %v4699_v9 = vpop.permute.xlu1 %4698 }
 0xaff   : > { %v4703_v40 = vadd.f32 %v4699_v9, %v4683_v49 }
 0xb02   : > { %v4864_v1 = vpop.permute.xlu1 %4863  ;;  %v4884_v28 = vpop.permute.xlu0 %4883 }
 0xb06   : > { %v4705_v54 = vpop.permute.xlu1 %4704 }
 0xb07   : > { %v4707_v60 = vmul.f32 %v4705_v54, %v4702_v16  ;;  %v4708_v59 = vmul.f32 %v4705_v54, %v4703_v40  ;;  %v4802_v63 = vpop.permute.xlu0 %4801  ;;  %v9733_v16 = vpop.f32.mrf.mxu0 }
 0xb08   : > { %v4807_v43 = vadd.f32 %v4802_v63, %v4787_v15  ;;  %v9770_v15 = vpop.f32.mrf.mxu1 }
 0xb09   : > { %4713 = vrot.lane.b32.xlu0 %v4708_v59, %s15539_s23  ;;  %4711 = vrot.lane.b32.xlu1 %v4707_v60, %s15539_s23 }
 0xb0a   : > { %v4882_v32 = vpop.permute.xlu1 %4881  ;;  %v9771_v59 = vpop.f32.mrf.mxu1 }
 0xb0b   : > { %v4887_v34 = vadd.f32 %v4882_v32, %v4867_v50 }
 0xb0c   : > { %v4987_v7 = vpop.permute.xlu0 %4986 }
 0xb0d   : > { %4811 = vrot.lane.b32.xlu1 %v4807_v43, %s15540_s10 }
 0xb0e   : > { %v4784_v31 = vpop.permute.xlu1 %4783 }
 0xb0f   : > { %v4788_v48 = vadd.f32 %v4784_v31, %v4768_v3  ;;  %v9773_v31 = vpop.f32.mrf.mxu1 }
 0xb10   : > { %v4904_v58 = vpop.permute.xlu0 %4903 }
 0xb11   : > { %5035 = vperm.xlu1 %10512, %v13316_v30   ;;  %v4848_v30 = vadd.f32 %v4844_v53, %v4828_v8 }
 0xb12   : > { %v4969_v52 = vpop.permute.xlu1 %4968 }
 0xb13   : > { %v4868_v23 = vadd.f32 %v4864_v1, %v4848_v30  ;;  %v4973_v39 = vadd.f32 %v4969_v52, %v4953_v20  ;;  %v9735_v60 = vpop.f32.mrf.mxu0  ;;  %v9774_v52 = vpop.f32.mrf.mxu1  ;;  %v9734_v20 = vadd.f32 %v9733_v16, %v9732_v55 }
 0xb14   : > { %v4910_v42 = vpop.permute.xlu0 %4909 }
 0xb15   : > { %5039 = vperm.xlu1 %10512, %v13319_v41   ;;  %v4932_v41 = vmul.f32 %v13750_v21, %v13489_v37  ;;  %v4888_v19 = vadd.f32 %v4884_v28, %v4868_v23  ;;  %v9736_v63 = vpop.f32.mrf.mxu0 }
 0xb16   : > { %v4902_v29 = vpop.permute.xlu1 %4901 }
 0xb17   : > { %v4907_v38 = vadd.f32 %v4902_v29, %v4887_v34  ;;  %v4952_v14 = vadd.f32 %v13756_v22, %v4932_v41  ;;  %v4908_v46 = vadd.f32 %v4904_v58, %v4888_v19  ;;  %v9846_v29 = vpop.f32.mrf.mxu1 }
 0xb19   : > { %10513 = vset.pattern.permute.xlu1 %v15537_v26  ;;  %v4912_v53 = vmul.f32 %v4910_v42, %v4907_v38  ;;  %v4972_v9 = vadd.f32 %v4967_v5, %v4952_v14  ;;  %v4913_v18 = vmul.f32 %v4910_v42, %v4908_v46  ;;  %v4611_v14 = vrot.slane %v13725_v36, %v15542_v57 }
 0xb1a   : > { %v4804_v27 = vpop.permute.xlu1 %4803  ;;  %5045 = vperm.xlu1 %10513, %v10629_v2   ;;  %v9847_v2 = vpop.f32.mrf.mxu1  ;;  %v9775_v36 = vadd.f32 %v9774_v52, %v9773_v31 }
 0xb1b   : > { %v4808_v25 = vadd.f32 %v4804_v27, %v4788_v48  ;;  %v4992_v47 = vadd.f32 %v4987_v7, %v4972_v9  ;;  %v5009_v13 = vpop.permute.xlu0 %5008  ;;  %v9808_v7 = vpop.f32.mrf.mxu0  ;;  %v9848_v16 = vadd.f32 %v9847_v2, %v9846_v29 }
 0xb1c   : > { %v9849_v38 = vpop.f32.mrf.mxu1 }
 0xb1d   : > { %4813 = vrot.lane.b32.xlu0 %v4808_v25, %s15540_s10  ;;  %v9809_v56 = vpop.f32.mrf.mxu0 }
 0xb1e   : > { %v4989_v51 = vpop.permute.xlu1 %4988  ;;  %5049 = vperm.xlu1 %10513, %v10630_v44   ;;  %v9850_v9 = vpop.f32.mrf.mxu1 }
 0xb1f   : > { %v4993_v17 = vadd.f32 %v4989_v51, %v4973_v39  ;;  %v9811_v48 = vpop.f32.mrf.mxu0  ;;  %v9772_v39 = vadd.f32 %v9771_v59, %v9770_v15 }
 0xb21   : > { %4916 = vrot.lane.b32.xlu0 %v4912_v53, %s15541_s0  ;;  %v5013_v45 = vadd.f32 %v5009_v13, %v4993_v17  ;;  %v9812_v41 = vpop.f32.mrf.mxu0 }
 0xb22   : > { %v5007_v21 = vpop.permute.xlu1 %5006  ;;  %10514 = vset.pattern.permute.xlu1 %v15538_v10 }
 0xb23   : > { %v5012_v1 = vadd.f32 %v5007_v21, %v4992_v47 }
 0xb25   : > { %4918 = vrot.lane.b32.xlu0 %v4913_v18, %s15541_s0  ;;  %v9810_v18 = vadd.f32 %v9809_v56, %v9808_v7  ;;  %s15543_s0 = sld [smem:[#allocation10_spill]] }
 0xb26   : > { %v5020_v22 = vpop.permute.xlu1 %5019 }
 0xb27   : > { %v5022_v28 = vmul.f32 %v5020_v22, %v5012_v1  ;;  %v5023_v61 = vmul.f32 %v5020_v22, %v5013_v45  ;;  %v9737_v45 = vadd.f32 %v9736_v63, %v9735_v60 }
 0xb28   : > { %v4519_v49 = vpop.permute.xlu0 %4518 }
 0xb29   : > { %5026 = vrot.lane.b32.xlu0 %v5022_v28, %s15342_s26  ;;  %v4526_v35 = vmul.f32 %v4519_v49, %v13489_v37  ;;  %v5568_v28 = vadd.f32 %v9772_v39, %v9734_v20 }
 0xb2c   : > { %v4543_v40 = vpop.permute.xlu0 %4542 }
 0xb2d   : > { %5028 = vrot.lane.b32.xlu0 %v5023_v61, %s15342_s26 }
 0xb2e   : > { %v4524_v5 = vpop.permute.xlu1 %4523 }
 0xb2f   : > { %v4527_v3 = vmul.f32 %v4524_v5, %v13495_v0 }
 0xb30   : > { %v4563_v43 = vpop.permute.xlu0 %4562 }
 0xb31   : > { %v4547_v30 = vadd.f32 %v4543_v40, %v4527_v3  ;;  %v9813_v40 = vadd.f32 %v9812_v41, %v9811_v48  ;;  %v9851_v3 = vadd.f32 %v9850_v9, %v9849_v38  ;;  %v6179_v9 = vld [vmem:[%s15543_s0 + $0x38] sm:$0xff] }
 0xb32   : > { %v4541_v24 = vpop.permute.xlu1 %4540 }
 0xb33   : > { %v4546_v50 = vadd.f32 %v4541_v24, %v4526_v35  ;;  %v4567_v51 = vadd.f32 %v4563_v43, %v4547_v30  ;;  %v5713_v24 = vadd.f32 %v9810_v18, %v5568_v28 }
 0xb35   : > { %v5830_v35 = vadd.f32 %v9848_v16, %v5713_v24 }
 0xb36   : > { %v4561_v54 = vpop.permute.xlu1 %4560  ;;  %v9922_v17 = vpop.f32.mrf.mxu1 }
 0xb37   : > { %v4566_v34 = vadd.f32 %v4561_v54, %v4546_v50 }
 0xb38   : > { %v9923_v43 = vpop.f32.mrf.mxu1 }
 0xb39   : > { %v9924_v29 = vadd.f32 %v9923_v43, %v9922_v17  ;;  %v6176_v17 = vld [vmem:[%s15543_s0 + $0x20] sm:$0xff] }
 0xb3a   : > { %v4581_v32 = vpop.permute.xlu1 %4580  ;;  %v9925_v31 = vpop.f32.mrf.mxu1 }
 0xb3b   : > { %v4586_v42 = vadd.f32 %v4581_v32, %v4566_v34 }
 0xb3d   : > { %v4583_v11 = vpop.permute.xlu0 %4582 }
 0xb3e   : > { %v4601_v6 = vpop.permute.xlu1 %4600  ;;  %v9884_v37 = vpop.f32.mrf.mxu0  ;;  %v4587_v0 = vadd.f32 %v4583_v11, %v4567_v51  ;;  %v5575_v11 = vadd.f32 %v9775_v36, %v9737_v45 }
 0xb3f   : > { %v4606_v44 = vadd.f32 %v4601_v6, %v4586_v42 }
 0xb40   : > { %v9885_v47 = vpop.f32.mrf.mxu0 }
 0xb41   : > { %v4612_v21 = vmul.f32 %v4611_v14, %v4606_v44  ;;  %v9886_v15 = vadd.f32 %v9885_v47, %v9884_v37  ;;  %v13804_v47 = vand.u32 4294901760, %v6179_v9 }
 0xb42   : > { %v9887_v49 = vpop.f32.mrf.mxu0 }
 0xb43   : > { %10072 = vmatprep.subr.mxu0 %v13804_v47 }
 0xb44   : > { %v9888_v6 = vpop.f32.mrf.mxu0  ;;  %10073 = vmatpush3.msra.mxu0 %v13804_v47 }
 0xb45   : > { %v9889_v50 = vadd.f32 %v9888_v6, %v9887_v49 }
 0xb51   : > { %v4603_v58 = vpop.permute.xlu0 %4602 }
 0xb52   : > { %v4607_v46 = vadd.f32 %v4603_v58, %v4587_v0  ;;  %v5722_v58 = vadd.f32 %v9813_v40, %v5575_v11 }
 0xb54   : > { %v4613_v61 = vmul.f32 %v4611_v14, %v4607_v46  ;;  %v5841_v2 = vadd.f32 %v9851_v3, %v5722_v58  ;;  %v6178_v46 = vld [vmem:[%s15543_s0 + $0x30] sm:$0xff] }
 0xb55   : > { %v13806_v39 = vand.u32 4294901760, %v6178_v46 }
 0xb57   : > { %10074 = vmatprep.subr.mxu0 %v13806_v39 }
 0xb58   : > { %10075 = vmatpush3.msra.mxu0 %v13806_v39 }
 0xb7b   : > { %v4712_v8 = vpop.permute.xlu1 %4711  ;;  %v4714_v27 = vpop.permute.xlu0 %4713 }
 0xb7c   : > { %v4717_v1 = vadd.f32 %v4712_v8, %v4612_v21  ;;  %v4718_v54 = vadd.f32 %v4714_v27, %v4613_v61  ;;  %v6009_v8 = vadd.f32 %v9886_v15, %v5830_v35  ;;  %v6177_v21 = vld [vmem:[%s15543_s0 + $0x28] sm:$0xff] }
 0xb7d   : > { %v13808_v18 = vand.u32 4294901760, %v6177_v21 }
 0xb7e   : > { %v6120_v41 = vadd.f32 %v9924_v29, %v6009_v8 }
 0xb7f   : > { %v4812_v25 = vpop.permute.xlu1 %4811  ;;  %v13820_v28 = vsub.f32 %v6177_v21, %v13808_v18  ;;  %10076 = vmatprep.subr.mxu0 %v13808_v18 }
 0xb80   : > { %v4817_v5 = vadd.f32 %v4812_v25, %v4717_v1  ;;  %v9926_v25 = vpop.f32.mrf.mxu1  ;;  %v13811_v1 = vand.u32 4294901760, %v6176_v17  ;;  %10077 = vmatpush3.msra.mxu0 %v13808_v18 }
 0xb81   : > { %v9927_v38 = vadd.f32 %v9926_v25, %v9925_v31  ;;  %v13838_v49 = vand.u32 4294901760, %v13820_v28 }
 0xb82   : > { %v13826_v61 = vsub.f32 %v6176_v17, %v13811_v1  ;;  %10078 = vmatprep.subr.mxu0 %v13811_v1 }
 0xb83   : > { %10079 = vmatpush3.msra.mxu0 %v13811_v1 }
 0xb84   : > { %v13842_v24 = vand.u32 4294901760, %v13826_v61 }
 0xb86   : > { %v6320_v11 = vsub.f32 %v13826_v61, %v13842_v24 }
 0xb8c   : > { %v5036_v19 = vpop.permute.xlu1 %5035 }
 0xb8f   : > { %v4814_v23 = vpop.permute.xlu0 %4813 }
 0xb90   : > { %v5040_v13 = vpop.permute.xlu1 %5039  ;;  %v4818_v59 = vadd.f32 %v4814_v23, %v4718_v54  ;;  %v6016_v23 = vadd.f32 %v9889_v50, %v5841_v2 }
 0xb92   : > { %v6127_v37 = vadd.f32 %v9927_v38, %v6016_v23 }
 0xb93   : > { %v4917_v53 = vpop.permute.xlu0 %4916 }
 0xb94   : > { %v4922_v55 = vadd.f32 %v4917_v53, %v4817_v5 }
 0xb95   : > { %v5046_v56 = vpop.permute.xlu1 %5045 }
 0xb97   : > { %v4919_v22 = vpop.permute.xlu0 %4918 }
 0xb98   : > { %v4923_v60 = vadd.f32 %v4919_v22, %v4818_v59  ;;  %v13817_v22 = vsub.f32 %v6178_v46, %v13806_v39  ;;  %v6321_v59 = vand.u32 4294901760, %v6320_v11  ;;  %v15547_v46 = vmov 12  }
 0xb99   : > { %v5050_v42 = vpop.permute.xlu1 %5049 }
 0xb9a   : > { %v13835_v36 = vand.u32 4294901760, %v13817_v22 }
 0xb9b   : > { %v5027_v32 = vpop.permute.xlu0 %5026 }
 0xb9c   : > { %v5032_v7 = vadd.f32 %v5027_v32, %v4922_v55  ;;  %v6306_v54 = vsub.f32 %v13817_v22, %v13835_v36  ;;  %v6313_v55 = vsub.f32 %v13820_v28, %v13838_v49 }
 0xb9e   : > { %v5042_v63 = vmul.f32 %v5036_v19, %v5032_v7  ;;  %v6307_v32 = vand.u32 4294901760, %v6306_v54  ;;  %v6314_v15 = vand.u32 4294901760, %v6313_v55  ;;  %v6175_v7 = vld [vmem:[%s15543_s0 + $0x18] sm:$0xff] }
 0xb9f   : > { %v5029_v52 = vpop.permute.xlu0 %5028  ;;  %v13864_v6 = vand.u32 4294901760, %v6175_v7 }
 0xba0   : > { %v5052_v48 = vadd.f32 %v5046_v56, %v5042_v63  ;;  %v5033_v27 = vadd.f32 %v5029_v52, %v4923_v60  ;;  %v6174_v56 = vld [vmem:[%s15543_s0 + $0x10] sm:$0xff]  ;;  %v6173_v60 = vld [vmem:[%s15543_s0 + $0x8] sm:$0xff]  ;;  %v6172_v52 = vld [vmem:[%s15543_s0] sm:$0xff]  ;;  %s10734_s0 = smov 102  }
 0xba1   : > { %v13868_v58 = vsub.f32 %v6175_v7, %v13864_v6  ;;  %v13870_v35 = vand.u32 4294901760, %v6174_v56  ;;  %10080 = vmatprep.subr.mxu0 %v13864_v6  ;;  %v13881_v31 = vand.u32 4294901760, %v6173_v60 }
 0xba2   : > { %v5054_v30 = vmax.f32 %v5052_v48, 0.0  ;;  %v5043_v34 = vmul.f32 %v5040_v13, %v5033_v27  ;;  %v13814_v13 = vsub.f32 %v6179_v9, %v13804_v47  ;;  %10081 = vmatpush3.msra.mxu0 %v13864_v6  ;;  %v13894_v27 = vand.u32 4294901760, %v6172_v52 }
 0xba3   : > { %v13876_v63 = vand.u32 4294901760, %v13868_v58  ;;  %v13879_v3 = vsub.f32 %v6174_v56, %v13870_v35  ;;  %10082 = vmatprep.subr.mxu0 %v13870_v35  ;;  %v13892_v48 = vsub.f32 %v6173_v60, %v13881_v31  ;;  %v15546_v9 = vmov 9  }
 0xba4   : > { %v5056_v51 = vmin.f32 %v5054_v30, 6.0  ;;  %v5053_v44 = vadd.f32 %v5050_v42, %v5043_v34  ;;  %v13832_v5 = vand.u32 4294901760, %v13814_v13  ;;  %10083 = vmatpush3.msra.mxu0 %v13870_v35  ;;  %v13904_v34 = vsub.f32 %v6172_v52, %v13894_v27 }
 0xba5   : > { %v6327_v8 = vsub.f32 %v13868_v58, %v13876_v63  ;;  %v13889_v50 = vand.u32 4294901760, %v13879_v3  ;;  %10084 = vmatprep.subr.mxu0 %v13881_v31  ;;  %v13901_v30 = vand.u32 4294901760, %v13892_v48 }
 0xba6   : > { %v13791_v57 = vadd.f32 %v6120_v41, %v5056_v51  ;;  %v5055_v14 = vmax.f32 %v5053_v44, 0.0  ;;  %v6299_v40 = vsub.f32 %v13814_v13, %v13832_v5  ;;  %10085 = vmatpush3.msra.mxu0 %v13881_v31  ;;  %v13911_v41 = vand.u32 4294901760, %v13904_v34 }
 0xba7   : > { %v6328_v29 = vand.u32 4294901760, %v6327_v8  ;;  %v6334_v2 = vsub.f32 %v13879_v3, %v13889_v50  ;;  %10086 = vmatprep.subr.mxu0 %v13894_v27  ;;  %v6341_v42 = vsub.f32 %v13892_v48, %v13901_v30 }
 0xba8   : > { %v5057_v19 = vmin.f32 %v5055_v14, 6.0  ;;  %6134 = vrot.lane.b32.xlu1 %v13791_v57, %s15421_s11  ;;  %v6300_v43 = vand.u32 4294901760, %v6299_v40  ;;  %10087 = vmatpush3.msra.mxu0 %v13894_v27  ;;  %v6348_v51 = vsub.f32 %v13904_v34, %v13911_v41 }
 0xba9   : > { %v6335_v25 = vand.u32 4294901760, %v6334_v2  ;;  %10110 = vmatprep.subr.mxu0 %v13814_v13  ;;  %v6342_v23 = vand.u32 4294901760, %v6341_v42 }
 0xbaa   : > { %v13795_v0 = vadd.f32 %v6127_v37, %v5057_v19  ;;  %10091 = vmatprep.subr.mxu1 %v6300_v43  ;;  %v6349_v38 = vand.u32 4294901760, %v6348_v51 }
 0xbab   : > { %10092 = vmatpush3.msra.mxu1 %v6300_v43 }
 0xbac   : > { %6136 = vrot.lane.b32.xlu0 %v13795_v0, %s15421_s11  ;;  %10093 = vmatprep.subr.mxu1 %v6307_v32 }
 0xbad   : > { %10094 = vmatpush3.msra.mxu1 %v6307_v32 }
 0xbae   : > { %10095 = vmatprep.subr.mxu1 %v6314_v15 }
 0xbaf   : > { %10096 = vmatpush3.msra.mxu1 %v6314_v15 }
 0xbb0   : > { %10097 = vmatprep.subr.mxu1 %v6321_v59 }
 0xbb1   : > { %10098 = vmatpush3.msra.mxu1 %v6321_v59 }
 0xbb2   : > { %10099 = vmatprep.subr.mxu1 %v6328_v29 }
 0xbb3   : > { %10100 = vmatpush3.msra.mxu1 %v6328_v29 }
 0xbb4   : > { %10101 = vmatprep.subr.mxu1 %v6335_v25 }
 0xbb5   : > { %10102 = vmatpush3.msra.mxu1 %v6335_v25 }
 0xbb6   : > { %10103 = vmatprep.subr.mxu1 %v6342_v23 }
 0xbb7   : > { %10104 = vmatpush3.msra.mxu1 %v6342_v23 }
 0xbb8   : > { %10105 = vmatprep.subr.mxu1 %v6349_v38 }
 0xbb9   : > { %10106 = vmatpush3.msra.mxu1 %v6349_v38 }
 0xbba   : > { %10129 = vmatprep.subr.mxu1 %v13804_v47 }
 0xc1a   : > { %v6135_v53 = vpop.permute.xlu1 %6134 }
 0xc1b   : > { %6140 = vst.msk [vmem:[#allocation3] sm:$0xff] %vm1503_vm9, %v6135_v53 }
 0xc1e   : > { %v6137_v20 = vpop.permute.xlu0 %6136 }
 0xc1f   : > { %6141 = vst.msk [vmem:[#allocation3 + $0x8] sm:$0xff] %vm1503_vm9, %v6137_v20  ;;  %v15545_v20 = vmov 8  }
 0xc22   : > { %v13823_v45 = vld [vmem:[#allocation3] sm:$0xff] }
 0xc23   : > { %6154 = vrot.lane.b32.xlu1 %v13823_v45, %s15539_s23 }
 0xc26   : > { %v13852_v16 = vld [vmem:[#allocation3 + $0x8] sm:$0xff] }
 0xc27   : > { %6156 = vrot.lane.b32.xlu0 %v13852_v16, %s15539_s23  ;;  %6146 = vrot.lane.b32.xlu1 %v13823_v45, %s10733_s2 }
 0xc2b   : > { %6148 = vrot.lane.b32.xlu0 %v13852_v16, %s10733_s2  ;;  %s15544_s2 = sld [smem:[#allocation16_spill]] }
 0xc31   : > { %v13920_v53 = vld [vmem:[%s15544_s2] sm:$0xff]  ;;  %s15554_s2 = smov 34  }
 0xc95   : > { %v6155_v44 = vpop.permute.xlu1 %6154 }
 0xc96   : > { %v6160_v14 = vmax.f32 %v13823_v45, %v6155_v44 }
 0xc98   : > { %6164 = vrot.lane.b32.xlu1 %v6160_v14, %s10734_s0 }
 0xc99   : > { %v6157_v37 = vpop.permute.xlu0 %6156  ;;  %v6147_v21 = vpop.permute.xlu1 %6146 }
 0xc9a   : > { %v6161_v19 = vmax.f32 %v13852_v16, %v6157_v37  ;;  %v6152_v17 = vmax.f32 %v13791_v57, %v6147_v21  ;;  %v15552_v21 = vld [vmem:[#allocation36_spill] sm:$0xff] }
 0xc9c   : > { %6166 = vrot.lane.b32.xlu0 %v6161_v19, %s10734_s0  ;;  %6818 = vperm.xlu1 %10514, %v13920_v53   ;;  %s15548_s0 = sld [smem:[#allocation15_spill]] }
 0xc9d   : > { %v6149_v45 = vpop.permute.xlu0 %6148 }
 0xc9e   : > { %v6153_v55 = vmax.f32 %v13795_v0, %v6149_v45  ;;  %v15553_v45 = vld [vmem:[#allocation32_spill] sm:$0xff] }
 0xca0   : > { %6824 = vperm.xlu0 %10515, %v13920_v53   ;;  %10517 = vset.pattern.permute.xlu1 %v15546_v9 }
 0xca4   : > { %10516 = vset.pattern.permute.xlu0 %v15545_v20 }
 0xca5   : > { %6915 = vperm.xlu0 %10516, %v13920_v53  }
 0xca9   : > { %10519 = vset.pattern.permute.xlu0 %v15547_v46 }
 0xcaa   : > { %7011 = vperm.xlu0 %10519, %v13920_v53  }
 0xcae   : > { %10522 = vset.pattern.permute.xlu0 %v15471_v62 }
 0xcaf   : > { %6908 = vperm.xlu0 %10522, %v13920_v53  }
 0xcb3   : > { %10527 = vset.pattern.permute.xlu0 %v15538_v10 }
 0xd0a   : > { %v6165_v40 = vpop.permute.xlu1 %6164 }
 0xd0b   : > { %v6170_v54 = vmax.f32 %v6152_v17, %v6165_v40 }
 0xd0d   : > { %v6181_v16 = vsel %vm2523_vm11, %v6170_v54, 0 }
 0xd0e   : > { %v6259_v43 = vand.u32 4294901760, %v6181_v16  ;;  %v6167_v32 = vpop.permute.xlu0 %6166 }
 0xd0f   : > { %v6171_v11 = vmax.f32 %v6153_v55, %v6167_v32 }
 0xd10   : > { %v6260_v15 = vsub.f32 %v6181_v16, %v6259_v43  ;;  %10107 = vmatprep.mubr.f32.mxu1 %v6259_v43 }
 0xd11   : > { %v6184_v59 = vsel %vm2523_vm11, %v6171_v11, 0 }
 0xd12   : > { %v13936_v7 = vand.u32 4294901760, %v6184_v59  ;;  %v6261_v56 = vand.u32 4294901760, %v6260_v15 }
 0xd14   : > { %v6270_v60 = vsub.f32 %v6184_v59, %v13936_v7  ;;  %10108 = vmatmul.mubr.f32.vlgmr.msra.gmra.mxu1 %v13936_v7  ;;  %v6262_v52 = vsub.f32 %v6260_v15, %v6261_v56 }
 0xd15   : > { %10130 = vmatpush3.msra.mxu1 %v13804_v47  ;;  %10145 = vmatprep.mubr.f32.mxu1 %v6261_v56 }
 0xd16   : > { %v6271_v8 = vand.u32 4294901760, %v6270_v60  ;;  %10131 = vmatprep.subr.mxu1 %v13806_v39  ;;  %v6263_v29 = vand.u32 4294901760, %v6262_v52 }
 0xd17   : > { %10132 = vmatpush3.msra.mxu1 %v13806_v39  ;;  %v6819_v42 = vpop.permute.xlu1 %6818 }
 0xd18   : > { %v6272_v2 = vsub.f32 %v6270_v60, %v6271_v8  ;;  %10133 = vmatprep.subr.mxu1 %v13808_v18  ;;  %10088 = vmatprep.mubr.f32.mxu0 %v6263_v29  ;;  %v15555_v29 = vmov 11  }
 0xd19   : > { %10134 = vmatpush3.msra.mxu1 %v13808_v18 }
 0xd1a   : > { %v6273_v25 = vand.u32 4294901760, %v6272_v2  ;;  %10135 = vmatprep.subr.mxu1 %v13811_v1  ;;  %v15556_v2 = vmov 7  }
 0xd1b   : > { %10136 = vmatpush3.msra.mxu1 %v13811_v1  ;;  %v6825_v51 = vpop.permute.xlu0 %6824 }
 0xd1c   : > { %10137 = vmatprep.subr.mxu1 %v13864_v6  ;;  %10089 = vmatmul.mubr.f32.vlgmr.msra.gmra.mxu0 %v6273_v25  ;;  %v15557_v25 = vmov 10  }
 0xd1d   : > { %10111 = vmatpush3.msra.mxu0 %v13814_v13  ;;  %10138 = vmatpush3.msra.mxu1 %v13864_v6 }
 0xd1e   : > { %10112 = vmatprep.subr.mxu0 %v13817_v22  ;;  %10126 = vmatprep.mubr.f32.mxu0 %v6260_v15 }
 0xd1f   : > { %10139 = vmatprep.subr.mxu1 %v13870_v35  ;;  %10113 = vmatpush3.msra.mxu0 %v13817_v22  ;;  %v6768_v22 = vld [vmem:[%s15548_s0] sm:$0xf]  ;;  %s15559_s0 = smov 112  }
 0xd20   : > { %10140 = vmatpush3.msra.mxu1 %v13870_v35  ;;  %10114 = vmatprep.subr.mxu0 %v13820_v28 }
 0xd21   : > { %10141 = vmatprep.subr.mxu1 %v13881_v31  ;;  %10115 = vmatpush3.msra.mxu0 %v13820_v28 }
 0xd22   : > { %10142 = vmatpush3.msra.mxu1 %v13881_v31  ;;  %10116 = vmatprep.subr.mxu0 %v13826_v61 }
 0xd23   : > { %10143 = vmatprep.subr.mxu1 %v13894_v27  ;;  %10117 = vmatpush3.msra.mxu0 %v13826_v61 }
 0xd24   : > { %10144 = vmatpush3.msra.mxu1 %v13894_v27  ;;  %10118 = vmatprep.subr.mxu0 %v13868_v58 }
 0xd25   : > { %10146 = vmatmul.mubr.f32.vlgmr.msra.gmra.mxu1 %v6271_v8  ;;  %10167 = vmatprep.subr.mxu1 %v13804_v47 }
 0xd26   : > { %10119 = vmatpush3.msra.mxu0 %v13868_v58  ;;  %10168 = vmatpush3.msra.mxu1 %v13804_v47  ;;  %v15549_v47 = vld [vmem:[#allocation64_spill] sm:$0xff] }
 0xd27   : > { %10183 = vmatprep.mubr.f32.mxu1 %v6259_v43  ;;  %10120 = vmatprep.subr.mxu0 %v13879_v3 }
 0xd28   : > { %10169 = vmatprep.subr.mxu1 %v13806_v39  ;;  %10121 = vmatpush3.msra.mxu0 %v13879_v3 }
 0xd29   : > { %10170 = vmatpush3.msra.mxu1 %v13806_v39  ;;  %10122 = vmatprep.subr.mxu0 %v13892_v48  ;;  %v15550_v39 = vld [vmem:[#allocation53_spill] sm:$0xff] }
 0xd2a   : > { %10171 = vmatprep.subr.mxu1 %v13808_v18  ;;  %10123 = vmatpush3.msra.mxu0 %v13892_v48 }
 0xd2b   : > { %10172 = vmatpush3.msra.mxu1 %v13808_v18  ;;  %10124 = vmatprep.subr.mxu0 %v13904_v34  ;;  %v6771_v18 = vpack.c.bf16 %v15550_v39, %v15549_v47  ;;  %v15558_v47 = vmov 4  }
 0xd2c   : > { %10173 = vmatprep.subr.mxu1 %v13811_v1  ;;  %10125 = vmatpush3.msra.mxu0 %v13904_v34 }
 0xd2d   : > { %10174 = vmatpush3.msra.mxu1 %v13811_v1  ;;  %10127 = vmatmul.mubr.f32.vlgmr.msra.gmra.mxu0 %v6270_v60  ;;  %v15551_v1 = vld [vmem:[#allocation61_spill] sm:$0xff] }
 0xd2e   : > { %10148 = vmatprep.subr.mxu0 %v13832_v5  ;;  %10175 = vmatprep.subr.mxu1 %v13864_v6  ;;  %v6770_v13 = vpack.c.bf16 %v15470_v12, %v15551_v1 }
 0xd2f   : > { %10149 = vmatpush3.msra.mxu0 %v13832_v5  ;;  %10164 = vmatprep.mubr.f32.mxu0 %v6259_v43 }
 0xd30   : > { %10176 = vmatpush3.msra.mxu1 %v13864_v6  ;;  %10150 = vmatprep.subr.mxu0 %v13835_v36 }
 0xd31   : > { %10177 = vmatprep.subr.mxu1 %v13870_v35  ;;  %10151 = vmatpush3.msra.mxu0 %v13835_v36 }
 0xd32   : > { %10178 = vmatpush3.msra.mxu1 %v13870_v35  ;;  %10152 = vmatprep.subr.mxu0 %v13838_v49 }
 0xd33   : > { %10179 = vmatprep.subr.mxu1 %v13881_v31  ;;  %10153 = vmatpush3.msra.mxu0 %v13838_v49 }
 0xd34   : > { %10180 = vmatpush3.msra.mxu1 %v13881_v31  ;;  %10154 = vmatprep.subr.mxu0 %v13842_v24 }
 0xd35   : > { %10181 = vmatprep.subr.mxu1 %v13894_v27  ;;  %10155 = vmatpush3.msra.mxu0 %v13842_v24 }
 0xd36   : > { %10182 = vmatpush3.msra.mxu1 %v13894_v27  ;;  %10156 = vmatprep.subr.mxu0 %v13876_v63 }
 0xd37   : > { %10184 = vmatmul.mubr.f32.vlgmr.msra.gmra.mxu1 %v13936_v7  ;;  %10157 = vmatpush3.msra.mxu0 %v13876_v63 }
 0xd38   : > { %10158 = vmatprep.subr.mxu0 %v13889_v50  ;;  %7145 = vmatprep.mubr.bf16.mxu1 %v15538_v10 }
 0xd39   : > { %10159 = vmatpush3.msra.mxu0 %v13889_v50 }
 0xd3a   : > { %10160 = vmatprep.subr.mxu0 %v13901_v30 }
 0xd3b   : > { %10161 = vmatpush3.msra.mxu0 %v13901_v30 }
 0xd3c   : > { %10162 = vmatprep.subr.mxu0 %v13911_v41 }
 0xd3d   : > { %10163 = vmatpush3.msra.mxu0 %v13911_v41 }
 0xd3e   : > { %10165 = vmatmul.mubr.f32.vlgmr.msra.gmra.mxu0 %v13936_v7  ;;  %6789 = vmatprep.subr.bf16.mxu0 %v6771_v18 }
 0xd3f   : > { %6790 = vmatpush1.bf16.msra.mxu0 %v6770_v13  ;;  %6807 = vmatprep.mubr.bf16.mxu0 %v15538_v10  ;;  %v6916_v13 = vpop.permute.xlu0 %6915 }
 0xd42   : > { %9634 = vmatmul.mubr.msk.bf16.vlgmr.msra.gmra.mxu0 %vm1442_vm3, %v6768_v22 }
 0xd43   : > { %7195 = vmatprep.mubr.bf16.mxu0 %v15538_v10 }
 0xdd4   : > { %v10109_v28 = vpop.f32.mrf.mxu1 }
 0xdd6   : > { %v6386_v36 = vpop.f32.mrf.mxu1 }
 0xddc   : > { %v10090_v61 = vpop.f32.mrf.mxu0 }
 0xddd   : > { %v6393_v5 = vadd.f32 %v10109_v28, %v10090_v61 }
 0xdde   : > { %v6265_v49 = vpop.f32.mrf.mxu0 }
 0xddf   : > { %v6387_v24 = vadd.f32 %v6386_v36, %v6265_v49  ;;  %v7012_v36 = vpop.permute.xlu0 %7011 }
 0xde5   : > { %v10147_v6 = vpop.f32.mrf.mxu1 }
 0xde7   : > { %v6568_v31 = vpop.f32.mrf.mxu1 }
 0xded   : > { %v10128_v58 = vpop.f32.mrf.mxu0 }
 0xdee   : > { %v6488_v12 = vadd.f32 %v10128_v58, %v6393_v5 }
 0xdef   : > { %v6480_v35 = vpop.f32.mrf.mxu0 }
 0xdf0   : > { %v6481_v63 = vadd.f32 %v6480_v35, %v6387_v24  ;;  %v6577_v3 = vadd.f32 %v10147_v6, %v6488_v12 }
 0xdf2   : > { %v6569_v50 = vadd.f32 %v6568_v31, %v6481_v63 }
 0xdf7   : > { %v10185_v48 = vpop.f32.mrf.mxu1 }
 0xdf9   : > { %v6756_v44 = vpop.f32.mrf.mxu1 }
 0xdfe   : > { %v10166_v27 = vpop.f32.mrf.mxu0 }
 0xdff   : > { %v6678_v30 = vadd.f32 %v10166_v27, %v6577_v3 }
 0xe00   : > { %v6671_v34 = vpop.f32.mrf.mxu0 }
 0xe01   : > { %v6763_v41 = vadd.f32 %v10185_v48, %v6678_v30  ;;  %v6672_v23 = vadd.f32 %v6671_v34, %v6569_v50 }
 0xe02   : > { %v6809_v38 = vpop.f32.mrf.mxu0 }
 0xe03   : > { %v6757_v14 = vadd.f32 %v6756_v44, %v6672_v23  ;;  %v6821_v37 = vmul.f32 %v6819_v42, %v6809_v38  ;;  %v14014_v17 = vadd.f32 %v6763_v41, %v15552_v21 }
 0xe04   : > { %v6811_v19 = vpop.f32.mrf.mxu0 }
 0xe05   : > { %v14017_v40 = vadd.f32 %v6757_v14, %v15553_v45  ;;  %v6827_v54 = vadd.f32 %v6825_v51, %v6821_v37  ;;  %v6822_v55 = vmul.f32 %v6819_v42, %v6811_v19  ;;  %v15561_v14 = vmov 3   ;;  %v6909_v37 = vpop.permute.xlu0 %6908 }
 0xe06   : > { %v6813_v16 = vpop.f32.mrf.mxu0 }
 0xe07   : > { %v8710_v43 = vpack.c.bf16 %v14014_v17, %v14017_v40  ;;  %v6829_v32 = vmax.f32 %v6827_v54, 0.0  ;;  %v6828_v11 = vadd.f32 %v6825_v51, %v6822_v55 }
 0xe08   : > { %v6814_v15 = vpop.f32.mrf.mxu0 }
 0xe09   : > { %v6831_v59 = vmin.f32 %v6829_v32, 6.0  ;;  %v6830_v7 = vmax.f32 %v6828_v11, 0.0 }
 0xe0b   : > { %v6832_v56 = vmin.f32 %v6830_v7, 6.0  ;;  %6835 = vrot.lane.b32.xlu1 %v6831_v59, %s15554_s2  ;;  %v14022_v60 = vpack.c.bf16 %v6831_v59, %v6831_v59 }
 0xe0d   : > { %v14024_v52 = vpack.c.bf16 %v6832_v56, %v6832_v56  ;;  %v7158_v8 = vsel %vm7106_vm13, %v14022_v60, 0 }
 0xe0f   : > { %9637 = vmatprep.subr.msk.bf16.mxu0 %vm7106_vm13, %v14024_v52  ;;  %6837 = vrot.lane.b32.xlu1 %v6832_v56, %s15554_s2 }
 0xe10   : > { %7178 = vmatpush1.bf16.msra.mxu0 %v7158_v8 }
 0xe13   : > { %6987 = vperm.xlu1 %10517, %v13920_v53  }
 0xe17   : > { %10518 = vset.pattern.permute.xlu1 %v15555_v29 }
 0xe18   : > { %6939 = vperm.xlu1 %10518, %v13920_v53  }
 0xe1c   : > { %10520 = vset.pattern.permute.xlu1 %v15556_v2 }
 0xe1d   : > { %6857 = vperm.xlu1 %10520, %v13920_v53  }
 0xe21   : > { %10521 = vset.pattern.permute.xlu1 %v15557_v25 }
 0xe22   : > { %6881 = vperm.xlu1 %10521, %v13920_v53  }
 0xe26   : > { %10523 = vset.pattern.permute.xlu1 %v15474_v33 }
 0xe27   : > { %6980 = vperm.xlu1 %10523, %v13920_v53  }
 0xe2b   : > { %10524 = vset.pattern.permute.xlu1 %v15558_v47 }
 0xe7d   : > { %v6836_v39 = vpop.permute.xlu1 %6835 }
 0xe7e   : > { %6843 = vst.msk [vmem:[#allocation2] sm:$0xff] %vm2219_vm14, %v6836_v39 }
 0xe81   : > { %v6838_v18 = vpop.permute.xlu1 %6837 }
 0xe82   : > { %v14043_v1 = vsel %vm1221_vm12, %v6836_v39, %v6838_v18  ;;  %6845 = vst.msk [vmem:[#allocation2 + $0x10] sm:$0xff] %vm1221_vm12, %v6838_v18 }
 0xe83   : > { %6844 = vst [vmem:[#allocation2 + $0x8] sm:$0xff] %v14043_v1  ;;  %v6919_v63 = vmul.f32 %v6916_v13, %v14043_v1  ;;  %v7015_v30 = vmul.f32 %v7012_v36, %v14043_v1  ;;  %v6912_v18 = vmul.f32 %v6909_v37, %v14043_v1 }
 0xe85   : > { %v14047_v22 = vld [vmem:[#allocation2] sm:$0xff] }
 0xe86   : > { %v6918_v28 = vmul.f32 %v6916_v13, %v14047_v22  ;;  %v7014_v49 = vmul.f32 %v7012_v36, %v14047_v22  ;;  %v6911_v39 = vmul.f32 %v6909_v37, %v14047_v22 }
 0xe88   : > { %6924 = vrot.lane.b32.xlu1 %v6918_v28, %s15559_s0 }
 0xe89   : > { %v14055_v58 = vld [vmem:[#allocation2 + $0x10] sm:$0xff] }
 0xe8a   : > { %v6920_v35 = vmul.f32 %v6916_v13, %v14055_v58  ;;  %v7016_v27 = vmul.f32 %v7012_v36, %v14055_v58  ;;  %v6913_v11 = vmul.f32 %v6909_v37, %v14055_v58  ;;  %v15563_v37 = vld [vmem:[#allocation43_spill] sm:$0xff] }
 0xe8e   : > { %v6988_v61 = vpop.permute.xlu1 %6987 }
 0xe8f   : > { %v6990_v5 = vmul.f32 %v6988_v61, %v14047_v22  ;;  %v6992_v12 = vmul.f32 %v6988_v61, %v14055_v58  ;;  %v6991_v50 = vmul.f32 %v6988_v61, %v14043_v1 }
 0xe91   : > { %6996 = vrot.lane.b32.xlu0 %v6990_v5, %s15559_s0 }
 0xe93   : > { %v6940_v24 = vpop.permute.xlu1 %6939 }
 0xe94   : > { %v6942_v6 = vmul.f32 %v6940_v24, %v14047_v22  ;;  %v6944_v3 = vmul.f32 %v6940_v24, %v14055_v58  ;;  %v6943_v31 = vmul.f32 %v6940_v24, %v14043_v1 }
 0xe95   : > { %7020 = vrot.lane.b32.xlu0 %v7014_v49, %s15560_s3 }
 0xe96   : > { %6948 = vrot.lane.b32.xlu1 %v6942_v6, %s15560_s3 }
 0xe98   : > { %v6858_v48 = vpop.permute.xlu1 %6857 }
 0xe99   : > { %7000 = vrot.lane.b32.xlu0 %v6992_v12, %s15559_s0  ;;  %v6860_v34 = vmul.f32 %v6858_v48, %v14047_v22  ;;  %v6862_v41 = vmul.f32 %v6858_v48, %v14055_v58  ;;  %v6861_v38 = vmul.f32 %v6858_v48, %v14043_v1 }
 0xe9a   : > { %6928 = vrot.lane.b32.xlu1 %v6920_v35, %s15559_s0 }
 0xe9d   : > { %6926 = vrot.lane.b32.xlu0 %v6919_v63, %s15559_s0  ;;  %v6882_v42 = vpop.permute.xlu1 %6881 }
 0xe9e   : > { %6952 = vrot.lane.b32.xlu1 %v6944_v3, %s15560_s3  ;;  %v6884_v23 = vmul.f32 %v6882_v42, %v14047_v22  ;;  %v6885_v51 = vmul.f32 %v6882_v42, %v14043_v1  ;;  %v6886_v44 = vmul.f32 %v6882_v42, %v14055_v58 }
 0xea1   : > { %6950 = vrot.lane.b32.xlu0 %v6943_v31, %s15560_s3 }
 0xea2   : > { %6998 = vrot.lane.b32.xlu1 %v6991_v50, %s15559_s0  ;;  %v6981_v19 = vpop.permute.xlu1 %6980 }
 0xea3   : > { %v6983_v3 = vmul.f32 %v6981_v19, %v14047_v22  ;;  %v6984_v31 = vmul.f32 %v6981_v19, %v14043_v1  ;;  %v6985_v48 = vmul.f32 %v6981_v19, %v14055_v58  ;;  %v15565_v19 = vld [vmem:[#allocation56_spill] sm:$0xff] }
 0xea5   : > { %7024 = vrot.lane.b32.xlu0 %v7016_v27, %s15560_s3 }
 0xea6   : > { %7022 = vrot.lane.b32.xlu1 %v7015_v30, %s15560_s3 }
 0xea9   : > { %6866 = vrot.lane.b32.xlu0 %v6860_v34, %s15559_s0 }
 0xeaa   : > { %6850 = vperm.xlu1 %10524, %v13920_v53  }
 0xead   : > { %6870 = vrot.lane.b32.xlu0 %v6862_v41, %s15559_s0 }
 0xeae   : > { %6890 = vrot.lane.b32.xlu1 %v6884_v23, %s15560_s3 }
 0xeaf   : > { %10525 = vset.pattern.permute.xlu1 %v15528_v4 }
 0xeb1   : > { %6892 = vrot.lane.b32.xlu0 %v6885_v51, %s15560_s3 }
 0xeb2   : > { %6894 = vrot.lane.b32.xlu1 %v6886_v44, %s15560_s3 }
 0xeb6   : > { %7055 = vperm.xlu1 %10525, %v13920_v53  }
 0xeba   : > { %6868 = vrot.lane.b32.xlu1 %v6861_v38, %s15559_s0 }
 0xebb   : > { %10526 = vset.pattern.permute.xlu1 %v15561_v14 }
 0xefa   : > { %v6925_v45 = vpop.permute.xlu1 %6924 }
 0xf03   : > { %v6997_v21 = vpop.permute.xlu0 %6996 }
 0xf07   : > { %v7021_v54 = vpop.permute.xlu0 %7020 }
 0xf08   : > { %v6949_v55 = vpop.permute.xlu1 %6948 }
 0xf0b   : > { %v7001_v16 = vpop.permute.xlu0 %7000 }
 0xf0c   : > { %v6929_v32 = vpop.permute.xlu1 %6928  ;;  %v7009_v23 = vadd.f32 %v7001_v16, %v6985_v48 }
 0xf0d   : > { %v6937_v15 = vadd.f32 %v6929_v32, %v6913_v11 }
 0xf0f   : > { %v6927_v59 = vpop.permute.xlu0 %6926 }
 0xf10   : > { %v6930_v7 = vsel %vm2249_vm15, %v6925_v45, %v6927_v59  ;;  %v6931_v56 = vsel %vm2249_vm15, %v6927_v59, %v6929_v32  ;;  %v6953_v8 = vpop.permute.xlu1 %6952  ;;  %v15564_v45 = vld [vmem:[#allocation82_spill] sm:$0xff] }
 0xf11   : > { %v6961_v13 = vadd.f32 %v6953_v8, %v6937_v15  ;;  %v6935_v28 = vadd.f32 %v6930_v7, %v6911_v39  ;;  %v6936_v61 = vadd.f32 %v6931_v56, %v6912_v18 }
 0xf13   : > { %v6951_v5 = vpop.permute.xlu0 %6950  ;;  %6969 = vrot.lane.b32.xlu0 %v6961_v13, %s15539_s23 }
 0xf14   : > { %v6954_v36 = vsel %vm2274_vm1, %v6949_v55, %v6951_v5  ;;  %v6955_v49 = vsel %vm2274_vm1, %v6951_v5, %v6953_v8  ;;  %v6999_v24 = vpop.permute.xlu1 %6998 }
 0xf15   : > { %v6959_v6 = vadd.f32 %v6954_v36, %v6935_v28  ;;  %v6960_v12 = vadd.f32 %v6955_v49, %v6936_v61  ;;  %v7002_v35 = vsel %vm2249_vm15, %v6997_v21, %v6999_v24  ;;  %v7003_v63 = vsel %vm2249_vm15, %v6999_v24, %v7001_v16 }
 0xf16   : > { %v7007_v27 = vadd.f32 %v7002_v35, %v6983_v3  ;;  %v7008_v30 = vadd.f32 %v7003_v63, %v6984_v31 }
 0xf17   : > { %v7025_v50 = vpop.permute.xlu0 %7024  ;;  %6965 = vrot.lane.b32.xlu0 %v6959_v6, %s15539_s23  ;;  %6967 = vrot.lane.b32.xlu1 %v6960_v12, %s15539_s23 }
 0xf18   : > { %v7023_v34 = vpop.permute.xlu1 %7022  ;;  %v7033_v38 = vadd.f32 %v7025_v50, %v7009_v23 }
 0xf19   : > { %v7026_v42 = vsel %vm2274_vm1, %v7021_v54, %v7023_v34  ;;  %v7027_v41 = vsel %vm2274_vm1, %v7023_v34, %v7025_v50  ;;  %v14117_v54 = vld [vmem:[%s15562_s5] sm:$0x3]  ;;  %v15567_v34 = vld [vmem:[#allocation44_spill] sm:$0xff]  ;;  %s15569_s5 = sld [smem:[#allocation18_spill]] }
 0xf1a   : > { %v7031_v51 = vadd.f32 %v7026_v42, %v7007_v27  ;;  %v7032_v44 = vadd.f32 %v7027_v41, %v7008_v30  ;;  %v7036_v32 = vmul.f32 %v7033_v38, %v15565_v19  ;;  %9638 = vmatmul.mubr.msk.bf16.vlgmr.msra.gmra.mxu0 %vm4432_vm4, %v14117_v54  ;;  %v15566_v30 = vld [vmem:[#allocation57_spill] sm:$0xff]  ;;  %v15568_v41 = vld [vmem:[#allocation46_spill] sm:$0xff] }
 0xf1b   : > { %7578 = vmatprep.mubr.bf16.mxu0 %v15538_v10  ;;  %v6867_v15 = vpop.permute.xlu0 %6866 }
 0xf1c   : > { %v7034_v21 = vmul.f32 %v7031_v51, %v15563_v37  ;;  %v7035_v55 = vmul.f32 %v7032_v44, %v15564_v45 }
 0xf1e   : > { %7042 = vrot.lane.b32.xlu1 %v7035_v55, %s15540_s10  ;;  %7040 = vrot.lane.b32.xlu0 %v7034_v21, %s15540_s10 }
 0xf1f   : > { %v6871_v7 = vpop.permute.xlu0 %6870 }
 0xf22   : > { %7062 = vperm.xlu1 %10526, %v13920_v53   ;;  %7044 = vrot.lane.b32.xlu0 %v7036_v32, %s15540_s10 }
 0xf23   : > { %v6893_v8 = vpop.permute.xlu0 %6892 }
 0xf25   : > { %v6851_v16 = vpop.permute.xlu1 %6850 }
 0xf26   : > { %10528 = vset.pattern.permute.xlu1 %v15537_v26  ;;  %v6853_v28 = vmul.f32 %v6851_v16, %v14047_v22  ;;  %v6854_v61 = vmul.f32 %v6851_v16, %v14043_v1  ;;  %v6855_v5 = vmul.f32 %v6851_v16, %v14055_v58 }
 0xf28   : > { %v6879_v6 = vadd.f32 %v6871_v7, %v6855_v5 }
 0xf29   : > { %v6891_v11 = vpop.permute.xlu1 %6890 }
 0xf2a   : > { %v6896_v35 = vsel %vm2274_vm1, %v6891_v11, %v6893_v8 }
 0xf2d   : > { %v6895_v59 = vpop.permute.xlu1 %6894 }
 0xf2e   : > { %v6897_v63 = vsel %vm2274_vm1, %v6893_v8, %v6895_v59  ;;  %v6903_v3 = vadd.f32 %v6895_v59, %v6879_v6  ;;  %v10735_v59 = vmov 1983009808  }
 0xf30   : > { %v6906_v58 = vmul.f32 %v6903_v3, %v15566_v30 }
 0xf31   : > { %v7056_v56 = vpop.permute.xlu1 %7055 }
 0xf35   : > { %v6869_v39 = vpop.permute.xlu1 %6868 }
 0xf36   : > { %v6872_v18 = vsel %vm2249_vm15, %v6867_v15, %v6869_v39  ;;  %v6873_v13 = vsel %vm2249_vm15, %v6869_v39, %v6871_v7  ;;  %v7083_v7 = vunpack.c.l.s4 %v10735_v59 }
 0xf37   : > { %v6877_v36 = vadd.f32 %v6872_v18, %v6853_v28  ;;  %v6878_v49 = vadd.f32 %v6873_v13, %v6854_v61 }
 0xf39   : > { %v6901_v31 = vadd.f32 %v6896_v35, %v6877_v36  ;;  %v6902_v50 = vadd.f32 %v6897_v63, %v6878_v49  ;;  %v7084_v36 = vunpack.c.0.s8 %v7083_v7  ;;  %v15570_v35 = vld [vmem:[#allocation33_spill] sm:$0xff] }
 0xf3b   : > { %v6904_v42 = vmul.f32 %v6901_v31, %v15567_v34  ;;  %v6905_v23 = vmul.f32 %v6902_v50, %v15568_v41  ;;  %v14137_v63 = vsub.s32 %v7084_v36, %v15570_v35 }
 0xf85   : > { %v6970_v53 = vpop.permute.xlu0 %6969 }
 0xf86   : > { %v6978_v21 = vadd.f32 %v6970_v53, %v6906_v58 }
 0xf89   : > { %v6966_v24 = vpop.permute.xlu0 %6965  ;;  %v6968_v12 = vpop.permute.xlu1 %6967 }
 0xf8a   : > { %v6971_v22 = vsel %vm2369_vm5, %v6966_v24, %v6968_v12  ;;  %v6972_v1 = vsel %vm2369_vm5, %v6968_v12, %v6970_v53 }
 0xf8b   : > { %v6976_v55 = vadd.f32 %v6971_v22, %v6904_v42  ;;  %v6977_v32 = vadd.f32 %v6972_v1, %v6905_v23 }
 0xf90   : > { %v7041_v48 = vpop.permute.xlu0 %7040  ;;  %v7043_v27 = vpop.permute.xlu1 %7042 }
 0xf91   : > { %v7046_v44 = vsel %vm2464_vm7, %v7041_v48, %v7043_v27 }
 0xf92   : > { %v7051_v16 = vadd.f32 %v7046_v44, %v6976_v55 }
 0xf94   : > { %v7045_v51 = vpop.permute.xlu0 %7044  ;;  %v7058_v8 = vmul.f32 %v7056_v56, %v7051_v16 }
 0xf95   : > { %v7047_v38 = vsel %vm2464_vm7, %v7043_v27, %v7045_v51  ;;  %v7053_v15 = vadd.f32 %v7045_v51, %v6978_v21  ;;  %v14155_v27 = vld [vmem:[%s15569_s5] sm:$0xf]  ;;  %s15572_s5 = sld [smem:[#allocation19_spill]] }
 0xf96   : > { %v7052_v11 = vadd.f32 %v7047_v38, %v6977_v32 }
 0xf97   : > { %v7060_v18 = vmul.f32 %v7056_v56, %v7053_v15 }
 0xf98   : > { %v7059_v39 = vmul.f32 %v7056_v56, %v7052_v11  ;;  %v7088_v56 = vrot.slane %v14117_v54, %v14137_v63 }
 0xf9d   : > { %v7063_v13 = vpop.permute.xlu1 %7062 }
 0xf9e   : > { %v7065_v28 = vadd.f32 %v7063_v13, %v7058_v8  ;;  %v7066_v61 = vadd.f32 %v7063_v13, %v7059_v39  ;;  %v7067_v5 = vadd.f32 %v7063_v13, %v7060_v18 }
 0xfa0   : > { %v7068_v49 = vmax.f32 %v7065_v28, 0.0  ;;  %v7069_v24 = vmax.f32 %v7066_v61, 0.0  ;;  %v7070_v6 = vmax.f32 %v7067_v5, 0.0 }
 0xfa2   : > { %v7071_v53 = vmin.f32 %v7068_v49, 6.0  ;;  %v7072_v12 = vmin.f32 %v7069_v24, 6.0  ;;  %v7073_v3 = vmin.f32 %v7070_v6, 6.0 }
 0xfa4   : > { %v14139_v31 = vpack.c.bf16 %v7071_v53, %v7071_v53  ;;  %v14141_v50 = vpack.c.bf16 %v7072_v12, %v7072_v12  ;;  %v14149_v48 = vpack.c.bf16 %v7073_v3, %v7073_v3 }
 0xfa6   : > { %7096 = vrot.lane.b32.xlu1 %v14141_v50, %s15571_s6  ;;  %7094 = vrot.lane.b32.xlu0 %v14139_v31, %s15571_s6 }
 0xfaa   : > { %7098 = vrot.lane.b32.xlu0 %v14149_v48, %s15571_s6  ;;  %7089 = vrot.lane.b32.xlu1 %v7088_v56, %s15342_s26 }
 0xfae   : > { %7206 = vperm.xlu0 %10527, %v14155_v27   ;;  %7212 = vperm.xlu1 %10528, %v14155_v27  }
 0xfb2   : > { %10529 = vset.pattern.permute.xlu1 %v15545_v20  ;;  %10530 = vset.pattern.permute.xlu0 %v15546_v9 }
 0xfb3   : > { %7305 = vperm.xlu1 %10529, %v14155_v27  }
 0xfb7   : > { %10531 = vset.pattern.permute.xlu1 %v15555_v29 }
 0xfda   : > { %v7197_v54 = vpop.f32.mrf.mxu0 }
 0xfdc   : > { %v7199_v22 = vpop.f32.mrf.mxu0 }
 0xfde   : > { %v7201_v1 = vpop.f32.mrf.mxu0 }
 0xfe0   : > { %v7202_v58 = vpop.f32.mrf.mxu0 }
0x1018   : > { %v7097_v42 = vpop.permute.xlu1 %7096  ;;  %v7095_v23 = vpop.permute.xlu0 %7094 }
0x1019   : > { %v7101_v51 = vsel %vm2502_vm2, %v7095_v23, %v7097_v42 }
0x101a   : > { %v7108_v21 = vsel %vm7106_vm13, %v7101_v51, 0 }
0x101c   : > { %v7099_v44 = vpop.permute.xlu0 %7098  ;;  %v7090_v55 = vpop.permute.xlu1 %7089 }
0x101d   : > { %v7102_v38 = vsel %vm2502_vm2, %v7097_v42, %v7099_v44 }
0x101e   : > { %9635 = vmatprep.subr.msk.bf16.mxu1 %vm7106_vm13, %v7102_v38 }
0x101f   : > { %7128 = vmatpush1.bf16.msra.mxu1 %v7108_v21 }
0x1022   : > { %9636 = vmatmul.mubr.msk.bf16.vlgmr.msra.gmra.mxu1 %vm4432_vm4, %v7090_v55 }
0x1023   : > { %7528 = vmatprep.mubr.bf16.mxu1 %v15538_v10 }
0x1029   : > { %v7207_v16 = vpop.permute.xlu0 %7206  ;;  %v7213_v59 = vpop.permute.xlu1 %7212 }
0x102e   : > { %v7306_v35 = vpop.permute.xlu1 %7305 }
0x10e2   : > { %v7147_v32 = vpop.f32.mrf.mxu1 }
0x10e3   : > { %v7198_v11 = vadd.f32 %v7197_v54, %v7147_v32 }
0x10e4   : > { %v7149_v15 = vpop.f32.mrf.mxu1 }
0x10e5   : > { %v7200_v7 = vadd.f32 %v7199_v22, %v7149_v15  ;;  %v7209_v8 = vmul.f32 %v7207_v16, %v7198_v11 }
0x10e6   : > { %v7151_v39 = vpop.f32.mrf.mxu1 }
0x10e7   : > { %v7210_v18 = vmul.f32 %v7207_v16, %v7200_v7  ;;  %v7215_v13 = vadd.f32 %v7213_v59, %v7209_v8 }
0x10e8   : > { %v7152_v28 = vpop.f32.mrf.mxu1 }
0x10e9   : > { %v7216_v61 = vadd.f32 %v7213_v59, %v7210_v18  ;;  %v7217_v5 = vmax.f32 %v7215_v13, 0.0 }
0x10eb   : > { %v7218_v36 = vmax.f32 %v7216_v61, 0.0  ;;  %v7219_v49 = vmin.f32 %v7217_v5, 6.0 }
0x10ed   : > { %v7220_v24 = vmin.f32 %v7218_v36, 6.0  ;;  %7223 = vrot.lane.b32.xlu1 %v7219_v49, %s15554_s2  ;;  %v7466_v6 = vpack.c.bf16 %v7219_v49, %v7219_v49 }
0x10ef   : > { %v7467_v53 = vpack.c.bf16 %v7220_v24, %v7220_v24  ;;  %7225 = vrot.lane.b32.xlu0 %v7220_v24, %s15554_s2  ;;  %v7541_v12 = vsel %vm7106_vm13, %v7466_v6, 0 }
0x10f1   : > { %9642 = vmatprep.subr.msk.bf16.mxu0 %vm7106_vm13, %v7467_v53  ;;  %7329 = vperm.xlu1 %10531, %v14155_v27  }
0x10f2   : > { %7561 = vmatpush1.bf16.msra.mxu0 %v7541_v12 }
0x10f3   : > { %7377 = vperm.xlu0 %10530, %v14155_v27  }
0x10f5   : > { %10532 = vset.pattern.permute.xlu1 %v15547_v46 }
0x10f6   : > { %7401 = vperm.xlu1 %10532, %v14155_v27  }
0x10f7   : > { %10533 = vset.pattern.permute.xlu0 %v15556_v2 }
0x10f8   : > { %7247 = vperm.xlu0 %10533, %v14155_v27  }
0x10fa   : > { %10534 = vset.pattern.permute.xlu1 %v15557_v25 }
0x10fb   : > { %7271 = vperm.xlu1 %10534, %v14155_v27  }
0x10fc   : > { %10536 = vset.pattern.permute.xlu0 %v15474_v33 }
0x10fd   : > { %7370 = vperm.xlu0 %10536, %v14155_v27  }
0x10ff   : > { %10535 = vset.pattern.permute.xlu1 %v15471_v62 }
0x1100   : > { %7298 = vperm.xlu1 %10535, %v14155_v27  }
0x1101   : > { %10537 = vset.pattern.permute.xlu0 %v15558_v47 }
0x1104   : > { %10538 = vset.pattern.permute.xlu1 %v15528_v4 }
0x115f   : > { %v7224_v3 = vpop.permute.xlu1 %7223 }
0x1160   : > { %7232 = vst.msk [vmem:[#allocation2] sm:$0xf] %vm7231_vm8, %v7224_v3  ;;  %vm8275_vm8 = vcmask 666768  }
0x1161   : > { %v7226_v56 = vpop.permute.xlu0 %7225 }
0x1162   : > { %v7227_v54 = vsel %vm1221_vm12, %v7224_v3, %v7226_v56  ;;  %7235 = vst.msk [vmem:[#allocation2 + $0x10] sm:$0xf] %vm7234_vm10, %v7226_v56  ;;  %vm8998_vm10 = vcmask 207952  }
0x1163   : > { %7233 = vst [vmem:[#allocation2 + $0x8] sm:$0xf] %v7227_v54 }
0x1167   : > { %v14188_v22 = vld [vmem:[#allocation2] sm:$0xf] }
0x1168   : > { %v7308_v1 = vmul.f32 %v7306_v35, %v14188_v22 }
0x1169   : > { %v14193_v23 = vld [vmem:[#allocation2 + $0x10] sm:$0xf] }
0x116a   : > { %7314 = vrot.lane.b32.xlu1 %v7308_v1, %s15559_s0  ;;  %v7310_v21 = vmul.f32 %v7306_v35, %v14193_v23  ;;  %v14205_v11 = vld [vmem:[#allocation2 + $0x8] sm:$0xf] }
0x116b   : > { %v7309_v59 = vmul.f32 %v7306_v35, %v14205_v11 }
0x116c   : > { %v7330_v58 = vpop.permute.xlu1 %7329 }
0x116d   : > { %v7332_v42 = vmul.f32 %v7330_v58, %v14188_v22  ;;  %v7334_v32 = vmul.f32 %v7330_v58, %v14193_v23  ;;  %v7333_v8 = vmul.f32 %v7330_v58, %v14205_v11 }
0x116e   : > { %v7378_v51 = vpop.permute.xlu0 %7377 }
0x116f   : > { %v7380_v44 = vmul.f32 %v7378_v51, %v14188_v22  ;;  %7338 = vrot.lane.b32.xlu0 %v7332_v42, %s15560_s3  ;;  %v7382_v16 = vmul.f32 %v7378_v51, %v14193_v23  ;;  %v7381_v15 = vmul.f32 %v7378_v51, %v14205_v11 }
0x1171   : > { %7386 = vrot.lane.b32.xlu1 %v7380_v44, %s15559_s0  ;;  %v7402_v38 = vpop.permute.xlu1 %7401 }
0x1172   : > { %v7404_v55 = vmul.f32 %v7402_v38, %v14188_v22  ;;  %v7405_v7 = vmul.f32 %v7402_v38, %v14205_v11  ;;  %v7406_v18 = vmul.f32 %v7402_v38, %v14193_v23 }
0x1173   : > { %7318 = vrot.lane.b32.xlu0 %v7310_v21, %s15559_s0  ;;  %v7248_v39 = vpop.permute.xlu0 %7247 }
0x1174   : > { %v7252_v13 = vmul.f32 %v7248_v39, %v14193_v23  ;;  %v7250_v61 = vmul.f32 %v7248_v39, %v14188_v22  ;;  %v7251_v24 = vmul.f32 %v7248_v39, %v14205_v11 }
0x1175   : > { %7410 = vrot.lane.b32.xlu1 %v7404_v55, %s15560_s3 }
0x1176   : > { %v7272_v28 = vpop.permute.xlu1 %7271 }
0x1177   : > { %7342 = vrot.lane.b32.xlu0 %v7334_v32, %s15560_s3  ;;  %v7275_v5 = vmul.f32 %v7272_v28, %v14205_v11  ;;  %v7274_v36 = vmul.f32 %v7272_v28, %v14188_v22  ;;  %v7276_v49 = vmul.f32 %v7272_v28, %v14193_v23 }
0x1178   : > { %v7371_v53 = vpop.permute.xlu0 %7370 }
0x1179   : > { %7390 = vrot.lane.b32.xlu1 %v7382_v16, %s15559_s0 }
0x117b   : > { %7388 = vrot.lane.b32.xlu0 %v7381_v15, %s15559_s0  ;;  %v7299_v6 = vpop.permute.xlu1 %7298  ;;  %v7373_v15 = vmul.f32 %v7371_v53, %v14188_v22 }
0x117c   : > { %v7303_v54 = vmul.f32 %v7299_v6, %v14193_v23 }
0x117d   : > { %7316 = vrot.lane.b32.xlu1 %v7309_v59, %s15559_s0  ;;  %v7301_v59 = vmul.f32 %v7299_v6, %v14188_v22 }
0x117f   : > { %7412 = vrot.lane.b32.xlu0 %v7405_v7, %s15560_s3  ;;  %v7302_v7 = vmul.f32 %v7299_v6, %v14205_v11 }
0x1181   : > { %7340 = vrot.lane.b32.xlu1 %v7333_v8, %s15560_s3 }
0x1183   : > { %7240 = vperm.xlu0 %10537, %v14155_v27  }
0x1185   : > { %7414 = vrot.lane.b32.xlu1 %v7406_v18, %s15560_s3 }
0x1187   : > { %7260 = vrot.lane.b32.xlu0 %v7252_v13, %s15559_s0 }
0x1188   : > { %10541 = vset.pattern.permute.xlu0 %v15537_v26 }
0x1189   : > { %7256 = vrot.lane.b32.xlu1 %v7250_v61, %s15559_s0 }
0x118b   : > { %7282 = vrot.lane.b32.xlu0 %v7275_v5, %s15560_s3  ;;  %v7374_v5 = vmul.f32 %v7371_v53, %v14205_v11 }
0x118d   : > { %7280 = vrot.lane.b32.xlu1 %v7274_v36, %s15560_s3 }
0x1191   : > { %7284 = vrot.lane.b32.xlu1 %v7276_v49, %s15560_s3 }
0x1195   : > { %7445 = vperm.xlu1 %10538, %v14155_v27  }
0x1199   : > { %7258 = vrot.lane.b32.xlu1 %v7251_v24, %s15559_s0 }
0x119a   : > { %10539 = vset.pattern.permute.xlu1 %v15561_v14 }
0x11dc   : > { %v7315_v12 = vpop.permute.xlu1 %7314 }
0x11e1   : > { %v7339_v35 = vpop.permute.xlu0 %7338 }
0x11e3   : > { %v7387_v3 = vpop.permute.xlu1 %7386 }
0x11e5   : > { %v7319_v56 = vpop.permute.xlu0 %7318 }
0x11e6   : > { %v7327_v58 = vadd.f32 %v7319_v56, %v7303_v54 }
0x11e7   : > { %v7411_v1 = vpop.permute.xlu1 %7410 }
0x11e9   : > { %v7343_v42 = vpop.permute.xlu0 %7342 }
0x11ea   : > { %v7351_v51 = vadd.f32 %v7343_v42, %v7327_v58 }
0x11eb   : > { %v7391_v44 = vpop.permute.xlu1 %7390 }
0x11ec   : > { %7359 = vrot.lane.b32.xlu0 %v7351_v51, %s15539_s23 }
0x11ed   : > { %v7389_v38 = vpop.permute.xlu0 %7388 }
0x11ee   : > { %v7392_v55 = vsel %vm2249_vm15, %v7387_v3, %v7389_v38  ;;  %v7393_v36 = vsel %vm2249_vm15, %v7389_v38, %v7391_v44 }
0x11ef   : > { %v7317_v21 = vpop.permute.xlu1 %7316  ;;  %v7397_v18 = vadd.f32 %v7392_v55, %v7373_v15 }
0x11f0   : > { %v7320_v32 = vsel %vm2249_vm15, %v7315_v12, %v7317_v21  ;;  %v7321_v16 = vsel %vm2249_vm15, %v7317_v21, %v7319_v56  ;;  %v7375_v12 = vmul.f32 %v7371_v53, %v14193_v23 }
0x11f1   : > { %v7413_v8 = vpop.permute.xlu0 %7412  ;;  %v7325_v13 = vadd.f32 %v7320_v32, %v7301_v59  ;;  %v7326_v28 = vadd.f32 %v7321_v16, %v7302_v7 }
0x11f2   : > { %v7416_v39 = vsel %vm2274_vm1, %v7411_v1, %v7413_v8  ;;  %v7399_v54 = vadd.f32 %v7391_v44, %v7375_v12  ;;  %v7398_v1 = vadd.f32 %v7393_v36, %v7374_v5  ;;  %v7464_v44 = vld [vmem:[%s15572_s5] sm:$0xf]  ;;  %s15573_s5 = sld [smem:[#allocation22_spill]] }
0x11f3   : > { %v7341_v61 = vpop.permute.xlu1 %7340  ;;  %v7421_v3 = vadd.f32 %v7416_v39, %v7397_v18  ;;  %9643 = vmatmul.mubr.msk.bf16.vlgmr.msra.gmra.mxu0 %vm4432_vm4, %v7464_v44 }
0x11f4   : > { %v7344_v49 = vsel %vm2274_vm1, %v7339_v35, %v7341_v61  ;;  %v7345_v24 = vsel %vm2274_vm1, %v7341_v61, %v7343_v42  ;;  %7699 = vmatprep.mubr.bf16.mxu0 %v15538_v10 }
0x11f5   : > { %v7349_v56 = vadd.f32 %v7344_v49, %v7325_v13  ;;  %v7350_v6 = vadd.f32 %v7345_v24, %v7326_v28  ;;  %v7424_v38 = vmul.f32 %v7421_v3, %v15563_v37 }
0x11f7   : > { %7357 = vrot.lane.b32.xlu1 %v7350_v6, %s15539_s23  ;;  %7355 = vrot.lane.b32.xlu0 %v7349_v56, %s15539_s23  ;;  %v7415_v58 = vpop.permute.xlu1 %7414 }
0x11f8   : > { %v7417_v51 = vsel %vm2274_vm1, %v7413_v8, %v7415_v58  ;;  %v7423_v21 = vadd.f32 %v7415_v58, %v7399_v54 }
0x11f9   : > { %v7422_v35 = vadd.f32 %v7417_v51, %v7398_v1 }
0x11fa   : > { %v7426_v53 = vmul.f32 %v7423_v21, %v15565_v19 }
0x11fb   : > { %v7425_v42 = vmul.f32 %v7422_v35, %v15564_v45  ;;  %7430 = vrot.lane.b32.xlu0 %v7424_v38, %s15540_s10  ;;  %v7257_v55 = vpop.permute.xlu1 %7256 }
0x11fd   : > { %7432 = vrot.lane.b32.xlu1 %v7425_v42, %s15540_s10 }
0x11fe   : > { %v7241_v32 = vpop.permute.xlu0 %7240 }
0x11ff   : > { %7434 = vrot.lane.b32.xlu0 %v7426_v53, %s15540_s10  ;;  %v7281_v16 = vpop.permute.xlu1 %7280  ;;  %v7243_v28 = vmul.f32 %v7241_v32, %v14188_v22  ;;  %v7244_v61 = vmul.f32 %v7241_v32, %v14205_v11  ;;  %v7245_v5 = vmul.f32 %v7241_v32, %v14193_v23 }
0x1201   : > { %7452 = vperm.xlu1 %10539, %v14155_v27  }
0x1202   : > { %v7261_v15 = vpop.permute.xlu0 %7260 }
0x1203   : > { %v7285_v59 = vpop.permute.xlu1 %7284  ;;  %v7269_v49 = vadd.f32 %v7261_v15, %v7245_v5 }
0x1205   : > { %10540 = vset.pattern.permute.xlu1 %v15538_v10  ;;  %v7293_v1 = vadd.f32 %v7285_v59, %v7269_v49 }
0x1206   : > { %v7283_v8 = vpop.permute.xlu0 %7282 }
0x1207   : > { %v7286_v6 = vsel %vm2274_vm1, %v7281_v16, %v7283_v8  ;;  %v7287_v54 = vsel %vm2274_vm1, %v7283_v8, %v7285_v59  ;;  %v7296_v23 = vmul.f32 %v7293_v1, %v15566_v30 }
0x1210   : > { %v7446_v7 = vpop.permute.xlu1 %7445 }
0x1214   : > { %v7259_v39 = vpop.permute.xlu1 %7258 }
0x1215   : > { %v7262_v13 = vsel %vm2249_vm15, %v7257_v55, %v7259_v39  ;;  %v7263_v27 = vsel %vm2249_vm15, %v7259_v39, %v7261_v15 }
0x1216   : > { %v7267_v24 = vadd.f32 %v7262_v13, %v7243_v28  ;;  %v7268_v12 = vadd.f32 %v7263_v27, %v7244_v61 }
0x1218   : > { %v7291_v58 = vadd.f32 %v7286_v6, %v7267_v24  ;;  %v7292_v51 = vadd.f32 %v7287_v54, %v7268_v12 }
0x121a   : > { %v7294_v21 = vmul.f32 %v7291_v58, %v15567_v34  ;;  %v7295_v42 = vmul.f32 %v7292_v51, %v15568_v41  ;;  %v14278_v58 = vcombine.low %v7464_v44, %v7464_v44  ;;  %v14286_v51 = vld [vmem:[%s15573_s5] sm:$0xff]  ;;  %s15574_s5 = sld [smem:[#allocation21_spill]] }
0x125e   : > { %v7360_v18 = vpop.permute.xlu0 %7359 }
0x125f   : > { %v7368_v32 = vadd.f32 %v7360_v18, %v7296_v23 }
0x1269   : > { %v7356_v36 = vpop.permute.xlu0 %7355  ;;  %v7358_v3 = vpop.permute.xlu1 %7357 }
0x126a   : > { %v7361_v22 = vsel %vm2369_vm5, %v7356_v36, %v7358_v3  ;;  %v7362_v11 = vsel %vm2369_vm5, %v7358_v3, %v7360_v18 }
0x126b   : > { %v7366_v16 = vadd.f32 %v7361_v22, %v7294_v21  ;;  %v7367_v15 = vadd.f32 %v7362_v11, %v7295_v42  ;;  %v7592_v21 = vrot.slane %v14024_v52, 2  ;;  %v7591_v42 = vrot.slane %v14022_v60, 2  ;;  %v7985_v60 = vld [vmem:[%s15574_s5] sm:$0xf]  ;;  %s15576_s5 = sld [smem:[#allocation23_spill]] }
0x126c   : > { %v7987_v52 = vpack.c.bf16 %v13795_v0, %v13791_v57 }
0x126d   : > { %v7431_v56 = vpop.permute.xlu0 %7430 }
0x126f   : > { %v7433_v38 = vpop.permute.xlu1 %7432 }
0x1270   : > { %v7436_v53 = vsel %vm2464_vm7, %v7431_v56, %v7433_v38 }
0x1271   : > { %v7435_v35 = vpop.permute.xlu0 %7434  ;;  %v7441_v59 = vadd.f32 %v7436_v53, %v7366_v16 }
0x1272   : > { %v7437_v55 = vsel %vm2464_vm7, %v7433_v38, %v7435_v35  ;;  %v7443_v39 = vadd.f32 %v7435_v35, %v7368_v32  ;;  %v15575_v32 = vmov 0.0  }
0x1273   : > { %v7442_v8 = vadd.f32 %v7437_v55, %v7367_v15  ;;  %v7448_v13 = vmul.f32 %v7446_v7, %v7441_v59  ;;  %v7597_v55 = vsel %vm7106_vm13, %v7591_v42, 0 }
0x1274   : > { %v7450_v28 = vmul.f32 %v7446_v7, %v7443_v39 }
0x1275   : > { %v7449_v27 = vmul.f32 %v7446_v7, %v7442_v8 }
0x127c   : > { %v7453_v61 = vpop.permute.xlu1 %7452 }
0x127d   : > { %v7455_v5 = vadd.f32 %v7453_v61, %v7448_v13  ;;  %v7456_v36 = vadd.f32 %v7453_v61, %v7449_v27  ;;  %v7457_v49 = vadd.f32 %v7453_v61, %v7450_v28 }
0x127f   : > { %v7458_v24 = vmax.f32 %v7455_v5, 0.0  ;;  %v7459_v12 = vmax.f32 %v7456_v36, 0.0  ;;  %v7460_v3 = vmax.f32 %v7457_v49, 0.0 }
0x1281   : > { %v7461_v56 = vmin.f32 %v7458_v24, 6.0  ;;  %v7462_v6 = vmin.f32 %v7459_v12, 6.0  ;;  %v7463_v54 = vmin.f32 %v7460_v3, 6.0 }
0x1283   : > { %v7468_v18 = vpack.c.bf16 %v7461_v56, %v7461_v56  ;;  %v7469_v1 = vpack.c.bf16 %v7462_v6, %v7462_v6  ;;  %v7470_v7 = vpack.c.bf16 %v7463_v54, %v7463_v54 }
0x1285   : > { %7481 = vrot.lane.b32.xlu1 %v7469_v1, %s15571_s6  ;;  %7479 = vrot.lane.b32.xlu0 %v7468_v18, %s15571_s6 }
0x1289   : > { %7483 = vrot.lane.b32.xlu0 %v7470_v7, %s15571_s6  ;;  %7474 = vrot.lane.b32.xlu1 %v14278_v58, %s15342_s26 }
0x128d   : > { %7587 = vrot.lane.b32.xlu0 %v14278_v58, %s15465_s1  ;;  %8033 = vperm.xlu1 %10540, %v14286_v51  }
0x1291   : > { %8038 = vperm.xlu0 %10541, %v14286_v51   ;;  %10542 = vset.pattern.permute.xlu1 %v15545_v20 }
0x1292   : > { %8082 = vperm.xlu1 %10542, %v14286_v51  }
0x1295   : > { %10543 = vset.pattern.permute.xlu0 %v15546_v9 }
0x1296   : > { %8112 = vperm.xlu0 %10543, %v14286_v51   ;;  %10544 = vset.pattern.permute.xlu1 %v15555_v29 }
0x129a   : > { %10546 = vset.pattern.permute.xlu0 %v15556_v2 }
0x129b   : > { %8056 = vperm.xlu0 %10546, %v14286_v51  }
0x129f   : > { %10549 = vset.pattern.permute.xlu0 %v15474_v33 }
0x12a0   : > { %8107 = vperm.xlu0 %10549, %v14286_v51  }
0x12a4   : > { %10550 = vset.pattern.permute.xlu0 %v15558_v47 }
0x12b3   : > { %v7580_v15 = vpop.f32.mrf.mxu0 }
0x12b5   : > { %v7582_v59 = vpop.f32.mrf.mxu0 }
0x12b7   : > { %v7584_v8 = vpop.f32.mrf.mxu0 }
0x12b9   : > { %v7585_v39 = vpop.f32.mrf.mxu0 }
0x12f7   : > { %v7482_v44 = vpop.permute.xlu1 %7481  ;;  %v7480_v38 = vpop.permute.xlu0 %7479 }
0x12f8   : > { %v7485_v35 = vsel %vm2502_vm2, %v7480_v38, %v7482_v44 }
0x12f9   : > { %v7491_v23 = vsel %vm7106_vm13, %v7485_v35, 0 }
0x12fb   : > { %v7484_v22 = vpop.permute.xlu0 %7483  ;;  %v7475_v53 = vpop.permute.xlu1 %7474 }
0x12fc   : > { %v7486_v11 = vsel %vm2502_vm2, %v7482_v44, %v7484_v22 }
0x12fd   : > { %9640 = vmatprep.subr.msk.bf16.mxu1 %vm7106_vm13, %v7486_v11 }
0x12fe   : > { %7511 = vmatpush1.bf16.msra.mxu1 %v7491_v23 }
0x12ff   : > { %9644 = vmatprep.subr.msk.bf16.mxu1 %vm7106_vm13, %v7592_v21  ;;  %v7588_v16 = vpop.permute.xlu0 %7587 }
0x1301   : > { %9641 = vmatmul.mubr.msk.bf16.vlgmr.msra.gmra.mxu1 %vm4432_vm4, %v7475_v53 }
0x1302   : > { %7617 = vmatpush1.bf16.msra.mxu1 %v7597_v55  ;;  %7634 = vmatprep.mubr.bf16.mxu1 %v15538_v10 }
0x1303   : > { %10186 = vmatprep.subr.bf16.mxu1 %v15575_v32 }
0x1308   : > { %v8034_v56 = vpop.permute.xlu1 %8033 }
0x1309   : > { %9645 = vmatmul.mubr.msk.bf16.vlgmr.msra.gmra.mxu1 %vm4432_vm4, %v7588_v16 }
0x130a   : > { %10187 = vmatpush3.bf16.msra.mxu1 %v7987_v52  ;;  %10188 = vmatprep.mubr.msk.bf16.mxu1 %vm10678_vm0, %v15575_v32 }
0x130b   : > { %10198 = vmatprep.subr.bf16.mxu1 %v15575_v32 }
0x130c   : > { %v8039_v54 = vpop.permute.xlu0 %8038 }
0x130d   : > { %v8083_v21 = vpop.permute.xlu1 %8082 }
0x1311   : > { %10189 = vmatmul.mubr.msk.bf16.vlgmr.msra.gmra.mxu1 %vm1442_vm3, %v7985_v60  ;;  %v8113_v16 = vpop.permute.xlu0 %8112 }
0x1312   : > { %10200 = vmatprep.mubr.msk.bf16.mxu1 %vm10678_vm0, %v15575_v32 }
0x1316   : > { %v8057_v39 = vpop.permute.xlu0 %8056 }
0x13c1   : > { %v7530_v13 = vpop.f32.mrf.mxu1 }
0x13c2   : > { %v7581_v28 = vadd.f32 %v7580_v15, %v7530_v13 }
0x13c3   : > { %v7532_v57 = vpop.f32.mrf.mxu1 }
0x13c4   : > { %v7583_v5 = vadd.f32 %v7582_v59, %v7532_v57 }
0x13c5   : > { %v7534_v0 = vpop.f32.mrf.mxu1 }
0x13c7   : > { %v7535_v27 = vpop.f32.mrf.mxu1 }
0x13c9   : > { %v7636_v61 = vpop.f32.mrf.mxu1 }
0x13ca   : > { %v14321_v36 = vadd.f32 %v7636_v61, %v7581_v28  ;;  %v8108_v61 = vpop.permute.xlu0 %8107 }
0x13cb   : > { %v7638_v49 = vpop.f32.mrf.mxu1 }
0x13cc   : > { %v14323_v24 = vadd.f32 %v7638_v49, %v7583_v5 }
0x13cd   : > { %v7640_v12 = vpop.f32.mrf.mxu1 }
0x13cf   : > { %v7641_v3 = vpop.f32.mrf.mxu1 }
0x13d1   : > { %v8025_v6 = vpop.f32.mrf.mxu1 }
0x13d2   : > { %v8036_v18 = vmul.f32 %v8034_v56, %v8025_v6 }
0x13d3   : > { %v10190_v1 = vpop.f32.mrf.mxu1 }
0x13d4   : > { %v8041_v7 = vadd.f32 %v8039_v54, %v8036_v18 }
0x13d5   : > { %v8028_v44 = vpop.f32.mrf.mxu1 }
0x13d6   : > { %v8042_v38 = vmax.f32 %v8041_v7, 0.0  ;;  %v15577_v7 = vld [vmem:[#allocation39_spill] sm:$0xff] }
0x13d7   : > { %v10191_v35 = vpop.f32.mrf.mxu1 }
0x13d8   : > { %v8043_v22 = vmin.f32 %v8042_v38, 6.0  ;;  %v7647_v38 = vrot.slane %v14139_v31, 2  ;;  %v7648_v35 = vrot.slane %v14141_v50, 2 }
0x13da   : > { %v14325_v11 = vpack.c.bf16 %v8043_v22, %v8043_v22  ;;  %8045 = vrot.lane.b32.xlu1 %v8043_v22, %s15421_s11  ;;  %v7649_v22 = vrot.slane %v14149_v48, 2 }
0x13dc   : > { %v8216_v23 = vsel %vm7106_vm13, %v14325_v11, 0 }
0x13dd   : > { %10199 = vmatpush3.bf16.msra.mxu1 %v8216_v23  ;;  %v8149_v23 = vld [vmem:[%s15576_s5] sm:$0x3]  ;;  %s15581_s5 = sld [smem:[#allocation25_spill]] }
0x13de   : > { %8092 = vperm.xlu1 %10544, %v14286_v51   ;;  %10210 = vmatprep.subr.bf16.mxu1 %v15575_v32  ;;  %v8160_v31 = vrot.slane %v8149_v23, %v14137_v63 }
0x13e0   : > { %10201 = vmatmul.mubr.msk.bf16.vlgmr.msra.gmra.mxu1 %vm4432_vm4, %v8149_v23 }
0x13e1   : > { %10212 = vmatprep.mubr.msk.bf16.mxu1 %vm10678_vm0, %v15575_v32 }
0x13e2   : > { %10545 = vset.pattern.permute.xlu1 %v15547_v46 }
0x13e3   : > { %8122 = vperm.xlu1 %10545, %v14286_v51  }
0x13e7   : > { %10547 = vset.pattern.permute.xlu1 %v15557_v25 }
0x13e8   : > { %8066 = vperm.xlu1 %10547, %v14286_v51  }
0x13ec   : > { %10548 = vset.pattern.permute.xlu1 %v15471_v62 }
0x13ed   : > { %8077 = vperm.xlu1 %10548, %v14286_v51  }
0x13f1   : > { %10552 = vset.pattern.permute.xlu1 %v15561_v14 }
0x144c   : > { %v8046_v42 = vpop.permute.xlu1 %8045 }
0x144d   : > { %8048 = vst.msk [vmem:[#allocation3] sm:$0xff] %vm1503_vm9, %v8046_v42 }
0x1454   : > { %v8049_v53 = vld [vmem:[#allocation3] sm:$0xff] }
0x1455   : > { %v8085_v55 = vmul.f32 %v8083_v21, %v8049_v53  ;;  %v8115_v52 = vmul.f32 %v8113_v16, %v8049_v53  ;;  %v8059_v13 = vmul.f32 %v8057_v39, %v8049_v53  ;;  %v8110_v6 = vmul.f32 %v8108_v61, %v8049_v53 }
0x1457   : > { %8087 = vrot.lane.b32.xlu1 %v8085_v55, %s15465_s1 }
0x1459   : > { %v8093_v60 = vpop.permute.xlu1 %8092 }
0x145a   : > { %v8095_v15 = vmul.f32 %v8093_v60, %v8049_v53  ;;  %v15579_v60 = vld [vmem:[#allocation41_spill] sm:$0xff] }
0x145b   : > { %8117 = vrot.lane.b32.xlu1 %v8115_v52, %s15465_s1 }
0x145c   : > { %8097 = vrot.lane.b32.xlu0 %v8095_v15, %s15559_s0 }
0x145e   : > { %v8123_v59 = vpop.permute.xlu1 %8122 }
0x145f   : > { %v8125_v8 = vmul.f32 %v8123_v59, %v8049_v53 }
0x1460   : > { %8051 = vperm.xlu0 %10550, %v14286_v51  }
0x1461   : > { %8127 = vrot.lane.b32.xlu1 %v8125_v8, %s15559_s0 }
0x1463   : > { %v8067_v57 = vpop.permute.xlu1 %8066 }
0x1464   : > { %10551 = vset.pattern.permute.xlu0 %v15528_v4  ;;  %v8069_v0 = vmul.f32 %v8067_v57, %v8049_v53  ;;  %v14371_v57 = vld [vmem:[%s15578_s9] sm:$0xf]  ;;  %s15580_s9 = smov 119  }
0x1465   : > { %8061 = vrot.lane.b32.xlu1 %v8059_v13, %s15465_s1  ;;  %8138 = vperm.xlu0 %10551, %v14286_v51  }
0x1468   : > { %v8078_v27 = vpop.permute.xlu1 %8077 }
0x1469   : > { %8071 = vrot.lane.b32.xlu1 %v8069_v0, %s15559_s0  ;;  %10554 = vset.pattern.permute.xlu0 %v15537_v26  ;;  %v8080_v5 = vmul.f32 %v8078_v27, %v8049_v53 }
0x14c9   : > { %v8088_v28 = vpop.permute.xlu1 %8087 }
0x14ca   : > { %v8090_v49 = vadd.f32 %v8088_v28, %v8080_v5 }
0x14cd   : > { %v8118_v3 = vpop.permute.xlu1 %8117 }
0x14ce   : > { %v8098_v12 = vpop.permute.xlu0 %8097  ;;  %v8120_v54 = vadd.f32 %v8118_v3, %v8110_v6 }
0x14cf   : > { %v8100_v56 = vadd.f32 %v8098_v12, %v8090_v49 }
0x14d1   : > { %8102 = vrot.lane.b32.xlu1 %v8100_v56, %s15539_s23 }
0x14d3   : > { %v8128_v18 = vpop.permute.xlu1 %8127 }
0x14d4   : > { %v8130_v1 = vadd.f32 %v8128_v18, %v8120_v54  ;;  %v8252_v54 = vpop.f32.mrf.mxu1 }
0x14d5   : > { %8143 = vperm.xlu1 %10552, %v14286_v51  }
0x14d6   : > { %v8131_v44 = vmul.f32 %v8130_v1, %v15577_v7  ;;  %v10202_v18 = vpop.f32.mrf.mxu1 }
0x14d7   : > { %v8062_v51 = vpop.permute.xlu1 %8061 }
0x14d8   : > { %8133 = vrot.lane.b32.xlu0 %v8131_v44, %s15540_s10  ;;  %v8255_v1 = vpop.f32.mrf.mxu1 }
0x14d9   : > { %7650 = vrot.lane.b32.xlu1 %v7647_v38, %s15571_s6 }
0x14da   : > { %10553 = vset.pattern.permute.xlu1 %v15538_v10  ;;  %v10203_v44 = vpop.f32.mrf.mxu1 }
0x14db   : > { %v8052_v50 = vpop.permute.xlu0 %8051  ;;  %v8072_v42 = vpop.permute.xlu1 %8071 }
0x14dc   : > { %7652 = vrot.lane.b32.xlu0 %v7648_v35, %s15571_s6  ;;  %v8054_v48 = vmul.f32 %v8052_v50, %v8049_v53 }
0x14dd   : > { %7654 = vrot.lane.b32.xlu1 %v7649_v22, %s15571_s6 }
0x14de   : > { %v8064_v21 = vadd.f32 %v8062_v51, %v8054_v48 }
0x14e0   : > { %7645 = vrot.lane.b32.xlu0 %v14278_v58, %s15167_s7  ;;  %v8074_v55 = vadd.f32 %v8072_v42, %v8064_v21  ;;  %v8139_v16 = vpop.permute.xlu0 %8138  ;;  %s15582_s7 = sld [smem:[#allocation28_spill]] }
0x14e2   : > { %v8075_v15 = vmul.f32 %v8074_v55, %v15579_v60 }
0x14e4   : > { %8161 = vrot.lane.b32.xlu0 %v8160_v31, %s15342_s26 }
0x14e8   : > { %8265 = vperm.xlu0 %10554, %v14371_v57  }
0x14ec   : > { %10556 = vset.pattern.permute.xlu0 %v15546_v9 }
0x14ed   : > { %8340 = vperm.xlu0 %10556, %v14371_v57  }
0x14f1   : > { %10559 = vset.pattern.permute.xlu0 %v15556_v2 }
0x14f2   : > { %8284 = vperm.xlu0 %10559, %v14371_v57  }
0x14f6   : > { %10562 = vset.pattern.permute.xlu0 %v15474_v33 }
0x14f7   : > { %8335 = vperm.xlu0 %10562, %v14371_v57  }
0x14fb   : > { %10563 = vset.pattern.permute.xlu0 %v15558_v47 }
0x1543   : > { %v8103_v52 = vpop.permute.xlu1 %8102 }
0x1544   : > { %v8105_v59 = vadd.f32 %v8103_v52, %v8075_v15 }
0x154a   : > { %v8134_v8 = vpop.permute.xlu0 %8133 }
0x154b   : > { %v8136_v39 = vadd.f32 %v8134_v8, %v8105_v59 }
0x154d   : > { %v8141_v13 = vmul.f32 %v8139_v16, %v8136_v39 }
0x154e   : > { %v7653_v61 = vpop.permute.xlu0 %7652 }
0x1550   : > { %v8144_v58 = vpop.permute.xlu1 %8143 }
0x1551   : > { %v8146_v0 = vadd.f32 %v8144_v58, %v8141_v13 }
0x1552   : > { %v7646_v6 = vpop.permute.xlu0 %7645 }
0x1553   : > { %v8147_v27 = vmax.f32 %v8146_v0, 0.0 }
0x1554   : > { %v7651_v53 = vpop.permute.xlu1 %7650 }
0x1555   : > { %v8148_v28 = vmin.f32 %v8147_v27, 6.0  ;;  %v7656_v49 = vsel %vm2502_vm2, %v7651_v53, %v7653_v61 }
0x1556   : > { %v7662_v56 = vsel %vm7106_vm13, %v7656_v49, 0  ;;  %v8162_v22 = vpop.permute.xlu0 %8161 }
0x1557   : > { %v14376_v5 = vpack.c.bf16 %v8148_v28, %v8148_v28 }
0x1558   : > { %v7655_v12 = vpop.permute.xlu1 %7654 }
0x1559   : > { %v7657_v3 = vsel %vm2502_vm2, %v7653_v61, %v7655_v12  ;;  %8164 = vrot.lane.b32.xlu1 %v14376_v5, %s15580_s9 }
0x155a   : > { %9646 = vmatprep.subr.msk.bf16.mxu0 %vm7106_vm13, %v7657_v3 }
0x155b   : > { %7682 = vmatpush1.bf16.msra.mxu0 %v7662_v56 }
0x155c   : > { %10192 = vmatprep.subr.bf16.mxu0 %v15575_v32 }
0x155d   : > { %8260 = vperm.xlu1 %10553, %v14371_v57  }
0x155e   : > { %9647 = vmatmul.mubr.msk.bf16.vlgmr.msra.gmra.mxu0 %vm4432_vm4, %v7646_v6 }
0x155f   : > { %10194 = vmatprep.mubr.msk.bf16.mxu0 %vm10678_vm0, %v15575_v32 }
0x1561   : > { %10555 = vset.pattern.permute.xlu1 %v15545_v20 }
0x1562   : > { %8310 = vperm.xlu1 %10555, %v14371_v57  }
0x1563   : > { %v8266_v15 = vpop.permute.xlu0 %8265 }
0x1566   : > { %10557 = vset.pattern.permute.xlu1 %v15555_v29 }
0x1568   : > { %v8341_v49 = vpop.permute.xlu0 %8340 }
0x156d   : > { %v8285_v18 = vpop.permute.xlu0 %8284 }
0x15cb   : > { %v8165_v38 = vpop.permute.xlu1 %8164 }
0x15cc   : > { %v8170_v35 = vsel %vm7106_vm13, %v8165_v38, 0 }
0x15cd   : > { %10193 = vmatpush3.bf16.msra.mxu0 %v8170_v35 }
0x15ce   : > { %10204 = vmatprep.subr.bf16.mxu0 %v15575_v32 }
0x15d0   : > { %10195 = vmatmul.mubr.msk.bf16.vlgmr.msra.gmra.mxu0 %vm4432_vm4, %v8162_v22 }
0x15d1   : > { %10206 = vmatprep.mubr.msk.bf16.mxu0 %vm10678_vm0, %v15575_v32 }
0x15d8   : > { %v8261_v55 = vpop.permute.xlu1 %8260 }
0x161e   : > { %v7701_v23 = vpop.f32.mrf.mxu0 }
0x161f   : > { %v14403_v31 = vadd.f32 %v7701_v23, %v14321_v36  ;;  %v8336_v23 = vpop.permute.xlu0 %8335 }
0x1620   : > { %v7703_v50 = vpop.f32.mrf.mxu0 }
0x1621   : > { %v14406_v48 = vadd.f32 %v7703_v50, %v14323_v24  ;;  %v8311_v24 = vpop.permute.xlu1 %8310 }
0x1622   : > { %v7705_v51 = vpop.f32.mrf.mxu0 }
0x1624   : > { %v7706_v21 = vpop.f32.mrf.mxu0 }
0x1690   : > { %v8206_v42 = vpop.f32.mrf.mxu0 }
0x1691   : > { %v8253_v16 = vadd.f32 %v8252_v54, %v8206_v42 }
0x1692   : > { %v10196_v52 = vpop.f32.mrf.mxu0 }
0x1693   : > { %v8263_v59 = vmul.f32 %v8261_v55, %v8253_v16 }
0x1694   : > { %v8209_v8 = vpop.f32.mrf.mxu0 }
0x1695   : > { %v8268_v39 = vadd.f32 %v8266_v15, %v8263_v59 }
0x1696   : > { %v10197_v13 = vpop.f32.mrf.mxu0 }
0x1697   : > { %v8269_v58 = vmax.f32 %v8268_v39, 0.0  ;;  %v8377_v39 = vld [vmem:[%s15581_s5] sm:$0xf]  ;;  %s15584_s5 = smov 10  }
0x1698   : > { %v14435_v13 = vcombine.low %v8377_v39, %v8377_v39 }
0x1699   : > { %v8270_v0 = vmin.f32 %v8269_v58, 6.0 }
0x169b   : > { %v8379_v27 = vpack.c.bf16 %v8270_v0, %v8270_v0  ;;  %8272 = vrot.lane.b32.xlu1 %v8270_v0, %s15421_s11 }
0x169d   : > { %v8439_v36 = vsel %vm7106_vm13, %v8379_v27, 0 }
0x169e   : > { %10211 = vmatpush3.bf16.msra.mxu1 %v8439_v36 }
0x169f   : > { %8320 = vperm.xlu1 %10557, %v14371_v57   ;;  %10222 = vmatprep.subr.bf16.mxu1 %v15575_v32 }
0x16a1   : > { %10213 = vmatmul.mubr.msk.bf16.vlgmr.msra.gmra.mxu1 %vm4432_vm4, %v8377_v39 }
0x16a2   : > { %10224 = vmatprep.mubr.msk.bf16.mxu1 %vm10678_vm0, %v15575_v32 }
0x16a3   : > { %10558 = vset.pattern.permute.xlu1 %v15547_v46 }
0x16a4   : > { %8350 = vperm.xlu1 %10558, %v14371_v57  }
0x16a8   : > { %10560 = vset.pattern.permute.xlu1 %v15557_v25 }
0x16a9   : > { %8294 = vperm.xlu1 %10560, %v14371_v57  }
0x16ad   : > { %10561 = vset.pattern.permute.xlu1 %v15471_v62 }
0x16ae   : > { %8305 = vperm.xlu1 %10561, %v14371_v57  }
0x16b2   : > { %10565 = vset.pattern.permute.xlu1 %v15561_v14 }
0x170d   : > { %v8273_v53 = vpop.permute.xlu1 %8272 }
0x170e   : > { %8276 = vst.msk [vmem:[#allocation3] sm:$0xf] %vm8275_vm8, %v8273_v53 }
0x1715   : > { %v8277_v28 = vld [vmem:[#allocation3] sm:$0xf] }
0x1716   : > { %v8313_v61 = vmul.f32 %v8311_v24, %v8277_v28  ;;  %v8343_v3 = vmul.f32 %v8341_v49, %v8277_v28  ;;  %v8287_v1 = vmul.f32 %v8285_v18, %v8277_v28  ;;  %v8338_v16 = vmul.f32 %v8336_v23, %v8277_v28 }
0x1717   : > { %v8484_v23 = vrot.slane %v14325_v11, 2 }
0x1718   : > { %8315 = vrot.lane.b32.xlu1 %v8313_v61, %s15465_s1 }
0x171a   : > { %v8321_v12 = vpop.permute.xlu1 %8320 }
0x171b   : > { %v8323_v56 = vmul.f32 %v8321_v12, %v8277_v28 }
0x171c   : > { %8345 = vrot.lane.b32.xlu1 %v8343_v3, %s15465_s1 }
0x171d   : > { %8325 = vrot.lane.b32.xlu0 %v8323_v56, %s15559_s0 }
0x171f   : > { %v8351_v6 = vpop.permute.xlu1 %8350 }
0x1720   : > { %v8353_v54 = vmul.f32 %v8351_v6, %v8277_v28 }
0x1721   : > { %8279 = vperm.xlu0 %10563, %v14371_v57  }
0x1722   : > { %8355 = vrot.lane.b32.xlu1 %v8353_v54, %s15559_s0 }
0x1724   : > { %v8295_v44 = vpop.permute.xlu1 %8294 }
0x1725   : > { %10564 = vset.pattern.permute.xlu0 %v15528_v4  ;;  %v8297_v38 = vmul.f32 %v8295_v44, %v8277_v28 }
0x1726   : > { %8289 = vrot.lane.b32.xlu1 %v8287_v1, %s15465_s1  ;;  %8366 = vperm.xlu0 %10564, %v14371_v57  }
0x1729   : > { %v8306_v35 = vpop.permute.xlu1 %8305 }
0x172a   : > { %8299 = vrot.lane.b32.xlu1 %v8297_v38, %s15559_s0  ;;  %10566 = vset.pattern.permute.xlu0 %v15538_v10  ;;  %v8308_v50 = vmul.f32 %v8306_v35, %v8277_v28 }
0x178a   : > { %v8316_v22 = vpop.permute.xlu1 %8315 }
0x178b   : > { %v8318_v51 = vadd.f32 %v8316_v22, %v8308_v50 }
0x178e   : > { %v8346_v42 = vpop.permute.xlu1 %8345 }
0x178f   : > { %v8326_v21 = vpop.permute.xlu0 %8325  ;;  %v8348_v52 = vadd.f32 %v8346_v42, %v8338_v16  ;;  %v8475_v42 = vpop.f32.mrf.mxu1 }
0x1790   : > { %v8328_v55 = vadd.f32 %v8326_v21, %v8318_v51  ;;  %v8489_v51 = vsel %vm7106_vm13, %v8484_v23, 0 }
0x1792   : > { %8330 = vrot.lane.b32.xlu1 %v8328_v55, %s15539_s23  ;;  %v10214_v55 = vpop.f32.mrf.mxu1 }
0x1794   : > { %v8356_v15 = vpop.permute.xlu1 %8355  ;;  %v8478_v16 = vpop.f32.mrf.mxu1 }
0x1795   : > { %v8358_v59 = vadd.f32 %v8356_v15, %v8348_v52 }
0x1796   : > { %8371 = vperm.xlu1 %10565, %v14371_v57   ;;  %v10215_v52 = vpop.f32.mrf.mxu1 }
0x1797   : > { %v8359_v8 = vmul.f32 %v8358_v59, %v15577_v7 }
0x1798   : > { %v8290_v57 = vpop.permute.xlu1 %8289 }
0x1799   : > { %8361 = vrot.lane.b32.xlu0 %v8359_v8, %s15540_s10 }
0x179a   : > { %10567 = vset.pattern.permute.xlu1 %v15537_v26 }
0x179c   : > { %v8280_v58 = vpop.permute.xlu0 %8279  ;;  %v8300_v36 = vpop.permute.xlu1 %8299 }
0x179d   : > { %8384 = vrot.lane.b32.xlu0 %v14435_v13, %s15342_s26  ;;  %v8282_v0 = vmul.f32 %v8280_v58, %v8277_v28  ;;  %v14447_v28 = vld [vmem:[%s15582_s7] sm:$0xff]  ;;  %s15583_s7 = sld [smem:[#allocation27_spill]] }
0x179f   : > { %v8292_v27 = vadd.f32 %v8290_v57, %v8282_v0 }
0x17a1   : > { %v8302_v24 = vadd.f32 %v8300_v36, %v8292_v27  ;;  %v8367_v53 = vpop.permute.xlu0 %8366  ;;  %8756 = vperm.xlu0 %10566, %v14447_v28  }
0x17a3   : > { %v8303_v49 = vmul.f32 %v8302_v24, %v15579_v60  ;;  %v8708_v11 = vld [vmem:[%s15583_s7] sm:$0xf]  ;;  %s15585_s7 = sld [smem:[#allocation29_spill]] }
0x17a5   : > { %10568 = vset.pattern.permute.xlu0 %v15545_v20 }
0x17a6   : > { %8805 = vperm.xlu0 %10568, %v14447_v28  }
0x17aa   : > { %10571 = vset.pattern.permute.xlu0 %v15547_v46 }
0x17ab   : > { %8845 = vperm.xlu0 %10571, %v14447_v28  }
0x17af   : > { %10574 = vset.pattern.permute.xlu0 %v15471_v62 }
0x17b0   : > { %8800 = vperm.xlu0 %10574, %v14447_v28  }
0x17b4   : > { %10577 = vset.pattern.permute.xlu0 %v15528_v4 }
0x1804   : > { %v8331_v61 = vpop.permute.xlu1 %8330 }
0x1805   : > { %v8333_v12 = vadd.f32 %v8331_v61, %v8303_v49 }
0x180b   : > { %v8362_v3 = vpop.permute.xlu0 %8361 }
0x180c   : > { %v8364_v56 = vadd.f32 %v8362_v3, %v8333_v12 }
0x180e   : > { %v8369_v6 = vmul.f32 %v8367_v53, %v8364_v56 }
0x180f   : > { %v8385_v50 = vpop.permute.xlu0 %8384 }
0x1811   : > { %v8372_v54 = vpop.permute.xlu1 %8371 }
0x1812   : > { %v8374_v18 = vadd.f32 %v8372_v54, %v8369_v6 }
0x1814   : > { %v8375_v1 = vmax.f32 %v8374_v18, 0.0 }
0x1816   : > { %v8376_v44 = vmin.f32 %v8375_v1, 6.0 }
0x1818   : > { %v8380_v38 = vpack.c.bf16 %v8376_v44, %v8376_v44 }
0x181a   : > { %8387 = vrot.lane.b32.xlu1 %v8380_v38, %s15580_s9 }
0x181c   : > { %v8757_v27 = vpop.permute.xlu0 %8756 }
0x181e   : > { %8481 = vrot.lane.b32.xlu1 %v14435_v13, %s15465_s1 }
0x1821   : > { %v8806_v44 = vpop.permute.xlu0 %8805 }
0x1822   : > { %8761 = vperm.xlu1 %10567, %v14447_v28  }
0x1826   : > { %10569 = vset.pattern.permute.xlu1 %v15546_v9 }
0x188c   : > { %v8388_v35 = vpop.permute.xlu1 %8387 }
0x188d   : > { %v8393_v22 = vsel %vm7106_vm13, %v8388_v35, 0 }
0x188e   : > { %10205 = vmatpush3.bf16.msra.mxu0 %v8393_v22 }
0x188f   : > { %10216 = vmatprep.subr.bf16.mxu0 %v15575_v32 }
0x1890   : > { %v8482_v21 = vpop.permute.xlu1 %8481 }
0x1891   : > { %10207 = vmatmul.mubr.msk.bf16.vlgmr.msra.gmra.mxu0 %vm4432_vm4, %v8385_v50  ;;  %v8846_v50 = vpop.permute.xlu0 %8845 }
0x1892   : > { %10217 = vmatpush3.bf16.msra.mxu0 %v8489_v51  ;;  %10218 = vmatprep.mubr.msk.bf16.mxu0 %vm10678_vm0, %v15575_v32 }
0x1893   : > { %10228 = vmatprep.subr.bf16.mxu0 %v15575_v32 }
0x1899   : > { %10219 = vmatmul.mubr.msk.bf16.vlgmr.msra.gmra.mxu0 %vm4432_vm4, %v8482_v21 }
0x189a   : > { %10229 = vmatpush3.bf16.msra.mxu0 %v8710_v43  ;;  %10230 = vmatprep.mubr.msk.bf16.mxu0 %vm10678_vm0, %v15575_v32 }
0x189b   : > { %10240 = vmatprep.subr.bf16.mxu0 %v15575_v32 }
0x189d   : > { %v8762_v24 = vpop.permute.xlu1 %8761 }
0x18a1   : > { %10231 = vmatmul.mubr.msk.bf16.vlgmr.msra.gmra.mxu0 %vm1442_vm3, %v8708_v11 }
0x18a2   : > { %10242 = vmatprep.mubr.msk.bf16.mxu0 %vm10678_vm0, %v15575_v32 }
0x1951   : > { %v8429_v15 = vpop.f32.mrf.mxu0 }
0x1952   : > { %v8476_v40 = vadd.f32 %v8475_v42, %v8429_v15  ;;  %v8801_v15 = vpop.permute.xlu0 %8800 }
0x1953   : > { %v10208_v59 = vpop.f32.mrf.mxu0 }
0x1955   : > { %v8432_v8 = vpop.f32.mrf.mxu0 }
0x1957   : > { %v10209_v17 = vpop.f32.mrf.mxu0 }
0x1959   : > { %v8525_v43 = vpop.f32.mrf.mxu0 }
0x195a   : > { %v14478_v39 = vadd.f32 %v8525_v43, %v8476_v40 }
0x195b   : > { %v10220_v58 = vpop.f32.mrf.mxu0 }
0x195d   : > { %v8528_v0 = vpop.f32.mrf.mxu0 }
0x195f   : > { %v10221_v57 = vpop.f32.mrf.mxu0 }
0x1961   : > { %v8748_v36 = vpop.f32.mrf.mxu0 }
0x1962   : > { %v8759_v53 = vmul.f32 %v8757_v27, %v8748_v36 }
0x1963   : > { %v10232_v61 = vpop.f32.mrf.mxu0 }
0x1964   : > { %v8764_v49 = vadd.f32 %v8762_v24, %v8759_v53  ;;  %v15586_v53 = vld [vmem:[#allocation34_spill] sm:$0xff] }
0x1965   : > { %v8751_v12 = vpop.f32.mrf.mxu0 }
0x1966   : > { %v8765_v3 = vmax.f32 %v8764_v49, 0.0  ;;  %v8534_v49 = vrot.slane %v14376_v5, 2  ;;  %v8872_v12 = vld [vmem:[%s15585_s7] sm:$0x3]  ;;  %s15591_s7 = sld [smem:[#allocation31_spill]] }
0x1967   : > { %v10233_v56 = vpop.f32.mrf.mxu0 }
0x1968   : > { %v8766_v6 = vmin.f32 %v8765_v3, 6.0  ;;  %v8883_v3 = vrot.slane %v8872_v12, %v14137_v63 }
0x196a   : > { %v14480_v54 = vpack.c.bf16 %v8766_v6, %v8766_v6  ;;  %8768 = vrot.lane.b32.xlu1 %v8766_v6, %s15584_s5 }
0x196c   : > { %v8939_v18 = vsel %vm7106_vm13, %v14480_v54, 0 }
0x196d   : > { %10241 = vmatpush3.bf16.msra.mxu0 %v8939_v18 }
0x196e   : > { %8835 = vperm.xlu1 %10569, %v14447_v28   ;;  %10252 = vmatprep.subr.bf16.mxu0 %v15575_v32 }
0x1970   : > { %10243 = vmatmul.mubr.msk.bf16.vlgmr.msra.gmra.mxu0 %vm4432_vm4, %v8872_v12 }
0x1971   : > { %10254 = vmatprep.mubr.msk.bf16.mxu0 %vm10678_vm0, %v15575_v32 }
0x1972   : > { %10570 = vset.pattern.permute.xlu1 %v15555_v29 }
0x1973   : > { %8815 = vperm.xlu1 %10570, %v14447_v28  }
0x1977   : > { %10572 = vset.pattern.permute.xlu1 %v15556_v2 }
0x1978   : > { %8779 = vperm.xlu1 %10572, %v14447_v28  }
0x197c   : > { %10573 = vset.pattern.permute.xlu1 %v15557_v25 }
0x197d   : > { %8789 = vperm.xlu1 %10573, %v14447_v28  }
0x1981   : > { %10575 = vset.pattern.permute.xlu1 %v15474_v33 }
0x1982   : > { %8830 = vperm.xlu1 %10575, %v14447_v28  }
0x1986   : > { %10576 = vset.pattern.permute.xlu1 %v15558_v47 }
0x19dc   : > { %v8769_v1 = vpop.permute.xlu1 %8768 }
0x19dd   : > { %8771 = vst.msk [vmem:[#allocation4] sm:$0xff] %vm1315_vm6, %v8769_v1 }
0x19e4   : > { %v8772_v38 = vld [vmem:[#allocation4] sm:$0xff] }
0x19e5   : > { %v8808_v35 = vmul.f32 %v8806_v44, %v8772_v38  ;;  %v8848_v51 = vmul.f32 %v8846_v50, %v8772_v38  ;;  %v8803_v43 = vmul.f32 %v8801_v15, %v8772_v38 }
0x19e7   : > { %8810 = vrot.lane.b32.xlu1 %v8808_v35, %s15342_s26  ;;  %v15589_v35 = vld [vmem:[#allocation35_spill] sm:$0xff] }
0x19e9   : > { %v8836_v22 = vpop.permute.xlu1 %8835 }
0x19ea   : > { %v8838_v23 = vmul.f32 %v8836_v22, %v8772_v38 }
0x19ec   : > { %8840 = vrot.lane.b32.xlu0 %v8838_v23, %s15342_s26 }
0x19ee   : > { %v8816_v21 = vpop.permute.xlu1 %8815 }
0x19ef   : > { %v8818_v11 = vmul.f32 %v8816_v21, %v8772_v38 }
0x19f0   : > { %8850 = vrot.lane.b32.xlu0 %v8848_v51, %s15465_s1 }
0x19f1   : > { %8820 = vrot.lane.b32.xlu1 %v8818_v11, %s15465_s1  ;;  %v14524_v11 = vld [vmem:[%s15588_s13] sm:$0xf]  ;;  %s15590_s13 = smov 123  }
0x19f3   : > { %v8780_v42 = vpop.permute.xlu1 %8779 }
0x19f4   : > { %v8782_v55 = vmul.f32 %v8780_v42, %v8772_v38 }
0x19f5   : > { %8774 = vperm.xlu1 %10576, %v14447_v28  }
0x19f6   : > { %8784 = vrot.lane.b32.xlu0 %v8782_v55, %s15342_s26 }
0x19f8   : > { %v8790_v16 = vpop.permute.xlu1 %8789 }
0x19f9   : > { %v8792_v52 = vmul.f32 %v8790_v16, %v8772_v38  ;;  %10578 = vset.pattern.permute.xlu1 %v15561_v14 }
0x19fa   : > { %8861 = vperm.xlu0 %10577, %v14447_v28  }
0x19fb   : > { %8794 = vrot.lane.b32.xlu1 %v8792_v52, %s15465_s1 }
0x19fd   : > { %v8831_v59 = vpop.permute.xlu1 %8830 }
0x19fe   : > { %10580 = vset.pattern.permute.xlu0 %v15537_v26  ;;  %v8833_v17 = vmul.f32 %v8831_v59, %v8772_v38 }
0x1a59   : > { %v8811_v40 = vpop.permute.xlu1 %8810 }
0x1a5a   : > { %v8813_v0 = vadd.f32 %v8811_v40, %v8803_v43 }
0x1a5e   : > { %v8841_v8 = vpop.permute.xlu0 %8840 }
0x1a5f   : > { %v8843_v58 = vadd.f32 %v8841_v8, %v8833_v17  ;;  %v8975_v8 = vpop.f32.mrf.mxu0 }
0x1a61   : > { %v10244_v17 = vpop.f32.mrf.mxu0 }
0x1a62   : > { %v8851_v57 = vpop.permute.xlu0 %8850 }
0x1a63   : > { %v8853_v27 = vadd.f32 %v8851_v57, %v8843_v58  ;;  %v8821_v36 = vpop.permute.xlu1 %8820  ;;  %v8978_v40 = vpop.f32.mrf.mxu0 }
0x1a64   : > { %v8823_v24 = vadd.f32 %v8821_v36, %v8813_v0 }
0x1a65   : > { %v8854_v61 = vmul.f32 %v8853_v27, %v15586_v53  ;;  %v10245_v43 = vpop.f32.mrf.mxu0 }
0x1a66   : > { %8825 = vrot.lane.b32.xlu1 %v8823_v24, %s15539_s23 }
0x1a67   : > { %8856 = vrot.lane.b32.xlu0 %v8854_v61, %s15540_s10 }
0x1a6a   : > { %8866 = vperm.xlu1 %10578, %v14447_v28  }
0x1a6b   : > { %8532 = vrot.lane.b32.xlu0 %v14435_v13, %s15587_s12  ;;  %v8785_v13 = vpop.permute.xlu0 %8784 }
0x1a6e   : > { %8535 = vrot.lane.b32.xlu1 %v8534_v49, %s15580_s9 }
0x1a6f   : > { %10579 = vset.pattern.permute.xlu1 %v15538_v10  ;;  %8884 = vrot.lane.b32.xlu0 %v8883_v3, %s15342_s26 }
0x1a70   : > { %v8775_v28 = vpop.permute.xlu1 %8774 }
0x1a71   : > { %v8777_v56 = vmul.f32 %v8775_v28, %v8772_v38 }
0x1a73   : > { %v8787_v6 = vadd.f32 %v8785_v13, %v8777_v56  ;;  %8988 = vperm.xlu0 %10580, %v14524_v11  }
0x1a74   : > { %v8795_v5 = vpop.permute.xlu1 %8794 }
0x1a75   : > { %v8797_v18 = vadd.f32 %v8795_v5, %v8787_v6  ;;  %v8862_v1 = vpop.permute.xlu0 %8861 }
0x1a77   : > { %v8798_v63 = vmul.f32 %v8797_v18, %v15589_v35  ;;  %10582 = vset.pattern.permute.xlu0 %v15546_v9 }
0x1a78   : > { %9063 = vperm.xlu0 %10582, %v14524_v11  }
0x1a7c   : > { %10585 = vset.pattern.permute.xlu0 %v15556_v2 }
0x1a7d   : > { %9007 = vperm.xlu0 %10585, %v14524_v11  }
0x1a81   : > { %10588 = vset.pattern.permute.xlu0 %v15474_v33 }
0x1a82   : > { %9058 = vperm.xlu0 %10588, %v14524_v11  }
0x1a86   : > { %10589 = vset.pattern.permute.xlu0 %v15558_v47 }
0x1ad8   : > { %v8826_v44 = vpop.permute.xlu1 %8825 }
0x1ad9   : > { %v8828_v22 = vadd.f32 %v8826_v44, %v8798_v63  ;;  %v8857_v23 = vpop.permute.xlu0 %8856 }
0x1adb   : > { %v8859_v50 = vadd.f32 %v8857_v23, %v8828_v22 }
0x1add   : > { %v8864_v51 = vmul.f32 %v8862_v1, %v8859_v50  ;;  %v8533_v15 = vpop.permute.xlu0 %8532 }
0x1ae1   : > { %v8885_v57 = vpop.permute.xlu0 %8884 }
0x1ae5   : > { %v8867_v21 = vpop.permute.xlu1 %8866 }
0x1ae6   : > { %v8869_v42 = vadd.f32 %v8867_v21, %v8864_v51 }
0x1ae8   : > { %v8870_v55 = vmax.f32 %v8869_v42, 0.0 }
0x1ae9   : > { %v8536_v38 = vpop.permute.xlu1 %8535 }
0x1aea   : > { %v8871_v16 = vmin.f32 %v8870_v55, 6.0  ;;  %v8541_v52 = vsel %vm7106_vm13, %v8536_v38, 0 }
0x1aeb   : > { %10223 = vmatpush3.bf16.msra.mxu1 %v8541_v52  ;;  %v9100_v52 = vld [vmem:[%s15591_s7] sm:$0xf]  ;;  %s15592_s7 = sld [smem:[#allocation20_spill]] }
0x1aec   : > { %v14530_v59 = vpack.c.bf16 %v8871_v16, %v8871_v16  ;;  %10234 = vmatprep.subr.bf16.mxu1 %v15575_v32 }
0x1aee   : > { %8887 = vrot.lane.b32.xlu1 %v14530_v59, %s15590_s13  ;;  %10225 = vmatmul.mubr.msk.bf16.vlgmr.msra.gmra.mxu1 %vm4432_vm4, %v8533_v15  ;;  %v8989_v13 = vpop.permute.xlu0 %8988 }
0x1aef   : > { %10236 = vmatprep.mubr.msk.bf16.mxu1 %vm10678_vm0, %v15575_v32 }
0x1af2   : > { %8983 = vperm.xlu1 %10579, %v14524_v11  }
0x1af3   : > { %v9064_v42 = vpop.permute.xlu0 %9063 }
0x1af6   : > { %10581 = vset.pattern.permute.xlu1 %v15545_v20 }
0x1af7   : > { %9033 = vperm.xlu1 %10581, %v14524_v11  }
0x1af8   : > { %v9008_v17 = vpop.permute.xlu0 %9007 }
0x1afb   : > { %10583 = vset.pattern.permute.xlu1 %v15555_v29 }
0x1b60   : > { %v8888_v58 = vpop.permute.xlu1 %8887 }
0x1b61   : > { %v8893_v0 = vsel %vm7106_vm13, %v8888_v58, 0 }
0x1b62   : > { %10235 = vmatpush3.bf16.msra.mxu1 %v8893_v0 }
0x1b63   : > { %10246 = vmatprep.subr.bf16.mxu1 %v15575_v32 }
0x1b65   : > { %10237 = vmatmul.mubr.msk.bf16.vlgmr.msra.gmra.mxu1 %vm4432_vm4, %v8885_v57 }
0x1b66   : > { %10248 = vmatprep.mubr.msk.bf16.mxu1 %vm10678_vm0, %v15575_v32 }
0x1b6d   : > { %v8984_v3 = vpop.permute.xlu1 %8983 }
0x1b72   : > { %v9034_v23 = vpop.permute.xlu1 %9033 }
0x1bae   : > { %v8577_v27 = vpop.f32.mrf.mxu1 }
0x1baf   : > { %v14553_v36 = vadd.f32 %v8577_v27, %v14478_v39  ;;  %v9059_v27 = vpop.permute.xlu0 %9058 }
0x1bb0   : > { %v10226_v24 = vpop.f32.mrf.mxu1 }
0x1bb2   : > { %v8580_v61 = vpop.f32.mrf.mxu1 }
0x1bb4   : > { %v10227_v49 = vpop.f32.mrf.mxu1 }
0x1c25   : > { %v8929_v12 = vpop.f32.mrf.mxu1 }
0x1c26   : > { %v8976_v28 = vadd.f32 %v8975_v8, %v8929_v12 }
0x1c27   : > { %v10238_v56 = vpop.f32.mrf.mxu1 }
0x1c28   : > { %v8986_v6 = vmul.f32 %v8984_v3, %v8976_v28 }
0x1c29   : > { %v8932_v5 = vpop.f32.mrf.mxu1 }
0x1c2a   : > { %v8991_v18 = vadd.f32 %v8989_v13, %v8986_v6 }
0x1c2b   : > { %v10239_v1 = vpop.f32.mrf.mxu1 }
0x1c2c   : > { %v8992_v44 = vmax.f32 %v8991_v18, 0.0  ;;  %v9659_v18 = vcombine.low %v9100_v52, %v9100_v52  ;;  %v14588_v1 = vld [vmem:[%s15592_s7] sm:$0xff]  ;;  %s15593_s7 = sld [smem:[#allocation26_spill]] }
0x1c2e   : > { %v8993_v63 = vmin.f32 %v8992_v44, 6.0 }
0x1c30   : > { %v9102_v22 = vpack.c.bf16 %v8993_v63, %v8993_v63  ;;  %8995 = vrot.lane.b32.xlu1 %v8993_v63, %s15584_s5 }
0x1c32   : > { %v9162_v39 = vsel %vm7106_vm13, %v9102_v22, 0 }
0x1c33   : > { %10253 = vmatpush3.bf16.msra.mxu0 %v9162_v39 }
0x1c34   : > { %9043 = vperm.xlu1 %10583, %v14524_v11   ;;  %10264 = vmatprep.subr.bf16.mxu0 %v15575_v32 }
0x1c36   : > { %10255 = vmatmul.mubr.msk.bf16.vlgmr.msra.gmra.mxu0 %vm4432_vm4, %v9100_v52 }
0x1c37   : > { %10266 = vmatprep.mubr.msk.bf16.mxu0 %vm10678_vm0, %v15575_v32 }
0x1c38   : > { %10584 = vset.pattern.permute.xlu1 %v15547_v46 }
0x1c39   : > { %9073 = vperm.xlu1 %10584, %v14524_v11  }
0x1c3d   : > { %10586 = vset.pattern.permute.xlu1 %v15557_v25 }
0x1c3e   : > { %9017 = vperm.xlu1 %10586, %v14524_v11  }
0x1c42   : > { %10587 = vset.pattern.permute.xlu1 %v15471_v62 }
0x1c43   : > { %9028 = vperm.xlu1 %10587, %v14524_v11  }
0x1c47   : > { %10591 = vset.pattern.permute.xlu1 %v15561_v14 }
0x1ca2   : > { %v8996_v50 = vpop.permute.xlu1 %8995 }
0x1ca3   : > { %8999 = vst.msk [vmem:[#allocation4] sm:$0xf] %vm8998_vm10, %v8996_v50 }
0x1caa   : > { %v9000_v51 = vld [vmem:[#allocation4] sm:$0xf] }
0x1cab   : > { %v9036_v21 = vmul.f32 %v9034_v23, %v9000_v51  ;;  %v9066_v38 = vmul.f32 %v9064_v42, %v9000_v51  ;;  %v9010_v40 = vmul.f32 %v9008_v17, %v9000_v51  ;;  %v9061_v28 = vmul.f32 %v9059_v27, %v9000_v51  ;;  %v14593_v17 = vld [vmem:[%s10920_s8] sm:$0xff] }
0x1cac   : > { %v9207_v27 = vrot.slane %v14480_v54, 2 }
0x1cad   : > { %9038 = vrot.lane.b32.xlu1 %v9036_v21, %s15342_s26 }
0x1caf   : > { %v9044_v55 = vpop.permute.xlu1 %9043 }
0x1cb0   : > { %v9046_v16 = vmul.f32 %v9044_v55, %v9000_v51 }
0x1cb1   : > { %9068 = vrot.lane.b32.xlu1 %v9066_v38, %s15342_s26 }
0x1cb2   : > { %9048 = vrot.lane.b32.xlu0 %v9046_v16, %s15465_s1 }
0x1cb4   : > { %v9074_v15 = vpop.permute.xlu1 %9073 }
0x1cb5   : > { %v9076_v8 = vmul.f32 %v9074_v15, %v9000_v51 }
0x1cb6   : > { %9002 = vperm.xlu0 %10589, %v14524_v11  }
0x1cb7   : > { %9078 = vrot.lane.b32.xlu1 %v9076_v8, %s15465_s1 }
0x1cb9   : > { %v9018_v43 = vpop.permute.xlu1 %9017 }
0x1cba   : > { %10590 = vset.pattern.permute.xlu0 %v15528_v4  ;;  %v9020_v58 = vmul.f32 %v9018_v43, %v9000_v51 }
0x1cbb   : > { %9012 = vrot.lane.b32.xlu1 %v9010_v40, %s15342_s26  ;;  %9089 = vperm.xlu0 %10590, %v14524_v11  }
0x1cbe   : > { %v9029_v0 = vpop.permute.xlu1 %9028 }
0x1cbf   : > { %9022 = vrot.lane.b32.xlu1 %v9020_v58, %s15465_s1  ;;  %10592 = vset.pattern.permute.xlu0 %v15538_v10  ;;  %v9031_v24 = vmul.f32 %v9029_v0, %v9000_v51  ;;  %v9257_v58 = vrot.slane %v14530_v59, 2  ;;  %v14609_v0 = vld [vmem:[%s15593_s7] sm:$0xff] }
0x1d1f   : > { %v9039_v57 = vpop.permute.xlu1 %9038 }
0x1d20   : > { %v9041_v61 = vadd.f32 %v9039_v57, %v9031_v24 }
0x1d23   : > { %v9069_v12 = vpop.permute.xlu1 %9068 }
0x1d24   : > { %v9049_v49 = vpop.permute.xlu0 %9048  ;;  %v9071_v56 = vadd.f32 %v9069_v12, %v9061_v28 }
0x1d25   : > { %v9051_v3 = vadd.f32 %v9049_v49, %v9041_v61 }
0x1d27   : > { %9053 = vrot.lane.b32.xlu1 %v9051_v3, %s15539_s23 }
0x1d29   : > { %v9079_v13 = vpop.permute.xlu1 %9078 }
0x1d2a   : > { %v9081_v6 = vadd.f32 %v9079_v13, %v9071_v56 }
0x1d2b   : > { %9094 = vperm.xlu1 %10591, %v14524_v11  }
0x1d2c   : > { %v9082_v5 = vmul.f32 %v9081_v6, %v15586_v53 }
0x1d2d   : > { %v9013_v22 = vpop.permute.xlu1 %9012 }
0x1d2e   : > { %9084 = vrot.lane.b32.xlu0 %v9082_v5, %s15540_s10 }
0x1d2f   : > { %10593 = vset.pattern.permute.xlu1 %v15537_v26 }
0x1d31   : > { %v9003_v44 = vpop.permute.xlu0 %9002  ;;  %v9023_v39 = vpop.permute.xlu1 %9022 }
0x1d32   : > { %9107 = vrot.lane.b32.xlu0 %v9659_v18, %s15342_s26  ;;  %v9005_v63 = vmul.f32 %v9003_v44, %v9000_v51 }
0x1d34   : > { %v9015_v11 = vadd.f32 %v9013_v22, %v9005_v63 }
0x1d36   : > { %9204 = vrot.lane.b32.xlu0 %v9659_v18, %s15465_s1  ;;  %v9025_v23 = vadd.f32 %v9023_v39, %v9015_v11  ;;  %v9090_v50 = vpop.permute.xlu0 %9089 }
0x1d38   : > { %v9026_v42 = vmul.f32 %v9025_v23, %v15589_v35 }
0x1d3a   : > { %7712 = vperm.xlu0 %10592, %v14588_v1  }
0x1d3e   : > { %9309 = vperm.xlu0 %10592, %v14593_v17  }
0x1d42   : > { %10596 = vset.pattern.permute.xlu0 %v15537_v26 }
0x1d43   : > { %9314 = vperm.xlu0 %10596, %v14593_v17  }
0x1d47   : > { %10597 = vset.pattern.permute.xlu0 %v15545_v20 }
0x1d48   : > { %7809 = vperm.xlu0 %10597, %v14588_v1  }
0x1d4c   : > { %9358 = vperm.xlu0 %10597, %v14593_v17  }
0x1d50   : > { %10602 = vset.pattern.permute.xlu0 %v15547_v46 }
0x1d51   : > { %7905 = vperm.xlu0 %10602, %v14588_v1  }
0x1d55   : > { %8675 = vperm.xlu0 %10602, %v14609_v0  }
0x1d59   : > { %10605 = vset.pattern.permute.xlu0 %v15556_v2 }
0x1d99   : > { %v9054_v21 = vpop.permute.xlu1 %9053 }
0x1d9a   : > { %v9056_v55 = vadd.f32 %v9054_v21, %v9026_v42 }
0x1da0   : > { %v9085_v38 = vpop.permute.xlu0 %9084 }
0x1da1   : > { %v9087_v16 = vadd.f32 %v9085_v38, %v9056_v55 }
0x1da3   : > { %v9092_v52 = vmul.f32 %v9090_v50, %v9087_v16 }
0x1da6   : > { %v9095_v15 = vpop.permute.xlu1 %9094 }
0x1da7   : > { %v9097_v8 = vadd.f32 %v9095_v15, %v9092_v52 }
0x1da9   : > { %v9098_v51 = vmax.f32 %v9097_v8, 0.0 }
0x1dab   : > { %v9099_v40 = vmin.f32 %v9098_v51, 6.0 }
0x1dad   : > { %v9103_v43 = vpack.c.bf16 %v9099_v40, %v9099_v40 }
0x1daf   : > { %9110 = vrot.lane.b32.xlu1 %v9103_v43, %s15590_s13 }
0x1db3   : > { %9258 = vrot.lane.b32.xlu1 %v9257_v58, %s15590_s13 }
0x1db7   : > { %9255 = vrot.lane.b32.xlu1 %v9659_v18, %s15587_s12  ;;  %s9668_s12 = sshll.u32 %s15595_s16, 5  ;;  %s14641_s16 = scalar_lea.vmem %s10930_s4, %s10972_s22 }
0x1db8   : > { %s14632_s7 = scalar_lea.vmem %s10925_s27, %s9668_s12 }
0x1dbb   : > { %7718 = vperm.xlu1 %10593, %v14588_v1  }
0x1dbf   : > { %10594 = vset.pattern.permute.xlu1 %v15538_v10  ;;  %v9108_v10 = vpop.permute.xlu0 %9107 }
0x1dc0   : > { %8586 = vperm.xlu1 %10594, %v14609_v0  }
0x1dc3   : > { %v9205_v54 = vpop.permute.xlu0 %9204 }
0x1dc4   : > { %10595 = vset.pattern.permute.xlu1 %v15537_v26  ;;  %v9212_v26 = vsel %vm7106_vm13, %v9207_v27, 0 }
0x1dc5   : > { %8591 = vperm.xlu1 %10595, %v14609_v0  }
0x1dc7   : > { %v7713_v12 = vpop.permute.xlu0 %7712 }
0x1dc8   : > { %v7715_v3 = vmul.f32 %v7713_v12, %v14403_v31  ;;  %v7716_v28 = vmul.f32 %v7713_v12, %v14406_v48 }
0x1dc9   : > { %10598 = vset.pattern.permute.xlu1 %v15546_v9 }
0x1e21   : > { %v9111_v59 = vpop.permute.xlu1 %9110 }
0x1e22   : > { %v9116_v57 = vsel %vm7106_vm13, %v9111_v59, 0 }
0x1e23   : > { %10247 = vmatpush3.bf16.msra.mxu1 %v9116_v57 }
0x1e24   : > { %10258 = vmatprep.subr.bf16.mxu1 %v15575_v32 }
0x1e25   : > { %v9259_v24 = vpop.permute.xlu1 %9258 }
0x1e26   : > { %v9264_v61 = vsel %vm7106_vm13, %v9259_v24, 0  ;;  %10249 = vmatmul.mubr.msk.bf16.vlgmr.msra.gmra.mxu1 %vm4432_vm4, %v9108_v10 }
0x1e27   : > { %10259 = vmatpush3.bf16.msra.mxu1 %v9212_v26  ;;  %10265 = vmatpush3.bf16.msra.mxu0 %v9264_v61 }
0x1e28   : > { %10260 = vmatprep.mubr.msk.bf16.mxu1 %vm10678_vm0, %v15575_v32 }
0x1e29   : > { %v9256_v49 = vpop.permute.xlu1 %9255 }
0x1e2a   : > { %10267 = vmatmul.mubr.msk.bf16.vlgmr.msra.gmra.mxu0 %vm4432_vm4, %v9256_v49 }
0x1e2e   : > { %10261 = vmatmul.mubr.msk.bf16.vlgmr.msra.gmra.mxu1 %vm4432_vm4, %v9205_v54 }
0x1e36   : > { %v7719_v56 = vpop.permute.xlu1 %7718 }
0x1e37   : > { %v7721_v13 = vadd.f32 %v7719_v56, %v7715_v3  ;;  %v7722_v6 = vadd.f32 %v7719_v56, %v7716_v28 }
0x1e39   : > { %v7723_v5 = vmax.f32 %v7721_v13, 0.0  ;;  %v7724_v18 = vmax.f32 %v7722_v6, 0.0 }
0x1e3b   : > { %v7725_v32 = vmin.f32 %v7723_v5, 6.0  ;;  %v7726_v44 = vmin.f32 %v7724_v18, 6.0  ;;  %v8587_v63 = vpop.permute.xlu1 %8586 }
0x1e3c   : > { %v8589_v31 = vmul.f32 %v8587_v63, %v14553_v36  ;;  %v14657_v36 = vpop.f32.mrf.mxu0 }
0x1e3d   : > { %7968 = vst [vmem:[%s14632_s7] sm:$0xff] %v7725_v32  ;;  %7969 = vst [vmem:[%s14632_s7 + $0x8] sm:$0xff] %v7726_v44  ;;  %7729 = vrot.lane.b32.xlu1 %v7725_v32, %s15554_s2 }
0x1e3e   : > { %v10256_v23 = vpop.f32.mrf.mxu0 }
0x1e40   : > { %v8592_v48 = vpop.permute.xlu1 %8591 }
0x1e41   : > { %v8594_v22 = vadd.f32 %v8592_v48, %v8589_v31  ;;  %7731 = vrot.lane.b32.xlu1 %v7726_v44, %s15554_s2 }
0x1e43   : > { %v8595_v11 = vmax.f32 %v8594_v22, 0.0 }
0x1e45   : > { %v8596_v39 = vmin.f32 %v8595_v11, 6.0  ;;  %7881 = vperm.xlu1 %10598, %v14588_v1  }
0x1e47   : > { %8702 = vst.msk [vmem:[%s14641_s16] sm:$0xff] %vm2523_vm11, %v8596_v39 }
0x1e49   : > { %8598 = vrot.lane.b32.xlu1 %v8596_v39, %s15421_s11  ;;  %s14711_s11 = scalar_lea.vmem %s10935_s14, %s10972_s22 }
0x1e4a   : > { %10599 = vset.pattern.permute.xlu1 %v15555_v29 }
0x1e4d   : > { %7833 = vperm.xlu1 %10599, %v14588_v1  }
0x1e51   : > { %10600 = vset.pattern.permute.xlu1 %v15545_v20  ;;  %v9201_v20 = vpop.f32.mrf.mxu0 }
0x1e52   : > { %8635 = vperm.xlu1 %10600, %v14609_v0  }
0x1e53   : > { %v10257_v50 = vpop.f32.mrf.mxu0 }
0x1e56   : > { %10601 = vset.pattern.permute.xlu1 %v15546_v9  ;;  %v9310_v9 = vpop.permute.xlu0 %9309 }
0x1e57   : > { %8665 = vperm.xlu1 %10601, %v14609_v0  }
0x1e5b   : > { %9388 = vperm.xlu1 %10601, %v14593_v17  }
0x1e5f   : > { %10603 = vset.pattern.permute.xlu1 %v15555_v29  ;;  %v9315_v29 = vpop.permute.xlu0 %9314 }
0x1e60   : > { %8645 = vperm.xlu1 %10603, %v14609_v0  }
0x1e63   : > { %v7810_v42 = vpop.permute.xlu0 %7809 }
0x1e64   : > { %9368 = vperm.xlu1 %10603, %v14593_v17  }
0x1e67   : > { %v14693_v40 = vpop.permute.xlu0 %9358 }
0x1e68   : > { %10604 = vset.pattern.permute.xlu1 %v15547_v46 }
0x1e69   : > { %9398 = vperm.xlu1 %10604, %v14593_v17  }
0x1e6b   : > { %v7906_v59 = vpop.permute.xlu0 %7905 }
0x1e6d   : > { %10606 = vset.pattern.permute.xlu1 %v15557_v25 }
0x1e6e   : > { %7775 = vperm.xlu1 %10606, %v14588_v1  }
0x1e6f   : > { %v8676_v49 = vpop.permute.xlu0 %8675 }
0x1e72   : > { %10607 = vset.pattern.permute.xlu1 %v15471_v62 }
0x1e73   : > { %7802 = vperm.xlu1 %10607, %v14588_v1  }
0x1e77   : > { %10608 = vset.pattern.permute.xlu1 %v15556_v2 }
0x1e78   : > { %8609 = vperm.xlu1 %10608, %v14609_v0  }
0x1e7c   : > { %9332 = vperm.xlu1 %10608, %v14593_v17  }
0x1e80   : > { %10610 = vset.pattern.permute.xlu1 %v15471_v62 }
0x1e81   : > { %8630 = vperm.xlu1 %10610, %v14609_v0  }
0x1e85   : > { %10611 = vset.pattern.permute.xlu1 %v15474_v33 }
0x1e86   : > { %8660 = vperm.xlu1 %10611, %v14609_v0  }
0x1e8a   : > { %10613 = vset.pattern.permute.xlu1 %v15471_v62 }
0x1e8b   : > { %9353 = vperm.xlu1 %10613, %v14593_v17  }
0x1e8f   : > { %10615 = vset.pattern.permute.xlu1 %v15558_v47 }
0x1eaf   : > { %v7730_v46 = vpop.permute.xlu1 %7729 }
0x1eb0   : > { %7737 = vst.msk [vmem:[#allocation2] sm:$0xff] %vm2219_vm14, %v7730_v46 }
0x1eb3   : > { %v7732_v2 = vpop.permute.xlu1 %7731 }
0x1eb4   : > { %v14677_v21 = vsel %vm1221_vm12, %v7730_v46, %v7732_v2  ;;  %7739 = vst.msk [vmem:[#allocation2 + $0x10] sm:$0xff] %vm1221_vm12, %v7732_v2 }
0x1eb5   : > { %7738 = vst [vmem:[#allocation2 + $0x8] sm:$0xff] %v14677_v21  ;;  %v7813_v38 = vmul.f32 %v7810_v42, %v14677_v21 }
0x1eb7   : > { %v14681_v55 = vld [vmem:[#allocation2] sm:$0xff] }
0x1eb8   : > { %v7812_v62 = vmul.f32 %v7810_v42, %v14681_v55  ;;  %v7908_v57 = vmul.f32 %v7906_v59, %v14681_v55 }
0x1eba   : > { %7818 = vrot.lane.b32.xlu1 %v7812_v62, %s15559_s0 }
0x1ebb   : > { %v14689_v15 = vld [vmem:[#allocation2 + $0x10] sm:$0xff] }
0x1ebc   : > { %v7910_v10 = vmul.f32 %v7906_v59, %v14689_v15 }
0x1ebe   : > { %7820 = vrot.lane.b32.xlu1 %v7813_v38, %s15559_s0 }
0x1ec0   : > { %v7882_v16 = vpop.permute.xlu1 %7881 }
0x1ec1   : > { %v7884_v52 = vmul.f32 %v7882_v16, %v14681_v55  ;;  %v7886_v51 = vmul.f32 %v7882_v16, %v14689_v15 }
0x1ec3   : > { %7890 = vrot.lane.b32.xlu1 %v7884_v52, %s15559_s0 }
0x1ec4   : > { %v8599_v8 = vpop.permute.xlu1 %8598 }
0x1ec5   : > { %8601 = vst.msk [vmem:[#allocation3] sm:$0xff] %vm1503_vm9, %v8599_v8 }
0x1ec7   : > { %7894 = vrot.lane.b32.xlu1 %v7886_v51, %s15559_s0 }
0x1ec8   : > { %v7834_v43 = vpop.permute.xlu1 %7833 }
0x1ec9   : > { %v7837_v58 = vmul.f32 %v7834_v43, %v14677_v21 }
0x1ecb   : > { %7844 = vrot.lane.b32.xlu1 %v7837_v58, %s15560_s3 }
0x1ecc   : > { %v14702_v61 = vld [vmem:[#allocation3] sm:$0xff] }
0x1ecd   : > { %v8636_v27 = vpop.permute.xlu1 %8635  ;;  %v8678_v54 = vmul.f32 %v8676_v49, %v14702_v61 }
0x1ece   : > { %v8638_v2 = vmul.f32 %v8636_v27, %v14702_v61 }
0x1ecf   : > { %7914 = vrot.lane.b32.xlu1 %v7908_v57, %s15560_s3 }
0x1ed2   : > { %v8666_v24 = vpop.permute.xlu1 %8665 }
0x1ed3   : > { %7918 = vrot.lane.b32.xlu1 %v7910_v10, %s15560_s3  ;;  %v8668_v26 = vmul.f32 %v8666_v24, %v14702_v61 }
0x1ed6   : > { %v9389_v46 = vpop.permute.xlu1 %9388 }
0x1ed7   : > { %8670 = vrot.lane.b32.xlu1 %v8668_v26, %s15465_s1 }
0x1edb   : > { %8680 = vrot.lane.b32.xlu1 %v8678_v54, %s15559_s0 }
0x1ee6   : > { %v9152_v12 = vpop.f32.mrf.mxu1 }
0x1ee7   : > { %v9199_v5 = vadd.f32 %v14657_v36, %v9152_v12  ;;  %v7814_v36 = vmul.f32 %v7810_v42, %v14689_v15 }
0x1ee8   : > { %v10250_v3 = vpop.f32.mrf.mxu1 }
0x1eea   : > { %v9155_v28 = vpop.f32.mrf.mxu1  ;;  %v9300_v56 = vpop.f32.mrf.mxu0 }
0x1eec   : > { %v10251_v13 = vpop.f32.mrf.mxu1  ;;  %v10268_v6 = vpop.f32.mrf.mxu0 }
0x1eee   : > { %v9248_v18 = vpop.f32.mrf.mxu1  ;;  %v9303_v44 = vpop.f32.mrf.mxu0 }
0x1eef   : > { %v9254_v32 = vadd.f32 %v9248_v18, %v9199_v5 }
0x1ef0   : > { %v10262_v63 = vpop.f32.mrf.mxu1  ;;  %v10269_v48 = vpop.f32.mrf.mxu0 }
0x1ef1   : > { %v9306_v31 = vadd.f32 %v9300_v56, %v9254_v32 }
0x1ef2   : > { %v9251_v22 = vpop.f32.mrf.mxu1 }
0x1ef3   : > { %v9312_v11 = vmul.f32 %v9310_v9, %v9306_v31  ;;  %v7885_v9 = vmul.f32 %v7882_v16, %v14677_v21 }
0x1ef4   : > { %v10263_v39 = vpop.f32.mrf.mxu1 }
0x1ef5   : > { %v9317_v23 = vadd.f32 %v9315_v29, %v9312_v11  ;;  %v7909_v29 = vmul.f32 %v7906_v59, %v14677_v21 }
0x1ef7   : > { %v9318_v20 = vmax.f32 %v9317_v23, 0.0 }
0x1ef9   : > { %v9319_v50 = vmin.f32 %v9318_v20, 6.0 }
0x1efb   : > { %9321 = vrot.lane.b32.xlu0 %v9319_v50, %s15584_s5  ;;  %9425 = vst.msk [vmem:[%s14711_s11] sm:$0xff] %vm1442_vm3, %v9319_v50 }
0x1eff   : > { %7751 = vperm.xlu0 %10605, %v14588_v1  }
0x1f03   : > { %10609 = vset.pattern.permute.xlu0 %v15557_v25  ;;  %v7836_v25 = vmul.f32 %v7834_v43, %v14681_v55 }
0x1f04   : > { %8619 = vperm.xlu0 %10609, %v14609_v0  }
0x1f08   : > { %9342 = vperm.xlu0 %10609, %v14593_v17  }
0x1f0c   : > { %10612 = vset.pattern.permute.xlu0 %v15474_v33  ;;  %v7838_v33 = vmul.f32 %v7834_v43, %v14689_v15 }
0x1f0d   : > { %7874 = vperm.xlu0 %10612, %v14588_v1  }
0x1f11   : > { %9383 = vperm.xlu0 %10612, %v14593_v17  }
0x1f15   : > { %7822 = vrot.lane.b32.xlu0 %v7814_v36, %s15559_s0 }
0x1f16   : > { %10614 = vset.pattern.permute.xlu0 %v15558_v47  ;;  %v8646_v47 = vpop.permute.xlu1 %8645 }
0x1f17   : > { %v8648_v42 = vmul.f32 %v8646_v47, %v14702_v61 }
0x1f19   : > { %7892 = vrot.lane.b32.xlu0 %v7885_v9, %s15559_s0 }
0x1f1a   : > { %v9369_v62 = vpop.permute.xlu1 %9368 }
0x1f1d   : > { %7842 = vrot.lane.b32.xlu0 %v7836_v25, %s15560_s3 }
0x1f1e   : > { %v9399_v38 = vpop.permute.xlu1 %9398 }
0x1f21   : > { %7846 = vrot.lane.b32.xlu0 %v7838_v33, %s15560_s3 }
0x1f22   : > { %v7776_v16 = vpop.permute.xlu1 %7775 }
0x1f23   : > { %v7778_v32 = vmul.f32 %v7776_v16, %v14681_v55  ;;  %v7779_v44 = vmul.f32 %v7776_v16, %v14677_v21  ;;  %v7780_v48 = vmul.f32 %v7776_v16, %v14689_v15 }
0x1f25   : > { %7916 = vrot.lane.b32.xlu0 %v7909_v29, %s15560_s3 }
0x1f26   : > { %v7803_v52 = vpop.permute.xlu1 %7802 }
0x1f27   : > { %v7805_v50 = vmul.f32 %v7803_v52, %v14681_v55  ;;  %v7807_v25 = vmul.f32 %v7803_v52, %v14689_v15 }
0x1f29   : > { %8640 = vrot.lane.b32.xlu0 %v8638_v2, %s15465_s1  ;;  %v7806_v2 = vmul.f32 %v7803_v52, %v14677_v21 }
0x1f2a   : > { %v8610_v8 = vpop.permute.xlu1 %8609 }
0x1f2b   : > { %v8612_v22 = vmul.f32 %v8610_v8, %v14702_v61 }
0x1f2d   : > { %8650 = vrot.lane.b32.xlu0 %v8648_v42, %s15559_s0 }
0x1f2e   : > { %v14738_v51 = vpop.permute.xlu1 %9332 }
0x1f32   : > { %v14740_v43 = vpop.permute.xlu1 %8630 }
0x1f36   : > { %v14743_v59 = vpop.permute.xlu1 %8660 }
0x1f3a   : > { %v14745_v57 = vpop.permute.xlu1 %9353 }
0x1f3e   : > { %v7819_v12 = vpop.permute.xlu1 %7818 }
0x1f6d   : > { %v9322_v58 = vpop.permute.xlu0 %9321 }
0x1f6e   : > { %9324 = vst.msk [vmem:[#allocation4] sm:$0xff] %vm1315_vm6, %v9322_v58 }
0x1f75   : > { %v14747_v27 = vld [vmem:[#allocation4] sm:$0xff] }
0x1f76   : > { %v9391_v10 = vmul.f32 %v9389_v46, %v14747_v27  ;;  %v9361_v24 = vmul.f32 %v14693_v40, %v14747_v27  ;;  %v9371_v49 = vmul.f32 %v9369_v62, %v14747_v27  ;;  %v9401_v54 = vmul.f32 %v9399_v38, %v14747_v27  ;;  %v7821_v40 = vpop.permute.xlu1 %7820 }
0x1f77   : > { %v7824_v20 = vsel %vm2249_vm15, %v7819_v12, %v7821_v40 }
0x1f78   : > { %9393 = vrot.lane.b32.xlu1 %v9391_v10, %s15342_s26  ;;  %9363 = vrot.lane.b32.xlu0 %v9361_v24, %s15342_s26  ;;  %v7829_v36 = vadd.f32 %v7824_v20, %v7805_v50 }
0x1f7a   : > { %v7752_v26 = vpop.permute.xlu0 %7751  ;;  %v7891_v5 = vpop.permute.xlu1 %7890 }
0x1f7b   : > { %v7754_v28 = vmul.f32 %v7752_v26, %v14681_v55  ;;  %v7755_v13 = vmul.f32 %v7752_v26, %v14677_v21  ;;  %v7756_v6 = vmul.f32 %v7752_v26, %v14689_v15 }
0x1f7c   : > { %9373 = vrot.lane.b32.xlu0 %v9371_v49, %s15465_s1  ;;  %9403 = vrot.lane.b32.xlu1 %v9401_v54, %s15465_s1 }
0x1f7e   : > { %v7895_v31 = vpop.permute.xlu1 %7894 }
0x1f7f   : > { %v8620_v3 = vpop.permute.xlu0 %8619 }
0x1f80   : > { %7744 = vperm.xlu0 %10614, %v14588_v1   ;;  %8604 = vperm.xlu1 %10615, %v14609_v0  }
0x1f82   : > { %v7845_v39 = vpop.permute.xlu1 %7844 }
0x1f83   : > { %v14761_v56 = vpop.permute.xlu0 %9342 }
0x1f84   : > { %7760 = vrot.lane.b32.xlu0 %v7754_v28, %s15559_s0  ;;  %9327 = vperm.xlu1 %10615, %v14593_v17  }
0x1f85   : > { %10617 = vset.pattern.permute.xlu0 %v15528_v4 }
0x1f86   : > { %v7915_v33 = vpop.permute.xlu1 %7914 }
0x1f88   : > { %v7875_v18 = vpop.permute.xlu0 %7874  ;;  %7764 = vrot.lane.b32.xlu0 %v7756_v6, %s15559_s0  ;;  %7762 = vrot.lane.b32.xlu1 %v7755_v13, %s15559_s0 }
0x1f89   : > { %10616 = vset.pattern.permute.xlu1 %v15528_v4  ;;  %v8622_v4 = vmul.f32 %v8620_v3, %v14702_v61  ;;  %v7878_v10 = vmul.f32 %v7875_v18, %v14677_v21  ;;  %v7877_v3 = vmul.f32 %v7875_v18, %v14681_v55 }
0x1f8a   : > { %v7919_v26 = vpop.permute.xlu1 %7918 }
0x1f8c   : > { %v14773_v63 = vpop.permute.xlu0 %9383  ;;  %7786 = vrot.lane.b32.xlu0 %v7779_v44, %s15560_s3  ;;  %7784 = vrot.lane.b32.xlu1 %v7778_v32, %s15560_s3 }
0x1f8e   : > { %v8671_v32 = vpop.permute.xlu1 %8670 }
0x1f90   : > { %v7823_v11 = vpop.permute.xlu0 %7822  ;;  %7788 = vrot.lane.b32.xlu1 %v7780_v48, %s15560_s3  ;;  %8614 = vrot.lane.b32.xlu0 %v8612_v22, %s15465_s1 }
0x1f91   : > { %v7825_v46 = vsel %vm2249_vm15, %v7821_v40, %v7823_v11  ;;  %v7831_v42 = vadd.f32 %v7823_v11, %v7807_v25  ;;  %v7879_v40 = vmul.f32 %v7875_v18, %v14689_v15  ;;  %v8663_v18 = vmul.f32 %v14743_v59, %v14702_v61 }
0x1f92   : > { %v7830_v62 = vadd.f32 %v7825_v46, %v7806_v2 }
0x1f93   : > { %v7903_v44 = vadd.f32 %v7895_v31, %v7879_v40 }
0x1f94   : > { %v7893_v23 = vpop.permute.xlu0 %7892  ;;  %8624 = vrot.lane.b32.xlu0 %v8622_v4, %s15559_s0 }
0x1f95   : > { %v7897_v16 = vsel %vm2249_vm15, %v7893_v23, %v7895_v31  ;;  %v7896_v52 = vsel %vm2249_vm15, %v7891_v5, %v7893_v23  ;;  %v7927_v11 = vadd.f32 %v7919_v26, %v7903_v44  ;;  %v8673_v23 = vadd.f32 %v8671_v32, %v8663_v18 }
0x1f96   : > { %v7902_v49 = vadd.f32 %v7897_v16, %v7878_v10  ;;  %v7901_v6 = vadd.f32 %v7896_v52, %v7877_v3 }
0x1f97   : > { %v7930_v20 = vmul.f32 %v7927_v11, %v15565_v19  ;;  %v9345_v19 = vmul.f32 %v14761_v56, %v14747_v27 }
0x1f98   : > { %v7843_v9 = vpop.permute.xlu0 %7842 }
0x1f99   : > { %v7848_v29 = vsel %vm2274_vm1, %v7843_v9, %v7845_v39 }
0x1f9a   : > { %v7853_v47 = vadd.f32 %v7848_v29, %v7829_v36 }
0x1f9c   : > { %v7847_v38 = vpop.permute.xlu0 %7846  ;;  %7859 = vrot.lane.b32.xlu0 %v7853_v47, %s15539_s23 }
0x1f9d   : > { %v7849_v8 = vsel %vm2274_vm1, %v7845_v39, %v7847_v38  ;;  %v7855_v58 = vadd.f32 %v7847_v38, %v7831_v42  ;;  %v8681_v39 = vpop.permute.xlu1 %8680 }
0x1f9e   : > { %v7854_v24 = vadd.f32 %v7849_v8, %v7830_v62  ;;  %v8683_v31 = vadd.f32 %v8681_v39, %v8673_v23 }
0x1fa0   : > { %v7917_v54 = vpop.permute.xlu0 %7916  ;;  %7861 = vrot.lane.b32.xlu1 %v7854_v24, %s15539_s23  ;;  %7863 = vrot.lane.b32.xlu0 %v7855_v58, %s15539_s23 }
0x1fa1   : > { %v7921_v12 = vsel %vm2274_vm1, %v7917_v54, %v7919_v26  ;;  %v7920_v13 = vsel %vm2274_vm1, %v7915_v33, %v7917_v54 }
0x1fa2   : > { %v7926_v28 = vadd.f32 %v7921_v12, %v7902_v49  ;;  %v7925_v48 = vadd.f32 %v7920_v13, %v7901_v6 }
0x1fa4   : > { %7949 = vperm.xlu1 %10616, %v14588_v1   ;;  %8691 = vperm.xlu0 %10617, %v14609_v0   ;;  %v7929_v22 = vmul.f32 %v7926_v28, %v15564_v45  ;;  %v8641_v5 = vpop.permute.xlu0 %8640  ;;  %v7928_v4 = vmul.f32 %v7925_v48, %v15563_v37  ;;  %v8633_v45 = vmul.f32 %v14740_v43, %v14702_v61 }
0x1fa5   : > { %v8684_v37 = vmul.f32 %v8683_v31, %v15577_v7  ;;  %v9386_v7 = vmul.f32 %v14773_v63, %v14747_v27  ;;  %v9356_v43 = vmul.f32 %v14745_v57, %v14747_v27 }
0x1fa6   : > { %v8643_v36 = vadd.f32 %v8641_v5, %v8633_v45 }
0x1fa8   : > { %9414 = vperm.xlu1 %10616, %v14593_v17   ;;  %7936 = vrot.lane.b32.xlu0 %v7929_v22, %s15540_s10  ;;  %v8651_v50 = vpop.permute.xlu0 %8650 }
0x1fa9   : > { %10618 = vset.pattern.permute.xlu0 %v15561_v14  ;;  %v8653_v59 = vadd.f32 %v8651_v50, %v8643_v36 }
0x1fac   : > { %7934 = vrot.lane.b32.xlu1 %v7928_v4, %s15540_s10  ;;  %7956 = vperm.xlu0 %10618, %v14588_v1  }
0x1fad   : > { %10619 = vset.pattern.permute.xlu1 %v15561_v14  ;;  %v9335_v14 = vmul.f32 %v14738_v51, %v14747_v27 }
0x1fb0   : > { %7938 = vrot.lane.b32.xlu1 %v7930_v20, %s15540_s10  ;;  %8696 = vperm.xlu0 %10618, %v14609_v0  }
0x1fb4   : > { %8655 = vrot.lane.b32.xlu1 %v8653_v59, %s15539_s23  ;;  %8686 = vrot.lane.b32.xlu0 %v8684_v37, %s15540_s10 }
0x1fb8   : > { %9419 = vperm.xlu1 %10619, %v14593_v17  }
0x1fbc   : > { %9337 = vrot.lane.b32.xlu1 %v9335_v14, %s15342_s26 }
0x1fc0   : > { %9347 = vrot.lane.b32.xlu1 %v9345_v19, %s15465_s1 }
0x1fea   : > { %v9364_v1 = vpop.permute.xlu0 %9363  ;;  %v9394_v0 = vpop.permute.xlu1 %9393 }
0x1feb   : > { %v9366_v9 = vadd.f32 %v9364_v1, %v9356_v43  ;;  %v9396_v17 = vadd.f32 %v9394_v0, %v9386_v7 }
0x1fee   : > { %v9374_v25 = vpop.permute.xlu0 %9373  ;;  %v9404_v33 = vpop.permute.xlu1 %9403 }
0x1fef   : > { %v9376_v51 = vadd.f32 %v9374_v25, %v9366_v9  ;;  %v9406_v46 = vadd.f32 %v9404_v33, %v9396_v17 }
0x1ff1   : > { %9378 = vrot.lane.b32.xlu1 %v9376_v51, %s15539_s23  ;;  %v9407_v56 = vmul.f32 %v9406_v46, %v15586_v53 }
0x1ff5   : > { %9409 = vrot.lane.b32.xlu1 %v9407_v56, %s15540_s10 }
0x1ffb   : > { %v7745_v29 = vpop.permute.xlu0 %7744  ;;  %v8605_v2 = vpop.permute.xlu1 %8604 }
0x1ffc   : > { %v7747_v53 = vmul.f32 %v7745_v29, %v14681_v55  ;;  %v7749_v40 = vmul.f32 %v7745_v29, %v14689_v15  ;;  %v7748_v13 = vmul.f32 %v7745_v29, %v14677_v21  ;;  %v8607_v39 = vmul.f32 %v8605_v2, %v14702_v61 }
0x1fff   : > { %v7761_v47 = vpop.permute.xlu0 %7760  ;;  %v14834_v63 = vpop.permute.xlu1 %9327 }
0x2003   : > { %v7765_v42 = vpop.permute.xlu0 %7764  ;;  %v7763_v57 = vpop.permute.xlu1 %7762 }
0x2004   : > { %v7766_v49 = vsel %vm2249_vm15, %v7761_v47, %v7763_v57  ;;  %v7767_v28 = vsel %vm2249_vm15, %v7763_v57, %v7765_v42  ;;  %v7773_v32 = vadd.f32 %v7765_v42, %v7749_v40 }
0x2005   : > { %v7771_v52 = vadd.f32 %v7766_v49, %v7747_v53  ;;  %v7772_v48 = vadd.f32 %v7767_v28, %v7748_v13 }
0x2007   : > { %v7787_v62 = vpop.permute.xlu0 %7786  ;;  %v7785_v8 = vpop.permute.xlu1 %7784 }
0x2008   : > { %v7790_v54 = vsel %vm2274_vm1, %v7785_v8, %v7787_v62 }
0x2009   : > { %v7795_v6 = vadd.f32 %v7790_v54, %v7771_v52 }
0x200b   : > { %v8615_v38 = vpop.permute.xlu0 %8614  ;;  %v7789_v10 = vpop.permute.xlu1 %7788  ;;  %v7798_v4 = vmul.f32 %v7795_v6, %v15567_v34 }
0x200c   : > { %v7791_v44 = vsel %vm2274_vm1, %v7787_v62, %v7789_v10  ;;  %v7797_v18 = vadd.f32 %v7789_v10, %v7773_v32  ;;  %v8617_v31 = vadd.f32 %v8615_v38, %v8607_v39 }
0x200d   : > { %v7796_v11 = vadd.f32 %v7791_v44, %v7772_v48 }
0x200e   : > { %v7800_v21 = vmul.f32 %v7797_v18, %v15566_v30 }
0x200f   : > { %v8625_v16 = vpop.permute.xlu0 %8624  ;;  %v7799_v36 = vmul.f32 %v7796_v11, %v15568_v41 }
0x2010   : > { %v8627_v59 = vadd.f32 %v8625_v16, %v8617_v31 }
0x2012   : > { %v7862_v24 = vpop.permute.xlu1 %7861  ;;  %v8628_v30 = vmul.f32 %v8627_v59, %v15579_v60 }
0x2013   : > { %v7860_v58 = vpop.permute.xlu0 %7859 }
0x2014   : > { %v7865_v55 = vsel %vm2369_vm5, %v7860_v58, %v7862_v24 }
0x2015   : > { %v7870_v15 = vadd.f32 %v7865_v55, %v7798_v4 }
0x2017   : > { %v7864_v26 = vpop.permute.xlu0 %7863 }
0x2018   : > { %v7866_v20 = vsel %vm2369_vm5, %v7862_v24, %v7864_v26  ;;  %v7872_v14 = vadd.f32 %v7864_v26, %v7800_v21  ;;  %v9330_v26 = vmul.f32 %v14834_v63, %v14747_v27 }
0x2019   : > { %v7871_v19 = vadd.f32 %v7866_v20, %v7799_v36 }
0x201f   : > { %v8692_v12 = vpop.permute.xlu0 %8691  ;;  %v7950_v3 = vpop.permute.xlu1 %7949 }
0x2023   : > { %v7937_v22 = vpop.permute.xlu0 %7936  ;;  %v9415_v5 = vpop.permute.xlu1 %9414 }
0x2027   : > { %v7957_v23 = vpop.permute.xlu0 %7956  ;;  %v7935_v45 = vpop.permute.xlu1 %7934 }
0x2028   : > { %v7940_v50 = vsel %vm2464_vm7, %v7935_v45, %v7937_v22 }
0x2029   : > { %v7945_v37 = vadd.f32 %v7940_v50, %v7870_v15 }
0x202b   : > { %v7952_v1 = vmul.f32 %v7950_v3, %v7945_v37  ;;  %v8697_v34 = vpop.permute.xlu0 %8696  ;;  %v7939_v0 = vpop.permute.xlu1 %7938 }
0x202c   : > { %v7941_v61 = vsel %vm2464_vm7, %v7937_v22, %v7939_v0  ;;  %v7947_v7 = vadd.f32 %v7939_v0, %v7872_v14 }
0x202d   : > { %v7959_v43 = vadd.f32 %v7957_v23, %v7952_v1  ;;  %v7946_v9 = vadd.f32 %v7941_v61, %v7871_v19 }
0x202e   : > { %v7954_v17 = vmul.f32 %v7950_v3, %v7947_v7 }
0x202f   : > { %v7962_v25 = vmax.f32 %v7959_v43, 0.0  ;;  %v7953_v33 = vmul.f32 %v7950_v3, %v7946_v9  ;;  %v8656_v51 = vpop.permute.xlu1 %8655  ;;  %v8687_v29 = vpop.permute.xlu0 %8686 }
0x2030   : > { %v7961_v46 = vadd.f32 %v7957_v23, %v7954_v17  ;;  %v8658_v41 = vadd.f32 %v8656_v51, %v8628_v30 }
0x2031   : > { %v7960_v56 = vadd.f32 %v7957_v23, %v7953_v33  ;;  %v7965_v2 = vmin.f32 %v7962_v25, 6.0 }
0x2032   : > { %v7964_v47 = vmax.f32 %v7961_v46, 0.0  ;;  %v8689_v42 = vadd.f32 %v8687_v29, %v8658_v41 }
0x2033   : > { %v7963_v62 = vmax.f32 %v7960_v56, 0.0  ;;  %7973 = vrot.lane.b32.xlu0 %v7965_v2, %s15571_s6  ;;  %v9420_v10 = vpop.permute.xlu1 %9419 }
0x2034   : > { %v7967_v57 = vmin.f32 %v7964_v47, 6.0  ;;  %v8694_v38 = vmul.f32 %v8692_v12, %v8689_v42 }
0x2035   : > { %v7966_v16 = vmin.f32 %v7963_v62, 6.0 }
0x2036   : > { %v8699_v8 = vadd.f32 %v8697_v34, %v8694_v38 }
0x2037   : > { %7977 = vrot.lane.b32.xlu0 %v7967_v57, %s15571_s6  ;;  %7975 = vrot.lane.b32.xlu1 %v7966_v16, %s15571_s6  ;;  %v9338_v24 = vpop.permute.xlu1 %9337 }
0x2038   : > { %v8700_v60 = vmax.f32 %v8699_v8, 0.0  ;;  %v9340_v53 = vadd.f32 %v9338_v24, %v9330_v26 }
0x203a   : > { %v8701_v58 = vmin.f32 %v8700_v60, 6.0 }
0x203b   : > { %v9348_v49 = vpop.permute.xlu1 %9347 }
0x203c   : > { %8704 = vrot.lane.b32.xlu1 %v8701_v58, %s15580_s9  ;;  %v9350_v54 = vadd.f32 %v9348_v49, %v9340_v53 }
0x203e   : > { %v9351_v12 = vmul.f32 %v9350_v54, %v15589_v35 }
0x2063   : > { %v9379_v52 = vpop.permute.xlu1 %9378 }
0x2064   : > { %v9381_v3 = vadd.f32 %v9379_v52, %v9351_v12 }
0x2067   : > { %v9410_v40 = vpop.permute.xlu1 %9409 }
0x2068   : > { %v9412_v28 = vadd.f32 %v9410_v40, %v9381_v3 }
0x206a   : > { %v9417_v13 = vmul.f32 %v9415_v5, %v9412_v28 }
0x206c   : > { %v9422_v6 = vadd.f32 %v9420_v10, %v9417_v13 }
0x206e   : > { %v9423_v32 = vmax.f32 %v9422_v6, 0.0 }
0x2070   : > { %v9424_v44 = vmin.f32 %v9423_v32, 6.0 }
0x2072   : > { %9427 = vrot.lane.b32.xlu0 %v9424_v44, %s15590_s13 }
0x20a5   : > { %v7974_v27 = vpop.permute.xlu0 %7973 }
0x20a9   : > { %v7978_v63 = vpop.permute.xlu0 %7977  ;;  %v7976_v48 = vpop.permute.xlu1 %7975 }
0x20aa   : > { %v7979_v22 = vsel %vm2502_vm2, %v7974_v27, %v7976_v48  ;;  %v7980_v18 = vsel %vm2502_vm2, %v7976_v48, %v7978_v63 }
0x20ab   : > { %7983 = vst [vmem:[%s14632_s7 + $0x10] sm:$0xff] %v7979_v22  ;;  %7984 = vst [vmem:[%s14632_s7 + $0x18] sm:$0xff] %v7980_v18 }
0x20ae   : > { %v8705_v35 = vpop.permute.xlu1 %8704 }
0x20af   : > { %8707 = vst.msk [vmem:[%s14641_s16 + $0x8] sm:$0xff] %vm2523_vm11, %v8705_v35 }
0x20e4   : > { %v9428_v55 = vpop.permute.xlu0 %9427 }
0x20e5   : > { %9430 = vst.msk [vmem:[%s14711_s11 + $0x8] sm:$0xff] %vm1442_vm3, %v9428_v55 }
0x20e6 PF: > { %s88_s15 = sadd.s32 1, %s10637_s15  }
0x20e7   : > { %p85_p4 = scmp.ge.s32.totalorder %s88_s15, 4  }
0x20e9   :  { %87 = sbr.rel (!%p85_p4) target bundleno = 71 (0x47), region = 262 }

</bundles_post_ra>
